<compile_context>
chip_gen: v7x
topology: tpu7x:2x2x1
jax: 0.10.0
libtpu: 0.0.40
codegen_flags: <defaults>
</compile_context>

<pallas_src>
import functools

import jax
import jax.numpy as jnp
from jax import lax
from jax.experimental import pallas as pl
from jax.experimental.pallas import tpu as pltpu


def _round_up(x, m):
    return (x + m - 1) // m * m


# ----------------------------------------------------------------------------
# In-kernel helpers
# ----------------------------------------------------------------------------
def _gelu_erf(x):
    # erf-based GELU (torch.nn.GELU default) via Abramowitz–Stegun 7.1.26.
    # The divide goes to the EUP via pl.reciprocal(approx=True); outputs are bf16
    # downstream so the approximate reciprocal's ~1e-4 error is irrelevant.
    z = x * 0.7071067811865476
    az = jnp.abs(z)
    t = pl.reciprocal(1.0 + 0.3275911 * az, approx=True)
    poly = ((((1.061405429 * t - 1.453152027) * t + 1.421413741) * t
             - 0.284496736) * t + 0.254829592) * t
    erf_abs = 1.0 - poly * jnp.exp(-az * az)
    erf = jnp.where(z >= 0.0, erf_abs, -erf_abs)
    return 0.5 * x * (1.0 + erf)


# ----------------------------------------------------------------------------
# Pallas kernel 1: fused  conv1(merged Inception) -> GELU -> conv2(merged Inception)
#   grid = (B, n_cff)   axis 0 "parallel" (batch), axis 1 "arbitrary" (d_ff chunks)
# ----------------------------------------------------------------------------
def _fused_conv_kernel(x_ref, w1_ref, b1_ref, w2_ref, b2_ref, o_ref,
                       slab_ref, mid_ref, acc2_ref, *, K, Wp, W, M, P):
    """One (batch, d_ff-chunk) pair per grid step.

    x_ref  : (1, Hp*Wp, Cin) bf16   flattened zero-padded NHWC image of this batch elem
    w1_ref : (K, K*Cin, Cff_t) bf16 conv1 weights, kx taps fused along contraction
    b1_ref : (1, Cff_t) f32
    w2_ref : (K*K, Cff_t, Cout) bf16 conv2 weights, one matrix per tap
    b2_ref : (1, Cout) f32
    o_ref  : (1, M, Cout) bf16      flat conv2 output (gap rows cropped in the wrapper)
    slab_ref: (J, K*Cin) bf16 VMEM  kx-direction im2col of x (built once per batch elem)
    mid_ref : (Hp*Wp, Cff_t) bf16 VMEM  zero-padded GELU(conv1) image for this chunk
    acc2_ref: (M, Cout) f32 VMEM    conv2 accumulator across d_ff chunks
    """
    c = pl.program_id(1)
    n_cff = pl.num_programs(1)
    cin = x_ref.shape[-1]
    cff_t = mid_ref.shape[-1]
    mid_rows = mid_ref.shape[0]
    J = slab_ref.shape[0]
    start = P * Wp + P                      # flat offset of padded position (P, P)

    # ---- once per batch element (c == 0): border zero + in-VMEM kx im2col ----
    @pl.when(c == 0)
    def _():
        # Only the padding border needs zeroing; [start, start+M) (valid + gap rows)
        # is fully rewritten below on every step. Keyed on c (an "arbitrary" axis),
        # never on program_id(0), so it is megacore-safe.
        if start > 0:
            mid_ref[0:start, :] = jnp.zeros((start, cff_t), mid_ref.dtype)
        tail = mid_rows - (start + M)
        if tail > 0:
            mid_ref[start + M:, :] = jnp.zeros((tail, cff_t), mid_ref.dtype)
        # slab[j, kx*Cin + ci] = x_flat[j + kx, ci]   (VMEM only; no HBM replication)
        for kx in range(K):
            slab_ref[:, kx * cin:(kx + 1) * cin] = x_ref[0, kx:kx + J, :]

    # ---- conv1: K ky-taps, each a single deep (M, K*Cin) @ (K*Cin, Cff_t) matmul ----
    acc1 = jnp.zeros((M, cff_t), jnp.float32)
    for ky in range(K):
        acc1 = acc1 + jnp.dot(slab_ref[ky * Wp:ky * Wp + M, :], w1_ref[ky],
                              preferred_element_type=jnp.float32)
    acc1 = _gelu_erf(acc1 + b1_ref[...])

    # In-kernel gap mask: zero the inter-row gap columns so they act as conv2's
    # zero padding (they land on padding columns of the mid image).
    col = lax.broadcasted_iota(jnp.int32, (M, 1), 0) % Wp
    acc1 = jnp.where(col < W, acc1, 0.0)
    mid_ref[start:start + M, :] = acc1.astype(mid_ref.dtype)

    # ---- conv2: per-tap matmuls (contraction = Cff_t), accumulated across chunks ----
    @pl.when(c == 0)
    def _():
        acc2_ref[...] = jnp.zeros_like(acc2_ref)

    acc2 = acc2_ref[...]
    for ky in range(K):
        for kx in range(K):
            d = ky * Wp + kx
            acc2 = acc2 + jnp.dot(mid_ref[d:d + M, :], w2_ref[ky * K + kx],
                                  preferred_element_type=jnp.float32)
    acc2_ref[...] = acc2

    @pl.when(c == n_cff - 1)
    def _():
        o_ref[0, :, :] = (acc2_ref[...] + b2_ref[...]).astype(o_ref.dtype)


def fused_inception_conv(xflat, w1r, b1, w2f, b2, *, K, Wp, W, M, P, cff_tile):
    B, HWp, cin = xflat.shape
    cff = w1r.shape[-1]
    cout = w2f.shape[-1]
    assert cff % cff_tile == 0
    n_cff = cff // cff_tile
    J = (K - 1) * Wp + M
    kern = functools.partial(_fused_conv_kernel, K=K, Wp=Wp, W=W, M=M, P=P)
    return pl.pallas_call(
        kern,
        out_shape=jax.ShapeDtypeStruct((B, M, cout), jnp.bfloat16),
        grid_spec=pltpu.PrefetchScalarGridSpec(
            num_scalar_prefetch=0,
            grid=(B, n_cff),
            in_specs=[
                pl.BlockSpec((1, HWp, cin), lambda b, c: (b, 0, 0)),
                pl.BlockSpec((K, K * cin, cff_tile), lambda b, c: (0, 0, c)),
                pl.BlockSpec((1, cff_tile), lambda b, c: (0, c)),
                pl.BlockSpec((K * K, cff_tile, cout), lambda b, c: (0, c, 0)),
                pl.BlockSpec((1, cout), lambda b, c: (0, 0)),
            ],
            out_specs=pl.BlockSpec((1, M, cout), lambda b, c: (b, 0, 0)),
            scratch_shapes=[
                pltpu.VMEM((J, K * cin), jnp.bfloat16),     # kx im2col slab
                pltpu.VMEM((HWp, cff_tile), jnp.bfloat16),  # GELU(conv1) padded image
                pltpu.VMEM((M, cout), jnp.float32),         # conv2 accumulator
            ],
        ),
        compiler_params=pltpu.CompilerParams(
            dimension_semantics=("parallel", "arbitrary"),
            # 48 MiB leaves headroom on v7x's 64 MiB physical VMEM; raise on v5e/v6e
            # (128 MiB physical) if larger Cff/M tiles are used.
            vmem_limit_bytes=48 * 1024 * 1024,
        ),
    )(xflat, w1r, b1, w2f, b2)


# ----------------------------------------------------------------------------
# Pallas kernel 2: weighted sum of top-k period branches + residual
#   data presented as (B, TN/128, 128) -> sublane/lane-dense vregs;
#   softmaxed period weights read from SMEM.
# ----------------------------------------------------------------------------
def _combine_kernel(pw_ref, *refs, k):
    res_refs, x_ref, o_ref = refs[:k], refs[k], refs[k + 1]
    b = pl.program_id(0)
    acc = x_ref[...].astype(jnp.float32)
    for i in range(k):
        acc = acc + res_refs[i][...].astype(jnp.float32) * pw_ref[b, i]
    o_ref[...] = acc.astype(o_ref.dtype)


def combine(res_list, pw, x):
    B, T, N = x.shape
    k = len(res_list)
    TN = T * N
    TNp = _round_up(TN, 128)
    S = TNp // 128

    def prep(a):
        a = a.reshape(B, TN)
        if TNp != TN:
            a = jnp.pad(a, ((0, 0), (0, TNp - TN)))
        return a.reshape(B, S, 128)

    res3 = [prep(r) for r in res_list]
    x3 = prep(x)
    out = pl.pallas_call(
        functools.partial(_combine_kernel, k=k),
        out_shape=jax.ShapeDtypeStruct((B, S, 128), jnp.float32),
        grid_spec=pltpu.PrefetchScalarGridSpec(
            num_scalar_prefetch=0,
            grid=(B,),
            in_specs=[pl.BlockSpec(memory_space=pltpu.MemorySpace.SMEM)]
                    + [pl.BlockSpec((1, S, 128), lambda b: (b, 0, 0))
                       for _ in range(k + 1)],
            out_specs=pl.BlockSpec((1, S, 128), lambda b: (b, 0, 0)),
        ),
        compiler_params=pltpu.CompilerParams(dimension_semantics=("parallel",)),
    )(pw, *res3, x3)
    return out.reshape(B, TNp)[:, :TN].reshape(B, T, N)


# ----------------------------------------------------------------------------
# Glue: FFT period selection, layout prep, parameters
# ----------------------------------------------------------------------------
def fft_for_period(x, k=2):
    # TODO(synk): rfft + data-dependent top-k (dynamic period shapes) stay in plain JAX
    # with a host sync, mirroring torch's .detach().cpu().numpy(); a static candidate
    # period set would remove the host round-trip and the per-top-k-set recompiles.
    xf = jnp.fft.rfft(x, axis=1)
    amp = jnp.abs(xf)
    frequency_list = amp.mean(axis=0).mean(axis=-1)
    frequency_list = frequency_list.at[0].set(0.0)
    _, top = jax.lax.top_k(frequency_list, k)
    top_np = jax.device_get(top)
    period = x.shape[1] // top_np
    period_weight = amp.mean(axis=-1)[:, top_np]              # (B, k), stays on device
    return period, period_weight


def make_inception_params(key, cin, cout, num_kernels, *, row_merged):
    """Merged weights of Inception_Block_V1: mean of centered, zero-padded
    kaiming-normal (fan_out) conv kernels of sizes 1,3,...,2*num_kernels-1; zero bias.
    row_merged=True returns (K, K*cin, cout) (kx taps fused along contraction),
    otherwise (K*K, cin, cout) (one matrix per tap)."""
    kmax = 2 * num_kernels - 1
    w = jnp.zeros((kmax, kmax, cin, cout), jnp.float32)
    keys = jax.random.split(key, num_kernels)
    for i in range(num_kernels):
        ki = 2 * i + 1
        fan_out = cout * ki * ki
        std = (2.0 / fan_out) ** 0.5
        wi = jax.random.normal(keys[i], (ki, ki, cin, cout), jnp.float32) * std
        off = (kmax - ki) // 2
        w = w.at[off:off + ki, off:off + ki, :, :].add(wi)
    w = w / num_kernels
    b = jnp.zeros((1, cout), jnp.float32)
    if row_merged:
        wr = w.reshape(kmax, kmax * cin, cout)
    else:
        wr = w.reshape(kmax * kmax, cin, cout)
    return wr.astype(jnp.bfloat16), b


def _pick_cff_tile(d_ff):
    for t in (256, 128):
        if d_ff % t == 0:
            return t
    return d_ff


def timesblock_forward(x, params, *, top_k, num_kernels, cff_tile=None):
    B, T, N = x.shape
    K = 2 * num_kernels - 1
    P = num_kernels - 1
    d_ff = params["b1"].shape[-1]
    if cff_tile is None:
        cff_tile = _pick_cff_tile(d_ff)
    period_list, period_weight = fft_for_period(x, top_k)

    res = []
    for i in range(top_k):
        period = int(period_list[i])
        if T % period != 0:
            length = (T // period + 1) * period
            out = jnp.concatenate([x, jnp.zeros((B, length - T, N), x.dtype)], axis=1)
        else:
            length = T
            out = x
        H, W = length // period, period
        Wp = _round_up(W + 2 * P, 8)        # sublane-aligned padded width
        Hp = H + 2 * P
        M = (H - 1) * Wp + W                # flat conv rows (valid + inter-row gaps)

        # NHWC view of the NCHW conv input, zero-padded (left/top P, right to Wp),
        # flattened and cast to bf16 for the MXU.
        xpad = jnp.pad(out.reshape(B, H, W, N),
                       ((0, 0), (P, P), (P, Wp - W - P), (0, 0))).astype(jnp.bfloat16)
        xflat = xpad.reshape(B, Hp * Wp, N)

        y = fused_inception_conv(xflat, params["w1"], params["b1"],
                                 params["w2"], params["b2"],
                                 K=K, Wp=Wp, W=W, M=M, P=P,
                                 cff_tile=cff_tile)            # (B, M, N) bf16
        # Crop flat rows -> (B, length, N) -> (B, T, N)   (small bf16 tensor)
        y = jnp.pad(y, ((0, 0), (0, H * Wp - M), (0, 0)))
        y = y.reshape(B, H, Wp, N)[:, :, :W, :].reshape(B, length, N)[:, :T, :]
        res.append(y)

    pw = jax.nn.softmax(period_weight, axis=1).astype(jnp.float32)   # (B, k) scalars
    return combine(res, pw, x)


# ----------------------------------------------------------------------------
# Plain-JAX reference (same merged weights) used only for a correctness check.
# ----------------------------------------------------------------------------
def reference_forward(x, params, *, top_k, num_kernels):
    B, T, N = x.shape
    K = 2 * num_kernels - 1
    d_ff = params["b1"].shape[-1]
    period_list, period_weight = fft_for_period(x, top_k)
    w1 = params["w1"].reshape(K, K, N, d_ff).astype(jnp.float32)
    w2 = params["w2"].reshape(K, K, d_ff, N).astype(jnp.float32)
    b1 = params["b1"].reshape(1, 1, 1, d_ff)
    b2 = params["b2"].reshape(1, 1, 1, N)
    dn = ("NHWC", "HWIO", "NHWC")
    res = []
    for i in range(top_k):
        period = int(period_list[i])
        if T % period != 0:
            length = (T // period + 1) * period
            xb = jnp.concatenate([x, jnp.zeros((B, length - T, N), x.dtype)], axis=1)
        else:
            length = T
            xb = x
        H, W = length // period, period
        img = xb.reshape(B, H, W, N).astype(jnp.bfloat16).astype(jnp.float32)
        y = lax.conv_general_dilated(img, w1, (1, 1), "SAME", dimension_numbers=dn,
                                     precision=lax.Precision.HIGHEST) + b1
        y = jax.nn.gelu(y, approximate=False)
        y = y.astype(jnp.bfloat16).astype(jnp.float32)
        y = lax.conv_general_dilated(y, w2, (1, 1), "SAME", dimension_numbers=dn,
                                     precision=lax.Precision.HIGHEST) + b2
        y = y.astype(jnp.bfloat16).astype(jnp.float32)
        res.append(y.reshape(B, length, N)[:, :T, :])
    pw = jax.nn.softmax(period_weight, axis=1)
    out = x
    for i in range(top_k):
        out = out + pw[:, i][:, None, None] * res[i]
    return out


# ----------------------------------------------------------------------------
if __name__ == "__main__":
    # Small, module-consistent config: T = seq_len + pred_len, N = d_model
    B, seq_len, pred_len = 2, 32, 0
    d_model, d_ff = 32, 256
    top_k, num_kernels = 2, 3
    T = seq_len + pred_len

    key = jax.random.PRNGKey(0)
    kx_, kw1, kw2 = jax.random.split(key, 3)
    x = jax.random.normal(kx_, (B, T, d_model), jnp.float32)

    w1, b1 = make_inception_params(kw1, d_model, d_ff, num_kernels, row_merged=True)
    w2, b2 = make_inception_params(kw2, d_ff, d_model, num_kernels, row_merged=False)
    params = {"w1": w1, "b1": b1, "w2": w2, "b2": b2}

    # cff_tile=128 with d_ff=256 -> 2 d_ff chunks, exercising the accumulation path.
    out = timesblock_forward(x, params, top_k=top_k, num_kernels=num_kernels,
                             cff_tile=128)
    out = jax.block_until_ready(out)
    assert out.shape == (B, T, d_model)
    assert bool(jnp.all(jnp.isfinite(out)))

    # Numerical cross-check against a plain-JAX lax.conv reference (bf16-equivalent).
    ref = jax.block_until_ready(
        reference_forward(x, params, top_k=top_k, num_kernels=num_kernels))
    rel_err = float(jnp.max(jnp.abs(out - ref)) / (jnp.max(jnp.abs(ref)) + 1e-6))
    assert rel_err < 5e-2, f"mismatch vs reference: rel_err={rel_err}"

    print("KERNEL_OK")
</pallas_src>

<mosaic_0001>
module attributes {stable_mosaic.version = 11 : i64} {
  func.func @_fused_conv_kernel(%arg0: i32, %arg1: i32, %arg2: memref<1x120x32xbf16, #tpu.memory_space<vmem>>, %arg3: memref<5x160x128xbf16, #tpu.memory_space<vmem>>, %arg4: memref<1x128xf32, #tpu.memory_space<vmem>>, %arg5: memref<25x128x32xbf16, #tpu.memory_space<vmem>>, %arg6: memref<1x32xf32, #tpu.memory_space<vmem>>, %arg7: memref<1x83x32xbf16, #tpu.memory_space<vmem>>, %arg8: memref<115x160xbf16, #tpu.memory_space<vmem>>, %arg9: memref<120x128xbf16, #tpu.memory_space<vmem>>, %arg10: memref<83x32xf32, #tpu.memory_space<vmem>>) attributes {dimension_semantics = [#tpu.dimension_semantics<parallel>, #tpu.dimension_semantics<arbitrary>], iteration_bounds = array<i64: 2, 2>, scalar_prefetch = 0 : i64, scratch_operands = 3 : i64, tpu.core_type = #tpu.core_type<tc>, window_params = [{transform_indices = @transform_0, window_bounds = array<i64: 1, 120, 32>}, {transform_indices = @transform_1, window_bounds = array<i64: 5, 160, 128>}, {transform_indices = @transform_2, window_bounds = array<i64: 1, 128>}, {transform_indices = @transform_3, window_bounds = array<i64: 25, 128, 32>}, {pipeline_mode = #tpu.pipeline_mode<synchronous>, transform_indices = @transform_4, window_bounds = array<i64: 1, 32>}, {transform_indices = @transform_5, window_bounds = array<i64: 1, 83, 32>}]} {
    %c0_i32 = arith.constant 0 : i32
    %0 = arith.cmpi eq, %arg1, %c0_i32 : i32
    %1 = arith.extui %0 : i1 to i32
    %c0_i32_0 = arith.constant 0 : i32
    %2 = arith.cmpi ne, %1, %c0_i32_0 : i32
    scf.if %2 {
      %cst_178 = arith.constant 0.000000e+00 : bf16
      %229 = vector.broadcast %cst_178 : bf16 to vector<18x128xbf16>
      %c0_179 = arith.constant 0 : index
      %c0_180 = arith.constant 0 : index
      %230 = vector.load %arg9[%c0_179, %c0_180] : memref<120x128xbf16, #tpu.memory_space<vmem>>, vector<18x128xbf16>
      tpu.vector_store %arg9[%c0_179, %c0_180], %229 {strides = array<i32>} : memref<120x128xbf16, #tpu.memory_space<vmem>>, vector<18x128xbf16>,
      %cst_181 = arith.constant 0.000000e+00 : bf16
      %231 = vector.broadcast %cst_181 : bf16 to vector<19x128xbf16>
      %c101 = arith.constant 101 : index
      %c0_182 = arith.constant 0 : index
      %232 = vector.load %arg9[%c101, %c0_182] : memref<120x128xbf16, #tpu.memory_space<vmem>>, vector<19x128xbf16>
      tpu.vector_store %arg9[%c101, %c0_182], %231 {strides = array<i32>} : memref<120x128xbf16, #tpu.memory_space<vmem>>, vector<19x128xbf16>,
      %c0_183 = arith.constant 0 : index
      %c0_184 = arith.constant 0 : index
      %c0_185 = arith.constant 0 : index
      %233 = vector.load %arg2[%c0_183, %c0_184, %c0_185] : memref<1x120x32xbf16, #tpu.memory_space<vmem>>, vector<1x115x32xbf16>
      %234 = vector.shape_cast %233 : vector<1x115x32xbf16> to vector<115x32xbf16>
      %c0_186 = arith.constant 0 : index
      %c0_187 = arith.constant 0 : index
      %235 = vector.load %arg8[%c0_186, %c0_187] : memref<115x160xbf16, #tpu.memory_space<vmem>>, vector<115x32xbf16>
      tpu.vector_store %arg8[%c0_186, %c0_187], %234 {strides = array<i32>} : memref<115x160xbf16, #tpu.memory_space<vmem>>, vector<115x32xbf16>,
      %c0_188 = arith.constant 0 : index
      %c1_189 = arith.constant 1 : index
      %c0_190 = arith.constant 0 : index
      %236 = vector.load %arg2[%c0_188, %c1_189, %c0_190] : memref<1x120x32xbf16, #tpu.memory_space<vmem>>, vector<1x115x32xbf16>
      %237 = vector.shape_cast %236 : vector<1x115x32xbf16> to vector<115x32xbf16>
      %c0_191 = arith.constant 0 : index
      %c32_192 = arith.constant 32 : index
      %238 = vector.load %arg8[%c0_191, %c32_192] : memref<115x160xbf16, #tpu.memory_space<vmem>>, vector<115x32xbf16>
      tpu.vector_store %arg8[%c0_191, %c32_192], %237 {strides = array<i32>} : memref<115x160xbf16, #tpu.memory_space<vmem>>, vector<115x32xbf16>,
      %c0_193 = arith.constant 0 : index
      %c2_194 = arith.constant 2 : index
      %c0_195 = arith.constant 0 : index
      %239 = vector.load %arg2[%c0_193, %c2_194, %c0_195] : memref<1x120x32xbf16, #tpu.memory_space<vmem>>, vector<1x115x32xbf16>
      %240 = vector.shape_cast %239 : vector<1x115x32xbf16> to vector<115x32xbf16>
      %c0_196 = arith.constant 0 : index
      %c64 = arith.constant 64 : index
      %241 = vector.load %arg8[%c0_196, %c64] : memref<115x160xbf16, #tpu.memory_space<vmem>>, vector<115x32xbf16>
      tpu.vector_store %arg8[%c0_196, %c64], %240 {strides = array<i32>} : memref<115x160xbf16, #tpu.memory_space<vmem>>, vector<115x32xbf16>,
      %c0_197 = arith.constant 0 : index
      %c3_198 = arith.constant 3 : index
      %c0_199 = arith.constant 0 : index
      %242 = vector.load %arg2[%c0_197, %c3_198, %c0_199] : memref<1x120x32xbf16, #tpu.memory_space<vmem>>, vector<1x115x32xbf16>
      %243 = vector.shape_cast %242 : vector<1x115x32xbf16> to vector<115x32xbf16>
      %c0_200 = arith.constant 0 : index
      %c96 = arith.constant 96 : index
      %244 = vector.load %arg8[%c0_200, %c96] : memref<115x160xbf16, #tpu.memory_space<vmem>>, vector<115x32xbf16>
      tpu.vector_store %arg8[%c0_200, %c96], %243 {strides = array<i32>} : memref<115x160xbf16, #tpu.memory_space<vmem>>, vector<115x32xbf16>,
      %c0_201 = arith.constant 0 : index
      %c4_202 = arith.constant 4 : index
      %c0_203 = arith.constant 0 : index
      %245 = vector.load %arg2[%c0_201, %c4_202, %c0_203] : memref<1x120x32xbf16, #tpu.memory_space<vmem>>, vector<1x115x32xbf16>
      %246 = vector.shape_cast %245 : vector<1x115x32xbf16> to vector<115x32xbf16>
      %c0_204 = arith.constant 0 : index
      %c128 = arith.constant 128 : index
      %247 = vector.load %arg8[%c0_204, %c128] : memref<115x160xbf16, #tpu.memory_space<vmem>>, vector<115x32xbf16>
      tpu.vector_store %arg8[%c0_204, %c128], %246 {strides = array<i32>} : memref<115x160xbf16, #tpu.memory_space<vmem>>, vector<115x32xbf16>,
    } else {
    }
    %cst = arith.constant 0.000000e+00 : f32
    %3 = vector.broadcast %cst : f32 to vector<83x128xf32>
    %c0 = arith.constant 0 : index
    %c0_1 = arith.constant 0 : index
    %4 = vector.load %arg8[%c0, %c0_1] : memref<115x160xbf16, #tpu.memory_space<vmem>>, vector<83x160xbf16>
    %c0_2 = arith.constant 0 : index
    %c0_3 = arith.constant 0 : index
    %c0_4 = arith.constant 0 : index
    %5 = vector.load %arg3[%c0_2, %c0_3, %c0_4] : memref<5x160x128xbf16, #tpu.memory_space<vmem>>, vector<1x160x128xbf16>
    %6 = vector.shape_cast %5 : vector<1x160x128xbf16> to vector<160x128xbf16>
    %cst_5 = arith.constant dense<0.000000e+00> : vector<83x128xf32>
    %7 = tpu.matmul %4, %6, %cst_5 {dimension_numbers = #tpu.dot_dimension_numbers<[1], [0], [0], [1], [0, 0, 1, 1], [], []>} : vector<83x160xbf16>, vector<160x128xbf16>, vector<83x128xf32> -> vector<83x128xf32>
    %8 = arith.addf %3, %7 : vector<83x128xf32>
    %c8 = arith.constant 8 : index
    %c0_6 = arith.constant 0 : index
    %9 = vector.load %arg8[%c8, %c0_6] : memref<115x160xbf16, #tpu.memory_space<vmem>>, vector<83x160xbf16>
    %c1 = arith.constant 1 : index
    %c0_7 = arith.constant 0 : index
    %c0_8 = arith.constant 0 : index
    %10 = vector.load %arg3[%c1, %c0_7, %c0_8] : memref<5x160x128xbf16, #tpu.memory_space<vmem>>, vector<1x160x128xbf16>
    %11 = vector.shape_cast %10 : vector<1x160x128xbf16> to vector<160x128xbf16>
    %cst_9 = arith.constant dense<0.000000e+00> : vector<83x128xf32>
    %12 = tpu.matmul %9, %11, %cst_9 {dimension_numbers = #tpu.dot_dimension_numbers<[1], [0], [0], [1], [0, 0, 1, 1], [], []>} : vector<83x160xbf16>, vector<160x128xbf16>, vector<83x128xf32> -> vector<83x128xf32>
    %13 = arith.addf %8, %12 : vector<83x128xf32>
    %c16 = arith.constant 16 : index
    %c0_10 = arith.constant 0 : index
    %14 = vector.load %arg8[%c16, %c0_10] : memref<115x160xbf16, #tpu.memory_space<vmem>>, vector<83x160xbf16>
    %c2 = arith.constant 2 : index
    %c0_11 = arith.constant 0 : index
    %c0_12 = arith.constant 0 : index
    %15 = vector.load %arg3[%c2, %c0_11, %c0_12] : memref<5x160x128xbf16, #tpu.memory_space<vmem>>, vector<1x160x128xbf16>
    %16 = vector.shape_cast %15 : vector<1x160x128xbf16> to vector<160x128xbf16>
    %cst_13 = arith.constant dense<0.000000e+00> : vector<83x128xf32>
    %17 = tpu.matmul %14, %16, %cst_13 {dimension_numbers = #tpu.dot_dimension_numbers<[1], [0], [0], [1], [0, 0, 1, 1], [], []>} : vector<83x160xbf16>, vector<160x128xbf16>, vector<83x128xf32> -> vector<83x128xf32>
    %18 = arith.addf %13, %17 : vector<83x128xf32>
    %c24 = arith.constant 24 : index
    %c0_14 = arith.constant 0 : index
    %19 = vector.load %arg8[%c24, %c0_14] : memref<115x160xbf16, #tpu.memory_space<vmem>>, vector<83x160xbf16>
    %c3 = arith.constant 3 : index
    %c0_15 = arith.constant 0 : index
    %c0_16 = arith.constant 0 : index
    %20 = vector.load %arg3[%c3, %c0_15, %c0_16] : memref<5x160x128xbf16, #tpu.memory_space<vmem>>, vector<1x160x128xbf16>
    %21 = vector.shape_cast %20 : vector<1x160x128xbf16> to vector<160x128xbf16>
    %cst_17 = arith.constant dense<0.000000e+00> : vector<83x128xf32>
    %22 = tpu.matmul %19, %21, %cst_17 {dimension_numbers = #tpu.dot_dimension_numbers<[1], [0], [0], [1], [0, 0, 1, 1], [], []>} : vector<83x160xbf16>, vector<160x128xbf16>, vector<83x128xf32> -> vector<83x128xf32>
    %23 = arith.addf %18, %22 : vector<83x128xf32>
    %c32 = arith.constant 32 : index
    %c0_18 = arith.constant 0 : index
    %24 = vector.load %arg8[%c32, %c0_18] : memref<115x160xbf16, #tpu.memory_space<vmem>>, vector<83x160xbf16>
    %c4 = arith.constant 4 : index
    %c0_19 = arith.constant 0 : index
    %c0_20 = arith.constant 0 : index
    %25 = vector.load %arg3[%c4, %c0_19, %c0_20] : memref<5x160x128xbf16, #tpu.memory_space<vmem>>, vector<1x160x128xbf16>
    %26 = vector.shape_cast %25 : vector<1x160x128xbf16> to vector<160x128xbf16>
    %cst_21 = arith.constant dense<0.000000e+00> : vector<83x128xf32>
    %27 = tpu.matmul %24, %26, %cst_21 {dimension_numbers = #tpu.dot_dimension_numbers<[1], [0], [0], [1], [0, 0, 1, 1], [], []>} : vector<83x160xbf16>, vector<160x128xbf16>, vector<83x128xf32> -> vector<83x128xf32>
    %28 = arith.addf %23, %27 : vector<83x128xf32>
    %c0_22 = arith.constant 0 : index
    %c0_23 = arith.constant 0 : index
    %29 = vector.load %arg4[%c0_22, %c0_23] : memref<1x128xf32, #tpu.memory_space<vmem>>, vector<1x128xf32>
    %30 = vector.broadcast %29 : vector<1x128xf32> to vector<83x128xf32>
    %31 = arith.addf %28, %30 : vector<83x128xf32>
    %cst_24 = arith.constant 0.707106769 : f32
    %32 = vector.broadcast %cst_24 : f32 to vector<83x128xf32>
    %33 = arith.mulf %31, %32 : vector<83x128xf32>
    %34 = math.absf %33 : vector<83x128xf32>
    %cst_25 = arith.constant 0.327591091 : f32
    %35 = vector.broadcast %cst_25 : f32 to vector<83x128xf32>
    %36 = arith.mulf %35, %34 : vector<83x128xf32>
    %cst_26 = arith.constant 1.000000e+00 : f32
    %37 = vector.broadcast %cst_26 : f32 to vector<83x128xf32>
    %38 = arith.addf %37, %36 : vector<83x128xf32>
    %39 = tpu.reciprocal %38 {approx = true} : vector<83x128xf32> -> vector<83x128xf32>
    %cst_27 = arith.constant 1.06140542 : f32
    %40 = vector.broadcast %cst_27 : f32 to vector<83x128xf32>
    %41 = arith.mulf %40, %39 : vector<83x128xf32>
    %cst_28 = arith.constant 1.45315206 : f32
    %42 = vector.broadcast %cst_28 : f32 to vector<83x128xf32>
    %43 = arith.subf %41, %42 : vector<83x128xf32>
    %44 = arith.mulf %43, %39 : vector<83x128xf32>
    %cst_29 = arith.constant 1.42141378 : f32
    %45 = vector.broadcast %cst_29 : f32 to vector<83x128xf32>
    %46 = arith.addf %44, %45 : vector<83x128xf32>
    %47 = arith.mulf %46, %39 : vector<83x128xf32>
    %cst_30 = arith.constant 0.284496725 : f32
    %48 = vector.broadcast %cst_30 : f32 to vector<83x128xf32>
    %49 = arith.subf %47, %48 : vector<83x128xf32>
    %50 = arith.mulf %49, %39 : vector<83x128xf32>
    %cst_31 = arith.constant 0.254829586 : f32
    %51 = vector.broadcast %cst_31 : f32 to vector<83x128xf32>
    %52 = arith.addf %50, %51 : vector<83x128xf32>
    %53 = arith.mulf %52, %39 : vector<83x128xf32>
    %cst_32 = arith.constant 0.000000e+00 : f32
    %54 = vector.broadcast %cst_32 : f32 to vector<83x128xf32>
    %55 = arith.subf %54, %34 : vector<83x128xf32>
    %56 = arith.mulf %55, %34 : vector<83x128xf32>
    %57 = math.exp %56 : vector<83x128xf32>
    %58 = arith.mulf %53, %57 : vector<83x128xf32>
    %cst_33 = arith.constant 1.000000e+00 : f32
    %59 = vector.broadcast %cst_33 : f32 to vector<83x128xf32>
    %60 = arith.subf %59, %58 : vector<83x128xf32>
    %cst_34 = arith.constant 0.000000e+00 : f32
    %61 = vector.broadcast %cst_34 : f32 to vector<83x128xf32>
    %62 = arith.cmpf oge, %33, %61 : vector<83x128xf32>
    %cst_35 = arith.constant 0.000000e+00 : f32
    %63 = vector.broadcast %cst_35 : f32 to vector<83x128xf32>
    %64 = arith.subf %63, %60 : vector<83x128xf32>
    %65 = arith.select %62, %60, %64 : vector<83x128xi1>, vector<83x128xf32>
    %cst_36 = arith.constant 5.000000e-01 : f32
    %66 = vector.broadcast %cst_36 : f32 to vector<83x128xf32>
    %67 = arith.mulf %66, %31 : vector<83x128xf32>
    %cst_37 = arith.constant 1.000000e+00 : f32
    %68 = vector.broadcast %cst_37 : f32 to vector<83x128xf32>
    %69 = arith.addf %68, %65 : vector<83x128xf32>
    %70 = arith.mulf %67, %69 : vector<83x128xf32>
    %71 = tpu.iota {dimensions = array<i32: 0>} : vector<83x1xi32>
    %c8_i32 = arith.constant 8 : i32
    %c0_i32_38 = arith.constant 0 : i32
    %72 = arith.cmpi eq, %c8_i32, %c0_i32_38 : i32
    %c1_i32 = arith.constant 1 : i32
    %73 = arith.select %72, %c1_i32, %c8_i32 : i32
    %74 = vector.broadcast %73 : i32 to vector<83x1xi32>
    %75 = arith.remsi %71, %74 : vector<83x1xi32>
    %c0_i32_39 = arith.constant 0 : i32
    %76 = vector.broadcast %c0_i32_39 : i32 to vector<83x1xi32>
    %77 = arith.cmpi ne, %75, %76 : vector<83x1xi32>
    %c0_i32_40 = arith.constant 0 : i32
    %78 = vector.broadcast %c0_i32_40 : i32 to vector<83x1xi32>
    %79 = arith.cmpi slt, %75, %78 : vector<83x1xi32>
    %c0_i32_41 = arith.constant 0 : i32
    %80 = arith.cmpi slt, %73, %c0_i32_41 : i32
    %81 = vector.broadcast %80 : i1 to vector<83x1xi1>
    %82 = vector.broadcast %81 : vector<83x1xi1> to vector<83x1xi1>
    %83 = arith.xori %79, %82 : vector<83x1xi1>
    %84 = arith.andi %83, %77 : vector<83x1xi1>
    %85 = vector.broadcast %73 : i32 to vector<83x1xi32>
    %86 = arith.addi %75, %85 : vector<83x1xi32>
    %87 = arith.select %84, %86, %75 : vector<83x1xi1>, vector<83x1xi32>
    %c3_i32 = arith.constant 3 : i32
    %88 = vector.broadcast %c3_i32 : i32 to vector<83x1xi32>
    %89 = arith.cmpi slt, %87, %88 : vector<83x1xi32>
    %cst_42 = arith.constant 0.000000e+00 : f32
    %90 = vector.shape_cast %89 : vector<83x1xi1> to vector<83x1xi1>
    %91 = vector.broadcast %90 : vector<83x1xi1> to vector<83x128xi1>
    %92 = vector.broadcast %cst_42 : f32 to vector<83x128xf32>
    %93 = arith.select %91, %70, %92 : vector<83x128xi1>, vector<83x128xf32>
    %94 = arith.truncf %93 : vector<83x128xf32> to vector<83x128xbf16>
    %c18 = arith.constant 18 : index
    %c0_43 = arith.constant 0 : index
    %95 = vector.load %arg9[%c18, %c0_43] : memref<120x128xbf16, #tpu.memory_space<vmem>>, vector<83x128xbf16>
    tpu.vector_store %arg9[%c18, %c0_43], %94 {strides = array<i32>} : memref<120x128xbf16, #tpu.memory_space<vmem>>, vector<83x128xbf16>,
    %c0_i32_44 = arith.constant 0 : i32
    %96 = arith.cmpi eq, %arg1, %c0_i32_44 : i32
    %97 = arith.extui %96 : i1 to i32
    %c0_i32_45 = arith.constant 0 : i32
    %98 = arith.cmpi ne, %97, %c0_i32_45 : i32
    scf.if %98 {
      %cst_178 = arith.constant 0.000000e+00 : f32
      %229 = vector.broadcast %cst_178 : f32 to vector<83x32xf32>
      %c0_179 = arith.constant 0 : index
      %c0_180 = arith.constant 0 : index
      %230 = vector.load %arg10[%c0_179, %c0_180] : memref<83x32xf32, #tpu.memory_space<vmem>>, vector<83x32xf32>
      tpu.vector_store %arg10[%c0_179, %c0_180], %229 {strides = array<i32>} : memref<83x32xf32, #tpu.memory_space<vmem>>, vector<83x32xf32>,
    } else {
    }
    %c0_46 = arith.constant 0 : index
    %c0_47 = arith.constant 0 : index
    %99 = vector.load %arg10[%c0_46, %c0_47] : memref<83x32xf32, #tpu.memory_space<vmem>>, vector<83x32xf32>
    %c0_48 = arith.constant 0 : index
    %c0_49 = arith.constant 0 : index
    %100 = vector.load %arg9[%c0_48, %c0_49] : memref<120x128xbf16, #tpu.memory_space<vmem>>, vector<83x128xbf16>
    %c0_50 = arith.constant 0 : index
    %c0_51 = arith.constant 0 : index
    %c0_52 = arith.constant 0 : index
    %101 = vector.load %arg5[%c0_50, %c0_51, %c0_52] : memref<25x128x32xbf16, #tpu.memory_space<vmem>>, vector<1x128x32xbf16>
    %102 = vector.shape_cast %101 : vector<1x128x32xbf16> to vector<128x32xbf16>
    %cst_53 = arith.constant dense<0.000000e+00> : vector<83x32xf32>
    %103 = tpu.matmul %100, %102, %cst_53 {dimension_numbers = #tpu.dot_dimension_numbers<[1], [0], [0], [1], [0, 0, 1, 1], [], []>} : vector<83x128xbf16>, vector<128x32xbf16>, vector<83x32xf32> -> vector<83x32xf32>
    %104 = arith.addf %99, %103 : vector<83x32xf32>
    %c1_54 = arith.constant 1 : index
    %c0_55 = arith.constant 0 : index
    %105 = vector.load %arg9[%c1_54, %c0_55] : memref<120x128xbf16, #tpu.memory_space<vmem>>, vector<83x128xbf16>
    %c1_56 = arith.constant 1 : index
    %c0_57 = arith.constant 0 : index
    %c0_58 = arith.constant 0 : index
    %106 = vector.load %arg5[%c1_56, %c0_57, %c0_58] : memref<25x128x32xbf16, #tpu.memory_space<vmem>>, vector<1x128x32xbf16>
    %107 = vector.shape_cast %106 : vector<1x128x32xbf16> to vector<128x32xbf16>
    %cst_59 = arith.constant dense<0.000000e+00> : vector<83x32xf32>
    %108 = tpu.matmul %105, %107, %cst_59 {dimension_numbers = #tpu.dot_dimension_numbers<[1], [0], [0], [1], [0, 0, 1, 1], [], []>} : vector<83x128xbf16>, vector<128x32xbf16>, vector<83x32xf32> -> vector<83x32xf32>
    %109 = arith.addf %104, %108 : vector<83x32xf32>
    %c2_60 = arith.constant 2 : index
    %c0_61 = arith.constant 0 : index
    %110 = vector.load %arg9[%c2_60, %c0_61] : memref<120x128xbf16, #tpu.memory_space<vmem>>, vector<83x128xbf16>
    %c2_62 = arith.constant 2 : index
    %c0_63 = arith.constant 0 : index
    %c0_64 = arith.constant 0 : index
    %111 = vector.load %arg5[%c2_62, %c0_63, %c0_64] : memref<25x128x32xbf16, #tpu.memory_space<vmem>>, vector<1x128x32xbf16>
    %112 = vector.shape_cast %111 : vector<1x128x32xbf16> to vector<128x32xbf16>
    %cst_65 = arith.constant dense<0.000000e+00> : vector<83x32xf32>
    %113 = tpu.matmul %110, %112, %cst_65 {dimension_numbers = #tpu.dot_dimension_numbers<[1], [0], [0], [1], [0, 0, 1, 1], [], []>} : vector<83x128xbf16>, vector<128x32xbf16>, vector<83x32xf32> -> vector<83x32xf32>
    %114 = arith.addf %109, %113 : vector<83x32xf32>
    %c3_66 = arith.constant 3 : index
    %c0_67 = arith.constant 0 : index
    %115 = vector.load %arg9[%c3_66, %c0_67] : memref<120x128xbf16, #tpu.memory_space<vmem>>, vector<83x128xbf16>
    %c3_68 = arith.constant 3 : index
    %c0_69 = arith.constant 0 : index
    %c0_70 = arith.constant 0 : index
    %116 = vector.load %arg5[%c3_68, %c0_69, %c0_70] : memref<25x128x32xbf16, #tpu.memory_space<vmem>>, vector<1x128x32xbf16>
    %117 = vector.shape_cast %116 : vector<1x128x32xbf16> to vector<128x32xbf16>
    %cst_71 = arith.constant dense<0.000000e+00> : vector<83x32xf32>
    %118 = tpu.matmul %115, %117, %cst_71 {dimension_numbers = #tpu.dot_dimension_numbers<[1], [0], [0], [1], [0, 0, 1, 1], [], []>} : vector<83x128xbf16>, vector<128x32xbf16>, vector<83x32xf32> -> vector<83x32xf32>
    %119 = arith.addf %114, %118 : vector<83x32xf32>
    %c4_72 = arith.constant 4 : index
    %c0_73 = arith.constant 0 : index
    %120 = vector.load %arg9[%c4_72, %c0_73] : memref<120x128xbf16, #tpu.memory_space<vmem>>, vector<83x128xbf16>
    %c4_74 = arith.constant 4 : index
    %c0_75 = arith.constant 0 : index
    %c0_76 = arith.constant 0 : index
    %121 = vector.load %arg5[%c4_74, %c0_75, %c0_76] : memref<25x128x32xbf16, #tpu.memory_space<vmem>>, vector<1x128x32xbf16>
    %122 = vector.shape_cast %121 : vector<1x128x32xbf16> to vector<128x32xbf16>
    %cst_77 = arith.constant dense<0.000000e+00> : vector<83x32xf32>
    %123 = tpu.matmul %120, %122, %cst_77 {dimension_numbers = #tpu.dot_dimension_numbers<[1], [0], [0], [1], [0, 0, 1, 1], [], []>} : vector<83x128xbf16>, vector<128x32xbf16>, vector<83x32xf32> -> vector<83x32xf32>
    %124 = arith.addf %119, %123 : vector<83x32xf32>
    %c8_78 = arith.constant 8 : index
    %c0_79 = arith.constant 0 : index
    %125 = vector.load %arg9[%c8_78, %c0_79] : memref<120x128xbf16, #tpu.memory_space<vmem>>, vector<83x128xbf16>
    %c5 = arith.constant 5 : index
    %c0_80 = arith.constant 0 : index
    %c0_81 = arith.constant 0 : index
    %126 = vector.load %arg5[%c5, %c0_80, %c0_81] : memref<25x128x32xbf16, #tpu.memory_space<vmem>>, vector<1x128x32xbf16>
    %127 = vector.shape_cast %126 : vector<1x128x32xbf16> to vector<128x32xbf16>
    %cst_82 = arith.constant dense<0.000000e+00> : vector<83x32xf32>
    %128 = tpu.matmul %125, %127, %cst_82 {dimension_numbers = #tpu.dot_dimension_numbers<[1], [0], [0], [1], [0, 0, 1, 1], [], []>} : vector<83x128xbf16>, vector<128x32xbf16>, vector<83x32xf32> -> vector<83x32xf32>
    %129 = arith.addf %124, %128 : vector<83x32xf32>
    %c9 = arith.constant 9 : index
    %c0_83 = arith.constant 0 : index
    %130 = vector.load %arg9[%c9, %c0_83] : memref<120x128xbf16, #tpu.memory_space<vmem>>, vector<83x128xbf16>
    %c6 = arith.constant 6 : index
    %c0_84 = arith.constant 0 : index
    %c0_85 = arith.constant 0 : index
    %131 = vector.load %arg5[%c6, %c0_84, %c0_85] : memref<25x128x32xbf16, #tpu.memory_space<vmem>>, vector<1x128x32xbf16>
    %132 = vector.shape_cast %131 : vector<1x128x32xbf16> to vector<128x32xbf16>
    %cst_86 = arith.constant dense<0.000000e+00> : vector<83x32xf32>
    %133 = tpu.matmul %130, %132, %cst_86 {dimension_numbers = #tpu.dot_dimension_numbers<[1], [0], [0], [1], [0, 0, 1, 1], [], []>} : vector<83x128xbf16>, vector<128x32xbf16>, vector<83x32xf32> -> vector<83x32xf32>
    %134 = arith.addf %129, %133 : vector<83x32xf32>
    %c10 = arith.constant 10 : index
    %c0_87 = arith.constant 0 : index
    %135 = vector.load %arg9[%c10, %c0_87] : memref<120x128xbf16, #tpu.memory_space<vmem>>, vector<83x128xbf16>
    %c7 = arith.constant 7 : index
    %c0_88 = arith.constant 0 : index
    %c0_89 = arith.constant 0 : index
    %136 = vector.load %arg5[%c7, %c0_88, %c0_89] : memref<25x128x32xbf16, #tpu.memory_space<vmem>>, vector<1x128x32xbf16>
    %137 = vector.shape_cast %136 : vector<1x128x32xbf16> to vector<128x32xbf16>
    %cst_90 = arith.constant dense<0.000000e+00> : vector<83x32xf32>
    %138 = tpu.matmul %135, %137, %cst_90 {dimension_numbers = #tpu.dot_dimension_numbers<[1], [0], [0], [1], [0, 0, 1, 1], [], []>} : vector<83x128xbf16>, vector<128x32xbf16>, vector<83x32xf32> -> vector<83x32xf32>
    %139 = arith.addf %134, %138 : vector<83x32xf32>
    %c11 = arith.constant 11 : index
    %c0_91 = arith.constant 0 : index
    %140 = vector.load %arg9[%c11, %c0_91] : memref<120x128xbf16, #tpu.memory_space<vmem>>, vector<83x128xbf16>
    %c8_92 = arith.constant 8 : index
    %c0_93 = arith.constant 0 : index
    %c0_94 = arith.constant 0 : index
    %141 = vector.load %arg5[%c8_92, %c0_93, %c0_94] : memref<25x128x32xbf16, #tpu.memory_space<vmem>>, vector<1x128x32xbf16>
    %142 = vector.shape_cast %141 : vector<1x128x32xbf16> to vector<128x32xbf16>
    %cst_95 = arith.constant dense<0.000000e+00> : vector<83x32xf32>
    %143 = tpu.matmul %140, %142, %cst_95 {dimension_numbers = #tpu.dot_dimension_numbers<[1], [0], [0], [1], [0, 0, 1, 1], [], []>} : vector<83x128xbf16>, vector<128x32xbf16>, vector<83x32xf32> -> vector<83x32xf32>
    %144 = arith.addf %139, %143 : vector<83x32xf32>
    %c12 = arith.constant 12 : index
    %c0_96 = arith.constant 0 : index
    %145 = vector.load %arg9[%c12, %c0_96] : memref<120x128xbf16, #tpu.memory_space<vmem>>, vector<83x128xbf16>
    %c9_97 = arith.constant 9 : index
    %c0_98 = arith.constant 0 : index
    %c0_99 = arith.constant 0 : index
    %146 = vector.load %arg5[%c9_97, %c0_98, %c0_99] : memref<25x128x32xbf16, #tpu.memory_space<vmem>>, vector<1x128x32xbf16>
    %147 = vector.shape_cast %146 : vector<1x128x32xbf16> to vector<128x32xbf16>
    %cst_100 = arith.constant dense<0.000000e+00> : vector<83x32xf32>
    %148 = tpu.matmul %145, %147, %cst_100 {dimension_numbers = #tpu.dot_dimension_numbers<[1], [0], [0], [1], [0, 0, 1, 1], [], []>} : vector<83x128xbf16>, vector<128x32xbf16>, vector<83x32xf32> -> vector<83x32xf32>
    %149 = arith.addf %144, %148 : vector<83x32xf32>
    %c16_101 = arith.constant 16 : index
    %c0_102 = arith.constant 0 : index
    %150 = vector.load %arg9[%c16_101, %c0_102] : memref<120x128xbf16, #tpu.memory_space<vmem>>, vector<83x128xbf16>
    %c10_103 = arith.constant 10 : index
    %c0_104 = arith.constant 0 : index
    %c0_105 = arith.constant 0 : index
    %151 = vector.load %arg5[%c10_103, %c0_104, %c0_105] : memref<25x128x32xbf16, #tpu.memory_space<vmem>>, vector<1x128x32xbf16>
    %152 = vector.shape_cast %151 : vector<1x128x32xbf16> to vector<128x32xbf16>
    %cst_106 = arith.constant dense<0.000000e+00> : vector<83x32xf32>
    %153 = tpu.matmul %150, %152, %cst_106 {dimension_numbers = #tpu.dot_dimension_numbers<[1], [0], [0], [1], [0, 0, 1, 1], [], []>} : vector<83x128xbf16>, vector<128x32xbf16>, vector<83x32xf32> -> vector<83x32xf32>
    %154 = arith.addf %149, %153 : vector<83x32xf32>
    %c17 = arith.constant 17 : index
    %c0_107 = arith.constant 0 : index
    %155 = vector.load %arg9[%c17, %c0_107] : memref<120x128xbf16, #tpu.memory_space<vmem>>, vector<83x128xbf16>
    %c11_108 = arith.constant 11 : index
    %c0_109 = arith.constant 0 : index
    %c0_110 = arith.constant 0 : index
    %156 = vector.load %arg5[%c11_108, %c0_109, %c0_110] : memref<25x128x32xbf16, #tpu.memory_space<vmem>>, vector<1x128x32xbf16>
    %157 = vector.shape_cast %156 : vector<1x128x32xbf16> to vector<128x32xbf16>
    %cst_111 = arith.constant dense<0.000000e+00> : vector<83x32xf32>
    %158 = tpu.matmul %155, %157, %cst_111 {dimension_numbers = #tpu.dot_dimension_numbers<[1], [0], [0], [1], [0, 0, 1, 1], [], []>} : vector<83x128xbf16>, vector<128x32xbf16>, vector<83x32xf32> -> vector<83x32xf32>
    %159 = arith.addf %154, %158 : vector<83x32xf32>
    %c18_112 = arith.constant 18 : index
    %c0_113 = arith.constant 0 : index
    %160 = vector.load %arg9[%c18_112, %c0_113] : memref<120x128xbf16, #tpu.memory_space<vmem>>, vector<83x128xbf16>
    %c12_114 = arith.constant 12 : index
    %c0_115 = arith.constant 0 : index
    %c0_116 = arith.constant 0 : index
    %161 = vector.load %arg5[%c12_114, %c0_115, %c0_116] : memref<25x128x32xbf16, #tpu.memory_space<vmem>>, vector<1x128x32xbf16>
    %162 = vector.shape_cast %161 : vector<1x128x32xbf16> to vector<128x32xbf16>
    %cst_117 = arith.constant dense<0.000000e+00> : vector<83x32xf32>
    %163 = tpu.matmul %160, %162, %cst_117 {dimension_numbers = #tpu.dot_dimension_numbers<[1], [0], [0], [1], [0, 0, 1, 1], [], []>} : vector<83x128xbf16>, vector<128x32xbf16>, vector<83x32xf32> -> vector<83x32xf32>
    %164 = arith.addf %159, %163 : vector<83x32xf32>
    %c19 = arith.constant 19 : index
    %c0_118 = arith.constant 0 : index
    %165 = vector.load %arg9[%c19, %c0_118] : memref<120x128xbf16, #tpu.memory_space<vmem>>, vector<83x128xbf16>
    %c13 = arith.constant 13 : index
    %c0_119 = arith.constant 0 : index
    %c0_120 = arith.constant 0 : index
    %166 = vector.load %arg5[%c13, %c0_119, %c0_120] : memref<25x128x32xbf16, #tpu.memory_space<vmem>>, vector<1x128x32xbf16>
    %167 = vector.shape_cast %166 : vector<1x128x32xbf16> to vector<128x32xbf16>
    %cst_121 = arith.constant dense<0.000000e+00> : vector<83x32xf32>
    %168 = tpu.matmul %165, %167, %cst_121 {dimension_numbers = #tpu.dot_dimension_numbers<[1], [0], [0], [1], [0, 0, 1, 1], [], []>} : vector<83x128xbf16>, vector<128x32xbf16>, vector<83x32xf32> -> vector<83x32xf32>
    %169 = arith.addf %164, %168 : vector<83x32xf32>
    %c20 = arith.constant 20 : index
    %c0_122 = arith.constant 0 : index
    %170 = vector.load %arg9[%c20, %c0_122] : memref<120x128xbf16, #tpu.memory_space<vmem>>, vector<83x128xbf16>
    %c14 = arith.constant 14 : index
    %c0_123 = arith.constant 0 : index
    %c0_124 = arith.constant 0 : index
    %171 = vector.load %arg5[%c14, %c0_123, %c0_124] : memref<25x128x32xbf16, #tpu.memory_space<vmem>>, vector<1x128x32xbf16>
    %172 = vector.shape_cast %171 : vector<1x128x32xbf16> to vector<128x32xbf16>
    %cst_125 = arith.constant dense<0.000000e+00> : vector<83x32xf32>
    %173 = tpu.matmul %170, %172, %cst_125 {dimension_numbers = #tpu.dot_dimension_numbers<[1], [0], [0], [1], [0, 0, 1, 1], [], []>} : vector<83x128xbf16>, vector<128x32xbf16>, vector<83x32xf32> -> vector<83x32xf32>
    %174 = arith.addf %169, %173 : vector<83x32xf32>
    %c24_126 = arith.constant 24 : index
    %c0_127 = arith.constant 0 : index
    %175 = vector.load %arg9[%c24_126, %c0_127] : memref<120x128xbf16, #tpu.memory_space<vmem>>, vector<83x128xbf16>
    %c15 = arith.constant 15 : index
    %c0_128 = arith.constant 0 : index
    %c0_129 = arith.constant 0 : index
    %176 = vector.load %arg5[%c15, %c0_128, %c0_129] : memref<25x128x32xbf16, #tpu.memory_space<vmem>>, vector<1x128x32xbf16>
    %177 = vector.shape_cast %176 : vector<1x128x32xbf16> to vector<128x32xbf16>
    %cst_130 = arith.constant dense<0.000000e+00> : vector<83x32xf32>
    %178 = tpu.matmul %175, %177, %cst_130 {dimension_numbers = #tpu.dot_dimension_numbers<[1], [0], [0], [1], [0, 0, 1, 1], [], []>} : vector<83x128xbf16>, vector<128x32xbf16>, vector<83x32xf32> -> vector<83x32xf32>
    %179 = arith.addf %174, %178 : vector<83x32xf32>
    %c25 = arith.constant 25 : index
    %c0_131 = arith.constant 0 : index
    %180 = vector.load %arg9[%c25, %c0_131] : memref<120x128xbf16, #tpu.memory_space<vmem>>, vector<83x128xbf16>
    %c16_132 = arith.constant 16 : index
    %c0_133 = arith.constant 0 : index
    %c0_134 = arith.constant 0 : index
    %181 = vector.load %arg5[%c16_132, %c0_133, %c0_134] : memref<25x128x32xbf16, #tpu.memory_space<vmem>>, vector<1x128x32xbf16>
    %182 = vector.shape_cast %181 : vector<1x128x32xbf16> to vector<128x32xbf16>
    %cst_135 = arith.constant dense<0.000000e+00> : vector<83x32xf32>
    %183 = tpu.matmul %180, %182, %cst_135 {dimension_numbers = #tpu.dot_dimension_numbers<[1], [0], [0], [1], [0, 0, 1, 1], [], []>} : vector<83x128xbf16>, vector<128x32xbf16>, vector<83x32xf32> -> vector<83x32xf32>
    %184 = arith.addf %179, %183 : vector<83x32xf32>
    %c26 = arith.constant 26 : index
    %c0_136 = arith.constant 0 : index
    %185 = vector.load %arg9[%c26, %c0_136] : memref<120x128xbf16, #tpu.memory_space<vmem>>, vector<83x128xbf16>
    %c17_137 = arith.constant 17 : index
    %c0_138 = arith.constant 0 : index
    %c0_139 = arith.constant 0 : index
    %186 = vector.load %arg5[%c17_137, %c0_138, %c0_139] : memref<25x128x32xbf16, #tpu.memory_space<vmem>>, vector<1x128x32xbf16>
    %187 = vector.shape_cast %186 : vector<1x128x32xbf16> to vector<128x32xbf16>
    %cst_140 = arith.constant dense<0.000000e+00> : vector<83x32xf32>
    %188 = tpu.matmul %185, %187, %cst_140 {dimension_numbers = #tpu.dot_dimension_numbers<[1], [0], [0], [1], [0, 0, 1, 1], [], []>} : vector<83x128xbf16>, vector<128x32xbf16>, vector<83x32xf32> -> vector<83x32xf32>
    %189 = arith.addf %184, %188 : vector<83x32xf32>
    %c27 = arith.constant 27 : index
    %c0_141 = arith.constant 0 : index
    %190 = vector.load %arg9[%c27, %c0_141] : memref<120x128xbf16, #tpu.memory_space<vmem>>, vector<83x128xbf16>
    %c18_142 = arith.constant 18 : index
    %c0_143 = arith.constant 0 : index
    %c0_144 = arith.constant 0 : index
    %191 = vector.load %arg5[%c18_142, %c0_143, %c0_144] : memref<25x128x32xbf16, #tpu.memory_space<vmem>>, vector<1x128x32xbf16>
    %192 = vector.shape_cast %191 : vector<1x128x32xbf16> to vector<128x32xbf16>
    %cst_145 = arith.constant dense<0.000000e+00> : vector<83x32xf32>
    %193 = tpu.matmul %190, %192, %cst_145 {dimension_numbers = #tpu.dot_dimension_numbers<[1], [0], [0], [1], [0, 0, 1, 1], [], []>} : vector<83x128xbf16>, vector<128x32xbf16>, vector<83x32xf32> -> vector<83x32xf32>
    %194 = arith.addf %189, %193 : vector<83x32xf32>
    %c28 = arith.constant 28 : index
    %c0_146 = arith.constant 0 : index
    %195 = vector.load %arg9[%c28, %c0_146] : memref<120x128xbf16, #tpu.memory_space<vmem>>, vector<83x128xbf16>
    %c19_147 = arith.constant 19 : index
    %c0_148 = arith.constant 0 : index
    %c0_149 = arith.constant 0 : index
    %196 = vector.load %arg5[%c19_147, %c0_148, %c0_149] : memref<25x128x32xbf16, #tpu.memory_space<vmem>>, vector<1x128x32xbf16>
    %197 = vector.shape_cast %196 : vector<1x128x32xbf16> to vector<128x32xbf16>
    %cst_150 = arith.constant dense<0.000000e+00> : vector<83x32xf32>
    %198 = tpu.matmul %195, %197, %cst_150 {dimension_numbers = #tpu.dot_dimension_numbers<[1], [0], [0], [1], [0, 0, 1, 1], [], []>} : vector<83x128xbf16>, vector<128x32xbf16>, vector<83x32xf32> -> vector<83x32xf32>
    %199 = arith.addf %194, %198 : vector<83x32xf32>
    %c32_151 = arith.constant 32 : index
    %c0_152 = arith.constant 0 : index
    %200 = vector.load %arg9[%c32_151, %c0_152] : memref<120x128xbf16, #tpu.memory_space<vmem>>, vector<83x128xbf16>
    %c20_153 = arith.constant 20 : index
    %c0_154 = arith.constant 0 : index
    %c0_155 = arith.constant 0 : index
    %201 = vector.load %arg5[%c20_153, %c0_154, %c0_155] : memref<25x128x32xbf16, #tpu.memory_space<vmem>>, vector<1x128x32xbf16>
    %202 = vector.shape_cast %201 : vector<1x128x32xbf16> to vector<128x32xbf16>
    %cst_156 = arith.constant dense<0.000000e+00> : vector<83x32xf32>
    %203 = tpu.matmul %200, %202, %cst_156 {dimension_numbers = #tpu.dot_dimension_numbers<[1], [0], [0], [1], [0, 0, 1, 1], [], []>} : vector<83x128xbf16>, vector<128x32xbf16>, vector<83x32xf32> -> vector<83x32xf32>
    %204 = arith.addf %199, %203 : vector<83x32xf32>
    %c33 = arith.constant 33 : index
    %c0_157 = arith.constant 0 : index
    %205 = vector.load %arg9[%c33, %c0_157] : memref<120x128xbf16, #tpu.memory_space<vmem>>, vector<83x128xbf16>
    %c21 = arith.constant 21 : index
    %c0_158 = arith.constant 0 : index
    %c0_159 = arith.constant 0 : index
    %206 = vector.load %arg5[%c21, %c0_158, %c0_159] : memref<25x128x32xbf16, #tpu.memory_space<vmem>>, vector<1x128x32xbf16>
    %207 = vector.shape_cast %206 : vector<1x128x32xbf16> to vector<128x32xbf16>
    %cst_160 = arith.constant dense<0.000000e+00> : vector<83x32xf32>
    %208 = tpu.matmul %205, %207, %cst_160 {dimension_numbers = #tpu.dot_dimension_numbers<[1], [0], [0], [1], [0, 0, 1, 1], [], []>} : vector<83x128xbf16>, vector<128x32xbf16>, vector<83x32xf32> -> vector<83x32xf32>
    %209 = arith.addf %204, %208 : vector<83x32xf32>
    %c34 = arith.constant 34 : index
    %c0_161 = arith.constant 0 : index
    %210 = vector.load %arg9[%c34, %c0_161] : memref<120x128xbf16, #tpu.memory_space<vmem>>, vector<83x128xbf16>
    %c22 = arith.constant 22 : index
    %c0_162 = arith.constant 0 : index
    %c0_163 = arith.constant 0 : index
    %211 = vector.load %arg5[%c22, %c0_162, %c0_163] : memref<25x128x32xbf16, #tpu.memory_space<vmem>>, vector<1x128x32xbf16>
    %212 = vector.shape_cast %211 : vector<1x128x32xbf16> to vector<128x32xbf16>
    %cst_164 = arith.constant dense<0.000000e+00> : vector<83x32xf32>
    %213 = tpu.matmul %210, %212, %cst_164 {dimension_numbers = #tpu.dot_dimension_numbers<[1], [0], [0], [1], [0, 0, 1, 1], [], []>} : vector<83x128xbf16>, vector<128x32xbf16>, vector<83x32xf32> -> vector<83x32xf32>
    %214 = arith.addf %209, %213 : vector<83x32xf32>
    %c35 = arith.constant 35 : index
    %c0_165 = arith.constant 0 : index
    %215 = vector.load %arg9[%c35, %c0_165] : memref<120x128xbf16, #tpu.memory_space<vmem>>, vector<83x128xbf16>
    %c23 = arith.constant 23 : index
    %c0_166 = arith.constant 0 : index
    %c0_167 = arith.constant 0 : index
    %216 = vector.load %arg5[%c23, %c0_166, %c0_167] : memref<25x128x32xbf16, #tpu.memory_space<vmem>>, vector<1x128x32xbf16>
    %217 = vector.shape_cast %216 : vector<1x128x32xbf16> to vector<128x32xbf16>
    %cst_168 = arith.constant dense<0.000000e+00> : vector<83x32xf32>
    %218 = tpu.matmul %215, %217, %cst_168 {dimension_numbers = #tpu.dot_dimension_numbers<[1], [0], [0], [1], [0, 0, 1, 1], [], []>} : vector<83x128xbf16>, vector<128x32xbf16>, vector<83x32xf32> -> vector<83x32xf32>
    %219 = arith.addf %214, %218 : vector<83x32xf32>
    %c36 = arith.constant 36 : index
    %c0_169 = arith.constant 0 : index
    %220 = vector.load %arg9[%c36, %c0_169] : memref<120x128xbf16, #tpu.memory_space<vmem>>, vector<83x128xbf16>
    %c24_170 = arith.constant 24 : index
    %c0_171 = arith.constant 0 : index
    %c0_172 = arith.constant 0 : index
    %221 = vector.load %arg5[%c24_170, %c0_171, %c0_172] : memref<25x128x32xbf16, #tpu.memory_space<vmem>>, vector<1x128x32xbf16>
    %222 = vector.shape_cast %221 : vector<1x128x32xbf16> to vector<128x32xbf16>
    %cst_173 = arith.constant dense<0.000000e+00> : vector<83x32xf32>
    %223 = tpu.matmul %220, %222, %cst_173 {dimension_numbers = #tpu.dot_dimension_numbers<[1], [0], [0], [1], [0, 0, 1, 1], [], []>} : vector<83x128xbf16>, vector<128x32xbf16>, vector<83x32xf32> -> vector<83x32xf32>
    %224 = arith.addf %219, %223 : vector<83x32xf32>
    %c0_174 = arith.constant 0 : index
    %c0_175 = arith.constant 0 : index
    %225 = vector.load %arg10[%c0_174, %c0_175] : memref<83x32xf32, #tpu.memory_space<vmem>>, vector<83x32xf32>
    tpu.vector_store %arg10[%c0_174, %c0_175], %224 {strides = array<i32>} : memref<83x32xf32, #tpu.memory_space<vmem>>, vector<83x32xf32>,
    %c1_i32_176 = arith.constant 1 : i32
    %226 = arith.cmpi eq, %arg1, %c1_i32_176 : i32
    %227 = arith.extui %226 : i1 to i32
    %c0_i32_177 = arith.constant 0 : i32
    %228 = arith.cmpi ne, %227, %c0_i32_177 : i32
    scf.if %228 {
      %c0_178 = arith.constant 0 : index
      %c0_179 = arith.constant 0 : index
      %229 = vector.load %arg10[%c0_178, %c0_179] : memref<83x32xf32, #tpu.memory_space<vmem>>, vector<83x32xf32>
      %c0_180 = arith.constant 0 : index
      %c0_181 = arith.constant 0 : index
      %230 = vector.load %arg6[%c0_180, %c0_181] : memref<1x32xf32, #tpu.memory_space<vmem>>, vector<1x32xf32>
      %231 = vector.broadcast %230 : vector<1x32xf32> to vector<83x32xf32>
      %232 = arith.addf %229, %231 : vector<83x32xf32>
      %233 = arith.truncf %232 : vector<83x32xf32> to vector<83x32xbf16>
      %c0_182 = arith.constant 0 : index
      %c0_183 = arith.constant 0 : index
      %c0_184 = arith.constant 0 : index
      %234 = vector.load %arg7[%c0_182, %c0_183, %c0_184] : memref<1x83x32xbf16, #tpu.memory_space<vmem>>, vector<1x83x32xbf16>
      %235 = vector.shape_cast %234 : vector<1x83x32xbf16> to vector<83x32xbf16>
      %236 = vector.shape_cast %233 : vector<83x32xbf16> to vector<1x83x32xbf16>
      tpu.vector_store %arg7[%c0_182, %c0_183, %c0_184], %236 {strides = array<i32>} : memref<1x83x32xbf16, #tpu.memory_space<vmem>>, vector<1x83x32xbf16>,
    } else {
    }
    return
  }
  func.func @transform_0(%arg0: i32, %arg1: i32) -> (i32, i32, i32) {
    %c0_i32 = arith.constant 0 : i32
    %c0_i32_0 = arith.constant 0 : i32
    %c0_i32_1 = arith.constant 0 : i32
    return %arg0, %c0_i32, %c0_i32_0 : i32, i32, i32
  }
  func.func @transform_1(%arg0: i32, %arg1: i32) -> (i32, i32, i32) {
    %c0_i32 = arith.constant 0 : i32
    %c0_i32_0 = arith.constant 0 : i32
    %c0_i32_1 = arith.constant 0 : i32
    return %c0_i32, %c0_i32_0, %arg1 : i32, i32, i32
  }
  func.func @transform_2(%arg0: i32, %arg1: i32) -> (i32, i32) {
    %c0_i32 = arith.constant 0 : i32
    %c0_i32_0 = arith.constant 0 : i32
    return %c0_i32, %arg1 : i32, i32
  }
  func.func @transform_3(%arg0: i32, %arg1: i32) -> (i32, i32, i32) {
    %c0_i32 = arith.constant 0 : i32
    %c0_i32_0 = arith.constant 0 : i32
    %c0_i32_1 = arith.constant 0 : i32
    return %c0_i32, %arg1, %c0_i32_0 : i32, i32, i32
  }
  func.func @transform_4(%arg0: i32, %arg1: i32) -> (i32, i32) {
    %c0_i32 = arith.constant 0 : i32
    %c0_i32_0 = arith.constant 0 : i32
    %c0_i32_1 = arith.constant 0 : i32
    return %c0_i32, %c0_i32_0 : i32, i32
  }
  func.func @transform_5(%arg0: i32, %arg1: i32) -> (i32, i32, i32) {
    %c0_i32 = arith.constant 0 : i32
    %c0_i32_0 = arith.constant 0 : i32
    %c0_i32_1 = arith.constant 0 : i32
    return %arg0, %c0_i32, %c0_i32_0 : i32, i32, i32
  }
}

</mosaic_0001>

<bundles_post_ra>
// kernel: tpu_custom_call.1
= control target key start
LH: loop header
LB: loop body
LE: loop exit
PB: predicated region body
PF: predicated region fallthrough
CT: control target
= control target key end

     0   :  { %s12861_s18 = smov 0   ;;  %s12863_s19 = smov 0   ;;  %s15469_s0 = inlined_call_operand.vmem [shape: bf16[2,120,32], index: 0, kind: input, shape index: {}]   ;;  %s15470_s1 = inlined_call_operand.vmem [shape: bf16[5,160,256], index: 1, kind: input, shape index: {}]   ;;  %s15471_s2 = inlined_call_operand.vmem [shape: f32[1,256], index: 2, kind: input, shape index: {}]   ;;  %s15472_s3 = inlined_call_operand.vmem [shape: bf16[25,256,32], index: 3, kind: input, shape index: {}]   ;;  %s15473_s4 = inlined_call_operand.vmem [shape: f32[1,32], index: 4, kind: input, shape index: {}]   ;;  %s15474_s5 = inlined_call_operand.vmem [shape: bf16[2,83,32], index: 5, kind: output, shape index: {}]  }
   0x1   :  { %s12865_s20 = smov 0   ;;  %s12867_s21 = smov 0  }
   0x2   :  { %s12869_s22 = smov 0   ;;  %s12871_s23 = smov 0  }
   0x3   :  { %s12873_s24 = smov 0  }
   0x4 LB: > { %s24_s25 = sadd.s32 1, %s12815_s22  ;;  %s27_s26 = sadd.s32 1, %s12819_s23  ;;  %s12823_s24 = sphi %s12873_s24, %s15_s24   ;;  %s12819_s23 = sphi %s12871_s23, %s15504_s23   ;;  %s12815_s22 = sphi %s12869_s22, %s15503_s22   ;;  %s12811_s21 = sphi %s12867_s21, %s15502_s21   ;;  %s12807_s20 = sphi %s12865_s20, %s15501_s20   ;;  %s12803_s19 = sphi %s12863_s19, %s15500_s19   ;;  %s12799_s18 = sphi %s12861_s18, %s15499_s18  }
   0x5   : > { %p25_p0 = scmp.ge.s32.totalorder %s24_s25, 2  ;;  %s60_s27 = sadd.s32 1, %s12803_s19 }
   0x6   : > { %p67_p1 = scmp.ne.s32.totalorder %s12803_s19, %s12799_s18  ;;  %p68_p2 = scmp.eq.s32.totalorder %s12823_s24, 0 }
   0x7   : > { %s15506_s25 = smov (%p25_p0, %s24_s25), 0  ;;  %s15508_s26 = smov (!%p25_p0, %s27_s26), %s12819_s23 }
   0x8   : > { %s57_s28 = ssub.s32 %s12815_s22, %s15506_s25  ;;  %p12907_p3 = por %p68_p2, %p67_p1 }
   0x9   : > { %p29_p4 = scmp.ge.s32.totalorder %s15508_s26, 2  ;;  %p58_p5 = scmp.eq.s32.totalorder %s57_s28, 0 }
   0xa   : > { %p10008_p6 = scmp.ge.s32.totalorder %s12823_s24, 4 }
   0xb   : > { %s15510_s26 = smov (%p29_p4, %s15508_s26), 0 }
   0xc   : > { %s12914_s30 = scalar_select %p58_p5, %s12803_s19, %s60_s27  }
   0xd   : > { %195 = sbr.rel (%p10008_p6) target bundleno = 196 (0xc4), region = 20 }
  0x14   : > { %206 = sbr.rel (!%p12907_p3) target bundleno = 91 (0x5b), region = 28  ;;  %s208_s6 = sand.u32 (%p12907_p3), 1, %s12803_s19  }
  0x15   : > { %s10009_s7 = sshll.u32 (%p12907_p3), %s12815_s22, 2  ;;  %s12309_s8 = smul.u32 (%p12907_p3), 400, %s208_s6 }
  0x16   : > { %s12924_s11 = scalar_lea.vmem (%p12907_p3), %s15470_s1, %s10009_s7 }
  0x17   : > { %v228_v0 = vld [vmem:[%s12924_s11] sm:$0xf] (%p12907_p3)  ;;  %v230_v1 = vld [vmem:[%s12924_s11 + $0x8] sm:$0xf] (%p12907_p3)  ;;  %v232_v2 = vld [vmem:[%s12924_s11 + $0x10] sm:$0xf] (%p12907_p3) }
  0x18   : > { %v234_v3 = vld [vmem:[%s12924_s11 + $0x18] sm:$0xf] (%p12907_p3)  ;;  %v236_v4 = vld [vmem:[%s12924_s11 + $0x20] sm:$0xf] (%p12907_p3)  ;;  %s12931_s12 = scalar_lea.vmem (%p12907_p3), [#allocation5], %s12309_s8 }
  0x19   : > { %229 = vst [vmem:[%s12931_s12] sm:$0xf] (%p12907_p3), %v228_v0  ;;  %231 = vst [vmem:[%s12931_s12 + $0x4] sm:$0xf] (%p12907_p3), %v230_v1  ;;  %v238_v5 = vld [vmem:[%s12924_s11 + $0x28] sm:$0xf] (%p12907_p3) }
  0x1a   : > { %233 = vst [vmem:[%s12931_s12 + $0x8] sm:$0xf] (%p12907_p3), %v232_v2  ;;  %235 = vst [vmem:[%s12931_s12 + $0xc] sm:$0xf] (%p12907_p3), %v234_v3  ;;  %v240_v6 = vld [vmem:[%s12924_s11 + $0x30] sm:$0xf] (%p12907_p3) }
  0x1b   : > { %237 = vst [vmem:[%s12931_s12 + $0x10] sm:$0xf] %v236_v4  ;;  %v242_v7 = vld [vmem:[%s12924_s11 + $0x38] sm:$0xf]  ;;  %239 = vst [vmem:[%s12931_s12 + $0x14] sm:$0xf] %v238_v5 }
  0x1c   : > { %241 = vst [vmem:[%s12931_s12 + $0x18] sm:$0xf] %v240_v6  ;;  %243 = vst [vmem:[%s12931_s12 + $0x1c] sm:$0xf] %v242_v7  ;;  %v244_v8 = vld [vmem:[%s12924_s11 + $0x40] sm:$0xf] }
  0x1d   : > { %v246_v9 = vld [vmem:[%s12924_s11 + $0x48] sm:$0xf]  ;;  %v248_v10 = vld [vmem:[%s12924_s11 + $0x50] sm:$0xf]  ;;  %245 = vst [vmem:[%s12931_s12 + $0x20] sm:$0xf] %v244_v8 }
  0x1e   : > { %247 = vst [vmem:[%s12931_s12 + $0x24] sm:$0xf] %v246_v9  ;;  %249 = vst [vmem:[%s12931_s12 + $0x28] sm:$0xf] %v248_v10  ;;  %v250_v11 = vld [vmem:[%s12924_s11 + $0x58] sm:$0xf] }
  0x1f   : > { %v252_v12 = vld [vmem:[%s12924_s11 + $0x60] sm:$0xf]  ;;  %v254_v13 = vld [vmem:[%s12924_s11 + $0x68] sm:$0xf]  ;;  %251 = vst [vmem:[%s12931_s12 + $0x2c] sm:$0xf] %v250_v11 }
  0x20   : > { %253 = vst [vmem:[%s12931_s12 + $0x30] sm:$0xf] %v252_v12  ;;  %255 = vst [vmem:[%s12931_s12 + $0x34] sm:$0xf] %v254_v13  ;;  %v256_v14 = vld [vmem:[%s12924_s11 + $0x70] sm:$0xf] }
  0x21   : > { %v258_v15 = vld [vmem:[%s12924_s11 + $0x78] sm:$0xf]  ;;  %v260_v16 = vld [vmem:[%s12924_s11 + $0x80] sm:$0xf]  ;;  %257 = vst [vmem:[%s12931_s12 + $0x38] sm:$0xf] %v256_v14 }
  0x22   : > { %259 = vst [vmem:[%s12931_s12 + $0x3c] sm:$0xf] %v258_v15  ;;  %261 = vst [vmem:[%s12931_s12 + $0x40] sm:$0xf] %v260_v16  ;;  %v262_v17 = vld [vmem:[%s12924_s11 + $0x88] sm:$0xf] }
  0x23   : > { %v264_v18 = vld [vmem:[%s12924_s11 + $0x90] sm:$0xf]  ;;  %v266_v19 = vld [vmem:[%s12924_s11 + $0x98] sm:$0xf]  ;;  %263 = vst [vmem:[%s12931_s12 + $0x44] sm:$0xf] %v262_v17 }
  0x24   : > { %265 = vst [vmem:[%s12931_s12 + $0x48] sm:$0xf] %v264_v18  ;;  %267 = vst [vmem:[%s12931_s12 + $0x4c] sm:$0xf] %v266_v19  ;;  %v268_v20 = vld [vmem:[%s12924_s11 + $0xa0] sm:$0xf] }
  0x25   : > { %v270_v21 = vld [vmem:[%s12924_s11 + $0xa8] sm:$0xf]  ;;  %v272_v22 = vld [vmem:[%s12924_s11 + $0xb0] sm:$0xf]  ;;  %269 = vst [vmem:[%s12931_s12 + $0x50] sm:$0xf] %v268_v20 }
  0x26   : > { %271 = vst [vmem:[%s12931_s12 + $0x54] sm:$0xf] %v270_v21  ;;  %273 = vst [vmem:[%s12931_s12 + $0x58] sm:$0xf] %v272_v22  ;;  %v274_v23 = vld [vmem:[%s12924_s11 + $0xb8] sm:$0xf] }
  0x27   : > { %v276_v24 = vld [vmem:[%s12924_s11 + $0xc0] sm:$0xf]  ;;  %v278_v25 = vld [vmem:[%s12924_s11 + $0xc8] sm:$0xf]  ;;  %275 = vst [vmem:[%s12931_s12 + $0x5c] sm:$0xf] %v274_v23 }
  0x28   : > { %277 = vst [vmem:[%s12931_s12 + $0x60] sm:$0xf] %v276_v24  ;;  %279 = vst [vmem:[%s12931_s12 + $0x64] sm:$0xf] %v278_v25  ;;  %v280_v26 = vld [vmem:[%s12924_s11 + $0xd0] sm:$0xf] }
  0x29   : > { %v282_v27 = vld [vmem:[%s12924_s11 + $0xd8] sm:$0xf]  ;;  %v284_v28 = vld [vmem:[%s12924_s11 + $0xe0] sm:$0xf]  ;;  %281 = vst [vmem:[%s12931_s12 + $0x68] sm:$0xf] %v280_v26 }
  0x2a   : > { %283 = vst [vmem:[%s12931_s12 + $0x6c] sm:$0xf] %v282_v27  ;;  %285 = vst [vmem:[%s12931_s12 + $0x70] sm:$0xf] %v284_v28  ;;  %v286_v29 = vld [vmem:[%s12924_s11 + $0xe8] sm:$0xf] }
  0x2b   : > { %v288_v30 = vld [vmem:[%s12924_s11 + $0xf0] sm:$0xf]  ;;  %v290_v31 = vld [vmem:[%s12924_s11 + $0xf8] sm:$0xf]  ;;  %287 = vst [vmem:[%s12931_s12 + $0x74] sm:$0xf] %v286_v29 }
  0x2c   : > { %289 = vst [vmem:[%s12931_s12 + $0x78] sm:$0xf] %v288_v30  ;;  %291 = vst [vmem:[%s12931_s12 + $0x7c] sm:$0xf] %v290_v31  ;;  %v292_v32 = vld [vmem:[%s12924_s11 + $0x100] sm:$0xf] }
  0x2d   : > { %v294_v33 = vld [vmem:[%s12924_s11 + $0x108] sm:$0xf]  ;;  %v296_v34 = vld [vmem:[%s12924_s11 + $0x110] sm:$0xf]  ;;  %293 = vst [vmem:[%s12931_s12 + $0x80] sm:$0xf] %v292_v32 }
  0x2e   : > { %295 = vst [vmem:[%s12931_s12 + $0x84] sm:$0xf] %v294_v33  ;;  %297 = vst [vmem:[%s12931_s12 + $0x88] sm:$0xf] %v296_v34  ;;  %v298_v35 = vld [vmem:[%s12924_s11 + $0x118] sm:$0xf] }
  0x2f   : > { %v300_v36 = vld [vmem:[%s12924_s11 + $0x120] sm:$0xf]  ;;  %v302_v37 = vld [vmem:[%s12924_s11 + $0x128] sm:$0xf]  ;;  %299 = vst [vmem:[%s12931_s12 + $0x8c] sm:$0xf] %v298_v35 }
  0x30   : > { %301 = vst [vmem:[%s12931_s12 + $0x90] sm:$0xf] %v300_v36  ;;  %303 = vst [vmem:[%s12931_s12 + $0x94] sm:$0xf] %v302_v37  ;;  %v304_v38 = vld [vmem:[%s12924_s11 + $0x130] sm:$0xf] }
  0x31   : > { %v306_v39 = vld [vmem:[%s12924_s11 + $0x138] sm:$0xf]  ;;  %v308_v40 = vld [vmem:[%s12924_s11 + $0x140] sm:$0xf]  ;;  %305 = vst [vmem:[%s12931_s12 + $0x98] sm:$0xf] %v304_v38 }
  0x32   : > { %307 = vst [vmem:[%s12931_s12 + $0x9c] sm:$0xf] %v306_v39  ;;  %309 = vst [vmem:[%s12931_s12 + $0xa0] sm:$0xf] %v308_v40  ;;  %v310_v41 = vld [vmem:[%s12924_s11 + $0x148] sm:$0xf] }
  0x33   : > { %v312_v42 = vld [vmem:[%s12924_s11 + $0x150] sm:$0xf]  ;;  %v314_v43 = vld [vmem:[%s12924_s11 + $0x158] sm:$0xf]  ;;  %311 = vst [vmem:[%s12931_s12 + $0xa4] sm:$0xf] %v310_v41 }
  0x34   : > { %313 = vst [vmem:[%s12931_s12 + $0xa8] sm:$0xf] %v312_v42  ;;  %315 = vst [vmem:[%s12931_s12 + $0xac] sm:$0xf] %v314_v43  ;;  %v316_v44 = vld [vmem:[%s12924_s11 + $0x160] sm:$0xf] }
  0x35   : > { %v318_v45 = vld [vmem:[%s12924_s11 + $0x168] sm:$0xf]  ;;  %v320_v46 = vld [vmem:[%s12924_s11 + $0x170] sm:$0xf]  ;;  %317 = vst [vmem:[%s12931_s12 + $0xb0] sm:$0xf] %v316_v44 }
  0x36   : > { %319 = vst [vmem:[%s12931_s12 + $0xb4] sm:$0xf] %v318_v45  ;;  %321 = vst [vmem:[%s12931_s12 + $0xb8] sm:$0xf] %v320_v46  ;;  %v322_v47 = vld [vmem:[%s12924_s11 + $0x178] sm:$0xf] }
  0x37   : > { %v324_v48 = vld [vmem:[%s12924_s11 + $0x180] sm:$0xf]  ;;  %v326_v49 = vld [vmem:[%s12924_s11 + $0x188] sm:$0xf]  ;;  %323 = vst [vmem:[%s12931_s12 + $0xbc] sm:$0xf] %v322_v47 }
  0x38   : > { %325 = vst [vmem:[%s12931_s12 + $0xc0] sm:$0xf] %v324_v48  ;;  %327 = vst [vmem:[%s12931_s12 + $0xc4] sm:$0xf] %v326_v49  ;;  %v328_v50 = vld [vmem:[%s12924_s11 + $0x190] sm:$0xf] }
  0x39   : > { %v330_v51 = vld [vmem:[%s12924_s11 + $0x198] sm:$0xf]  ;;  %v332_v52 = vld [vmem:[%s12924_s11 + $0x1a0] sm:$0xf]  ;;  %329 = vst [vmem:[%s12931_s12 + $0xc8] sm:$0xf] %v328_v50 }
  0x3a   : > { %331 = vst [vmem:[%s12931_s12 + $0xcc] sm:$0xf] %v330_v51  ;;  %333 = vst [vmem:[%s12931_s12 + $0xd0] sm:$0xf] %v332_v52  ;;  %v334_v53 = vld [vmem:[%s12924_s11 + $0x1a8] sm:$0xf] }
  0x3b   : > { %v336_v54 = vld [vmem:[%s12924_s11 + $0x1b0] sm:$0xf]  ;;  %v338_v55 = vld [vmem:[%s12924_s11 + $0x1b8] sm:$0xf]  ;;  %335 = vst [vmem:[%s12931_s12 + $0xd4] sm:$0xf] %v334_v53 }
  0x3c   : > { %337 = vst [vmem:[%s12931_s12 + $0xd8] sm:$0xf] %v336_v54  ;;  %339 = vst [vmem:[%s12931_s12 + $0xdc] sm:$0xf] %v338_v55  ;;  %v340_v56 = vld [vmem:[%s12924_s11 + $0x1c0] sm:$0xf] }
  0x3d   : > { %v342_v57 = vld [vmem:[%s12924_s11 + $0x1c8] sm:$0xf]  ;;  %v344_v58 = vld [vmem:[%s12924_s11 + $0x1d0] sm:$0xf]  ;;  %341 = vst [vmem:[%s12931_s12 + $0xe0] sm:$0xf] %v340_v56 }
  0x3e   : > { %343 = vst [vmem:[%s12931_s12 + $0xe4] sm:$0xf] %v342_v57  ;;  %345 = vst [vmem:[%s12931_s12 + $0xe8] sm:$0xf] %v344_v58  ;;  %v346_v59 = vld [vmem:[%s12924_s11 + $0x1d8] sm:$0xf] }
  0x3f   : > { %v348_v60 = vld [vmem:[%s12924_s11 + $0x1e0] sm:$0xf]  ;;  %v350_v61 = vld [vmem:[%s12924_s11 + $0x1e8] sm:$0xf]  ;;  %347 = vst [vmem:[%s12931_s12 + $0xec] sm:$0xf] %v346_v59 }
  0x40   : > { %349 = vst [vmem:[%s12931_s12 + $0xf0] sm:$0xf] %v348_v60  ;;  %351 = vst [vmem:[%s12931_s12 + $0xf4] sm:$0xf] %v350_v61  ;;  %v352_v62 = vld [vmem:[%s12924_s11 + $0x1f0] sm:$0xf] }
  0x41   : > { %v354_v63 = vld [vmem:[%s12924_s11 + $0x1f8] sm:$0xf]  ;;  %v356_v0 = vld [vmem:[%s12924_s11 + $0x200] sm:$0xf]  ;;  %353 = vst [vmem:[%s12931_s12 + $0xf8] sm:$0xf] %v352_v62 }
  0x42   : > { %355 = vst [vmem:[%s12931_s12 + $0xfc] sm:$0xf] %v354_v63  ;;  %357 = vst [vmem:[%s12931_s12 + $0x100] sm:$0xf] %v356_v0  ;;  %v358_v1 = vld [vmem:[%s12924_s11 + $0x208] sm:$0xf] }
  0x43   : > { %v360_v2 = vld [vmem:[%s12924_s11 + $0x210] sm:$0xf]  ;;  %v362_v3 = vld [vmem:[%s12924_s11 + $0x218] sm:$0xf]  ;;  %359 = vst [vmem:[%s12931_s12 + $0x104] sm:$0xf] %v358_v1 }
  0x44   : > { %361 = vst [vmem:[%s12931_s12 + $0x108] sm:$0xf] %v360_v2  ;;  %363 = vst [vmem:[%s12931_s12 + $0x10c] sm:$0xf] %v362_v3  ;;  %v364_v4 = vld [vmem:[%s12924_s11 + $0x220] sm:$0xf] }
  0x45   : > { %v366_v5 = vld [vmem:[%s12924_s11 + $0x228] sm:$0xf]  ;;  %v368_v6 = vld [vmem:[%s12924_s11 + $0x230] sm:$0xf]  ;;  %365 = vst [vmem:[%s12931_s12 + $0x110] sm:$0xf] %v364_v4 }
  0x46   : > { %367 = vst [vmem:[%s12931_s12 + $0x114] sm:$0xf] %v366_v5  ;;  %369 = vst [vmem:[%s12931_s12 + $0x118] sm:$0xf] %v368_v6  ;;  %v370_v7 = vld [vmem:[%s12924_s11 + $0x238] sm:$0xf] }
  0x47   : > { %v372_v8 = vld [vmem:[%s12924_s11 + $0x240] sm:$0xf]  ;;  %v374_v9 = vld [vmem:[%s12924_s11 + $0x248] sm:$0xf]  ;;  %371 = vst [vmem:[%s12931_s12 + $0x11c] sm:$0xf] %v370_v7 }
  0x48   : > { %373 = vst [vmem:[%s12931_s12 + $0x120] sm:$0xf] %v372_v8  ;;  %375 = vst [vmem:[%s12931_s12 + $0x124] sm:$0xf] %v374_v9  ;;  %v376_v10 = vld [vmem:[%s12924_s11 + $0x250] sm:$0xf] }
  0x49   : > { %v378_v11 = vld [vmem:[%s12924_s11 + $0x258] sm:$0xf]  ;;  %v380_v12 = vld [vmem:[%s12924_s11 + $0x260] sm:$0xf]  ;;  %377 = vst [vmem:[%s12931_s12 + $0x128] sm:$0xf] %v376_v10 }
  0x4a   : > { %379 = vst [vmem:[%s12931_s12 + $0x12c] sm:$0xf] %v378_v11  ;;  %381 = vst [vmem:[%s12931_s12 + $0x130] sm:$0xf] %v380_v12  ;;  %v382_v13 = vld [vmem:[%s12924_s11 + $0x268] sm:$0xf] }
  0x4b   : > { %v384_v14 = vld [vmem:[%s12924_s11 + $0x270] sm:$0xf]  ;;  %v386_v15 = vld [vmem:[%s12924_s11 + $0x278] sm:$0xf]  ;;  %383 = vst [vmem:[%s12931_s12 + $0x134] sm:$0xf] %v382_v13 }
  0x4c   : > { %385 = vst [vmem:[%s12931_s12 + $0x138] sm:$0xf] %v384_v14  ;;  %387 = vst [vmem:[%s12931_s12 + $0x13c] sm:$0xf] %v386_v15  ;;  %v388_v16 = vld [vmem:[%s12924_s11 + $0x280] sm:$0xf] }
  0x4d   : > { %v390_v17 = vld [vmem:[%s12924_s11 + $0x288] sm:$0xf]  ;;  %v392_v18 = vld [vmem:[%s12924_s11 + $0x290] sm:$0xf]  ;;  %389 = vst [vmem:[%s12931_s12 + $0x140] sm:$0xf] %v388_v16 }
  0x4e   : > { %391 = vst [vmem:[%s12931_s12 + $0x144] sm:$0xf] %v390_v17  ;;  %393 = vst [vmem:[%s12931_s12 + $0x148] sm:$0xf] %v392_v18  ;;  %v394_v19 = vld [vmem:[%s12924_s11 + $0x298] sm:$0xf] }
  0x4f   : > { %v396_v20 = vld [vmem:[%s12924_s11 + $0x2a0] sm:$0xf]  ;;  %v398_v21 = vld [vmem:[%s12924_s11 + $0x2a8] sm:$0xf]  ;;  %395 = vst [vmem:[%s12931_s12 + $0x14c] sm:$0xf] %v394_v19 }
  0x50   : > { %397 = vst [vmem:[%s12931_s12 + $0x150] sm:$0xf] %v396_v20  ;;  %399 = vst [vmem:[%s12931_s12 + $0x154] sm:$0xf] %v398_v21  ;;  %v400_v22 = vld [vmem:[%s12924_s11 + $0x2b0] sm:$0xf] }
  0x51   : > { %v402_v23 = vld [vmem:[%s12924_s11 + $0x2b8] sm:$0xf]  ;;  %v404_v24 = vld [vmem:[%s12924_s11 + $0x2c0] sm:$0xf]  ;;  %401 = vst [vmem:[%s12931_s12 + $0x158] sm:$0xf] %v400_v22 }
  0x52   : > { %403 = vst [vmem:[%s12931_s12 + $0x15c] sm:$0xf] %v402_v23  ;;  %405 = vst [vmem:[%s12931_s12 + $0x160] sm:$0xf] %v404_v24  ;;  %v406_v25 = vld [vmem:[%s12924_s11 + $0x2c8] sm:$0xf] }
  0x53   : > { %v408_v26 = vld [vmem:[%s12924_s11 + $0x2d0] sm:$0xf]  ;;  %v410_v27 = vld [vmem:[%s12924_s11 + $0x2d8] sm:$0xf]  ;;  %407 = vst [vmem:[%s12931_s12 + $0x164] sm:$0xf] %v406_v25 }
  0x54   : > { %409 = vst [vmem:[%s12931_s12 + $0x168] sm:$0xf] %v408_v26  ;;  %411 = vst [vmem:[%s12931_s12 + $0x16c] sm:$0xf] %v410_v27  ;;  %v412_v28 = vld [vmem:[%s12924_s11 + $0x2e0] sm:$0xf] }
  0x55   : > { %v414_v29 = vld [vmem:[%s12924_s11 + $0x2e8] sm:$0xf]  ;;  %v416_v30 = vld [vmem:[%s12924_s11 + $0x2f0] sm:$0xf]  ;;  %413 = vst [vmem:[%s12931_s12 + $0x170] sm:$0xf] %v412_v28 }
  0x56   : > { %415 = vst [vmem:[%s12931_s12 + $0x174] sm:$0xf] %v414_v29  ;;  %417 = vst [vmem:[%s12931_s12 + $0x178] sm:$0xf] %v416_v30  ;;  %v418_v31 = vld [vmem:[%s12924_s11 + $0x2f8] sm:$0xf] }
  0x57   : > { %v420_v32 = vld [vmem:[%s12924_s11 + $0x300] sm:$0xf]  ;;  %v422_v33 = vld [vmem:[%s12924_s11 + $0x308] sm:$0xf]  ;;  %419 = vst [vmem:[%s12931_s12 + $0x17c] sm:$0xf] %v418_v31 }
  0x58   : > { %421 = vst [vmem:[%s12931_s12 + $0x180] sm:$0xf] %v420_v32  ;;  %423 = vst [vmem:[%s12931_s12 + $0x184] sm:$0xf] %v422_v33  ;;  %v424_v34 = vld [vmem:[%s12924_s11 + $0x310] sm:$0xf] }
  0x59   : > { %v426_v35 = vld [vmem:[%s12924_s11 + $0x318] sm:$0xf]  ;;  %425 = vst [vmem:[%s12931_s12 + $0x188] sm:$0xf] %v424_v34 }
  0x5a   : > { %427 = vst [vmem:[%s12931_s12 + $0x18c] sm:$0xf] %v426_v35 }
  0x5b PF: > { %656 = sbr.rel (!%p12907_p3) target bundleno = 196 (0xc4), region = 73  ;;  %s658_s13 = sand.u32 (%p12907_p3), 1, %s12803_s19  }
  0x5c   : > { %s10922_s14 = sshll.u32 (%p12907_p3), %s12815_s22, 6  ;;  %s12310_s15 = smul.u32 (%p12907_p3), 1600, %s658_s13 }
  0x5d   : > { %s13135_s27 = scalar_lea.vmem (%p12907_p3), %s15472_s3, %s10922_s14 }
  0x5e   : > { %v679_v36 = vld [vmem:[%s13135_s27] sm:$0xff] (%p12907_p3)   ;;  %v683_v37 = vld [vmem:[%s13135_s27 + $0x8] sm:$0xff] (%p12907_p3)   ;;  %v687_v38 = vld [vmem:[%s13135_s27 + $0x10] sm:$0xff] (%p12907_p3)   ;;  %s13143_s28 = scalar_lea.vmem (%p12907_p3), [#allocation6], %s12310_s15 }
  0x5f   : > { %v691_v39 = vld [vmem:[%s13135_s27 + $0x18] sm:$0xff] (%p12907_p3)   ;;  %v695_v40 = vld [vmem:[%s13135_s27 + $0x20] sm:$0xff] (%p12907_p3)   ;;  %v699_v41 = vld [vmem:[%s13135_s27 + $0x28] sm:$0xff] (%p12907_p3)   ;;  %680 = vst [vmem:[%s13143_s28] sm:$0xff] (%p12907_p3), %v679_v36  }
  0x60   : > { %684 = vst [vmem:[%s13143_s28 + $0x8] sm:$0xff] (%p12907_p3), %v683_v37   ;;  %688 = vst [vmem:[%s13143_s28 + $0x10] sm:$0xff] (%p12907_p3), %v687_v38   ;;  %v703_v42 = vld [vmem:[%s13135_s27 + $0x30] sm:$0xff] (%p12907_p3)   ;;  %v707_v43 = vld [vmem:[%s13135_s27 + $0x38] sm:$0xff] (%p12907_p3)  }
  0x61   : > { %692 = vst [vmem:[%s13143_s28 + $0x18] sm:$0xff] (%p12907_p3), %v691_v39   ;;  %696 = vst [vmem:[%s13143_s28 + $0x20] sm:$0xff] (%p12907_p3), %v695_v40   ;;  %v711_v44 = vld [vmem:[%s13135_s27 + $0x80] sm:$0xff] (%p12907_p3)   ;;  %v715_v45 = vld [vmem:[%s13135_s27 + $0x88] sm:$0xff] (%p12907_p3)  }
  0x62   : > { %700 = vst [vmem:[%s13143_s28 + $0x28] sm:$0xff] %v699_v41   ;;  %704 = vst [vmem:[%s13143_s28 + $0x30] sm:$0xff] %v703_v42   ;;  %v719_v46 = vld [vmem:[%s13135_s27 + $0x90] sm:$0xff]   ;;  %v723_v47 = vld [vmem:[%s13135_s27 + $0x98] sm:$0xff]  }
  0x63   : > { %708 = vst [vmem:[%s13143_s28 + $0x38] sm:$0xff] %v707_v43   ;;  %712 = vst [vmem:[%s13143_s28 + $0x40] sm:$0xff] %v711_v44   ;;  %v727_v48 = vld [vmem:[%s13135_s27 + $0xa0] sm:$0xff]   ;;  %v731_v49 = vld [vmem:[%s13135_s27 + $0xa8] sm:$0xff]  }
  0x64   : > { %716 = vst [vmem:[%s13143_s28 + $0x48] sm:$0xff] %v715_v45   ;;  %720 = vst [vmem:[%s13143_s28 + $0x50] sm:$0xff] %v719_v46   ;;  %v735_v50 = vld [vmem:[%s13135_s27 + $0xb0] sm:$0xff]   ;;  %v739_v51 = vld [vmem:[%s13135_s27 + $0xb8] sm:$0xff]  }
  0x65   : > { %724 = vst [vmem:[%s13143_s28 + $0x58] sm:$0xff] %v723_v47   ;;  %728 = vst [vmem:[%s13143_s28 + $0x60] sm:$0xff] %v727_v48   ;;  %v743_v52 = vld [vmem:[%s13135_s27 + $0x100] sm:$0xff]   ;;  %v747_v53 = vld [vmem:[%s13135_s27 + $0x108] sm:$0xff]  }
  0x66   : > { %732 = vst [vmem:[%s13143_s28 + $0x68] sm:$0xff] %v731_v49   ;;  %736 = vst [vmem:[%s13143_s28 + $0x70] sm:$0xff] %v735_v50   ;;  %v751_v54 = vld [vmem:[%s13135_s27 + $0x110] sm:$0xff]   ;;  %v755_v55 = vld [vmem:[%s13135_s27 + $0x118] sm:$0xff]  }
  0x67   : > { %740 = vst [vmem:[%s13143_s28 + $0x78] sm:$0xff] %v739_v51   ;;  %744 = vst [vmem:[%s13143_s28 + $0x80] sm:$0xff] %v743_v52   ;;  %v759_v56 = vld [vmem:[%s13135_s27 + $0x120] sm:$0xff]   ;;  %v763_v57 = vld [vmem:[%s13135_s27 + $0x128] sm:$0xff]  }
  0x68   : > { %748 = vst [vmem:[%s13143_s28 + $0x88] sm:$0xff] %v747_v53   ;;  %752 = vst [vmem:[%s13143_s28 + $0x90] sm:$0xff] %v751_v54   ;;  %v767_v58 = vld [vmem:[%s13135_s27 + $0x130] sm:$0xff]   ;;  %v771_v59 = vld [vmem:[%s13135_s27 + $0x138] sm:$0xff]  }
  0x69   : > { %756 = vst [vmem:[%s13143_s28 + $0x98] sm:$0xff] %v755_v55   ;;  %760 = vst [vmem:[%s13143_s28 + $0xa0] sm:$0xff] %v759_v56   ;;  %v775_v60 = vld [vmem:[%s13135_s27 + $0x180] sm:$0xff]   ;;  %v779_v61 = vld [vmem:[%s13135_s27 + $0x188] sm:$0xff]  }
  0x6a   : > { %764 = vst [vmem:[%s13143_s28 + $0xa8] sm:$0xff] %v763_v57   ;;  %768 = vst [vmem:[%s13143_s28 + $0xb0] sm:$0xff] %v767_v58   ;;  %v783_v62 = vld [vmem:[%s13135_s27 + $0x190] sm:$0xff]   ;;  %v787_v63 = vld [vmem:[%s13135_s27 + $0x198] sm:$0xff]  }
  0x6b   : > { %772 = vst [vmem:[%s13143_s28 + $0xb8] sm:$0xff] %v771_v59   ;;  %776 = vst [vmem:[%s13143_s28 + $0xc0] sm:$0xff] %v775_v60   ;;  %v791_v0 = vld [vmem:[%s13135_s27 + $0x1a0] sm:$0xff]   ;;  %v795_v1 = vld [vmem:[%s13135_s27 + $0x1a8] sm:$0xff]  }
  0x6c   : > { %780 = vst [vmem:[%s13143_s28 + $0xc8] sm:$0xff] %v779_v61   ;;  %784 = vst [vmem:[%s13143_s28 + $0xd0] sm:$0xff] %v783_v62   ;;  %v799_v2 = vld [vmem:[%s13135_s27 + $0x1b0] sm:$0xff]   ;;  %v803_v3 = vld [vmem:[%s13135_s27 + $0x1b8] sm:$0xff]  }
  0x6d   : > { %788 = vst [vmem:[%s13143_s28 + $0xd8] sm:$0xff] %v787_v63   ;;  %792 = vst [vmem:[%s13143_s28 + $0xe0] sm:$0xff] %v791_v0   ;;  %v807_v4 = vld [vmem:[%s13135_s27 + $0x200] sm:$0xff]   ;;  %v811_v5 = vld [vmem:[%s13135_s27 + $0x208] sm:$0xff]  }
  0x6e   : > { %796 = vst [vmem:[%s13143_s28 + $0xe8] sm:$0xff] %v795_v1   ;;  %800 = vst [vmem:[%s13143_s28 + $0xf0] sm:$0xff] %v799_v2   ;;  %v815_v6 = vld [vmem:[%s13135_s27 + $0x210] sm:$0xff]   ;;  %v819_v7 = vld [vmem:[%s13135_s27 + $0x218] sm:$0xff]  }
  0x6f   : > { %804 = vst [vmem:[%s13143_s28 + $0xf8] sm:$0xff] %v803_v3   ;;  %808 = vst [vmem:[%s13143_s28 + $0x100] sm:$0xff] %v807_v4   ;;  %v823_v8 = vld [vmem:[%s13135_s27 + $0x220] sm:$0xff]   ;;  %v827_v9 = vld [vmem:[%s13135_s27 + $0x228] sm:$0xff]  }
  0x70   : > { %812 = vst [vmem:[%s13143_s28 + $0x108] sm:$0xff] %v811_v5   ;;  %816 = vst [vmem:[%s13143_s28 + $0x110] sm:$0xff] %v815_v6   ;;  %v831_v10 = vld [vmem:[%s13135_s27 + $0x230] sm:$0xff]   ;;  %v835_v11 = vld [vmem:[%s13135_s27 + $0x238] sm:$0xff]  }
  0x71   : > { %820 = vst [vmem:[%s13143_s28 + $0x118] sm:$0xff] %v819_v7   ;;  %824 = vst [vmem:[%s13143_s28 + $0x120] sm:$0xff] %v823_v8   ;;  %v839_v12 = vld [vmem:[%s13135_s27 + $0x280] sm:$0xff]   ;;  %v843_v13 = vld [vmem:[%s13135_s27 + $0x288] sm:$0xff]  }
  0x72   : > { %828 = vst [vmem:[%s13143_s28 + $0x128] sm:$0xff] %v827_v9   ;;  %832 = vst [vmem:[%s13143_s28 + $0x130] sm:$0xff] %v831_v10   ;;  %v847_v14 = vld [vmem:[%s13135_s27 + $0x290] sm:$0xff]   ;;  %v851_v15 = vld [vmem:[%s13135_s27 + $0x298] sm:$0xff]  }
  0x73   : > { %836 = vst [vmem:[%s13143_s28 + $0x138] sm:$0xff] %v835_v11   ;;  %840 = vst [vmem:[%s13143_s28 + $0x140] sm:$0xff] %v839_v12   ;;  %v855_v16 = vld [vmem:[%s13135_s27 + $0x2a0] sm:$0xff]   ;;  %v859_v17 = vld [vmem:[%s13135_s27 + $0x2a8] sm:$0xff]  }
  0x74   : > { %844 = vst [vmem:[%s13143_s28 + $0x148] sm:$0xff] %v843_v13   ;;  %848 = vst [vmem:[%s13143_s28 + $0x150] sm:$0xff] %v847_v14   ;;  %v863_v18 = vld [vmem:[%s13135_s27 + $0x2b0] sm:$0xff]   ;;  %v867_v19 = vld [vmem:[%s13135_s27 + $0x2b8] sm:$0xff]  }
  0x75   : > { %852 = vst [vmem:[%s13143_s28 + $0x158] sm:$0xff] %v851_v15   ;;  %856 = vst [vmem:[%s13143_s28 + $0x160] sm:$0xff] %v855_v16   ;;  %v871_v20 = vld [vmem:[%s13135_s27 + $0x300] sm:$0xff]   ;;  %v875_v21 = vld [vmem:[%s13135_s27 + $0x308] sm:$0xff]  }
  0x76   : > { %860 = vst [vmem:[%s13143_s28 + $0x168] sm:$0xff] %v859_v17   ;;  %864 = vst [vmem:[%s13143_s28 + $0x170] sm:$0xff] %v863_v18   ;;  %v879_v22 = vld [vmem:[%s13135_s27 + $0x310] sm:$0xff]   ;;  %v883_v23 = vld [vmem:[%s13135_s27 + $0x318] sm:$0xff]  }
  0x77   : > { %868 = vst [vmem:[%s13143_s28 + $0x178] sm:$0xff] %v867_v19   ;;  %872 = vst [vmem:[%s13143_s28 + $0x180] sm:$0xff] %v871_v20   ;;  %v887_v24 = vld [vmem:[%s13135_s27 + $0x320] sm:$0xff]   ;;  %v891_v25 = vld [vmem:[%s13135_s27 + $0x328] sm:$0xff]  }
  0x78   : > { %876 = vst [vmem:[%s13143_s28 + $0x188] sm:$0xff] %v875_v21   ;;  %880 = vst [vmem:[%s13143_s28 + $0x190] sm:$0xff] %v879_v22   ;;  %v895_v26 = vld [vmem:[%s13135_s27 + $0x330] sm:$0xff]   ;;  %v899_v27 = vld [vmem:[%s13135_s27 + $0x338] sm:$0xff]  }
  0x79   : > { %884 = vst [vmem:[%s13143_s28 + $0x198] sm:$0xff] %v883_v23   ;;  %888 = vst [vmem:[%s13143_s28 + $0x1a0] sm:$0xff] %v887_v24   ;;  %v903_v28 = vld [vmem:[%s13135_s27 + $0x380] sm:$0xff]   ;;  %v907_v29 = vld [vmem:[%s13135_s27 + $0x388] sm:$0xff]  }
  0x7a   : > { %892 = vst [vmem:[%s13143_s28 + $0x1a8] sm:$0xff] %v891_v25   ;;  %896 = vst [vmem:[%s13143_s28 + $0x1b0] sm:$0xff] %v895_v26   ;;  %v911_v30 = vld [vmem:[%s13135_s27 + $0x390] sm:$0xff]   ;;  %v915_v31 = vld [vmem:[%s13135_s27 + $0x398] sm:$0xff]  }
  0x7b   : > { %900 = vst [vmem:[%s13143_s28 + $0x1b8] sm:$0xff] %v899_v27   ;;  %904 = vst [vmem:[%s13143_s28 + $0x1c0] sm:$0xff] %v903_v28   ;;  %v919_v32 = vld [vmem:[%s13135_s27 + $0x3a0] sm:$0xff]   ;;  %v923_v33 = vld [vmem:[%s13135_s27 + $0x3a8] sm:$0xff]  }
  0x7c   : > { %908 = vst [vmem:[%s13143_s28 + $0x1c8] sm:$0xff] %v907_v29   ;;  %912 = vst [vmem:[%s13143_s28 + $0x1d0] sm:$0xff] %v911_v30   ;;  %v927_v34 = vld [vmem:[%s13135_s27 + $0x3b0] sm:$0xff]   ;;  %v931_v35 = vld [vmem:[%s13135_s27 + $0x3b8] sm:$0xff]  }
  0x7d   : > { %916 = vst [vmem:[%s13143_s28 + $0x1d8] sm:$0xff] %v915_v31   ;;  %920 = vst [vmem:[%s13143_s28 + $0x1e0] sm:$0xff] %v919_v32   ;;  %v935_v36 = vld [vmem:[%s13135_s27 + $0x400] sm:$0xff]   ;;  %v939_v37 = vld [vmem:[%s13135_s27 + $0x408] sm:$0xff]  }
  0x7e   : > { %924 = vst [vmem:[%s13143_s28 + $0x1e8] sm:$0xff] %v923_v33   ;;  %928 = vst [vmem:[%s13143_s28 + $0x1f0] sm:$0xff] %v927_v34   ;;  %v943_v38 = vld [vmem:[%s13135_s27 + $0x410] sm:$0xff]   ;;  %v947_v39 = vld [vmem:[%s13135_s27 + $0x418] sm:$0xff]  }
  0x7f   : > { %932 = vst [vmem:[%s13143_s28 + $0x1f8] sm:$0xff] %v931_v35   ;;  %936 = vst [vmem:[%s13143_s28 + $0x200] sm:$0xff] %v935_v36   ;;  %v951_v40 = vld [vmem:[%s13135_s27 + $0x420] sm:$0xff]   ;;  %v955_v41 = vld [vmem:[%s13135_s27 + $0x428] sm:$0xff]  }
  0x80   : > { %940 = vst [vmem:[%s13143_s28 + $0x208] sm:$0xff] %v939_v37   ;;  %944 = vst [vmem:[%s13143_s28 + $0x210] sm:$0xff] %v943_v38   ;;  %v959_v42 = vld [vmem:[%s13135_s27 + $0x430] sm:$0xff]   ;;  %v963_v43 = vld [vmem:[%s13135_s27 + $0x438] sm:$0xff]  }
  0x81   : > { %948 = vst [vmem:[%s13143_s28 + $0x218] sm:$0xff] %v947_v39   ;;  %952 = vst [vmem:[%s13143_s28 + $0x220] sm:$0xff] %v951_v40   ;;  %v967_v44 = vld [vmem:[%s13135_s27 + $0x480] sm:$0xff]   ;;  %v971_v45 = vld [vmem:[%s13135_s27 + $0x488] sm:$0xff]  }
  0x82   : > { %956 = vst [vmem:[%s13143_s28 + $0x228] sm:$0xff] %v955_v41   ;;  %960 = vst [vmem:[%s13143_s28 + $0x230] sm:$0xff] %v959_v42   ;;  %v975_v46 = vld [vmem:[%s13135_s27 + $0x490] sm:$0xff]   ;;  %v979_v47 = vld [vmem:[%s13135_s27 + $0x498] sm:$0xff]  }
  0x83   : > { %964 = vst [vmem:[%s13143_s28 + $0x238] sm:$0xff] %v963_v43   ;;  %968 = vst [vmem:[%s13143_s28 + $0x240] sm:$0xff] %v967_v44   ;;  %v983_v48 = vld [vmem:[%s13135_s27 + $0x4a0] sm:$0xff]   ;;  %v987_v49 = vld [vmem:[%s13135_s27 + $0x4a8] sm:$0xff]  }
  0x84   : > { %972 = vst [vmem:[%s13143_s28 + $0x248] sm:$0xff] %v971_v45   ;;  %976 = vst [vmem:[%s13143_s28 + $0x250] sm:$0xff] %v975_v46   ;;  %v991_v50 = vld [vmem:[%s13135_s27 + $0x4b0] sm:$0xff]   ;;  %v995_v51 = vld [vmem:[%s13135_s27 + $0x4b8] sm:$0xff]  }
  0x85   : > { %980 = vst [vmem:[%s13143_s28 + $0x258] sm:$0xff] %v979_v47   ;;  %984 = vst [vmem:[%s13143_s28 + $0x260] sm:$0xff] %v983_v48   ;;  %v999_v52 = vld [vmem:[%s13135_s27 + $0x500] sm:$0xff]   ;;  %v1003_v53 = vld [vmem:[%s13135_s27 + $0x508] sm:$0xff]  }
  0x86   : > { %988 = vst [vmem:[%s13143_s28 + $0x268] sm:$0xff] %v987_v49   ;;  %992 = vst [vmem:[%s13143_s28 + $0x270] sm:$0xff] %v991_v50   ;;  %v1007_v54 = vld [vmem:[%s13135_s27 + $0x510] sm:$0xff]   ;;  %v1011_v55 = vld [vmem:[%s13135_s27 + $0x518] sm:$0xff]  }
  0x87   : > { %996 = vst [vmem:[%s13143_s28 + $0x278] sm:$0xff] %v995_v51   ;;  %1000 = vst [vmem:[%s13143_s28 + $0x280] sm:$0xff] %v999_v52   ;;  %v1015_v56 = vld [vmem:[%s13135_s27 + $0x520] sm:$0xff]   ;;  %v1019_v57 = vld [vmem:[%s13135_s27 + $0x528] sm:$0xff]  }
  0x88   : > { %1004 = vst [vmem:[%s13143_s28 + $0x288] sm:$0xff] %v1003_v53   ;;  %1008 = vst [vmem:[%s13143_s28 + $0x290] sm:$0xff] %v1007_v54   ;;  %v1023_v58 = vld [vmem:[%s13135_s27 + $0x530] sm:$0xff]   ;;  %v1027_v59 = vld [vmem:[%s13135_s27 + $0x538] sm:$0xff]  }
  0x89   : > { %1012 = vst [vmem:[%s13143_s28 + $0x298] sm:$0xff] %v1011_v55   ;;  %1016 = vst [vmem:[%s13143_s28 + $0x2a0] sm:$0xff] %v1015_v56   ;;  %v1031_v60 = vld [vmem:[%s13135_s27 + $0x580] sm:$0xff]   ;;  %v1035_v61 = vld [vmem:[%s13135_s27 + $0x588] sm:$0xff]  }
  0x8a   : > { %1020 = vst [vmem:[%s13143_s28 + $0x2a8] sm:$0xff] %v1019_v57   ;;  %1024 = vst [vmem:[%s13143_s28 + $0x2b0] sm:$0xff] %v1023_v58   ;;  %v1039_v62 = vld [vmem:[%s13135_s27 + $0x590] sm:$0xff]   ;;  %v1043_v63 = vld [vmem:[%s13135_s27 + $0x598] sm:$0xff]  }
  0x8b   : > { %1028 = vst [vmem:[%s13143_s28 + $0x2b8] sm:$0xff] %v1027_v59   ;;  %1032 = vst [vmem:[%s13143_s28 + $0x2c0] sm:$0xff] %v1031_v60   ;;  %v1047_v0 = vld [vmem:[%s13135_s27 + $0x5a0] sm:$0xff]   ;;  %v1051_v1 = vld [vmem:[%s13135_s27 + $0x5a8] sm:$0xff]  }
  0x8c   : > { %1036 = vst [vmem:[%s13143_s28 + $0x2c8] sm:$0xff] %v1035_v61   ;;  %1040 = vst [vmem:[%s13143_s28 + $0x2d0] sm:$0xff] %v1039_v62   ;;  %v1055_v2 = vld [vmem:[%s13135_s27 + $0x5b0] sm:$0xff]   ;;  %v1059_v3 = vld [vmem:[%s13135_s27 + $0x5b8] sm:$0xff]  }
  0x8d   : > { %1044 = vst [vmem:[%s13143_s28 + $0x2d8] sm:$0xff] %v1043_v63   ;;  %1048 = vst [vmem:[%s13143_s28 + $0x2e0] sm:$0xff] %v1047_v0   ;;  %v1063_v4 = vld [vmem:[%s13135_s27 + $0x600] sm:$0xff]   ;;  %v1067_v5 = vld [vmem:[%s13135_s27 + $0x608] sm:$0xff]  }
  0x8e   : > { %1052 = vst [vmem:[%s13143_s28 + $0x2e8] sm:$0xff] %v1051_v1   ;;  %1056 = vst [vmem:[%s13143_s28 + $0x2f0] sm:$0xff] %v1055_v2   ;;  %v1071_v6 = vld [vmem:[%s13135_s27 + $0x610] sm:$0xff]   ;;  %v1075_v7 = vld [vmem:[%s13135_s27 + $0x618] sm:$0xff]  }
  0x8f   : > { %1060 = vst [vmem:[%s13143_s28 + $0x2f8] sm:$0xff] %v1059_v3   ;;  %1064 = vst [vmem:[%s13143_s28 + $0x300] sm:$0xff] %v1063_v4   ;;  %v1079_v8 = vld [vmem:[%s13135_s27 + $0x620] sm:$0xff]   ;;  %v1083_v9 = vld [vmem:[%s13135_s27 + $0x628] sm:$0xff]  }
  0x90   : > { %1068 = vst [vmem:[%s13143_s28 + $0x308] sm:$0xff] %v1067_v5   ;;  %1072 = vst [vmem:[%s13143_s28 + $0x310] sm:$0xff] %v1071_v6   ;;  %v1087_v10 = vld [vmem:[%s13135_s27 + $0x630] sm:$0xff]   ;;  %v1091_v11 = vld [vmem:[%s13135_s27 + $0x638] sm:$0xff]  }
  0x91   : > { %1076 = vst [vmem:[%s13143_s28 + $0x318] sm:$0xff] %v1075_v7   ;;  %1080 = vst [vmem:[%s13143_s28 + $0x320] sm:$0xff] %v1079_v8   ;;  %v1095_v12 = vld [vmem:[%s13135_s27 + $0x680] sm:$0xff]   ;;  %v1099_v13 = vld [vmem:[%s13135_s27 + $0x688] sm:$0xff]  }
  0x92   : > { %1084 = vst [vmem:[%s13143_s28 + $0x328] sm:$0xff] %v1083_v9   ;;  %1088 = vst [vmem:[%s13143_s28 + $0x330] sm:$0xff] %v1087_v10   ;;  %v1103_v14 = vld [vmem:[%s13135_s27 + $0x690] sm:$0xff]   ;;  %v1107_v15 = vld [vmem:[%s13135_s27 + $0x698] sm:$0xff]  }
  0x93   : > { %1092 = vst [vmem:[%s13143_s28 + $0x338] sm:$0xff] %v1091_v11   ;;  %1096 = vst [vmem:[%s13143_s28 + $0x340] sm:$0xff] %v1095_v12   ;;  %v1111_v16 = vld [vmem:[%s13135_s27 + $0x6a0] sm:$0xff]   ;;  %v1115_v17 = vld [vmem:[%s13135_s27 + $0x6a8] sm:$0xff]  }
  0x94   : > { %1100 = vst [vmem:[%s13143_s28 + $0x348] sm:$0xff] %v1099_v13   ;;  %1104 = vst [vmem:[%s13143_s28 + $0x350] sm:$0xff] %v1103_v14   ;;  %v1119_v18 = vld [vmem:[%s13135_s27 + $0x6b0] sm:$0xff]   ;;  %v1123_v19 = vld [vmem:[%s13135_s27 + $0x6b8] sm:$0xff]  }
  0x95   : > { %1108 = vst [vmem:[%s13143_s28 + $0x358] sm:$0xff] %v1107_v15   ;;  %1112 = vst [vmem:[%s13143_s28 + $0x360] sm:$0xff] %v1111_v16   ;;  %v1127_v20 = vld [vmem:[%s13135_s27 + $0x700] sm:$0xff]   ;;  %v1131_v21 = vld [vmem:[%s13135_s27 + $0x708] sm:$0xff]  }
  0x96   : > { %1116 = vst [vmem:[%s13143_s28 + $0x368] sm:$0xff] %v1115_v17   ;;  %1120 = vst [vmem:[%s13143_s28 + $0x370] sm:$0xff] %v1119_v18   ;;  %v1135_v22 = vld [vmem:[%s13135_s27 + $0x710] sm:$0xff]   ;;  %v1139_v23 = vld [vmem:[%s13135_s27 + $0x718] sm:$0xff]  }
  0x97   : > { %1124 = vst [vmem:[%s13143_s28 + $0x378] sm:$0xff] %v1123_v19   ;;  %1128 = vst [vmem:[%s13143_s28 + $0x380] sm:$0xff] %v1127_v20   ;;  %v1143_v24 = vld [vmem:[%s13135_s27 + $0x720] sm:$0xff]   ;;  %v1147_v25 = vld [vmem:[%s13135_s27 + $0x728] sm:$0xff]  }
  0x98   : > { %1132 = vst [vmem:[%s13143_s28 + $0x388] sm:$0xff] %v1131_v21   ;;  %1136 = vst [vmem:[%s13143_s28 + $0x390] sm:$0xff] %v1135_v22   ;;  %v1151_v26 = vld [vmem:[%s13135_s27 + $0x730] sm:$0xff]   ;;  %v1155_v27 = vld [vmem:[%s13135_s27 + $0x738] sm:$0xff]  }
  0x99   : > { %1140 = vst [vmem:[%s13143_s28 + $0x398] sm:$0xff] %v1139_v23   ;;  %1144 = vst [vmem:[%s13143_s28 + $0x3a0] sm:$0xff] %v1143_v24   ;;  %v1159_v28 = vld [vmem:[%s13135_s27 + $0x780] sm:$0xff]   ;;  %v1163_v29 = vld [vmem:[%s13135_s27 + $0x788] sm:$0xff]  }
  0x9a   : > { %1148 = vst [vmem:[%s13143_s28 + $0x3a8] sm:$0xff] %v1147_v25   ;;  %1152 = vst [vmem:[%s13143_s28 + $0x3b0] sm:$0xff] %v1151_v26   ;;  %v1167_v30 = vld [vmem:[%s13135_s27 + $0x790] sm:$0xff]   ;;  %v1171_v31 = vld [vmem:[%s13135_s27 + $0x798] sm:$0xff]  }
  0x9b   : > { %1156 = vst [vmem:[%s13143_s28 + $0x3b8] sm:$0xff] %v1155_v27   ;;  %1160 = vst [vmem:[%s13143_s28 + $0x3c0] sm:$0xff] %v1159_v28   ;;  %v1175_v32 = vld [vmem:[%s13135_s27 + $0x7a0] sm:$0xff]   ;;  %v1179_v33 = vld [vmem:[%s13135_s27 + $0x7a8] sm:$0xff]  }
  0x9c   : > { %1164 = vst [vmem:[%s13143_s28 + $0x3c8] sm:$0xff] %v1163_v29   ;;  %1168 = vst [vmem:[%s13143_s28 + $0x3d0] sm:$0xff] %v1167_v30   ;;  %v1183_v34 = vld [vmem:[%s13135_s27 + $0x7b0] sm:$0xff]   ;;  %v1187_v35 = vld [vmem:[%s13135_s27 + $0x7b8] sm:$0xff]  }
  0x9d   : > { %1172 = vst [vmem:[%s13143_s28 + $0x3d8] sm:$0xff] %v1171_v31   ;;  %1176 = vst [vmem:[%s13143_s28 + $0x3e0] sm:$0xff] %v1175_v32   ;;  %v1191_v36 = vld [vmem:[%s13135_s27 + $0x800] sm:$0xff]   ;;  %v1195_v37 = vld [vmem:[%s13135_s27 + $0x808] sm:$0xff]  }
  0x9e   : > { %1180 = vst [vmem:[%s13143_s28 + $0x3e8] sm:$0xff] %v1179_v33   ;;  %1184 = vst [vmem:[%s13143_s28 + $0x3f0] sm:$0xff] %v1183_v34   ;;  %v1199_v38 = vld [vmem:[%s13135_s27 + $0x810] sm:$0xff]   ;;  %v1203_v39 = vld [vmem:[%s13135_s27 + $0x818] sm:$0xff]  }
  0x9f   : > { %1188 = vst [vmem:[%s13143_s28 + $0x3f8] sm:$0xff] %v1187_v35   ;;  %1192 = vst [vmem:[%s13143_s28 + $0x400] sm:$0xff] %v1191_v36   ;;  %v1207_v40 = vld [vmem:[%s13135_s27 + $0x820] sm:$0xff]   ;;  %v1211_v41 = vld [vmem:[%s13135_s27 + $0x828] sm:$0xff]  }
  0xa0   : > { %1196 = vst [vmem:[%s13143_s28 + $0x408] sm:$0xff] %v1195_v37   ;;  %1200 = vst [vmem:[%s13143_s28 + $0x410] sm:$0xff] %v1199_v38   ;;  %v1215_v42 = vld [vmem:[%s13135_s27 + $0x830] sm:$0xff]   ;;  %v1219_v43 = vld [vmem:[%s13135_s27 + $0x838] sm:$0xff]  }
  0xa1   : > { %1204 = vst [vmem:[%s13143_s28 + $0x418] sm:$0xff] %v1203_v39   ;;  %1208 = vst [vmem:[%s13143_s28 + $0x420] sm:$0xff] %v1207_v40   ;;  %v1223_v44 = vld [vmem:[%s13135_s27 + $0x880] sm:$0xff]   ;;  %v1227_v45 = vld [vmem:[%s13135_s27 + $0x888] sm:$0xff]  }
  0xa2   : > { %1212 = vst [vmem:[%s13143_s28 + $0x428] sm:$0xff] %v1211_v41   ;;  %1216 = vst [vmem:[%s13143_s28 + $0x430] sm:$0xff] %v1215_v42   ;;  %v1231_v46 = vld [vmem:[%s13135_s27 + $0x890] sm:$0xff]   ;;  %v1235_v47 = vld [vmem:[%s13135_s27 + $0x898] sm:$0xff]  }
  0xa3   : > { %1220 = vst [vmem:[%s13143_s28 + $0x438] sm:$0xff] %v1219_v43   ;;  %1224 = vst [vmem:[%s13143_s28 + $0x440] sm:$0xff] %v1223_v44   ;;  %v1239_v48 = vld [vmem:[%s13135_s27 + $0x8a0] sm:$0xff]   ;;  %v1243_v49 = vld [vmem:[%s13135_s27 + $0x8a8] sm:$0xff]  }
  0xa4   : > { %1228 = vst [vmem:[%s13143_s28 + $0x448] sm:$0xff] %v1227_v45   ;;  %1232 = vst [vmem:[%s13143_s28 + $0x450] sm:$0xff] %v1231_v46   ;;  %v1247_v50 = vld [vmem:[%s13135_s27 + $0x8b0] sm:$0xff]   ;;  %v1251_v51 = vld [vmem:[%s13135_s27 + $0x8b8] sm:$0xff]  }
  0xa5   : > { %1236 = vst [vmem:[%s13143_s28 + $0x458] sm:$0xff] %v1235_v47   ;;  %1240 = vst [vmem:[%s13143_s28 + $0x460] sm:$0xff] %v1239_v48   ;;  %v1255_v52 = vld [vmem:[%s13135_s27 + $0x900] sm:$0xff]   ;;  %v1259_v53 = vld [vmem:[%s13135_s27 + $0x908] sm:$0xff]  }
  0xa6   : > { %1244 = vst [vmem:[%s13143_s28 + $0x468] sm:$0xff] %v1243_v49   ;;  %1248 = vst [vmem:[%s13143_s28 + $0x470] sm:$0xff] %v1247_v50   ;;  %v1263_v54 = vld [vmem:[%s13135_s27 + $0x910] sm:$0xff]   ;;  %v1267_v55 = vld [vmem:[%s13135_s27 + $0x918] sm:$0xff]  }
  0xa7   : > { %1252 = vst [vmem:[%s13143_s28 + $0x478] sm:$0xff] %v1251_v51   ;;  %1256 = vst [vmem:[%s13143_s28 + $0x480] sm:$0xff] %v1255_v52   ;;  %v1271_v56 = vld [vmem:[%s13135_s27 + $0x920] sm:$0xff]   ;;  %v1275_v57 = vld [vmem:[%s13135_s27 + $0x928] sm:$0xff]  }
  0xa8   : > { %1260 = vst [vmem:[%s13143_s28 + $0x488] sm:$0xff] %v1259_v53   ;;  %1264 = vst [vmem:[%s13143_s28 + $0x490] sm:$0xff] %v1263_v54   ;;  %v1279_v58 = vld [vmem:[%s13135_s27 + $0x930] sm:$0xff]   ;;  %v1283_v59 = vld [vmem:[%s13135_s27 + $0x938] sm:$0xff]  }
  0xa9   : > { %1268 = vst [vmem:[%s13143_s28 + $0x498] sm:$0xff] %v1267_v55   ;;  %1272 = vst [vmem:[%s13143_s28 + $0x4a0] sm:$0xff] %v1271_v56   ;;  %v1287_v60 = vld [vmem:[%s13135_s27 + $0x980] sm:$0xff]   ;;  %v1291_v61 = vld [vmem:[%s13135_s27 + $0x988] sm:$0xff]  }
  0xaa   : > { %1276 = vst [vmem:[%s13143_s28 + $0x4a8] sm:$0xff] %v1275_v57   ;;  %1280 = vst [vmem:[%s13143_s28 + $0x4b0] sm:$0xff] %v1279_v58   ;;  %v1295_v62 = vld [vmem:[%s13135_s27 + $0x990] sm:$0xff]   ;;  %v1299_v63 = vld [vmem:[%s13135_s27 + $0x998] sm:$0xff]  }
  0xab   : > { %1284 = vst [vmem:[%s13143_s28 + $0x4b8] sm:$0xff] %v1283_v59   ;;  %1288 = vst [vmem:[%s13143_s28 + $0x4c0] sm:$0xff] %v1287_v60   ;;  %v1303_v0 = vld [vmem:[%s13135_s27 + $0x9a0] sm:$0xff]   ;;  %v1307_v1 = vld [vmem:[%s13135_s27 + $0x9a8] sm:$0xff]  }
  0xac   : > { %1292 = vst [vmem:[%s13143_s28 + $0x4c8] sm:$0xff] %v1291_v61   ;;  %1296 = vst [vmem:[%s13143_s28 + $0x4d0] sm:$0xff] %v1295_v62   ;;  %v1311_v2 = vld [vmem:[%s13135_s27 + $0x9b0] sm:$0xff]   ;;  %v1315_v3 = vld [vmem:[%s13135_s27 + $0x9b8] sm:$0xff]  }
  0xad   : > { %1300 = vst [vmem:[%s13143_s28 + $0x4d8] sm:$0xff] %v1299_v63   ;;  %1304 = vst [vmem:[%s13143_s28 + $0x4e0] sm:$0xff] %v1303_v0   ;;  %v1319_v4 = vld [vmem:[%s13135_s27 + $0xa00] sm:$0xff]   ;;  %v1323_v5 = vld [vmem:[%s13135_s27 + $0xa08] sm:$0xff]  }
  0xae   : > { %1308 = vst [vmem:[%s13143_s28 + $0x4e8] sm:$0xff] %v1307_v1   ;;  %1312 = vst [vmem:[%s13143_s28 + $0x4f0] sm:$0xff] %v1311_v2   ;;  %v1327_v6 = vld [vmem:[%s13135_s27 + $0xa10] sm:$0xff]   ;;  %v1331_v7 = vld [vmem:[%s13135_s27 + $0xa18] sm:$0xff]  }
  0xaf   : > { %1316 = vst [vmem:[%s13143_s28 + $0x4f8] sm:$0xff] %v1315_v3   ;;  %1320 = vst [vmem:[%s13143_s28 + $0x500] sm:$0xff] %v1319_v4   ;;  %v1335_v8 = vld [vmem:[%s13135_s27 + $0xa20] sm:$0xff]   ;;  %v1339_v9 = vld [vmem:[%s13135_s27 + $0xa28] sm:$0xff]  }
  0xb0   : > { %1324 = vst [vmem:[%s13143_s28 + $0x508] sm:$0xff] %v1323_v5   ;;  %1328 = vst [vmem:[%s13143_s28 + $0x510] sm:$0xff] %v1327_v6   ;;  %v1343_v10 = vld [vmem:[%s13135_s27 + $0xa30] sm:$0xff]   ;;  %v1347_v11 = vld [vmem:[%s13135_s27 + $0xa38] sm:$0xff]  }
  0xb1   : > { %1332 = vst [vmem:[%s13143_s28 + $0x518] sm:$0xff] %v1331_v7   ;;  %1336 = vst [vmem:[%s13143_s28 + $0x520] sm:$0xff] %v1335_v8   ;;  %v1351_v12 = vld [vmem:[%s13135_s27 + $0xa80] sm:$0xff]   ;;  %v1355_v13 = vld [vmem:[%s13135_s27 + $0xa88] sm:$0xff]  }
  0xb2   : > { %1340 = vst [vmem:[%s13143_s28 + $0x528] sm:$0xff] %v1339_v9   ;;  %1344 = vst [vmem:[%s13143_s28 + $0x530] sm:$0xff] %v1343_v10   ;;  %v1359_v14 = vld [vmem:[%s13135_s27 + $0xa90] sm:$0xff]   ;;  %v1363_v15 = vld [vmem:[%s13135_s27 + $0xa98] sm:$0xff]  }
  0xb3   : > { %1348 = vst [vmem:[%s13143_s28 + $0x538] sm:$0xff] %v1347_v11   ;;  %1352 = vst [vmem:[%s13143_s28 + $0x540] sm:$0xff] %v1351_v12   ;;  %v1367_v16 = vld [vmem:[%s13135_s27 + $0xaa0] sm:$0xff]   ;;  %v1371_v17 = vld [vmem:[%s13135_s27 + $0xaa8] sm:$0xff]  }
  0xb4   : > { %1356 = vst [vmem:[%s13143_s28 + $0x548] sm:$0xff] %v1355_v13   ;;  %1360 = vst [vmem:[%s13143_s28 + $0x550] sm:$0xff] %v1359_v14   ;;  %v1375_v18 = vld [vmem:[%s13135_s27 + $0xab0] sm:$0xff]   ;;  %v1379_v19 = vld [vmem:[%s13135_s27 + $0xab8] sm:$0xff]  }
  0xb5   : > { %1364 = vst [vmem:[%s13143_s28 + $0x558] sm:$0xff] %v1363_v15   ;;  %1368 = vst [vmem:[%s13143_s28 + $0x560] sm:$0xff] %v1367_v16   ;;  %v1383_v20 = vld [vmem:[%s13135_s27 + $0xb00] sm:$0xff]   ;;  %v1387_v21 = vld [vmem:[%s13135_s27 + $0xb08] sm:$0xff]  }
  0xb6   : > { %1372 = vst [vmem:[%s13143_s28 + $0x568] sm:$0xff] %v1371_v17   ;;  %1376 = vst [vmem:[%s13143_s28 + $0x570] sm:$0xff] %v1375_v18   ;;  %v1391_v22 = vld [vmem:[%s13135_s27 + $0xb10] sm:$0xff]   ;;  %v1395_v23 = vld [vmem:[%s13135_s27 + $0xb18] sm:$0xff]  }
  0xb7   : > { %1380 = vst [vmem:[%s13143_s28 + $0x578] sm:$0xff] %v1379_v19   ;;  %1384 = vst [vmem:[%s13143_s28 + $0x580] sm:$0xff] %v1383_v20   ;;  %v1399_v24 = vld [vmem:[%s13135_s27 + $0xb20] sm:$0xff]   ;;  %v1403_v25 = vld [vmem:[%s13135_s27 + $0xb28] sm:$0xff]  }
  0xb8   : > { %1388 = vst [vmem:[%s13143_s28 + $0x588] sm:$0xff] %v1387_v21   ;;  %1392 = vst [vmem:[%s13143_s28 + $0x590] sm:$0xff] %v1391_v22   ;;  %v1407_v26 = vld [vmem:[%s13135_s27 + $0xb30] sm:$0xff]   ;;  %v1411_v27 = vld [vmem:[%s13135_s27 + $0xb38] sm:$0xff]  }
  0xb9   : > { %1396 = vst [vmem:[%s13143_s28 + $0x598] sm:$0xff] %v1395_v23   ;;  %1400 = vst [vmem:[%s13143_s28 + $0x5a0] sm:$0xff] %v1399_v24   ;;  %v1415_v28 = vld [vmem:[%s13135_s27 + $0xb80] sm:$0xff]   ;;  %v1419_v29 = vld [vmem:[%s13135_s27 + $0xb88] sm:$0xff]  }
  0xba   : > { %1404 = vst [vmem:[%s13143_s28 + $0x5a8] sm:$0xff] %v1403_v25   ;;  %1408 = vst [vmem:[%s13143_s28 + $0x5b0] sm:$0xff] %v1407_v26   ;;  %v1423_v30 = vld [vmem:[%s13135_s27 + $0xb90] sm:$0xff]   ;;  %v1427_v31 = vld [vmem:[%s13135_s27 + $0xb98] sm:$0xff]  }
  0xbb   : > { %1412 = vst [vmem:[%s13143_s28 + $0x5b8] sm:$0xff] %v1411_v27   ;;  %1416 = vst [vmem:[%s13143_s28 + $0x5c0] sm:$0xff] %v1415_v28   ;;  %v1431_v32 = vld [vmem:[%s13135_s27 + $0xba0] sm:$0xff]   ;;  %v1435_v33 = vld [vmem:[%s13135_s27 + $0xba8] sm:$0xff]  }
  0xbc   : > { %1420 = vst [vmem:[%s13143_s28 + $0x5c8] sm:$0xff] %v1419_v29   ;;  %1424 = vst [vmem:[%s13143_s28 + $0x5d0] sm:$0xff] %v1423_v30   ;;  %v1439_v34 = vld [vmem:[%s13135_s27 + $0xbb0] sm:$0xff]   ;;  %v1443_v35 = vld [vmem:[%s13135_s27 + $0xbb8] sm:$0xff]  }
  0xbd   : > { %1428 = vst [vmem:[%s13143_s28 + $0x5d8] sm:$0xff] %v1427_v31   ;;  %1432 = vst [vmem:[%s13143_s28 + $0x5e0] sm:$0xff] %v1431_v32   ;;  %v1447_v36 = vld [vmem:[%s13135_s27 + $0xc00] sm:$0xff]   ;;  %v1451_v37 = vld [vmem:[%s13135_s27 + $0xc08] sm:$0xff]  }
  0xbe   : > { %1436 = vst [vmem:[%s13143_s28 + $0x5e8] sm:$0xff] %v1435_v33   ;;  %1440 = vst [vmem:[%s13143_s28 + $0x5f0] sm:$0xff] %v1439_v34   ;;  %v1455_v38 = vld [vmem:[%s13135_s27 + $0xc10] sm:$0xff]   ;;  %v1459_v39 = vld [vmem:[%s13135_s27 + $0xc18] sm:$0xff]  }
  0xbf   : > { %1444 = vst [vmem:[%s13143_s28 + $0x5f8] sm:$0xff] %v1443_v35   ;;  %1448 = vst [vmem:[%s13143_s28 + $0x600] sm:$0xff] %v1447_v36   ;;  %v1463_v40 = vld [vmem:[%s13135_s27 + $0xc20] sm:$0xff]   ;;  %v1467_v41 = vld [vmem:[%s13135_s27 + $0xc28] sm:$0xff]  }
  0xc0   : > { %1452 = vst [vmem:[%s13143_s28 + $0x608] sm:$0xff] %v1451_v37   ;;  %1456 = vst [vmem:[%s13143_s28 + $0x610] sm:$0xff] %v1455_v38   ;;  %v1471_v42 = vld [vmem:[%s13135_s27 + $0xc30] sm:$0xff]   ;;  %v1475_v43 = vld [vmem:[%s13135_s27 + $0xc38] sm:$0xff]  }
  0xc1   : > { %1460 = vst [vmem:[%s13143_s28 + $0x618] sm:$0xff] %v1459_v39   ;;  %1464 = vst [vmem:[%s13143_s28 + $0x620] sm:$0xff] %v1463_v40  }
  0xc2   : > { %1468 = vst [vmem:[%s13143_s28 + $0x628] sm:$0xff] %v1467_v41   ;;  %1472 = vst [vmem:[%s13143_s28 + $0x630] sm:$0xff] %v1471_v42  }
  0xc3   : > { %1476 = vst [vmem:[%s13143_s28 + $0x638] sm:$0xff] %v1475_v43  }
  0xc4 PF: > { %p10012_p7 = scmp.ge.s32.totalorder %s12823_s24, 1  ;;  %p2300_p8 = scmp.lt.s32.totalorder %s12823_s24, 5 }
  0xc6   : > { %p2301_p9 = pnand %p10012_p7, %p2300_p8 }
  0xc7   : > { %s2307_s29 = sand.u32 (!%p2301_p9), 1, %s12799_s18   ;;  %p2353_p10 = scmp.lt.s32.totalorder (!%p2301_p9), %s12811_s21, 1 }
  0xc8   : > { %2304 = sbr.rel (%p2301_p9) target bundleno = 1779 (0x6f3), region = 114  ;;  %p2358_p11 = scmp.lt.s32.totalorder (!%p2301_p9), %s12807_s20, 1 }
  0xc9   : > { %s12311_s6 = smul.u32 (!%p2301_p9), 400, %s2307_s29  ;;  %p10015_p12 = scmp.ne.s32.totalorder (!%p2301_p9), %s12807_s20, 0 }
  0xca   : > { %s12312_s7 = smul.u32 (!%p2301_p9), 1600, %s2307_s29 }
  0xcb   : > { %s13562_s28 = scalar_lea.vmem (!%p2301_p9), [#allocation5], %s12311_s6 }
  0xcc   : > { %s13564_s29 = scalar_lea.vmem (!%p2301_p9), [#allocation6], %s12312_s7 }
  0xcf   : > { %s15512_s21 = smov (!%p2353_p10, %s12811_s21), 1  ;;  %2371 = sbr.rel (%p10015_p12) target bundleno = 426 (0x1aa), region = 126 }
  0xd0   : > { %s13546_s8 = scalar_select %p2358_p11, %s12807_s20, 1 }
  0xd1   : > { %s12313_s9 = smul.u32 60, %s15512_s21  ;;  %vm2434_vm0 = vsmask.f32 (!%p10015_p12), 3328  ;;  %vm2435_vm1 = vsmask.f32 (!%p10015_p12), 7440  ;;  %s12826_s6 = smov (!%p10015_p12), 64  }
  0xd2   : > { %s2360_s12 = scalar_lea.vmem %s15471_s2, %s13546_s8  ;;  %s12314_s13 = smul.u32 44, %s15512_s21  ;;  %vm13577_vm2 = vmor (!%p10015_p12), %vm2434_vm0, %vm2435_vm1  ;;  %vm2681_vm3 = vcmask (!%p10015_p12), 1042432   ;;  %vm2682_vm4 = vcmask (!%p10015_p12), 1046532   ;;  %vm2808_vm6 = vsmask.f32 (!%p10015_p12), 2304  ;;  %vm2398_vm9 = vcmask (!%p10015_p12), 257024  }
  0xd3   : > { %s13555_s16 = scalar_lea.vmem %s15469_s0, %s12313_s9  ;;  %s12825_s21 = smov (!%p10015_p12), 32   ;;  %vm13647_vm5 = vmor (!%p10015_p12), %vm2681_vm3, %vm2682_vm4  ;;  %vm2809_vm7 = vsmask.f32 (!%p10015_p12), 6416  ;;  %vm3055_vm10 = vcmask (!%p10015_p12), 1041408   ;;  %vm3056_vm11 = vcmask (!%p10015_p12), 1045508   ;;  %vm2413_vm13 = vcmask (!%p10015_p12), 254976  }
  0xd4   : > { %s13560_s27 = scalar_lea.vmem %s15474_s5, %s12314_s13  ;;  %v2419_v44 = vld [vmem:[%s13555_s16] sm:$0xf] (!%p10015_p12)  ;;  %v2420_v45 = vld [vmem:[%s13555_s16 + $0x4] sm:$0xf] (!%p10015_p12)  ;;  %v2421_v50 = vld [vmem:[%s13555_s16 + $0x8] sm:$0xf] (!%p10015_p12) }
  0xd5   : > { %v2438_v46 = vshrl.u32 (!%p10015_p12), %v2419_v44, 16  ;;  %v2441_v47 = vshll.u32 (!%p10015_p12), %v2419_v44, 16  ;;  %v2447_v48 = vshll.u32 (!%p10015_p12), %v2420_v45, 16  ;;  %v2451_v49 = vshrl.u32 (!%p10015_p12), %v2420_v45, 16  ;;  %v2422_v51 = vld [vmem:[%s13555_s16 + $0xc] sm:$0xf] (!%p10015_p12)  ;;  %vm13740_vm8 = vmor (!%p10015_p12), %vm2808_vm6, %vm2809_vm7 }
  0xd6   : > { %v2457_v55 = vshll.u32 %v2421_v50, 16  ;;  %v2423_v56 = vld [vmem:[%s13555_s16 + $0x10] sm:$0xf]  ;;  %v2461_v58 = vshrl.u32 %v2421_v50, 16  ;;  %v2467_v59 = vshll.u32 %v2422_v51, 16  ;;  %v2471_v60 = vshrl.u32 %v2422_v51, 16  ;;  %vm13860_vm12 = vmor %vm3055_vm10, %vm3056_vm11 }
  0xd7   : > { %v2440_v52 = vrot.slane %v2438_v46, 4  ;;  %v2443_v53 = vrot.slane %v2441_v47, 5  ;;  %v2449_v54 = vrot.slane %v2447_v48, 5  ;;  %v2453_v57 = vrot.slane %v2451_v49, 4  ;;  %v2424_v61 = vld [vmem:[%s13555_s16 + $0x14] sm:$0xf] }
  0xd8   : > { %v2459_v63 = vrot.slane %v2457_v55, 5  ;;  %v2477_v0 = vshll.u32 %v2423_v56, 16  ;;  %v2481_v1 = vshrl.u32 %v2423_v56, 16  ;;  %v2463_v3 = vrot.slane %v2461_v58, 4  ;;  %v2425_v7 = vld [vmem:[%s13555_s16 + $0x18] sm:$0xf] }
  0xd9   : > { %v2444_v62 = vor.u32 %v2443_v53, %v2440_v52  ;;  %v2469_v4 = vrot.slane %v2467_v59, 5  ;;  %v2473_v5 = vrot.slane %v2471_v60, 4  ;;  %v2454_v6 = vor.u32 %v2453_v57, %v2449_v54  ;;  %v2426_v16 = vld [vmem:[%s13555_s16 + $0x1c] sm:$0xf]  ;;  %v2433_v25 = vld [vmem:[%s13555_s16 + $0x38] sm:$0x3] }
  0xda   : > { %v2479_v9 = vrot.slane %v2477_v0, 5  ;;  %v2483_v10 = vrot.slane %v2481_v1, 4  ;;  %v2487_v11 = vshll.u32 %v2424_v61, 16  ;;  %v2464_v12 = vor.u32 %v2463_v3, %v2459_v63  ;;  %v2427_v30 = vld [vmem:[%s13555_s16 + $0x20] sm:$0xf]  ;;  %s12827_s7 = smov 96  }
  0xdb   : > { %v2445_v8 = vrot.slane %v2444_v62, 4  ;;  %v2455_v13 = vrot.slane %v2454_v6, 4  ;;  %v2474_v14 = vor.u32 %v2473_v5, %v2469_v4  ;;  %v2491_v15 = vshrl.u32 %v2424_v61, 16  ;;  %v2428_v35 = vld [vmem:[%s13555_s16 + $0x24] sm:$0xf] }
  0xdc   : > { %v2484_v18 = vor.u32 %v2483_v10, %v2479_v9  ;;  %v2489_v19 = vrot.slane %v2487_v11, 5  ;;  %v2497_v20 = vshll.u32 %v2425_v7, 16  ;;  %v2465_v21 = vrot.slane %v2464_v12, 4  ;;  %v2429_v48 = vld [vmem:[%s13555_s16 + $0x28] sm:$0xf] }
  0xdd   : > { %v2450_v17 = vsel %vm13577_vm2, %v2445_v8, %v2449_v54  ;;  %v2460_v22 = vsel %vm13577_vm2, %v2455_v13, %v2459_v63  ;;  %v2475_v23 = vrot.slane %v2474_v14, 4  ;;  %v2493_v24 = vrot.slane %v2491_v15, 4  ;;  %v2430_v61 = vld [vmem:[%s13555_s16 + $0x2c] sm:$0xf]  ;;  %v2431_v1 = vld [vmem:[%s13555_s16 + $0x30] sm:$0xf] }
  0xde   : > { %2586 = vrot.lane.b32.xlu0 %v2450_v17, %s12825_s21  ;;  %v2485_v26 = vrot.slane %v2484_v18, 4  ;;  %v2499_v27 = vrot.slane %v2497_v20, 5  ;;  %v2501_v28 = vshrl.u32 %v2425_v7, 16  ;;  %v2507_v29 = vshll.u32 %v2426_v16, 16  ;;  %v2432_v5 = vld [vmem:[%s13555_s16 + $0x34] sm:$0xf] }
  0xdf   : > { %v2470_v31 = vsel %vm13577_vm2, %v2465_v21, %v2469_v4  ;;  %v2480_v32 = vsel %vm13577_vm2, %v2475_v23, %v2479_v9  ;;  %v2494_v33 = vor.u32 %v2493_v24, %v2489_v19  ;;  %v2511_v34 = vshrl.u32 %v2426_v16, 16  ;;  %v13617_v11 = vld [vmem:[%s13555_s16 + $0x38] sm:$0x7] }
  0xe0   : > { %2590 = vrot.lane.b32.xlu1 %v2470_v31, %s12825_s21  ;;  %v2490_v36 = vsel %vm13577_vm2, %v2485_v26, %v2489_v19  ;;  %v2503_v37 = vrot.slane %v2501_v28, 4  ;;  %v2509_v38 = vrot.slane %v2507_v29, 5  ;;  %v2577_v39 = vshll.u32 %v2433_v25, 16 }
  0xe1   : > { %v2495_v40 = vrot.slane %v2494_v33, 4  ;;  %v2581_v41 = vshrl.u32 %v2433_v25, 16  ;;  %v2513_v42 = vrot.slane %v2511_v34, 4  ;;  %v2517_v43 = vshll.u32 %v2427_v30, 16  ;;  %v2651_v34 = vld [vmem:[%s13555_s16] sm:$0xe] }
  0xe2   : > { %2588 = vrot.lane.b32.xlu0 %v2460_v22, %s12825_s21  ;;  %v2504_v44 = vor.u32 %v2503_v37, %v2499_v27  ;;  %v13599_v45 = vrot.slane %v2577_v39, 5  ;;  %v2521_v46 = vshrl.u32 %v2427_v30, 16  ;;  %v2527_v47 = vshll.u32 %v2428_v35, 16  ;;  %v2655_v39 = vld [vmem:[%s13555_s16 + $0x10] sm:$0xf] }
  0xe3   : > { %v2500_v49 = vsel %vm13577_vm2, %v2495_v40, %v2499_v27  ;;  %v2583_v50 = vrot.slane %v2581_v41, 4  ;;  %v2514_v51 = vor.u32 %v2513_v42, %v2509_v38  ;;  %v2519_v52 = vrot.slane %v2517_v43, 5  ;;  %v2654_v40 = vld [vmem:[%s13555_s16 + $0xc] sm:$0xf]  ;;  %v2656_v41 = vld [vmem:[%s13555_s16 + $0x14] sm:$0xf] }
  0xe4   : > { %2592 = vrot.lane.b32.xlu1 %v2480_v32, %s12825_s21  ;;  %v2505_v53 = vrot.slane %v2504_v44, 4  ;;  %v2523_v54 = vrot.slane %v2521_v46, 4  ;;  %v2529_v55 = vrot.slane %v2527_v47, 5  ;;  %v2531_v56 = vshrl.u32 %v2428_v35, 16  ;;  %v2653_v35 = vld [vmem:[%s13555_s16 + $0x8] sm:$0xf] }
  0xe5   : > { %v2584_v57 = vor.u32 %v2583_v50, %v13599_v45  ;;  %v2515_v58 = vrot.slane %v2514_v51, 4  ;;  %v2537_v59 = vshll.u32 %v2429_v48, 16  ;;  %v2541_v60 = vshrl.u32 %v2429_v48, 16  ;;  %v2657_v42 = vld [vmem:[%s13555_s16 + $0x18] sm:$0xf] }
  0xe6   : > { %2594 = vrot.lane.b32.xlu0 %v2490_v36, %s12825_s21  ;;  %v2510_v62 = vsel %vm13577_vm2, %v2505_v53, %v2509_v38  ;;  %v2524_v63 = vor.u32 %v2523_v54, %v2519_v52  ;;  %v2533_v0 = vrot.slane %v2531_v56, 4  ;;  %v2547_v9 = vshll.u32 %v2430_v61, 16  ;;  %v2652_v38 = vld [vmem:[%s13555_s16 + $0x4] sm:$0xf]  ;;  %v2659_v44 = vld [vmem:[%s13555_s16 + $0x20] sm:$0xf] }
  0xe7   : > { %v2539_v3 = vrot.slane %v2537_v59, 5  ;;  %v2543_v4 = vrot.slane %v2541_v60, 4  ;;  %v2585_v6 = vrot.slane %v2584_v57, 4  ;;  %v2520_v7 = vsel %vm13577_vm2, %v2515_v58, %v2519_v52  ;;  %v2658_v50 = vld [vmem:[%s13555_s16 + $0x1c] sm:$0xf] }
  0xe8   : > { %2596 = vrot.lane.b32.xlu1 %v2500_v49, %s12825_s21  ;;  %v2534_v8 = vor.u32 %v2533_v0, %v2529_v55  ;;  %v2525_v10 = vrot.slane %v2524_v63, 4  ;;  %v2551_v12 = vshrl.u32 %v2430_v61, 16  ;;  %v2557_v13 = vshll.u32 %v2431_v1, 16  ;;  %v2660_v58 = vld [vmem:[%s13555_s16 + $0x24] sm:$0xf] }
  0xe9   : > { %v2561_v14 = vshrl.u32 %v2431_v1, 16  ;;  %v2544_v16 = vor.u32 %v2543_v4, %v2539_v3  ;;  %v2549_v17 = vrot.slane %v2547_v9, 5  ;;  %v2567_v18 = vshll.u32 %v2432_v5, 16  ;;  %v2661_v63 = vld [vmem:[%s13555_s16 + $0x28] sm:$0xf] }
  0xea   : > { %2598 = vrot.lane.b32.xlu0 %v2510_v62, %s12825_s21  ;;  %v2535_v15 = vrot.slane %v2534_v8, 4  ;;  %v2553_v19 = vrot.slane %v2551_v12, 4  ;;  %v2559_v20 = vrot.slane %v2557_v13, 5  ;;  %v2725_v22 = vrot.slane %v13617_v11, 5  ;;  %v2807_v8 = vld [vmem:[%s13555_s16 + $0x38] sm:$0x7] }
  0xeb   : > { %v2563_v21 = vrot.slane %v2561_v14, 4  ;;  %v2571_v23 = vshrl.u32 %v2432_v5, 16  ;;  %v2530_v24 = vsel %vm13577_vm2, %v2525_v10, %v2529_v55  ;;  %v2569_v26 = vrot.slane %v2567_v18, 5  ;;  %v2662_v12 = vld [vmem:[%s13555_s16 + $0x2c] sm:$0xf] }
  0xec   : > { %2614 = vrot.lane.b32.xlu1 %v2585_v6, %s12825_s21  ;;  %v2554_v25 = vor.u32 %v2553_v19, %v2549_v17  ;;  %v2540_v27 = vsel %vm13577_vm2, %v2535_v15, %v2539_v3  ;;  %v2545_v28 = vrot.slane %v2544_v16, 4  ;;  %v2727_v31 = vrot.slane %v2725_v22, 4  ;;  %v13663_v13 = vld [vmem:[%s13555_s16 + $0x30] sm:$0xf]  ;;  %v2793_v16 = vld [vmem:[%s13555_s16] sm:$0xe] }
  0xed   : > { %v2564_v29 = vor.u32 %v2563_v21, %v2559_v20  ;;  %v2573_v30 = vrot.slane %v2571_v23, 4  ;;  %v2689_v43 = vrot.slane %v2653_v35, 5  ;;  %v10016_v48 = vrot.slane %v2651_v34, 9  ;;  %v2794_v21 = vld [vmem:[%s13555_s16 + $0x4] sm:$0xf] }
  0xee   : > { %2600 = vrot.lane.b32.xlu0 %v2520_v7, %s12825_s21  ;;  %v2555_v32 = vrot.slane %v2554_v25, 4  ;;  %v2550_v36 = vsel %vm13577_vm2, %v2545_v28, %v2549_v17  ;;  %v2695_v49 = vrot.slane %v2655_v39, 5  ;;  %v2686_v52 = vrot.slane %v2652_v38, 5  ;;  %v2796_v28 = vld [vmem:[%s13555_s16 + $0xc] sm:$0xf] }
  0xef   : > { %v2574_v33 = vor.u32 %v2573_v30, %v2569_v26  ;;  %v2565_v37 = vrot.slane %v2564_v29, 4  ;;  %v2692_v53 = vrot.slane %v2654_v40, 5  ;;  %v2701_v54 = vrot.slane %v2657_v42, 5 }
  0xf0   : > { %2602 = vrot.lane.b32.xlu1 %v2530_v24, %s12825_s21  ;;  %v2560_v46 = vsel %vm13577_vm2, %v2555_v32, %v2559_v20  ;;  %v2698_v56 = vrot.slane %v2656_v41, 5  ;;  %v2707_v57 = vrot.slane %v2659_v44, 5  ;;  %v2688_v59 = vrot.slane %v2686_v52, 4 }
  0xf1   : > { %v2575_v47 = vrot.slane %v2574_v33, 4  ;;  %v2570_v51 = vsel %vm13577_vm2, %v2565_v37, %v2569_v26  ;;  %v2691_v60 = vrot.slane %v2689_v43, 4  ;;  %v2694_v61 = vrot.slane %v2692_v53, 4  ;;  %v2798_v33 = vld [vmem:[%s13555_s16 + $0x14] sm:$0xf] }
  0xf2   : > { %2604 = vrot.lane.b32.xlu0 %v2540_v27, %s12825_s21  ;;  %v2704_v62 = vrot.slane %v2658_v50, 5  ;;  %v2697_v1 = vrot.slane %v2695_v49, 4  ;;  %v2700_v3 = vrot.slane %v2698_v56, 4  ;;  %v2687_v4 = vsel %vm13647_vm5, %v10016_v48, %v2686_v52  ;;  %v2795_v27 = vld [vmem:[%s13555_s16 + $0x8] sm:$0xf] }
  0xf3   : > { %v2580_v0 = vsel %vm13577_vm2, %v2575_v47, %v13599_v45  ;;  %v2703_v5 = vrot.slane %v2701_v54, 4  ;;  %v2710_v7 = vrot.slane %v2660_v58, 5  ;;  %v2709_v9 = vrot.slane %v2707_v57, 4 }
  0xf4   : > { %2756 = vrot.lane.b32.xlu1 %v2727_v31, %s12826_s6  ;;  %v2706_v6 = vrot.slane %v2704_v62, 4  ;;  %v2713_v10 = vrot.slane %v2661_v63, 5  ;;  %v2690_v2 = vsel %vm13647_vm5, %v2688_v59, %v2689_v43  ;;  %v2693_v45 = vsel %vm13647_vm5, %v2691_v60, %v2692_v53  ;;  %v2797_v43 = vld [vmem:[%s13555_s16 + $0x10] sm:$0xf]  ;;  %v2799_v53 = vld [vmem:[%s13555_s16 + $0x18] sm:$0xf] }
  0xf5   : > { %v2696_v14 = vsel %vm13647_vm5, %v2694_v61, %v2695_v49  ;;  %v2712_v15 = vrot.slane %v2710_v7, 4  ;;  %v2699_v17 = vsel %vm13647_vm5, %v2697_v1, %v2698_v56  ;;  %v2702_v18 = vsel %vm13647_vm5, %v2700_v3, %v2701_v54  ;;  %v2800_v59 = vld [vmem:[%s13555_s16 + $0x1c] sm:$0xf] }
  0xf6   : > { %2606 = vrot.lane.b32.xlu0 %v2550_v36, %s12825_s21  ;;  %v2951_v19 = vshrl.u32 %v2807_v8, 16  ;;  %v2954_v20 = vshll.u32 %v2807_v8, 16  ;;  %v2705_v23 = vsel %vm13647_vm5, %v2703_v5, %v2704_v62  ;;  %v13683_v24 = vsel %vm13647_vm5, %v2706_v6, %v2707_v57  ;;  %v13701_v36 = vld [vmem:[%s13555_s16 + $0x34] sm:$0xf] }
  0xf7   : > { %v2716_v25 = vrot.slane %v2662_v12, 5  ;;  %v2719_v26 = vrot.slane %v13663_v13, 5  ;;  %v13690_v29 = vsel %vm13647_vm5, %v2709_v9, %v2710_v7  ;;  %v2715_v30 = vrot.slane %v2713_v10, 4  ;;  %v2801_v9 = vld [vmem:[%s13555_s16 + $0x20] sm:$0xf] }
  0xf8   : > { %2608 = vrot.lane.b32.xlu1 %v2560_v46, %s12825_s21  ;;  %v2812_v31 = vshrl.u32 %v2793_v16, 16  ;;  %v2815_v32 = vshll.u32 %v2793_v16, 16  ;;  %v13696_v34 = vsel %vm13647_vm5, %v2712_v15, %v2713_v10  ;;  %v2821_v37 = vshrl.u32 %v2794_v21, 16 }
  0xf9   : > { %v13698_v35 = vrot.slane %v2716_v25, 4  ;;  %v2824_v38 = vshll.u32 %v2794_v21, 16  ;;  %v2953_v39 = vrot.slane %v2951_v19, 5  ;;  %v2956_v40 = vrot.slane %v2954_v20, 6  ;;  %v2802_v21 = vld [vmem:[%s13555_s16 + $0x24] sm:$0xf] }
  0xfa   : > { %2610 = vrot.lane.b32.xlu0 %v2570_v51, %s12825_s21  ;;  %v2841_v41 = vshrl.u32 %v2796_v28, 16  ;;  %v2844_v42 = vshll.u32 %v2796_v28, 16  ;;  %v2831_v44 = vshrl.u32 %v2795_v27, 16  ;;  %v2834_v46 = vshll.u32 %v2795_v27, 16 }
  0xfb   : > { %v2861_v47 = vshrl.u32 %v2798_v33, 16  ;;  %v2864_v48 = vshll.u32 %v2798_v33, 16  ;;  %v13707_v49 = vrot.slane %v2719_v26, 4  ;;  %v2722_v50 = vrot.slane %v13701_v36, 5  ;;  %v2394_v36 = vld [vmem:[%s13555_s16 + $0x2c] sm:$0xf] }
  0xfc   : > { %2612 = vrot.lane.b32.xlu1 %v2580_v0, %s12825_s21  ;;  %v2814_v51 = vrot.slane %v2812_v31, 5  ;;  %v2817_v52 = vrot.slane %v2815_v32, 6  ;;  %v2823_v54 = vrot.slane %v2821_v37, 5  ;;  %v2826_v56 = vrot.slane %v2824_v38, 6  ;;  %2410 = vst.msk [vmem:[#allocation2 + $0x58] sm:$0xf] %vm2398_vm9, %v2394_v36 }
  0xfd   : > { %v2851_v57 = vshrl.u32 %v2797_v43, 16  ;;  %v2854_v58 = vshll.u32 %v2797_v43, 16  ;;  %v13716_v60 = vsel %vm13647_vm5, %v2715_v30, %v2716_v25  ;;  %v13718_v61 = vor.u32 %v2956_v40, %v2953_v39  ;;  %v13745_v40 = vld [vmem:[%s13555_s16 + $0x28] sm:$0xf] }
  0xfe   : > { %2728 = vrot.lane.b32.xlu0 %v2687_v4, %s12826_s6  ;;  %v2843_v62 = vrot.slane %v2841_v41, 5  ;;  %v2846_v63 = vrot.slane %v2844_v42, 6  ;;  %v2833_v0 = vrot.slane %v2831_v44, 5  ;;  %v2836_v1 = vrot.slane %v2834_v46, 6  ;;  %v2383_v44 = vld [vmem:[%s13555_s16] sm:$0xf] }
  0xff   : > { %v2863_v3 = vrot.slane %v2861_v47, 5  ;;  %v2866_v4 = vrot.slane %v2864_v48, 6  ;;  %v2871_v5 = vshrl.u32 %v2799_v53, 16  ;;  %v2874_v6 = vshll.u32 %v2799_v53, 16  ;;  %v2385_v46 = vld [vmem:[%s13555_s16 + $0x8] sm:$0xf] }
 0x100   : > { %2730 = vrot.lane.b32.xlu1 %v2690_v2, %s12826_s6  ;;  %v2881_v7 = vshrl.u32 %v2800_v59, 16  ;;  %v2884_v8 = vshll.u32 %v2800_v59, 16  ;;  %v2818_v10 = vor.u32 %v2817_v52, %v2814_v51  ;;  %v13722_v12 = vor.u32 %v2826_v56, %v2823_v54  ;;  %v2384_v47 = vld [vmem:[%s13555_s16 + $0x4] sm:$0xf]  ;;  %v2386_v48 = vld [vmem:[%s13555_s16 + $0xc] sm:$0xf] }
 0x101   : > { %v2853_v2 = vrot.slane %v2851_v57, 5  ;;  %v2847_v15 = vor.u32 %v2846_v63, %v2843_v62  ;;  %v2837_v16 = vor.u32 %v2836_v1, %v2833_v0  ;;  %v2891_v19 = vshrl.u32 %v2801_v9, 16  ;;  %v2387_v51 = vld [vmem:[%s13555_s16 + $0x10] sm:$0xf]  ;;  %v2388_v52 = vld [vmem:[%s13555_s16 + $0x14] sm:$0xf] }
 0x102   : > { %2732 = vrot.lane.b32.xlu0 %v2693_v45, %s12826_s6  ;;  %v2856_v45 = vrot.slane %v2854_v58, 6  ;;  %v2894_v20 = vshll.u32 %v2801_v9, 16  ;;  %v2876_v25 = vrot.slane %v2874_v6, 6  ;;  %v2883_v27 = vrot.slane %v2881_v7, 5  ;;  %v2389_v53 = vld [vmem:[%s13555_s16 + $0x18] sm:$0xf] }
 0x103   : > { %v2886_v28 = vrot.slane %v2884_v8, 6  ;;  %v13733_v30 = vrot.slane %v2818_v10, 4  ;;  %v2829_v31 = vrot.slane %v13722_v12, 4  ;;  %v2839_v33 = vrot.slane %v2837_v16, 4  ;;  %v2390_v54 = vld [vmem:[%s13555_s16 + $0x1c] sm:$0xf] }
 0x104   : > { %2734 = vrot.lane.b32.xlu1 %v2696_v14, %s12826_s6  ;;  %v2724_v14 = vrot.slane %v2722_v50, 4  ;;  %v2857_v32 = vor.u32 %v2856_v45, %v2853_v2  ;;  %v2849_v37 = vrot.slane %v2847_v15, 4  ;;  %v2901_v38 = vshrl.u32 %v2802_v21, 16  ;;  %v13766_v59 = vld [vmem:[%s13555_s16] sm:$0xc] }
 0x105   : > { %v2904_v39 = vshll.u32 %v2802_v21, 16  ;;  %v2893_v42 = vrot.slane %v2891_v19, 5  ;;  %v2896_v43 = vrot.slane %v2894_v20, 6  ;;  %v2720_v56 = vsel %vm13647_vm5, %v13698_v35, %v2719_v26  ;;  %v3026_v62 = vld [vmem:[%s13555_s16 + $0x4] sm:$0xf] }
 0x106   : > { %2736 = vrot.lane.b32.xlu0 %v2699_v17, %s12826_s6  ;;  %v13727_v17 = vor.u32 %v2866_v4, %v2863_v3  ;;  %v2859_v41 = vrot.slane %v2857_v32, 4  ;;  %v13763_v58 = vor.u32 %v2886_v28, %v2883_v27  ;;  %v2391_v63 = vld [vmem:[%s13555_s16 + $0x20] sm:$0xf]  ;;  %v2392_v0 = vld [vmem:[%s13555_s16 + $0x24] sm:$0xf]  ;;  %v2723_v13 = vsel %vm13647_vm5, %v13707_v49, %v2722_v50 }
 0x107   : > { %v2393_v1 = vld [vmem:[%s13555_s16 + $0x28] sm:$0xf]  ;;  %v13783_v26 = vsel %vm13647_vm5, %v2724_v14, %v2725_v22  ;;  %v2828_v35 = vsel %vm13740_vm8, %v13733_v30, %v13722_v12  ;;  %v2395_v49 = vld [vmem:[%s13555_s16 + $0x30] sm:$0xf]  ;;  %v2396_v50 = vld [vmem:[%s13555_s16 + $0x34] sm:$0xf]  ;;  %v13807_v6 = vsel %vm13740_vm8, %v2849_v37, %v2857_v32  ;;  %v13828_v14 = vor.u32 %v2896_v43, %v2893_v42 }
 0x108   : > { %2738 = vrot.lane.b32.xlu1 %v2702_v18, %s12826_s6  ;;  %v2873_v18 = vrot.slane %v2871_v5, 5  ;;  %v2903_v11 = vrot.slane %v2901_v38, 5  ;;  %v2906_v22 = vrot.slane %v2904_v39, 6  ;;  %v2911_v55 = vshrl.u32 %v13745_v40, 16  ;;  %v3027_v4 = vld [vmem:[%s13555_s16 + $0x8] sm:$0xf] }
 0x109   : > { %v2914_v3 = vshll.u32 %v13745_v40, 16  ;;  %v13803_v5 = vsel %vm13740_vm8, %v2839_v33, %v2847_v15  ;;  %v13812_v7 = vsel %vm13740_vm8, %v2859_v41, %v13727_v17  ;;  %v3028_v8 = vld [vmem:[%s13555_s16 + $0xc] sm:$0xf]  ;;  %v13819_v9 = vld [vmem:[%s13555_s16 + $0x10] sm:$0xf]  ;;  %v2889_v45 = vrot.slane %v13763_v58, 4 }
 0x10a   : > { %2740 = vrot.lane.b32.xlu0 %v2705_v23, %s12826_s6  ;;  %v2959_v23 = vrot.slane %v13718_v61, 4  ;;  %v13761_v57 = vor.u32 %v2876_v25, %v2873_v18  ;;  %2399 = vst.msk [vmem:[#allocation2] sm:$0xf] %vm2398_vm9, %v2383_v44  ;;  %2401 = vst.msk [vmem:[#allocation2 + $0x10] sm:$0xf] %vm2398_vm9, %v2385_v46  ;;  %v10017_v20 = vrot.slane %v13766_v59, 10  ;;  %v13853_v18 = vor.u32 %v2906_v22, %v2903_v11 }
 0x10b   : > { %2400 = vst.msk [vmem:[#allocation2 + $0x8] sm:$0xf] %vm2398_vm9, %v2384_v47  ;;  %2402 = vst.msk [vmem:[#allocation2 + $0x18] sm:$0xf] %vm2398_vm9, %v2386_v48  ;;  %v3030_v15 = vld [vmem:[%s13555_s16 + $0x14] sm:$0xf] }
 0x10c   : > { %2742 = vrot.lane.b32.xlu1 %v13683_v24, %s12826_s6  ;;  %v2879_v2 = vrot.slane %v13761_v57, 4  ;;  %2403 = vst.msk [vmem:[#allocation2 + $0x20] sm:$0xf] %vm2398_vm9, %v2387_v51  ;;  %2404 = vst.msk [vmem:[#allocation2 + $0x28] sm:$0xf] %vm2398_vm9, %v2388_v52  ;;  %v3060_v21 = vrot.slane %v3026_v62, 6 }
 0x10d   : > { %2405 = vst.msk [vmem:[#allocation2 + $0x30] sm:$0xf] %vm2398_vm9, %v2389_v53  ;;  %2406 = vst.msk [vmem:[#allocation2 + $0x38] sm:$0xf] %vm2398_vm9, %v2390_v54  ;;  %v3032_v19 = vld [vmem:[%s13555_s16 + $0x1c] sm:$0xf] }
 0x10e   : > { %2744 = vrot.lane.b32.xlu0 %v13690_v29, %s12826_s6  ;;  %v2869_v29 = vrot.slane %v13727_v17, 4  ;;  %2407 = vst.msk [vmem:[#allocation2 + $0x40] sm:$0xf] %vm2398_vm9, %v2391_v63  ;;  %2408 = vst.msk [vmem:[#allocation2 + $0x48] sm:$0xf] %vm2398_vm9, %v2392_v0  ;;  %v13855_v25 = vrot.slane %v2911_v55, 5  ;;  %v3061_v37 = vsel %vm13860_vm12, %v10017_v20, %v3060_v21 }
 0x10f   : > { %2409 = vst.msk [vmem:[#allocation2 + $0x50] sm:$0xf] %vm2398_vm9, %v2393_v1  ;;  %2411 = vst.msk [vmem:[#allocation2 + $0x60] sm:$0xf] %vm2398_vm9, %v2395_v49  ;;  %v13848_v17 = vld [vmem:[%s13555_s16 + $0x30] sm:$0xf] }
 0x110   : > { %2746 = vrot.lane.b32.xlu1 %v13696_v34, %s12826_s6  ;;  %v13791_v34 = vsel %vm13740_vm8, %v2829_v31, %v2837_v16  ;;  %v13824_v10 = vsel %vm13740_vm8, %v2869_v29, %v13761_v57  ;;  %v3031_v16 = vld [vmem:[%s13555_s16 + $0x18] sm:$0xf]  ;;  %2412 = vst.msk [vmem:[#allocation2 + $0x68] sm:$0xf] %vm2398_vm9, %v2396_v50  ;;  %v13857_v27 = vrot.slane %v2914_v3, 6  ;;  %v3063_v32 = vrot.slane %v3027_v4, 6 }
 0x111   : > { %v3033_v28 = vld [vmem:[%s13555_s16 + $0x20] sm:$0xf]  ;;  %v3034_v33 = vld [vmem:[%s13555_s16 + $0x24] sm:$0xf]  ;;  %v3062_v38 = vrot.slane %v3060_v21, 4  ;;  %v3066_v39 = vrot.slane %v3028_v8, 6  ;;  %v2898_v31 = vsel %vm13740_vm8, %v2889_v45, %v13828_v14 }
 0x112   : > { %2748 = vrot.lane.b32.xlu0 %v13716_v60, %s12826_s6  ;;  %v13815_v60 = vld [vmem:[%s13555_s16 + $0x2c] sm:$0xf]  ;;  %v3069_v40 = vrot.slane %v13819_v9, 6  ;;  %v3035_v42 = vld [vmem:[%s13555_s16 + $0x28] sm:$0xf]  ;;  %v3065_v43 = vrot.slane %v3063_v32, 4 }
 0x113   : > { %v2921_v41 = vshrl.u32 %v13815_v60, 16  ;;  %v2924_v29 = vshll.u32 %v13815_v60, 16  ;;  %v3072_v44 = vrot.slane %v3030_v15, 6  ;;  %3117 = vst.msk [vmem:[#allocation2 + $0x4] sm:$0xf] %vm2398_vm9, %v3061_v37  ;;  %v3064_v47 = vsel %vm13860_vm12, %v3062_v38, %v3063_v32 }
 0x114   : > { %2750 = vrot.lane.b32.xlu1 %v2720_v56, %s12826_s6  ;;  %v3036_v46 = vld [vmem:[%s13555_s16 + $0x2c] sm:$0xf]  ;;  %v3068_v48 = vrot.slane %v3066_v39, 4  ;;  %v3071_v51 = vrot.slane %v3069_v40, 4  ;;  %v3075_v52 = vrot.slane %v3031_v16, 6  ;;  %v2931_v53 = vshrl.u32 %v13848_v17, 16 }
 0x115   : > { %v3037_v54 = vld [vmem:[%s13555_s16 + $0x30] sm:$0xf]  ;;  %v3067_v56 = vsel %vm13860_vm12, %v3065_v43, %v3066_v39  ;;  %v3074_v59 = vrot.slane %v3072_v44, 4  ;;  %v3078_v62 = vrot.slane %v3032_v19, 6  ;;  %3118 = vst.msk [vmem:[#allocation2 + $0xc] sm:$0xf] %vm2398_vm9, %v3064_v47  ;;  %v2888_v60 = vsel %vm13740_vm8, %v2879_v2, %v13763_v58 }
 0x116   : > { %2752 = vrot.lane.b32.xlu0 %v2723_v13, %s12826_s6  ;;  %v3038_v63 = vld [vmem:[%s13555_s16 + $0x34] sm:$0xf]  ;;  %v3070_v0 = vsel %vm13860_vm12, %v3068_v48, %v3069_v40  ;;  %v3073_v1 = vsel %vm13860_vm12, %v3071_v51, %v3072_v44  ;;  %v3077_v13 = vrot.slane %v3075_v52, 4  ;;  %3119 = vst.msk [vmem:[#allocation2 + $0x14] sm:$0xf] %vm2398_vm9, %v3067_v56  ;;  %v3084_v50 = vrot.slane %v3034_v33, 6 }
 0x117   : > { %v3076_v36 = vsel %vm13860_vm12, %v3074_v59, %v3075_v52  ;;  %v3080_v49 = vrot.slane %v3078_v62, 4  ;;  %v3087_v11 = vrot.slane %v3035_v42, 6  ;;  %3120 = vst.msk [vmem:[#allocation2 + $0x1c] sm:$0xf] %vm2398_vm9, %v3070_v0  ;;  %3121 = vst.msk [vmem:[#allocation2 + $0x24] sm:$0xf] %vm2398_vm9, %v3073_v1  ;;  %v2917_v48 = vor.u32 %v13857_v27, %v13855_v25 }
 0x118   : > { %2754 = vrot.lane.b32.xlu1 %v13783_v26, %s12826_s6  ;;  %v3081_v26 = vrot.slane %v3033_v28, 6  ;;  %v3079_v22 = vsel %vm13860_vm12, %v3077_v13, %v3078_v62  ;;  %v3090_v3 = vrot.slane %v3036_v46, 6  ;;  %v3093_v4 = vrot.slane %v3037_v54, 6  ;;  %3122 = vst.msk [vmem:[#allocation2 + $0x2c] sm:$0xf] %vm2398_vm9, %v3076_v36 }
 0x119   : > { %v2806_v8 = vld [vmem:[%s13555_s16 + $0x34] sm:$0xf]  ;;  %v3086_v15 = vrot.slane %v3084_v50, 4  ;;  %v3089_v16 = vrot.slane %v3087_v11, 4  ;;  %v3096_v12 = vrot.slane %v3038_v63, 6  ;;  %v2923_v42 = vrot.slane %v2921_v41, 5 }
 0x11a   : > { %2988 = vrot.lane.b32.xlu0 %v2959_v23, %s12827_s7  ;;  %v3039_v23 = vld [vmem:[%s13555_s16 + $0x38] sm:$0xf]  ;;  %v3083_v55 = vrot.slane %v3081_v26, 4  ;;  %v3082_v9 = vsel %vm13860_vm12, %v3080_v49, %v3081_v26  ;;  %3123 = vst.msk [vmem:[#allocation2 + $0x34] sm:$0xf] %vm2398_vm9, %v3079_v22  ;;  %v3095_v19 = vrot.slane %v3093_v4, 4 }
 0x11b   : > { %v3099_v20 = vrot.slane %v3039_v23, 6  ;;  %v3131_v21 = vld [vmem:[#allocation2 + $0x74] sm:$0x3]  ;;  %3124 = vst.msk [vmem:[#allocation2 + $0x3c] sm:$0xf] %vm2398_vm9, %v3082_v9  ;;  %v3091_v28 = vsel %vm13860_vm12, %v3089_v16, %v3090_v3  ;;  %v3098_v32 = vrot.slane %v3096_v12, 4 }
 0x11c   : > { %2960 = vrot.lane.b32.xlu1 %v2828_v35, %s12827_s7  ;;  %v3085_v30 = vsel %vm13860_vm12, %v3083_v55, %v3084_v50  ;;  %v3092_v35 = vrot.slane %v3090_v3, 4  ;;  %v2397_v33 = vld [vmem:[%s13555_s16 + $0x38] sm:$0x3]  ;;  %v2416_v37 = vld [vmem:[#allocation2 + $0x70] sm:$0x3]  ;;  %v3097_v39 = vsel %vm13860_vm12, %v3095_v19, %v3096_v12  ;;  %v2934_v43 = vshll.u32 %v13848_v17, 16 }
 0x11d   : > { %3125 = vst.msk [vmem:[#allocation2 + $0x44] sm:$0xf] %vm2398_vm9, %v3085_v30  ;;  %v3101_v40 = vrot.slane %v3099_v20, 4  ;;  %vm2414_vm14 = vsmask.f32 1280  ;;  %v3100_v44 = vsel %vm13860_vm12, %v3098_v32, %v3099_v20  ;;  %v2941_v46 = vshrl.u32 %v2806_v8, 16 }
 0x11e   : > { %2962 = vrot.lane.b32.xlu0 %v13791_v34, %s12827_s7  ;;  %v3088_v34 = vsel %vm13860_vm12, %v3086_v15, %v3087_v11  ;;  %v3094_v38 = vsel %vm13860_vm12, %v3092_v35, %v3093_v4  ;;  %3127 = vst.msk [vmem:[#allocation2 + $0x54] sm:$0xf] %vm2398_vm9, %v3091_v28  ;;  %vm2415_vm15 = vmand %vm2413_vm13, %vm2414_vm14  ;;  %v2933_v57 = vrot.slane %v2931_v53, 5  ;;  %vm2375_vm0 = vcmask 1043458   ;;  %v2378_v45 = vld [vmem:[#allocation3 + $0x30] sm:$0xc] }
 0x11f   : > { %3126 = vst.msk [vmem:[#allocation2 + $0x4c] sm:$0xf] %vm2398_vm9, %v3088_v34  ;;  %3128 = vst.msk [vmem:[#allocation2 + $0x5c] sm:$0xf] %vm2398_vm9, %v3094_v38  ;;  %v2417_v47 = vsel %vm2415_vm15, %v2397_v33, %v2416_v37  ;;  %v3132_v41 = vsel %vm2415_vm15, %v3101_v40, %v3131_v21  ;;  %vm2376_vm1 = vsmask.f32 7946 }
 0x120   : > { %2964 = vrot.lane.b32.xlu1 %v13803_v5, %s12827_s7  ;;  %v2926_v5 = vrot.slane %v2924_v29, 6  ;;  %3129 = vst.msk [vmem:[#allocation2 + $0x64] sm:$0xf] %vm2398_vm9, %v3097_v39  ;;  %3130 = vst.msk [vmem:[#allocation2 + $0x6c] sm:$0xf] %vm2398_vm9, %v3100_v44  ;;  %v2899_v29 = vrot.slane %v13828_v14, 4 }
 0x121   : > { %2418 = vst [vmem:[#allocation2 + $0x70] sm:$0x3] %v2417_v47  ;;  %3133 = vst [vmem:[#allocation2 + $0x74] sm:$0x3] %v3132_v41  ;;  %v2936_v58 = vrot.slane %v2934_v43, 6  ;;  %v2943_v51 = vrot.slane %v2941_v46, 5 }
 0x122   : > { %2966 = vrot.lane.b32.xlu0 %v13807_v6, %s12827_s7  ;;  %v2944_v6 = vshll.u32 %v2806_v8, 16  ;;  %v2927_v2 = vor.u32 %v2926_v5, %v2923_v42  ;;  %vm2377_vm2 = vmand %vm2375_vm0, %vm2376_vm1  ;;  %v12828_v25 = vmov 0   ;;  %v2919_v17 = vrot.slane %v2917_v48, 4 }
 0x123   : > { %v2379_v14 = vsel %vm2377_vm2, 0, %v2378_v45  ;;  %2372 = vst [vmem:[#allocation3] sm:$0xf] %v12828_v25  ;;  %2373 = vst [vmem:[#allocation3 + $0x4] sm:$0xf] %v12828_v25  ;;  %v2937_v54 = vor.u32 %v2936_v58, %v2933_v57  ;;  %vm2631_vm3 = vcmask 519424  }
 0x124   : > { %2968 = vrot.lane.b32.xlu1 %v13812_v7, %s12827_s7  ;;  %v2909_v7 = vrot.slane %v13853_v18, 4  ;;  %v2946_v52 = vrot.slane %v2944_v6, 6  ;;  %2374 = vst [vmem:[#allocation3 + $0x8] sm:$0x1] %v12828_v25  ;;  %2380 = vst [vmem:[#allocation3 + $0x30] sm:$0xc] %v2379_v14  ;;  %v2928_v59 = vsel %vm13740_vm8, %v2919_v17, %v2927_v2 }
 0x125   : > { %2381 = vst [vmem:[#allocation3 + $0x34] sm:$0xf] %v12828_v25  ;;  %2382 = vst [vmem:[#allocation3 + $0x38] sm:$0xf] %v12828_v25  ;;  %v2929_v53 = vrot.slane %v2927_v2, 4  ;;  %v2939_v62 = vrot.slane %v2937_v54, 4 }
 0x126   : > { %2970 = vrot.lane.b32.xlu0 %v13824_v10, %s12827_s7  ;;  %v2908_v10 = vsel %vm13740_vm8, %v2899_v29, %v13853_v18  ;;  %v2918_v27 = vsel %vm13740_vm8, %v2909_v7, %v2917_v48  ;;  %v2947_v56 = vor.u32 %v2946_v52, %v2943_v51  ;;  %vm2646_vm4 = vcmask 517376  }
 0x127   : > { %v2938_v63 = vsel %vm13740_vm8, %v2929_v53, %v2937_v54  ;;  %vm2647_vm5 = vmand %vm2646_vm4, %vm2414_vm14  ;;  %vm2788_vm6 = vcmask 779776   ;;  %vm3020_vm9 = vcmask 1042176   ;;  %vm3005_vm11 = vcmask 1044224  }
 0x128   : > { %2972 = vrot.lane.b32.xlu1 %v2888_v60, %s12827_s7  ;;  %v2949_v0 = vrot.slane %v2947_v56, 4  ;;  %v2948_v18 = vsel %vm13740_vm8, %v2939_v62, %v2947_v56  ;;  %v2648_v50 = vld [vmem:[#allocation2 + $0x70] sm:$0x3]  ;;  %vm2789_vm7 = vmand %vm2788_vm6, %vm2414_vm14 }
 0x129   : > { %vm3021_vm10 = vmand %vm3020_vm9, %vm2414_vm14 }
 0x12a   : > { %2974 = vrot.lane.b32.xlu0 %v2898_v31, %s12827_s7  ;;  %v2958_v1 = vsel %vm13740_vm8, %v2949_v0, %v13718_v61  ;;  %vm2773_vm8 = vcmask 781824  }
 0x12c   : > { %2976 = vrot.lane.b32.xlu1 %v2908_v10, %s12827_s7 }
 0x12e   : > { %2978 = vrot.lane.b32.xlu0 %v2918_v27, %s12827_s7 }
 0x130   : > { %2980 = vrot.lane.b32.xlu1 %v2928_v59, %s12827_s7 }
 0x132   : > { %2982 = vrot.lane.b32.xlu0 %v2938_v63, %s12827_s7 }
 0x134   : > { %2984 = vrot.lane.b32.xlu1 %v2948_v18, %s12827_s7 }
 0x136   : > { %2986 = vrot.lane.b32.xlu0 %v2958_v1, %s12827_s7 }
 0x150   : > { %v2587_v13 = vpop.permute.xlu0 %2586 }
 0x151   : > { %2632 = vst.msk [vmem:[#allocation2] sm:$0xf] %vm2631_vm3, %v2587_v13 }
 0x152   : > { %v2591_v26 = vpop.permute.xlu1 %2590 }
 0x153   : > { %2634 = vst.msk [vmem:[#allocation2 + $0x10] sm:$0xf] %vm2631_vm3, %v2591_v26 }
 0x154   : > { %v2589_v23 = vpop.permute.xlu0 %2588 }
 0x155   : > { %2633 = vst.msk [vmem:[#allocation2 + $0x8] sm:$0xf] %vm2631_vm3, %v2589_v23 }
 0x156   : > { %v2593_v36 = vpop.permute.xlu1 %2592 }
 0x157   : > { %2635 = vst.msk [vmem:[#allocation2 + $0x18] sm:$0xf] %vm2631_vm3, %v2593_v36 }
 0x158   : > { %v2595_v49 = vpop.permute.xlu0 %2594 }
 0x159   : > { %2636 = vst.msk [vmem:[#allocation2 + $0x20] sm:$0xf] %vm2631_vm3, %v2595_v49 }
 0x15a   : > { %v2597_v61 = vpop.permute.xlu1 %2596 }
 0x15b   : > { %2637 = vst.msk [vmem:[#allocation2 + $0x28] sm:$0xf] %vm2631_vm3, %v2597_v61 }
 0x15c   : > { %v2599_v24 = vpop.permute.xlu0 %2598 }
 0x15d   : > { %2638 = vst.msk [vmem:[#allocation2 + $0x30] sm:$0xf] %vm2631_vm3, %v2599_v24 }
 0x15e   : > { %v2615_v11 = vpop.permute.xlu1 %2614 }
 0x15f   : > { %v2649_v22 = vsel %vm2647_vm5, %v2615_v11, %v2648_v50 }
 0x160   : > { %v2601_v55 = vpop.permute.xlu0 %2600  ;;  %2650 = vst [vmem:[#allocation2 + $0x70] sm:$0x3] %v2649_v22 }
 0x161   : > { %2639 = vst.msk [vmem:[#allocation2 + $0x38] sm:$0xf] %vm2631_vm3, %v2601_v55 }
 0x162   : > { %v2603_v3 = vpop.permute.xlu1 %2602 }
 0x163   : > { %2640 = vst.msk [vmem:[#allocation2 + $0x40] sm:$0xf] %vm2631_vm3, %v2603_v3 }
 0x164   : > { %v2605_v4 = vpop.permute.xlu0 %2604 }
 0x165   : > { %2641 = vst.msk [vmem:[#allocation2 + $0x48] sm:$0xf] %vm2631_vm3, %v2605_v4 }
 0x166   : > { %v2757_v8 = vpop.permute.xlu1 %2756 }
 0x167   : > { %v2790_v9 = vld [vmem:[#allocation2 + $0x70] sm:$0x3] }
 0x168   : > { %v2607_v15 = vpop.permute.xlu0 %2606  ;;  %v2791_v16 = vsel %vm2789_vm7, %v2757_v8, %v2790_v9 }
 0x169   : > { %2642 = vst.msk [vmem:[#allocation2 + $0x50] sm:$0xf] %vm2631_vm3, %v2607_v15  ;;  %2792 = vst [vmem:[#allocation2 + $0x70] sm:$0x3] %v2791_v16 }
 0x16a   : > { %v2609_v12 = vpop.permute.xlu1 %2608 }
 0x16b   : > { %2643 = vst.msk [vmem:[#allocation2 + $0x58] sm:$0xf] %vm2631_vm3, %v2609_v12 }
 0x16c   : > { %v2611_v30 = vpop.permute.xlu0 %2610 }
 0x16d   : > { %2644 = vst.msk [vmem:[#allocation2 + $0x60] sm:$0xf] %vm2631_vm3, %v2611_v30 }
 0x16e   : > { %v2613_v35 = vpop.permute.xlu1 %2612 }
 0x16f   : > { %2645 = vst.msk [vmem:[#allocation2 + $0x68] sm:$0xf] %vm2631_vm3, %v2613_v35 }
 0x170   : > { %v2729_v19 = vpop.permute.xlu0 %2728  ;;  %v3022_v46 = vld [vmem:[#allocation2 + $0x70] sm:$0x3] }
 0x171   : > { %2774 = vst.msk [vmem:[#allocation2] sm:$0xf] %vm2773_vm8, %v2729_v19 }
 0x172   : > { %v2731_v20 = vpop.permute.xlu1 %2730 }
 0x173   : > { %2775 = vst.msk [vmem:[#allocation2 + $0x8] sm:$0xf] %vm2773_vm8, %v2731_v20 }
 0x174   : > { %v2733_v21 = vpop.permute.xlu0 %2732 }
 0x175   : > { %2776 = vst.msk [vmem:[#allocation2 + $0x10] sm:$0xf] %vm2773_vm8, %v2733_v21 }
 0x176   : > { %v2735_v34 = vpop.permute.xlu1 %2734 }
 0x177   : > { %2777 = vst.msk [vmem:[#allocation2 + $0x18] sm:$0xf] %vm2773_vm8, %v2735_v34 }
 0x178   : > { %v2737_v28 = vpop.permute.xlu0 %2736 }
 0x179   : > { %2778 = vst.msk [vmem:[#allocation2 + $0x20] sm:$0xf] %vm2773_vm8, %v2737_v28 }
 0x17a   : > { %v2739_v32 = vpop.permute.xlu1 %2738 }
 0x17b   : > { %2779 = vst.msk [vmem:[#allocation2 + $0x28] sm:$0xf] %vm2773_vm8, %v2739_v32 }
 0x17c   : > { %v2741_v33 = vpop.permute.xlu0 %2740 }
 0x17d   : > { %2780 = vst.msk [vmem:[#allocation2 + $0x30] sm:$0xf] %vm2773_vm8, %v2741_v33 }
 0x17e   : > { %v2743_v37 = vpop.permute.xlu1 %2742 }
 0x17f   : > { %2781 = vst.msk [vmem:[#allocation2 + $0x38] sm:$0xf] %vm2773_vm8, %v2743_v37 }
 0x180   : > { %v2745_v38 = vpop.permute.xlu0 %2744 }
 0x181   : > { %2782 = vst.msk [vmem:[#allocation2 + $0x40] sm:$0xf] %vm2773_vm8, %v2745_v38 }
 0x182   : > { %v2747_v39 = vpop.permute.xlu1 %2746 }
 0x183   : > { %2783 = vst.msk [vmem:[#allocation2 + $0x48] sm:$0xf] %vm2773_vm8, %v2747_v39 }
 0x184   : > { %v2749_v40 = vpop.permute.xlu0 %2748 }
 0x185   : > { %2784 = vst.msk [vmem:[#allocation2 + $0x50] sm:$0xf] %vm2773_vm8, %v2749_v40 }
 0x186   : > { %v2751_v42 = vpop.permute.xlu1 %2750 }
 0x187   : > { %2785 = vst.msk [vmem:[#allocation2 + $0x58] sm:$0xf] %vm2773_vm8, %v2751_v42 }
 0x188   : > { %v2753_v5 = vpop.permute.xlu0 %2752 }
 0x189   : > { %2786 = vst.msk [vmem:[#allocation2 + $0x60] sm:$0xf] %vm2773_vm8, %v2753_v5 }
 0x18a   : > { %v2755_v43 = vpop.permute.xlu1 %2754 }
 0x18b   : > { %2787 = vst.msk [vmem:[#allocation2 + $0x68] sm:$0xf] %vm2773_vm8, %v2755_v43 }
 0x18c   : > { %v2989_v44 = vpop.permute.xlu0 %2988 }
 0x18d   : > { %v3023_v6 = vsel %vm3021_vm10, %v2989_v44, %v3022_v46 }
 0x18e   : > { %3024 = vst [vmem:[#allocation2 + $0x70] sm:$0x3] %v3023_v6  ;;  %v2961_v47 = vpop.permute.xlu1 %2960 }
 0x18f   : > { %3006 = vst.msk [vmem:[#allocation2] sm:$0xf] %vm3005_vm11, %v2961_v47 }
 0x190   : > { %v2963_v41 = vpop.permute.xlu0 %2962 }
 0x191   : > { %3007 = vst.msk [vmem:[#allocation2 + $0x8] sm:$0xf] %vm3005_vm11, %v2963_v41 }
 0x192   : > { %v2965_v60 = vpop.permute.xlu1 %2964 }
 0x193   : > { %3008 = vst.msk [vmem:[#allocation2 + $0x10] sm:$0xf] %vm3005_vm11, %v2965_v60 }
 0x194   : > { %v2967_v31 = vpop.permute.xlu0 %2966 }
 0x195   : > { %3009 = vst.msk [vmem:[#allocation2 + $0x18] sm:$0xf] %vm3005_vm11, %v2967_v31 }
 0x196   : > { %v2969_v29 = vpop.permute.xlu1 %2968 }
 0x197   : > { %3010 = vst.msk [vmem:[#allocation2 + $0x20] sm:$0xf] %vm3005_vm11, %v2969_v29 }
 0x198   : > { %v2971_v48 = vpop.permute.xlu0 %2970 }
 0x199   : > { %3011 = vst.msk [vmem:[#allocation2 + $0x28] sm:$0xf] %vm3005_vm11, %v2971_v48 }
 0x19a   : > { %v2973_v7 = vpop.permute.xlu1 %2972 }
 0x19b   : > { %3012 = vst.msk [vmem:[#allocation2 + $0x30] sm:$0xf] %vm3005_vm11, %v2973_v7 }
 0x19c   : > { %v2975_v57 = vpop.permute.xlu0 %2974 }
 0x19d   : > { %3013 = vst.msk [vmem:[#allocation2 + $0x38] sm:$0xf] %vm3005_vm11, %v2975_v57 }
 0x19e   : > { %v2977_v2 = vpop.permute.xlu1 %2976 }
 0x19f   : > { %3014 = vst.msk [vmem:[#allocation2 + $0x40] sm:$0xf] %vm3005_vm11, %v2977_v2 }
 0x1a0   : > { %v2979_v58 = vpop.permute.xlu0 %2978 }
 0x1a1   : > { %3015 = vst.msk [vmem:[#allocation2 + $0x48] sm:$0xf] %vm3005_vm11, %v2979_v58 }
 0x1a2   : > { %v2981_v51 = vpop.permute.xlu1 %2980 }
 0x1a3   : > { %3016 = vst.msk [vmem:[#allocation2 + $0x50] sm:$0xf] %vm3005_vm11, %v2981_v51 }
 0x1a4   : > { %v2983_v52 = vpop.permute.xlu0 %2982 }
 0x1a5   : > { %3017 = vst.msk [vmem:[#allocation2 + $0x58] sm:$0xf] %vm3005_vm11, %v2983_v52 }
 0x1a6   : > { %v2985_v45 = vpop.permute.xlu1 %2984 }
 0x1a7   : > { %3018 = vst.msk [vmem:[#allocation2 + $0x60] sm:$0xf] %vm3005_vm11, %v2985_v45 }
 0x1a8   : > { %v2987_v14 = vpop.permute.xlu0 %2986 }
 0x1a9   : > { %3019 = vst.msk [vmem:[#allocation2 + $0x68] sm:$0xf] %vm3005_vm11, %v2987_v14 }
 0x1aa PF: > { %v12377_v25 = vld [vmem:[%s13562_s28 + $0x50] sm:$0xff]   ;;  %v12829_v10 = vmov 0   ;;  %v12378_v17 = vld [vmem:[%s13562_s28 + $0x58] sm:$0xff]   ;;  %v12379_v27 = vld [vmem:[%s13562_s28 + $0x60] sm:$0xff]   ;;  %vm3299_vm12 = vcmask 261120   ;;  %vm4862_vm1 = vcmask 1040384  }
 0x1ab   : > { %3318 = vmatprep.subr.bf16.mxu0 %v12829_v10  ;;  %v12380_v53 = vld [vmem:[%s13562_s28 + $0x68] sm:$0xff]   ;;  %v12381_v62 = vld [vmem:[%s13562_s28 + $0x70] sm:$0xff]   ;;  %v12382_v63 = vld [vmem:[%s13562_s28 + $0x78] sm:$0xff]   ;;  %vm4863_vm2 = vcmask 1044484  }
 0x1ac   : > { %3319 = vmatpush1.bf16.msra.mxu0 %v12377_v25  ;;  %v14036_v54 = vld [vmem:[#allocation2 + $0x8] sm:$0xff]  ;;  %v14038_v56 = vld [vmem:[#allocation2 + $0x10] sm:$0xff]  ;;  %v14055_v26 = vld [vmem:[#allocation2 + $0x18] sm:$0xff] }
 0x1ad   : > { %3320 = vmatprep.subr.bf16.mxu0 %v12829_v10  ;;  %v10039_v59 = vcombine.high %v14036_v54, %v14038_v56  ;;  %v12383_v0 = vld [vmem:[%s13562_s28 + $0x80] sm:$0xff]   ;;  %v12384_v18 = vld [vmem:[%s13562_s28 + $0x88] sm:$0xff]   ;;  %v12385_v1 = vld [vmem:[%s13562_s28 + $0x90] sm:$0xff]   ;;  %v10038_v36 = vcombine.low %v14036_v54, %v14038_v56  ;;  %v10069_v46 = vcombine.high %v14038_v56, %v14055_v26  ;;  %v10068_v47 = vcombine.low %v14038_v56, %v14055_v26 }
 0x1ae   : > { %v12386_v13 = vld [vmem:[%s13562_s28 + $0x98] sm:$0xff]   ;;  %v12389_v49 = vld [vmem:[%s13562_s28] sm:$0xff]   ;;  %v12390_v24 = vld [vmem:[%s13562_s28 + $0x8] sm:$0xff]  }
 0x1af   : > { %10060 = vmatprep.mubr.msk.bf16.mxu0 %vm3299_vm12, %v10039_v59  ;;  %v14058_v23 = vld [vmem:[#allocation2 + $0x20] sm:$0xff]  ;;  %v14071_v50 = vld [vmem:[#allocation2 + $0x28] sm:$0xff]  ;;  %v14073_v11 = vld [vmem:[#allocation2 + $0x30] sm:$0xff] }
 0x1b0   : > { %3321 = vmatpush1.bf16.msra.mxu0 %v12378_v17  ;;  %v14065_v61 = vcombine.high %v14055_v26, %v14058_v23  ;;  %v12393_v22 = vld [vmem:[%s13562_s28 + $0x10] sm:$0xff]   ;;  %v14079_v55 = vcombine.low %v14055_v26, %v14058_v23  ;;  %v14083_v3 = vcombine.high %v14071_v50, %v14073_v11  ;;  %v12396_v4 = vld [vmem:[%s13562_s28 + $0x18] sm:$0xff]   ;;  %v14097_v15 = vcombine.low %v14071_v50, %v14073_v11  ;;  %v12397_v16 = vld [vmem:[%s13562_s28 + $0x20] sm:$0xff]  }
 0x1b1   : > { %3322 = vmatprep.subr.bf16.mxu0 %v12829_v10  ;;  %v14088_v8 = vld [vmem:[#allocation2 + $0x38] sm:$0xff]  ;;  %v14093_v9 = vld [vmem:[#allocation2 + $0x40] sm:$0xff]  ;;  %v14110_v35 = vld [vmem:[#allocation2 + $0x48] sm:$0xff]  ;;  %v14154_v60 = vcombine.high %v14058_v23, %v14071_v50  ;;  %v14163_v29 = vcombine.low %v14058_v23, %v14071_v50 }
 0x1b2   : > { %v14102_v12 = vcombine.high %v14088_v8, %v14093_v9  ;;  %v12400_v30 = vld [vmem:[%s13562_s28 + $0x28] sm:$0xff]   ;;  %v14116_v20 = vcombine.low %v14088_v8, %v14093_v9  ;;  %v12401_v21 = vld [vmem:[%s13562_s28 + $0x30] sm:$0xff]   ;;  %v12404_v28 = vld [vmem:[%s13562_s28 + $0x38] sm:$0xff]   ;;  %v14168_v7 = vcombine.high %v14073_v11, %v14088_v8  ;;  %v14178_v2 = vcombine.low %v14073_v11, %v14088_v8 }
 0x1b3   : > { %v14112_v19 = vld [vmem:[#allocation2 + $0x50] sm:$0xff]  ;;  %v3166_v32 = vld [vmem:[#allocation2 + $0x58] sm:$0x33]  ;;  %v3134_v40 = vld [vmem:[#allocation2] sm:$0xff]  ;;  %v14183_v51 = vcombine.high %v14093_v9, %v14110_v35  ;;  %v14193_v14 = vcombine.low %v14093_v9, %v14110_v35 }
 0x1b4   : > { %3323 = vmatpush1.bf16.msra.mxu0 %v12379_v27  ;;  %v14121_v34 = vcombine.high %v14110_v35, %v14112_v19  ;;  %v14131_v33 = vcombine.low %v14110_v35, %v14112_v19  ;;  %v10049_v37 = vcombine.high %v3166_v32, %v3166_v32  ;;  %v12407_v38 = vld [vmem:[%s13562_s28 + $0x40] sm:$0xff]   ;;  %v12408_v39 = vld [vmem:[%s13562_s28 + $0x48] sm:$0xff]   ;;  %v10048_v42 = vcombine.low %v3166_v32, %v3166_v32  ;;  %v12415_v41 = vld [vmem:[%s13562_s28 + $0xb0] sm:$0xff]  }
 0x1b5   : > { %3324 = vmatprep.subr.bf16.mxu0 %v12829_v10  ;;  %v10067_v5 = vcombine.high %v3134_v40, %v14036_v54  ;;  %v10066_v43 = vcombine.low %v3134_v40, %v14036_v54  ;;  %v12411_v44 = vld [vmem:[%s13562_s28 + $0xa0] sm:$0xff]   ;;  %v12412_v6 = vld [vmem:[%s13562_s28 + $0xa8] sm:$0xff]   ;;  %v12418_v31 = vld [vmem:[%s13562_s28 + $0xb8] sm:$0xff]  }
 0x1b6   : > { %v12419_v48 = vld [vmem:[%s13562_s28 + $0xc0] sm:$0xff]   ;;  %v12422_v57 = vld [vmem:[%s13562_s28 + $0xc8] sm:$0xff]   ;;  %v12423_v58 = vld [vmem:[%s13562_s28 + $0xd0] sm:$0xff]  }
 0x1b7   : > { %v12426_v52 = vld [vmem:[%s13562_s28 + $0xd8] sm:$0xff]   ;;  %v12429_v17 = vld [vmem:[%s13562_s28 + $0xe0] sm:$0xff]   ;;  %v12430_v27 = vld [vmem:[%s13562_s28 + $0xe8] sm:$0xff]  }
 0x1b8   : > { %3325 = vmatpush1.bf16.msra.mxu0 %v12380_v53  ;;  %v3144_v45 = vld [vmem:[#allocation2 + $0x50] sm:$0x33]  ;;  %v3590_v23 = vld [vmem:[#allocation2 + $0x60] sm:$0x33]  ;;  %vm14496_vm8 = vmor %vm4862_vm1, %vm4863_vm2 }
 0x1b9   : > { %3326 = vmatprep.subr.bf16.mxu0 %v12829_v10  ;;  %v10077_v25 = vcombine.high %v3144_v45, %v3144_v45  ;;  %v10076_v53 = vcombine.low %v3144_v45, %v3144_v45  ;;  %v12431_v54 = vld [vmem:[%s13562_s28 + $0xf0] sm:$0xff]   ;;  %v12432_v56 = vld [vmem:[%s13562_s28 + $0xf8] sm:$0xff]   ;;  %v12433_v59 = vld [vmem:[%s13562_s28 + $0x100] sm:$0xff]   ;;  %v10124_v11 = vcombine.low %v3590_v23, %v3590_v23 }
 0x1ba   : > { %v12440_v26 = vld [vmem:[%s13562_s28 + $0x128] sm:$0xff]   ;;  %v12444_v50 = vld [vmem:[%s13562_s28 + $0x138] sm:$0xff]   ;;  %v12447_v8 = vld [vmem:[%s13562_s28 + $0x150] sm:$0xff]  }
 0x1bb   : > { %v3841_v9 = vld [vmem:[#allocation2 + $0x60] sm:$0xff] }
 0x1bc   : > { %3327 = vmatpush1.bf16.msra.mxu0 %v12381_v62  ;;  %v12434_v62 = vld [vmem:[%s13562_s28 + $0x108] sm:$0xff]  }
 0x1bd   : > { %3328 = vmatprep.subr.bf16.mxu0 %v12829_v10 }
 0x1c0   : > { %3329 = vmatpush1.bf16.msra.mxu0 %v12382_v63  ;;  %v12435_v63 = vld [vmem:[%s13562_s28 + $0x110] sm:$0xff]  }
 0x1c1   : > { %3330 = vmatprep.subr.bf16.mxu0 %v12829_v10 }
 0x1c4   : > { %3331 = vmatpush1.bf16.msra.mxu0 %v12383_v0  ;;  %v12436_v0 = vld [vmem:[%s13562_s28 + $0x118] sm:$0xff]  }
 0x1c5   : > { %3332 = vmatprep.subr.bf16.mxu0 %v12829_v10 }
 0x1c8   : > { %3333 = vmatpush1.bf16.msra.mxu0 %v12384_v18  ;;  %v14222_v18 = vld [vmem:[#allocation2 + $0x58] sm:$0xff] }
 0x1c9   : > { %3334 = vmatprep.subr.bf16.mxu0 %v12829_v10  ;;  %v10170_v35 = vcombine.low %v14222_v18, %v3841_v9 }
 0x1cc   : > { %3335 = vmatpush1.bf16.msra.mxu0 %v12385_v1  ;;  %v12437_v1 = vld [vmem:[%s13562_s28 + $0x120] sm:$0xff]  }
 0x1cd   : > { %3336 = vmatprep.subr.bf16.mxu0 %v12829_v10 }
 0x1d0   : > { %3337 = vmatpush1.bf16.msra.mxu0 %v12386_v13  ;;  %v14227_v13 = vcombine.high %v14112_v19, %v14222_v18 }
 0x1d1   : > { %3500 = vmatprep.subr.bf16.mxu0 %v12829_v10 }
 0x1d3   : > { %3351 = vmatmul.mubr.bf16.vlgmr.msra.gmra.mrb[0].mxu0 %v10038_v36  ;;  %v14237_v36 = vcombine.low %v14112_v19, %v14222_v18 }
 0x1d4   : > { %3501 = vmatpush1.bf16.msra.mxu0 %v12389_v49  ;;  %10061 = vmatprep.mubr.msk.bf16.mxu0 %vm3299_vm12, %v14065_v61  ;;  %v10125_v49 = vcombine.high %v3590_v23, %v3590_v23 }
 0x1d5   : > { %3502 = vmatprep.subr.bf16.mxu0 %v12829_v10 }
 0x1d8   : > { %3503 = vmatpush1.bf16.msra.mxu0 %v12390_v24  ;;  %v12443_v24 = vld [vmem:[%s13562_s28 + $0x130] sm:$0xff]  }
 0x1d9   : > { %3504 = vmatprep.subr.bf16.mxu0 %v12829_v10 }
 0x1db   : > { %3359 = vmatmul.mubr.bf16.gmra.mrb[4].mxu0 %v14079_v55 }
 0x1dc   : > { %3505 = vmatpush1.bf16.msra.mxu0 %v12393_v22  ;;  %10062 = vmatprep.mubr.msk.bf16.mxu0 %vm3299_vm12, %v14083_v3  ;;  %v12445_v22 = vld [vmem:[%s13562_s28 + $0x140] sm:$0xff]  }
 0x1dd   : > { %3506 = vmatprep.subr.bf16.mxu0 %v12829_v10 }
 0x1e0   : > { %3507 = vmatpush1.bf16.msra.mxu0 %v12396_v4  ;;  %v12446_v4 = vld [vmem:[%s13562_s28 + $0x148] sm:$0xff]  }
 0x1e1   : > { %3508 = vmatprep.subr.bf16.mxu0 %v12829_v10 }
 0x1e3   : > { %3367 = vmatmul.mubr.bf16.gmra.mrb[8].mxu0 %v14097_v15 }
 0x1e4   : > { %3509 = vmatpush1.bf16.msra.mxu0 %v12397_v16  ;;  %10063 = vmatprep.mubr.msk.bf16.mxu0 %vm3299_vm12, %v14102_v12  ;;  %v10171_v16 = vcombine.high %v14222_v18, %v3841_v9 }
 0x1e5   : > { %3510 = vmatprep.subr.bf16.mxu0 %v12829_v10 }
 0x1e8   : > { %3511 = vmatpush1.bf16.msra.mxu0 %v12400_v30  ;;  %v3842_v30 = vld [vmem:[#allocation2 + $0x68] sm:$0x33] }
 0x1e9   : > { %3512 = vmatprep.subr.bf16.mxu0 %v12829_v10  ;;  %v10173_v19 = vcombine.high %v3842_v30, %v3842_v30 }
 0x1eb   : > { %3375 = vmatmul.mubr.bf16.gmra.mrb[12].mxu0 %v14116_v20 }
 0x1ec   : > { %3513 = vmatpush1.bf16.msra.mxu0 %v12401_v21  ;;  %10064 = vmatprep.mubr.msk.bf16.mxu0 %vm3299_vm12, %v14121_v34  ;;  %v12458_v21 = vld [vmem:[%s13562_s28 + $0x188] sm:$0xff]  }
 0x1ed   : > { %3514 = vmatprep.subr.bf16.mxu0 %v12829_v10 }
 0x1f0   : > { %3515 = vmatpush1.bf16.msra.mxu0 %v12404_v28 }
 0x1f1   : > { %3516 = vmatprep.subr.bf16.mxu0 %v12829_v10 }
 0x1f3   : > { %3383 = vmatmul.mubr.bf16.gmra.mrb[16].mxu0 %v14131_v33 }
 0x1f4   : > { %10065 = vmatprep.mubr.msk.bf16.mxu0 %vm3299_vm12, %v10049_v37  ;;  %3517 = vmatpush1.bf16.msra.mxu0 %v12407_v38 }
 0x1f5   : > { %3518 = vmatprep.subr.bf16.mxu0 %v12829_v10 }
 0x1f8   : > { %3519 = vmatpush1.bf16.msra.mxu0 %v12408_v39  ;;  %v4094_v39 = vld [vmem:[#allocation2 + $0x70] sm:$0x33] }
 0x1f9   : > { %3741 = vmatprep.subr.bf16.mxu0 %v12829_v10 }
 0x1fb   : > { %3391 = vmatmul.mubr.bf16.gmra.mrb[20].mxu0 %v10048_v42 }
 0x1fc   : > { %10088 = vmatprep.mubr.msk.bf16.mxu0 %vm3299_vm12, %v10067_v5 }
 0x203   : > { %3533 = vmatmul.mubr.bf16.vlgmr.msra.gmra.mrb[24].mxu0 %v10066_v43 }
 0x204   : > { %3742 = vmatpush1.bf16.msra.mxu0 %v12411_v44  ;;  %10089 = vmatprep.mubr.msk.bf16.mxu0 %vm3299_vm12, %v10069_v46  ;;  %v10221_v44 = vcombine.high %v4094_v39, %v4094_v39 }
 0x205   : > { %3743 = vmatprep.subr.bf16.mxu0 %v12829_v10 }
 0x208   : > { %3744 = vmatpush1.bf16.msra.mxu0 %v12412_v6 }
 0x209   : > { %3745 = vmatprep.subr.bf16.mxu0 %v12829_v10 }
 0x20b   : > { %3541 = vmatmul.mubr.bf16.gmra.mrb[28].mxu0 %v10068_v47 }
 0x20c   : > { %3746 = vmatpush1.bf16.msra.mxu0 %v12415_v41  ;;  %10090 = vmatprep.mubr.msk.bf16.mxu0 %vm3299_vm12, %v14154_v60  ;;  %v10220_v41 = vcombine.low %v4094_v39, %v4094_v39 }
 0x20d   : > { %3747 = vmatprep.subr.bf16.mxu0 %v12829_v10 }
 0x210   : > { %3748 = vmatpush1.bf16.msra.mxu0 %v12418_v31 }
 0x211   : > { %3749 = vmatprep.subr.bf16.mxu0 %v12829_v10 }
 0x213   : > { %3549 = vmatmul.mubr.bf16.gmra.mrb[32].mxu0 %v14163_v29 }
 0x214   : > { %3750 = vmatpush1.bf16.msra.mxu0 %v12419_v48  ;;  %10091 = vmatprep.mubr.msk.bf16.mxu0 %vm3299_vm12, %v14168_v7 }
 0x215   : > { %3751 = vmatprep.subr.bf16.mxu0 %v12829_v10 }
 0x218   : > { %3752 = vmatpush1.bf16.msra.mxu0 %v12422_v57 }
 0x219   : > { %3753 = vmatprep.subr.bf16.mxu0 %v12829_v10 }
 0x21b   : > { %3557 = vmatmul.mubr.bf16.gmra.mrb[36].mxu0 %v14178_v2 }
 0x21c   : > { %3754 = vmatpush1.bf16.msra.mxu0 %v12423_v58  ;;  %10092 = vmatprep.mubr.msk.bf16.mxu0 %vm3299_vm12, %v14183_v51 }
 0x21d   : > { %3755 = vmatprep.subr.bf16.mxu0 %v12829_v10 }
 0x220   : > { %3756 = vmatpush1.bf16.msra.mxu0 %v12426_v52 }
 0x221   : > { %3757 = vmatprep.subr.bf16.mxu0 %v12829_v10 }
 0x223   : > { %3565 = vmatmul.mubr.bf16.gmra.mrb[40].mxu0 %v14193_v14 }
 0x224   : > { %10093 = vmatprep.mubr.msk.bf16.mxu0 %vm3299_vm12, %v10077_v25  ;;  %3758 = vmatpush1.bf16.msra.mxu0 %v12429_v17 }
 0x225   : > { %3759 = vmatprep.subr.bf16.mxu0 %v12829_v10 }
 0x228   : > { %3760 = vmatpush1.bf16.msra.mxu0 %v12430_v27 }
 0x229   : > { %3993 = vmatprep.subr.bf16.mxu0 %v12829_v10 }
 0x22b   : > { %3573 = vmatmul.mubr.bf16.gmra.mrb[44].mxu0 %v10076_v53 }
 0x22c   : > { %10136 = vmatprep.mubr.msk.bf16.mxu0 %vm3299_vm12, %v10069_v46 }
 0x233   : > { %3774 = vmatmul.mubr.bf16.vlgmr.msra.gmra.mrb[48].mxu0 %v10068_v47 }
 0x234   : > { %3994 = vmatpush1.bf16.msra.mxu0 %v12431_v54  ;;  %10137 = vmatprep.mubr.msk.bf16.mxu0 %vm3299_vm12, %v14154_v60 }
 0x235   : > { %3995 = vmatprep.subr.bf16.mxu0 %v12829_v10 }
 0x238   : > { %3996 = vmatpush1.bf16.msra.mxu0 %v12432_v56 }
 0x239   : > { %3997 = vmatprep.subr.bf16.mxu0 %v12829_v10 }
 0x23b   : > { %3782 = vmatmul.mubr.bf16.gmra.mrb[52].mxu0 %v14163_v29 }
 0x23c   : > { %3998 = vmatpush1.bf16.msra.mxu0 %v12433_v59  ;;  %10138 = vmatprep.mubr.msk.bf16.mxu0 %vm3299_vm12, %v14168_v7 }
 0x23d   : > { %3999 = vmatprep.subr.bf16.mxu0 %v12829_v10 }
 0x240   : > { %4000 = vmatpush1.bf16.msra.mxu0 %v12434_v62 }
 0x241   : > { %4001 = vmatprep.subr.bf16.mxu0 %v12829_v10 }
 0x243   : > { %3790 = vmatmul.mubr.bf16.gmra.mrb[56].mxu0 %v14178_v2 }
 0x244   : > { %4002 = vmatpush1.bf16.msra.mxu0 %v12435_v63  ;;  %10139 = vmatprep.mubr.msk.bf16.mxu0 %vm3299_vm12, %v14183_v51 }
 0x245   : > { %4003 = vmatprep.subr.bf16.mxu0 %v12829_v10 }
 0x248   : > { %4004 = vmatpush1.bf16.msra.mxu0 %v12436_v0 }
 0x249   : > { %4005 = vmatprep.subr.bf16.mxu0 %v12829_v10 }
 0x24b   : > { %3798 = vmatmul.mubr.bf16.gmra.mrb[60].mxu0 %v14193_v14 }
 0x24c   : > { %4006 = vmatpush1.bf16.msra.mxu0 %v12437_v1  ;;  %10140 = vmatprep.mubr.msk.bf16.mxu0 %vm3299_vm12, %v14227_v13 }
 0x24d   : > { %4007 = vmatprep.subr.bf16.mxu0 %v12829_v10 }
 0x250   : > { %4008 = vmatpush1.bf16.msra.mxu0 %v12440_v26 }
 0x251   : > { %4009 = vmatprep.subr.bf16.mxu0 %v12829_v10 }
 0x253   : > { %3806 = vmatmul.mubr.bf16.gmra.mrb[64].mxu0 %v14237_v36 }
 0x254   : > { %10141 = vmatprep.mubr.msk.bf16.mxu0 %vm3299_vm12, %v10125_v49  ;;  %4010 = vmatpush1.bf16.msra.mxu0 %v12443_v24 }
 0x255   : > { %4011 = vmatprep.subr.bf16.mxu0 %v12829_v10 }
 0x258   : > { %4012 = vmatpush1.bf16.msra.mxu0 %v12444_v50 }
 0x259   : > { %4245 = vmatprep.subr.bf16.mxu0 %v12829_v10 }
 0x25b   : > { %3814 = vmatmul.mubr.bf16.gmra.mrb[68].mxu0 %v10124_v11 }
 0x25c   : > { %10184 = vmatprep.mubr.msk.bf16.mxu0 %vm3299_vm12, %v14065_v61  ;;  %v12448_v61 = vld [vmem:[%s13562_s28 + $0x158] sm:$0xff]  }
 0x263   : > { %4026 = vmatmul.mubr.bf16.vlgmr.msra.gmra.mrb[72].mxu0 %v14079_v55  ;;  %v12449_v55 = vld [vmem:[%s13562_s28 + $0x160] sm:$0xff]  }
 0x264   : > { %4246 = vmatpush1.bf16.msra.mxu0 %v12445_v22  ;;  %10185 = vmatprep.mubr.msk.bf16.mxu0 %vm3299_vm12, %v14083_v3  ;;  %v12450_v3 = vld [vmem:[%s13562_s28 + $0x168] sm:$0xff]  }
 0x265   : > { %4247 = vmatprep.subr.bf16.mxu0 %v12829_v10 }
 0x268   : > { %4248 = vmatpush1.bf16.msra.mxu0 %v12446_v4 }
 0x269   : > { %4249 = vmatprep.subr.bf16.mxu0 %v12829_v10 }
 0x26b   : > { %4034 = vmatmul.mubr.bf16.gmra.mrb[76].mxu0 %v14097_v15  ;;  %v12451_v15 = vld [vmem:[%s13562_s28 + $0x170] sm:$0xff]  }
 0x26c   : > { %4250 = vmatpush1.bf16.msra.mxu0 %v12447_v8  ;;  %10186 = vmatprep.mubr.msk.bf16.mxu0 %vm3299_vm12, %v14102_v12  ;;  %v12454_v12 = vld [vmem:[%s13562_s28 + $0x178] sm:$0xff]  }
 0x26d   : > { %4251 = vmatprep.subr.bf16.mxu0 %v12829_v10 }
 0x270   : > { %4252 = vmatpush1.bf16.msra.mxu0 %v12448_v61 }
 0x271   : > { %4253 = vmatprep.subr.bf16.mxu0 %v12829_v10 }
 0x273   : > { %4042 = vmatmul.mubr.bf16.gmra.mrb[80].mxu0 %v14116_v20  ;;  %v12457_v20 = vld [vmem:[%s13562_s28 + $0x180] sm:$0xff]  }
 0x274   : > { %4254 = vmatpush1.bf16.msra.mxu0 %v12449_v55  ;;  %10187 = vmatprep.mubr.msk.bf16.mxu0 %vm3299_vm12, %v14121_v34  ;;  %v10172_v34 = vcombine.low %v3842_v30, %v3842_v30 }
 0x275   : > { %4255 = vmatprep.subr.bf16.mxu0 %v12829_v10 }
 0x278   : > { %4256 = vmatpush1.bf16.msra.mxu0 %v12450_v3 }
 0x279   : > { %4257 = vmatprep.subr.bf16.mxu0 %v12829_v10 }
 0x27b   : > { %4050 = vmatmul.mubr.bf16.gmra.mrb[84].mxu0 %v14131_v33 }
 0x27c   : > { %4258 = vmatpush1.bf16.msra.mxu0 %v12451_v15  ;;  %10188 = vmatprep.mubr.msk.bf16.mxu0 %vm3299_vm12, %v10171_v16 }
 0x27d   : > { %4259 = vmatprep.subr.bf16.mxu0 %v12829_v10 }
 0x280   : > { %4260 = vmatpush1.bf16.msra.mxu0 %v12454_v12 }
 0x281   : > { %4261 = vmatprep.subr.bf16.mxu0 %v12829_v10 }
 0x283   : > { %4058 = vmatmul.mubr.bf16.gmra.mrb[88].mxu0 %v10170_v35 }
 0x284   : > { %10189 = vmatprep.mubr.msk.bf16.mxu0 %vm3299_vm12, %v10173_v19  ;;  %4262 = vmatpush1.bf16.msra.mxu0 %v12457_v20 }
 0x285   : > { %4263 = vmatprep.subr.bf16.mxu0 %v12829_v10  ;;  %v4093_v10 = vld [vmem:[#allocation2 + $0x68] sm:$0xff] }
 0x286   : > { %v10219_v37 = vcombine.high %v3841_v9, %v4093_v10  ;;  %v10218_v5 = vcombine.low %v3841_v9, %v4093_v10 }
 0x288   : > { %4264 = vmatpush1.bf16.msra.mxu0 %v12458_v21 }
 0x28b   : > { %4066 = vmatmul.mubr.bf16.gmra.mrb[92].mxu0 %v10172_v34 }
 0x28c   : > { %10232 = vmatprep.mubr.msk.bf16.mxu0 %vm3299_vm12, %v14154_v60 }
 0x293   : > { %4278 = vmatmul.mubr.bf16.vlgmr.msra.gmra.mrb[96].mxu0 %v14163_v29 }
 0x294   : > { %10233 = vmatprep.mubr.msk.bf16.mxu0 %vm3299_vm12, %v14168_v7 }
 0x29b   : > { %4286 = vmatmul.mubr.bf16.gmra.mrb[100].mxu0 %v14178_v2 }
 0x29c   : > { %10234 = vmatprep.mubr.msk.bf16.mxu0 %vm3299_vm12, %v14183_v51 }
 0x2a3   : > { %4294 = vmatmul.mubr.bf16.gmra.mrb[104].mxu0 %v14193_v14 }
 0x2a4   : > { %10235 = vmatprep.mubr.msk.bf16.mxu0 %vm3299_vm12, %v14227_v13 }
 0x2a6   : > { %v3352_v28 = vpop.f32.mrb[0].mxu0 }
 0x2a7   : > { %v3354_v32 = vpop.f32.mrb[1].mxu0 }
 0x2a8   : > { %v3355_v33 = vpop.f32.mrb[2].mxu0 }
 0x2a9   : > { %v3357_v38 = vpop.f32.mrb[3].mxu0 }
 0x2ab   : > { %4302 = vmatmul.mubr.bf16.gmra.mrb[108].mxu0 %v14237_v36 }
 0x2ac   : > { %10236 = vmatprep.mubr.msk.bf16.mxu0 %vm3299_vm12, %v10219_v37 }
 0x2ae   : > { %v3360_v40 = vpop.f32.mrb[4].mxu0 }
 0x2af   : > { %v3362_v42 = vpop.f32.mrb[5].mxu0 }
 0x2b0   : > { %v3363_v43 = vpop.f32.mrb[6].mxu0 }
 0x2b1   : > { %v3365_v46 = vpop.f32.mrb[7].mxu0 }
 0x2b3   : > { %4310 = vmatmul.mubr.bf16.gmra.mrb[112].mxu0 %v10218_v5 }
 0x2b4   : > { %10237 = vmatprep.mubr.msk.bf16.mxu0 %vm3299_vm12, %v10221_v44 }
 0x2b6   : > { %v3368_v6 = vpop.f32.mrb[8].mxu0 }
 0x2b7   : > { %v3370_v47 = vpop.f32.mrb[9].mxu0 }
 0x2b8   : > { %v3371_v60 = vpop.f32.mrb[10].mxu0 }
 0x2b9   : > { %v3373_v31 = vpop.f32.mrb[11].mxu0 }
 0x2bb   : > { %4318 = vmatmul.mubr.bf16.gmra.mrb[116].mxu0 %v10220_v41 }
 0x2be   : > { %v3376_v29 = vpop.f32.mrb[12].mxu0 }
 0x2bf   : > { %v3378_v48 = vpop.f32.mrb[13].mxu0 }
 0x2c0   : > { %v3379_v7 = vpop.f32.mrb[14].mxu0 }
 0x2c1   : > { %v3381_v57 = vpop.f32.mrb[15].mxu0 }
 0x2c6   : > { %v3384_v2 = vpop.f32.mrb[16].mxu0 }
 0x2c7   : > { %v3386_v58 = vpop.f32.mrb[17].mxu0 }
 0x2c8   : > { %v3387_v51 = vpop.f32.mrb[18].mxu0 }
 0x2c9   : > { %v3389_v52 = vpop.f32.mrb[19].mxu0 }
 0x2ce   : > { %v3392_v45 = vpop.f32.mrb[20].mxu0 }
 0x2cf   : > { %v3394_v14 = vpop.f32.mrb[21].mxu0 }
 0x2d0   : > { %v3395_v25 = vpop.f32.mrb[22].mxu0 }
 0x2d1   : > { %v3396_v17 = vpop.f32.mrb[23].mxu0 }
 0x2d6   : > { %v3534_v27 = vpop.f32.mrb[24].mxu0 }
 0x2d7   : > { %v3535_v53 = vadd.f32 %v3534_v27, %v3352_v28  ;;  %v3536_v54 = vpop.f32.mrb[25].mxu0 }
 0x2d8   : > { %v3537_v56 = vpop.f32.mrb[26].mxu0 }
 0x2d9   : > { %v3538_v59 = vadd.f32 %v3537_v56, %v3355_v33  ;;  %v3539_v62 = vpop.f32.mrb[27].mxu0 }
 0x2de   : > { %v3542_v63 = vpop.f32.mrb[28].mxu0 }
 0x2df   : > { %v3543_v0 = vadd.f32 %v3542_v63, %v3360_v40  ;;  %v3544_v18 = vpop.f32.mrb[29].mxu0 }
 0x2e0   : > { %v3545_v1 = vpop.f32.mrb[30].mxu0 }
 0x2e1   : > { %v3546_v13 = vadd.f32 %v3545_v1, %v3363_v43  ;;  %v3547_v26 = vpop.f32.mrb[31].mxu0 }
 0x2e6   : > { %v3550_v23 = vpop.f32.mrb[32].mxu0 }
 0x2e7   : > { %v3551_v36 = vadd.f32 %v3550_v23, %v3368_v6  ;;  %v3552_v49 = vpop.f32.mrb[33].mxu0 }
 0x2e8   : > { %v3553_v24 = vpop.f32.mrb[34].mxu0 }
 0x2e9   : > { %v3554_v50 = vadd.f32 %v3553_v24, %v3371_v60  ;;  %v3555_v11 = vpop.f32.mrb[35].mxu0 }
 0x2ee   : > { %v3558_v22 = vpop.f32.mrb[36].mxu0 }
 0x2ef   : > { %v3559_v4 = vadd.f32 %v3558_v22, %v3376_v29  ;;  %v3560_v8 = vpop.f32.mrb[37].mxu0 }
 0x2f0   : > { %v3561_v61 = vpop.f32.mrb[38].mxu0 }
 0x2f1   : > { %v3562_v55 = vadd.f32 %v3561_v61, %v3379_v7  ;;  %v3563_v3 = vpop.f32.mrb[39].mxu0 }
 0x2f6   : > { %v3566_v9 = vpop.f32.mrb[40].mxu0 }
 0x2f7   : > { %v3567_v15 = vadd.f32 %v3566_v9, %v3384_v2  ;;  %v3568_v16 = vpop.f32.mrb[41].mxu0 }
 0x2f8   : > { %v3569_v12 = vpop.f32.mrb[42].mxu0 }
 0x2f9   : > { %v3570_v30 = vadd.f32 %v3569_v12, %v3387_v51  ;;  %v3571_v35 = vpop.f32.mrb[43].mxu0 }
 0x2fe   : > { %v3574_v19 = vpop.f32.mrb[44].mxu0 }
 0x2ff   : > { %v3575_v20 = vadd.f32 %v3574_v19, %v3392_v45  ;;  %v3576_v21 = vpop.f32.mrb[45].mxu0 }
 0x300   : > { %v3577_v34 = vpop.f32.mrb[46].mxu0 }
 0x301   : > { %v3578_v10 = vpop.f32.mrb[47].mxu0 }
 0x306   : > { %v3775_v28 = vpop.f32.mrb[48].mxu0 }
 0x307   : > { %v3821_v32 = vadd.f32 %v3775_v28, %v3535_v53  ;;  %v3777_v33 = vpop.f32.mrb[49].mxu0 }
 0x308   : > { %v3778_v37 = vpop.f32.mrb[50].mxu0 }
 0x309   : > { %v3822_v38 = vadd.f32 %v3778_v37, %v3538_v59  ;;  %v3780_v39 = vpop.f32.mrb[51].mxu0 }
 0x30e   : > { %v3783_v40 = vpop.f32.mrb[52].mxu0 }
 0x30f   : > { %v3823_v42 = vadd.f32 %v3783_v40, %v3543_v0  ;;  %v3785_v5 = vpop.f32.mrb[53].mxu0 }
 0x310   : > { %v3786_v43 = vpop.f32.mrb[54].mxu0 }
 0x311   : > { %v3824_v44 = vadd.f32 %v3786_v43, %v3546_v13  ;;  %v3788_v46 = vpop.f32.mrb[55].mxu0 }
 0x316   : > { %v3791_v6 = vpop.f32.mrb[56].mxu0 }
 0x317   : > { %v3825_v47 = vadd.f32 %v3791_v6, %v3551_v36  ;;  %v3793_v41 = vpop.f32.mrb[57].mxu0 }
 0x318   : > { %v3794_v60 = vpop.f32.mrb[58].mxu0 }
 0x319   : > { %v3826_v31 = vadd.f32 %v3794_v60, %v3554_v50  ;;  %v3796_v29 = vpop.f32.mrb[59].mxu0 }
 0x31a   : > { %v4640_v29 = vlaneseq }
 0x31e   : > { %v3799_v48 = vpop.f32.mrb[60].mxu0 }
 0x31f   : > { %v3827_v7 = vadd.f32 %v3799_v48, %v3559_v4  ;;  %v3801_v57 = vpop.f32.mrb[61].mxu0 }
 0x320   : > { %v3802_v2 = vpop.f32.mrb[62].mxu0 }
 0x321   : > { %v3828_v58 = vadd.f32 %v3802_v2, %v3562_v55  ;;  %v3804_v51 = vpop.f32.mrb[63].mxu0 }
 0x326   : > { %v3807_v52 = vpop.f32.mrb[64].mxu0 }
 0x327   : > { %v3829_v45 = vadd.f32 %v3807_v52, %v3567_v15  ;;  %v3809_v14 = vpop.f32.mrb[65].mxu0 }
 0x328   : > { %v3810_v25 = vpop.f32.mrb[66].mxu0  ;;  %v14322_v14 = vshrl.u32 %v4640_v29, 7 }
 0x329   : > { %v3830_v17 = vadd.f32 %v3810_v25, %v3570_v30  ;;  %v3812_v27 = vpop.f32.mrb[67].mxu0 }
 0x32e   : > { %v3815_v53 = vpop.f32.mrb[68].mxu0 }
 0x32f   : > { %v3831_v54 = vadd.f32 %v3815_v53, %v3575_v20  ;;  %v3817_v56 = vpop.f32.mrb[69].mxu0 }
 0x330   : > { %v3818_v59 = vpop.f32.mrb[70].mxu0 }
 0x331   : > { %v3819_v62 = vpop.f32.mrb[71].mxu0 }
 0x336   : > { %v4027_v63 = vpop.f32.mrb[72].mxu0 }
 0x337   : > { %v4073_v0 = vadd.f32 %v4027_v63, %v3821_v32  ;;  %v4029_v18 = vpop.f32.mrb[73].mxu0 }
 0x338   : > { %v4030_v1 = vpop.f32.mrb[74].mxu0  ;;  %v14329_v18 = vadd.s32 8, %v14322_v14 }
 0x339   : > { %v4074_v13 = vadd.f32 %v4030_v1, %v3822_v38  ;;  %v4032_v26 = vpop.f32.mrb[75].mxu0  ;;  %v14332_v1 = vadd.s32 16, %v14322_v14 }
 0x33e   : > { %v4035_v23 = vpop.f32.mrb[76].mxu0 }
 0x33f   : > { %v4075_v36 = vadd.f32 %v4035_v23, %v3823_v42  ;;  %v4037_v49 = vpop.f32.mrb[77].mxu0  ;;  %v14312_v42 = vld [vmem:[%s2360_s12] ss:$0 sm:$0xff] }
 0x340   : > { %v4038_v24 = vpop.f32.mrb[78].mxu0  ;;  %v14338_v49 = vadd.s32 24, %v14322_v14 }
 0x341   : > { %v4076_v50 = vadd.f32 %v4038_v24, %v3824_v44  ;;  %v4040_v11 = vpop.f32.mrb[79].mxu0 }
 0x346   : > { %v4043_v22 = vpop.f32.mrb[80].mxu0 }
 0x347   : > { %v4077_v4 = vadd.f32 %v4043_v22, %v3825_v47  ;;  %v4045_v8 = vpop.f32.mrb[81].mxu0  ;;  %v4656_v22 = vand.u32 7, %v14322_v14 }
 0x348   : > { %v4046_v61 = vpop.f32.mrb[82].mxu0 }
 0x349   : > { %v14295_v55 = vadd.f32 %v4046_v61, %v3826_v31  ;;  %v4048_v3 = vpop.f32.mrb[83].mxu0  ;;  %vm14422_vm14 = vcmp.lt.s32.totalorder %v4656_v22, 3 }
 0x34a   : > { %v14346_v3 = vadd.s32 40, %v14322_v14 }
 0x34e   : > { %v4051_v9 = vpop.f32.mrb[84].mxu0 }
 0x34f   : > { %v14297_v15 = vadd.f32 %v4051_v9, %v3827_v7  ;;  %v4053_v16 = vpop.f32.mrb[85].mxu0 }
 0x350   : > { %v4054_v12 = vpop.f32.mrb[86].mxu0  ;;  %v4663_v16 = vand.u32 7, %v14329_v18 }
 0x351   : > { %v14299_v30 = vadd.f32 %v4054_v12, %v3828_v58  ;;  %v4056_v35 = vpop.f32.mrb[87].mxu0  ;;  %v4670_v12 = vand.u32 7, %v14332_v1 }
 0x352   : > { %vm14435_vm0 = vcmp.lt.s32.totalorder %v4663_v16, 3 }
 0x353   : > { %vm14464_vm4 = vcmp.lt.s32.totalorder %v4670_v12, 3 }
 0x356   : > { %v4059_v19 = vpop.f32.mrb[88].mxu0 }
 0x357   : > { %v14301_v20 = vadd.f32 %v4059_v19, %v3829_v45  ;;  %v4061_v21 = vpop.f32.mrb[89].mxu0 }
 0x358   : > { %v4062_v34 = vpop.f32.mrb[90].mxu0 }
 0x359   : > { %v14303_v10 = vadd.f32 %v4062_v34, %v3830_v17  ;;  %v4064_v28 = vpop.f32.mrb[91].mxu0 }
 0x35e   : > { %v4067_v32 = vpop.f32.mrb[92].mxu0 }
 0x35f   : > { %v14305_v33 = vadd.f32 %v4067_v32, %v3831_v54  ;;  %v4069_v37 = vpop.f32.mrb[93].mxu0  ;;  %v4677_v32 = vand.u32 7, %v14338_v49 }
 0x360   : > { %v4070_v38 = vpop.f32.mrb[94].mxu0 }
 0x361   : > { %v4071_v39 = vpop.f32.mrb[95].mxu0  ;;  %vm14480_vm6 = vcmp.lt.s32.totalorder %v4677_v32, 3 }
 0x366   : > { %v4279_v40 = vpop.f32.mrb[96].mxu0 }
 0x367   : > { %v4325_v5 = vadd.f32 %v4279_v40, %v4073_v0  ;;  %v4281_v43 = vpop.f32.mrb[97].mxu0 }
 0x368   : > { %v4282_v44 = vpop.f32.mrb[98].mxu0 }
 0x369   : > { %v4343_v46 = vadd.f32 %v14312_v42, %v4325_v5  ;;  %v4326_v6 = vadd.f32 %v4282_v44, %v4074_v13  ;;  %v4284_v47 = vpop.f32.mrb[99].mxu0 }
 0x36b   : > { %v14315_v41 = vmul.f32 0.70710677, %v4343_v46  ;;  %v4344_v60 = vadd.f32 %v14312_v42, %v4326_v6  ;;  %v14356_v40 = vmul.f32 0.5, %v4343_v46 }
 0x36d   : > { %v4365_v31 = vand.u32 2147483647, %v14315_v41  ;;  %v14319_v48 = vmul.f32 0.70710677, %v4344_v60  ;;  %vm4574_vm13 = vcmp.ge.f32.partialorder %v14315_v41, 0.0 }
 0x36e   : > { %v4287_v7 = vpop.f32.mrb[100].mxu0 }
 0x36f   : > { %v4376_v57 = vmul.f32 0.3275911, %v4365_v31  ;;  %v4366_v2 = vand.u32 2147483647, %v14319_v48  ;;  %v4327_v58 = vadd.f32 %v4287_v7, %v4075_v36  ;;  %v4289_v51 = vpop.f32.mrb[101].mxu0  ;;  %v4508_v45 = vsub.f32 0.0, %v4365_v31 }
 0x370   : > { %v4290_v17 = vpop.f32.mrb[102].mxu0  ;;  %v14366_v7 = vmul.f32 0.5, %v4344_v60  ;;  %vm4575_vm15 = vcmp.ge.f32.partialorder %v14319_v48, 0.0 }
 0x371   : > { %v4387_v52 = vadd.f32 1.0, %v4376_v57  ;;  %v4377_v25 = vmul.f32 0.3275911, %v4366_v2  ;;  %v4509_v27 = vsub.f32 0.0, %v4366_v2  ;;  %v4345_v53 = vadd.f32 %v14312_v42, %v4327_v58  ;;  %v4292_v56 = vpop.f32.mrb[103].mxu0 }
 0x372   : > { %v4328_v54 = vadd.f32 %v4290_v17, %v4076_v50  ;;  %v4519_v0 = vmul.f32 %v4508_v45, %v4365_v31  ;;  %v14341_v50 = vadd.s32 32, %v14322_v14 }
 0x373   : > { %12463 = vrcp.f32 %v4387_v52  ;;  %v4388_v59 = vadd.f32 1.0, %v4377_v25  ;;  %v14325_v62 = vmul.f32 0.70710677, %v4345_v53  ;;  %v4520_v13 = vmul.f32 %v4509_v27, %v4366_v2 }
 0x374   : > { %v4346_v63 = vadd.f32 %v14312_v42, %v4328_v54  ;;  %v4530_v9 = vmul.f32 1.442695, %v4519_v0  ;;  %v4684_v38 = vand.u32 7, %v14341_v50  ;;  %v14368_v57 = vmul.f32 0.5, %v4345_v53 }
 0x375   : > { %12465 = vrcp.f32 %v4388_v59  ;;  %v4367_v26 = vand.u32 2147483647, %v14325_v62  ;;  %v4532_v19 = vmul.f32 1.442695, %v4520_v13  ;;  %vm4576_vm3 = vcmp.ge.f32.partialorder %v14325_v62, 0.0 }
 0x376   : > { %v14335_v23 = vmul.f32 0.70710677, %v4346_v63  ;;  %v4295_v36 = vpop.f32.mrb[104].mxu0  ;;  %v14375_v25 = vmul.f32 0.5, %v4346_v63  ;;  %vm14502_vm9 = vcmp.lt.s32.totalorder %v4684_v38, 3 }
 0x377   : > { %v4329_v24 = vadd.f32 %v4295_v36, %v4077_v4  ;;  %v4297_v11 = vpop.f32.mrb[105].mxu0  ;;  %v4378_v8 = vmul.f32 0.3275911, %v4367_v26  ;;  %v4510_v6 = vsub.f32 0.0, %v4367_v26 }
 0x378   : > { %v4368_v61 = vand.u32 2147483647, %v14335_v23  ;;  %v4298_v4 = vpop.f32.mrb[106].mxu0  ;;  %vm4577_vm5 = vcmp.ge.f32.partialorder %v14335_v23, 0.0 }
 0x379   : > { %v4347_v35 = vadd.f32 %v14312_v42, %v4329_v24  ;;  %v4389_v21 = vadd.f32 1.0, %v4378_v8  ;;  %v4300_v28 = vpop.f32.mrb[107].mxu0  ;;  %v4330_v39 = vadd.f32 %v4298_v4, %v14295_v55  ;;  %v4521_v56 = vmul.f32 %v4510_v6, %v4367_v26 }
 0x37a   : > { %v4379_v34 = vmul.f32 0.3275911, %v4368_v61  ;;  %v4511_v55 = vsub.f32 0.0, %v4368_v61 }
 0x37b   : > { %v14352_v37 = vmul.f32 0.70710677, %v4347_v35  ;;  %12467 = vrcp.f32 %v4389_v21  ;;  %v14363_v31 = vadd.f32 %v14312_v42, %v4330_v39  ;;  %v14385_v8 = vmul.f32 0.5, %v4347_v35 }
 0x37c   : > { %v4390_v5 = vadd.f32 1.0, %v4379_v34  ;;  %12469 = vpow2.f32 %v4530_v9  ;;  %v4522_v36 = vmul.f32 %v4511_v55, %v4368_v61  ;;  %v4534_v34 = vmul.f32 1.442695, %v4521_v56 }
 0x37d   : > { %v14359_v44 = vpop.eup %12463  ;;  %v4369_v47 = vand.u32 2147483647, %v14352_v37  ;;  %12471 = vpow2.f32 %v4532_v19  ;;  %v14371_v58 = vmul.f32 0.70710677, %v14363_v31  ;;  %vm4578_vm7 = vcmp.ge.f32.partialorder %v14352_v37, 0.0 }
 0x37e   : > { %v4409_v29 = vmul.f32 1.0614054, %v14359_v44  ;;  %v4303_v46 = vpop.f32.mrb[108].mxu0  ;;  %12473 = vrcp.f32 %v4390_v5  ;;  %v4536_v35 = vmul.f32 1.442695, %v4522_v36 }
 0x37f   : > { %v4380_v2 = vmul.f32 0.3275911, %v4369_v47  ;;  %v4305_v51 = vpop.f32.mrb[109].mxu0  ;;  %v14373_v52 = vpop.eup %12465  ;;  %v4512_v17 = vsub.f32 0.0, %v4369_v47  ;;  %v4331_v27 = vadd.f32 %v4303_v46, %v14297_v15  ;;  %v4370_v59 = vand.u32 2147483647, %v14371_v58 }
 0x380   : > { %v10239_v45 = vadd.f32 -1.4531521, %v4409_v29  ;;  %v4306_v60 = vpop.f32.mrb[110].mxu0  ;;  %v4410_v54 = vmul.f32 1.0614054, %v14373_v52  ;;  %vm4579_vm10 = vcmp.ge.f32.partialorder %v14371_v58, 0.0 }
 0x381   : > { %v4391_v53 = vadd.f32 1.0, %v4380_v2  ;;  %v4308_v0 = vpop.f32.mrb[111].mxu0  ;;  %v14382_v24 = vadd.f32 %v14312_v42, %v4331_v27  ;;  %v4332_v63 = vadd.f32 %v4306_v60, %v14299_v30  ;;  %v4381_v15 = vmul.f32 0.3275911, %v4370_v59 }
 0x382   : > { %v4431_v13 = vmul.f32 %v14359_v44, %v10239_v45  ;;  %v10240_v11 = vadd.f32 -1.4531521, %v4410_v54  ;;  %v4523_v4 = vmul.f32 %v4512_v17, %v4369_v47  ;;  %v4513_v26 = vsub.f32 0.0, %v4370_v59 }
 0x383   : > { %12475 = vrcp.f32 %v4391_v53  ;;  %v14388_v19 = vmul.f32 0.70710677, %v14382_v24  ;;  %v4392_v61 = vadd.f32 1.0, %v4381_v15  ;;  %v14392_v28 = vadd.f32 %v14312_v42, %v4332_v63 }
 0x384   : > { %v4442_v9 = vadd.f32 1.4214138, %v4431_v13  ;;  %v4432_v21 = vmul.f32 %v14373_v52, %v10240_v11  ;;  %v4524_v5 = vmul.f32 %v4513_v26, %v4370_v59  ;;  %v4538_v17 = vmul.f32 1.442695, %v4523_v4 }
 0x385   : > { %v14394_v39 = vpop.eup %12467  ;;  %v4371_v6 = vand.u32 2147483647, %v14388_v19  ;;  %12477 = vrcp.f32 %v4392_v61  ;;  %v14400_v2 = vmul.f32 0.70710677, %v14392_v28 }
 0x386   : > { %v4453_v30 = vmul.f32 %v14359_v44, %v4442_v9  ;;  %v4311_v47 = vpop.f32.mrb[112].mxu0  ;;  %v12470_v29 = vpop.eup %12469  ;;  %v4443_v55 = vadd.f32 1.4214138, %v4432_v21  ;;  %v4411_v46 = vmul.f32 1.0614054, %v14394_v39  ;;  %12479 = vpow2.f32 %v4534_v34 }
 0x387   : > { %v12472_v51 = vpop.eup %12471  ;;  %v4382_v27 = vmul.f32 0.3275911, %v4371_v6  ;;  %v4333_v60 = vadd.f32 %v4311_v47, %v14301_v20  ;;  %v4514_v59 = vsub.f32 0.0, %v4371_v6  ;;  %v4372_v0 = vand.u32 2147483647, %v14400_v2  ;;  %v4313_v13 = vpop.f32.mrb[113].mxu0 }
 0x388   : > { %v10250_v45 = vadd.f32 -0.28449672, %v4453_v30  ;;  %v14403_v54 = vpop.eup %12473  ;;  %v4454_v56 = vmul.f32 %v14373_v52, %v4443_v55  ;;  %v10241_v53 = vadd.f32 -1.4531521, %v4411_v46  ;;  %v4540_v11 = vmul.f32 1.442695, %v4524_v5 }
 0x389   : > { %v4412_v63 = vmul.f32 1.0614054, %v14403_v54  ;;  %v4393_v15 = vadd.f32 1.0, %v4382_v27  ;;  %v4314_v9 = vpop.f32.mrb[114].mxu0  ;;  %v4383_v20 = vmul.f32 0.3275911, %v4372_v0  ;;  %v4525_v5 = vmul.f32 %v4514_v59, %v4371_v6 }
 0x38a   : > { %v4475_v36 = vmul.f32 %v14359_v44, %v10250_v45  ;;  %v10251_v4 = vadd.f32 -0.28449672, %v4454_v56  ;;  %v4433_v26 = vmul.f32 %v14394_v39, %v10241_v53  ;;  %v4316_v21 = vpop.f32.mrb[115].mxu0  ;;  %v4515_v47 = vsub.f32 0.0, %v4372_v0 }
 0x38b   : > { %v10242_v30 = vadd.f32 -1.4531521, %v4412_v63  ;;  %12481 = vrcp.f32 %v4393_v15  ;;  %v4394_v27 = vadd.f32 1.0, %v4383_v20 }
 0x38c   : > { %v4486_v61 = vadd.f32 0.2548296, %v4475_v36  ;;  %v4476_v46 = vmul.f32 %v14373_v52, %v10251_v4  ;;  %v4444_v45 = vadd.f32 1.4214138, %v4433_v26  ;;  %12483 = vpow2.f32 %v4536_v35 }
 0x38d   : > { %v14410_v55 = vpop.eup %12475  ;;  %v4434_v53 = vmul.f32 %v14403_v54, %v10242_v30  ;;  %12485 = vpow2.f32 %v4538_v17  ;;  %v4526_v15 = vmul.f32 %v4515_v47, %v4372_v0  ;;  %v4542_v0 = vmul.f32 1.442695, %v4525_v5 }
 0x38e   : > { %v4497_v56 = vmul.f32 %v14359_v44, %v4486_v61  ;;  %v4413_v34 = vmul.f32 1.0614054, %v14410_v55  ;;  %v14417_v13 = vpop.f32.mrb[116].mxu0  ;;  %v4487_v36 = vadd.f32 0.2548296, %v4476_v46  ;;  %v4455_v63 = vmul.f32 %v14394_v39, %v4444_v45 }
 0x38f   : > { %v4321_v21 = vpop.f32.mrb[117].mxu0  ;;  %v4445_v44 = vadd.f32 1.4214138, %v4434_v53  ;;  %12487 = vrcp.f32 %v4394_v27  ;;  %v14427_v4 = vpop.eup %12477  ;;  %v4544_v45 = vmul.f32 1.442695, %v4526_v15 }
 0x390   : > { %v4552_v43 = vmul.f32 %v12470_v29, %v4497_v56  ;;  %v10243_v35 = vadd.f32 -1.4531521, %v4413_v34  ;;  %v4322_v59 = vpop.f32.mrb[118].mxu0  ;;  %v4498_v26 = vmul.f32 %v14373_v52, %v4487_v36  ;;  %v10252_v17 = vadd.f32 -0.28449672, %v4455_v63  ;;  %v12480_v53 = vpop.eup %12479 }
 0x391   : > { %12489 = vpow2.f32 %v4540_v11  ;;  %v4323_v29 = vpop.f32.mrb[119].mxu0  ;;  %v4456_v22 = vmul.f32 %v14403_v54, %v4445_v44  ;;  %v4414_v30 = vmul.f32 1.0614054, %v14427_v4  ;;  %v14441_v11 = vadd.f32 %v14312_v42, %v4333_v60 }
 0x392   : > { %v4563_v20 = vsub.f32 1.0, %v4552_v43  ;;  %v4435_v61 = vmul.f32 %v14410_v55, %v10243_v35  ;;  %v4553_v47 = vmul.f32 %v12472_v51, %v4498_v26  ;;  %v4477_v52 = vmul.f32 %v14394_v39, %v10252_v17 }
 0x393   : > { %v10253_v5 = vadd.f32 -0.28449672, %v4456_v22  ;;  %v14444_v56 = vadd.f32 %v4314_v9, %v14303_v10  ;;  %v10244_v16 = vadd.f32 -1.4531521, %v4414_v30  ;;  %12491 = vpow2.f32 %v4542_v0 }
 0x394   : > { %v4585_v43 = vsub.f32 0.0, %v4563_v20  ;;  %v4446_v27 = vadd.f32 1.4214138, %v4435_v61  ;;  %v4564_v51 = vsub.f32 1.0, %v4553_v47  ;;  %v4488_v18 = vadd.f32 0.2548296, %v4477_v52 }
 0x395   : > { %v14446_v34 = vpop.eup %12481  ;;  %v4478_v60 = vmul.f32 %v14403_v54, %v10253_v5  ;;  %v14454_v10 = vmul.f32 0.70710677, %v14441_v11  ;;  %v4436_v44 = vmul.f32 %v14427_v4, %v10244_v16  ;;  %12493 = vpow2.f32 %v4544_v45 }
 0x396   : > { %v4596_v36 = vsel %vm4574_vm13, %v4563_v20, %v4585_v43  ;;  %v4457_v63 = vmul.f32 %v14410_v55, %v4446_v27  ;;  %v4586_v15 = vsub.f32 0.0, %v4564_v51  ;;  %v4499_v21 = vmul.f32 %v14394_v39, %v4488_v18  ;;  %v12484_v35 = vpop.eup %12483 }
 0x397   : > { %v4618_v9 = vadd.f32 1.0, %v4596_v36  ;;  %v4489_v59 = vadd.f32 0.2548296, %v4478_v60  ;;  %v4415_v41 = vmul.f32 1.0614054, %v14446_v34  ;;  %v12486_v17 = vpop.eup %12485  ;;  %vm4580_vm13 = vcmp.ge.f32.partialorder %v14388_v19, 0.0 }
 0x398   : > { %v10254_v26 = vadd.f32 -0.28449672, %v4457_v63  ;;  %v4597_v29 = vsel %vm4575_vm15, %v4564_v51, %v4586_v15  ;;  %v4554_v20 = vmul.f32 %v12480_v53, %v4499_v21  ;;  %v4447_v39 = vadd.f32 1.4214138, %v4436_v44 }
 0x399   : > { %v4629_v0 = vmul.f32 %v4618_v9, %v14356_v40  ;;  %v14469_v61 = vpop.eup %12487  ;;  %v4619_v30 = vadd.f32 1.0, %v4597_v29  ;;  %v4500_v47 = vmul.f32 %v14403_v54, %v4489_v59  ;;  %v10245_v52 = vadd.f32 -1.4531521, %v4415_v41 }
 0x39a   : > { %v4479_v40 = vmul.f32 %v14410_v55, %v10254_v26  ;;  %v4565_v1 = vsub.f32 1.0, %v4554_v20  ;;  %v4458_v12 = vmul.f32 %v14427_v4, %v4447_v39  ;;  %v4416_v43 = vmul.f32 1.0614054, %v14469_v61 }
 0x39b   : > { %v12490_v48 = vpop.eup %12489  ;;  %v4817_v45 = vsel %vm14422_vm14, %v4629_v0, 0.0  ;;  %v4630_v27 = vmul.f32 %v4619_v30, %v14366_v7  ;;  %v4555_v53 = vmul.f32 %v12484_v35, %v4500_v47  ;;  %v4437_v16 = vmul.f32 %v14446_v34, %v10245_v52 }
 0x39c   : > { %v10923_v5 = vpack.c.bf16 %v4817_v45, %v4817_v45  ;;  %v4490_v51 = vadd.f32 0.2548296, %v4479_v40  ;;  %v4587_v18 = vsub.f32 0.0, %v4565_v1  ;;  %v10255_v6 = vadd.f32 -0.28449672, %v4458_v12 }
 0x39d   : > { %v10246_v36 = vadd.f32 -1.4531521, %v4416_v43  ;;  %v4818_v63 = vsel %vm14435_vm0, %v4630_v27, 0.0  ;;  %v4566_v7 = vsub.f32 1.0, %v4555_v53  ;;  %v14489_v49 = vpop.eup %12491  ;;  %v4448_v44 = vadd.f32 1.4214138, %v4437_v16 }
 0x39e   : > { %v4865_v60 = vrot.slane %v10923_v5, 7  ;;  %v4501_v9 = vmul.f32 %v14410_v55, %v4490_v51  ;;  %v10924_v32 = vpack.c.bf16 %v4818_v63, %v4818_v63  ;;  %v4598_v15 = vsel %vm4576_vm3, %v4565_v1, %v4587_v18 }
 0x39f   : > { %v4480_v21 = vmul.f32 %v14427_v4, %v10255_v6  ;;  %v4620_v46 = vadd.f32 1.0, %v4598_v15  ;;  %v4588_v26 = vsub.f32 0.0, %v4566_v7  ;;  %v4459_v29 = vmul.f32 %v14446_v34, %v4448_v44  ;;  %v14508_v39 = vpop.eup %12493 }
 0x3a0   : > { %v4866_v35 = vrot.slane %v4865_v60, 4  ;;  %4907 = vst [vmem:[#allocation3 + $0x8] sm:$0xe] %v4865_v60  ;;  %v4556_v55 = vmul.f32 %v12486_v17, %v4501_v9  ;;  %v4867_v62 = vrot.slane %v10924_v32, 7  ;;  %v4438_v20 = vmul.f32 %v14469_v61, %v10246_v36 }
 0x3a1   : > { %v4491_v0 = vadd.f32 0.2548296, %v4480_v21  ;;  %v4631_v30 = vmul.f32 %v4620_v46, %v14368_v57  ;;  %v4599_v47 = vsel %vm4577_vm5, %v4566_v7, %v4588_v26  ;;  %v14515_v50 = vand.u32 2147483647, %v14454_v10 }
 0x3a2   : > { %v4567_v17 = vsub.f32 1.0, %v4556_v55  ;;  %v4868_v38 = vsel %vm14496_vm8, %v4866_v35, %v4867_v62  ;;  %v4621_v40 = vadd.f32 1.0, %v4599_v47  ;;  %v14522_v45 = vadd.f32 %v14312_v42, %v14444_v56 }
 0x3a3   : > { %v4502_v52 = vmul.f32 %v14427_v4, %v4491_v0  ;;  %4908 = vst [vmem:[#allocation3 + $0xc] sm:$0xf] %v4868_v38  ;;  %v4819_v23 = vsel %vm14464_vm4, %v4631_v30, 0.0  ;;  %v10256_v1 = vadd.f32 -0.28449672, %v4459_v29  ;;  %v4869_v51 = vrot.slane %v4867_v62, 4 }
 0x3a4   : > { %v4589_v57 = vsub.f32 0.0, %v4567_v17  ;;  %v4449_v12 = vadd.f32 1.4214138, %v4438_v20  ;;  %v10925_v43 = vpack.c.bf16 %v4819_v23, %v4819_v23  ;;  %v4632_v5 = vmul.f32 %v4621_v40, %v14375_v25 }
 0x3a5   : > { %v4557_v27 = vmul.f32 %v12490_v48, %v4502_v52  ;;  %v4384_v53 = vmul.f32 0.3275911, %v14515_v50  ;;  %v4481_v56 = vmul.f32 %v14446_v34, %v10256_v1  ;;  %v15496_v46 = vand.u32 7, %v14346_v3 }
 0x3a6   : > { %v4600_v4 = vsel %vm4578_vm7, %v4567_v17, %v4589_v57  ;;  %v4460_v18 = vmul.f32 %v14469_v61, %v4449_v12  ;;  %v4870_v6 = vrot.slane %v10925_v43, 7  ;;  %v4820_v22 = vsel %vm14480_vm6, %v4632_v5, 0.0 }
 0x3a7   : > { %v4622_v16 = vadd.f32 1.0, %v4600_v4  ;;  %v4568_v36 = vsub.f32 1.0, %v4557_v27  ;;  %v10926_v60 = vpack.c.bf16 %v4820_v22, %v4820_v22  ;;  %v4492_v63 = vadd.f32 0.2548296, %v4481_v56 }
 0x3a8   : > { %v10257_v25 = vadd.f32 -0.28449672, %v4460_v18  ;;  %v4395_v48 = vadd.f32 1.0, %v4384_v53  ;;  %v4871_v7 = vsel %vm14496_vm8, %v4869_v51, %v4870_v6  ;;  %v4872_v9 = vrot.slane %v4870_v6, 4 }
 0x3a9   : > { %v4633_v37 = vmul.f32 %v4622_v16, %v14385_v8  ;;  %v4590_v32 = vsub.f32 0.0, %v4568_v36  ;;  %4909 = vst [vmem:[#allocation3 + $0x10] sm:$0xf] %v4871_v7  ;;  %v4873_v15 = vrot.slane %v10926_v60, 7  ;;  %v4503_v21 = vmul.f32 %v14446_v34, %v4492_v63 }
 0x3aa   : > { %v4482_v54 = vmul.f32 %v14469_v61, %v10257_v25  ;;  %12495 = vrcp.f32 %v4395_v48  ;;  %vm14545_vm11 = vcmp.lt.s32.totalorder %v15496_v46, 3  ;;  %v4647_v8 = vadd.s32 48, %v14322_v14 }
 0x3ab   : > { %v4821_v44 = vsel %vm14502_vm9, %v4633_v37, 0.0  ;;  %v4601_v35 = vsel %vm4579_vm10, %v4568_v36, %v4590_v32  ;;  %v4874_v34 = vsel %vm14496_vm8, %v4872_v9, %v4873_v15  ;;  %v4612_v62 = vmul.f32 0.5, %v14363_v31 }
 0x3ac   : > { %v10927_v55 = vpack.c.bf16 %v4821_v44, %v4821_v44  ;;  %v4623_v0 = vadd.f32 1.0, %v4601_v35  ;;  %4910 = vst [vmem:[#allocation3 + $0x14] sm:$0xf] %v4874_v34  ;;  %v4558_v41 = vmul.f32 %v14489_v49, %v4503_v21  ;;  %v4493_v58 = vadd.f32 0.2548296, %v4482_v54 }
 0x3ad   : > { %v4516_v29 = vsub.f32 0.0, %v14515_v50  ;;  %v14556_v3 = vmul.f32 0.70710677, %v14522_v45  ;;  %v4875_v20 = vrot.slane %v4873_v15, 4  ;;  %v4335_v17 = vadd.f32 %v14417_v13, %v14305_v33 }
 0x3ae   : > { %v4876_v30 = vrot.slane %v10927_v55, 7  ;;  %v4634_v47 = vmul.f32 %v4623_v0, %v4612_v62  ;;  %v4569_v38 = vsub.f32 1.0, %v4558_v41  ;;  %v4698_v40 = vand.u32 7, %v4647_v8 }
 0x3af   : > { %v4504_v31 = vmul.f32 %v14469_v61, %v4493_v58  ;;  %v4374_v52 = vand.u32 2147483647, %v14556_v3  ;;  %v4648_v1 = vadd.s32 56, %v14322_v14  ;;  %v4527_v61 = vmul.f32 %v4516_v29, %v14515_v50 }
 0x3b0   : > { %v4877_v49 = vsel %vm14496_vm8, %v4875_v20, %v4876_v30  ;;  %v4878_v23 = vrot.slane %v4876_v30, 4  ;;  %v4822_v57 = vsel %vm14545_vm11, %v4634_v47, 0.0  ;;  %v4591_v43 = vsub.f32 0.0, %v4569_v38 }
 0x3b1   : > { %4911 = vst [vmem:[#allocation3 + $0x18] sm:$0xf] %v4877_v49  ;;  %v10928_v12 = vpack.c.bf16 %v4822_v57, %v4822_v57  ;;  %v4559_v33 = vmul.f32 %v14508_v39, %v4504_v31  ;;  %v4385_v13 = vmul.f32 0.3275911, %v4374_v52  ;;  %v14571_v5 = vadd.f32 %v14312_v42, %v4335_v17 }
 0x3b2   : > { %v4602_v53 = vsel %vm4580_vm13, %v4569_v38, %v4591_v43  ;;  %v4613_v18 = vmul.f32 0.5, %v14382_v24  ;;  %vm4790_vm14 = vcmp.lt.s32.totalorder %v4698_v40, 3  ;;  %v4705_v50 = vand.u32 7, %v4648_v1 }
 0x3b3   : > { %v4879_v27 = vrot.slane %v10928_v12, 7  ;;  %v4570_v51 = vsub.f32 1.0, %v4559_v33  ;;  %v4396_v4 = vadd.f32 1.0, %v4385_v13  ;;  %v4624_v6 = vadd.f32 1.0, %v4602_v53 }
 0x3b4   : > { %v12496_v56 = vpop.eup %12495  ;;  %v14575_v22 = vmul.f32 0.70710677, %v14571_v5  ;;  %vm4581_vm15 = vcmp.ge.f32.partialorder %v14400_v2, 0.0  ;;  %v4546_v63 = vmul.f32 1.442695, %v4527_v61  ;;  %v4614_v48 = vmul.f32 0.5, %v14392_v28 }
 0x3b5   : > { %v4880_v19 = vsel %vm14496_vm8, %v4878_v23, %v4879_v27  ;;  %v4592_v39 = vsub.f32 0.0, %v4570_v51  ;;  %v4417_v16 = vmul.f32 1.0614054, %v12496_v56  ;;  %v4635_v42 = vmul.f32 %v4624_v6, %v4613_v18 }
 0x3b6   : > { %4912 = vst [vmem:[#allocation3 + $0x1c] sm:$0xf] %v4880_v19  ;;  %12497 = vrcp.f32 %v4396_v4  ;;  %v4375_v36 = vand.u32 2147483647, %v14575_v22  ;;  %vm4791_vm0 = vcmp.lt.s32.totalorder %v4705_v50, 3  ;;  %v4881_v54 = vrot.slane %v4879_v27, 4 }
 0x3b7   : > { %v4603_v60 = vsel %vm4581_vm15, %v4570_v51, %v4592_v39  ;;  %v10247_v24 = vadd.f32 -1.4531521, %v4417_v16  ;;  %v4823_v25 = vsel %vm4790_vm14, %v4635_v42, 0.0  ;;  %12499 = vpow2.f32 %v4546_v63 }
 0x3b8   : > { %v4625_v7 = vadd.f32 1.0, %v4603_v60  ;;  %v4386_v9 = vmul.f32 0.3275911, %v4375_v36  ;;  %v10929_v37 = vpack.c.bf16 %v4823_v25, %v4823_v25  ;;  %v4517_v46 = vsub.f32 0.0, %v4374_v52 }
 0x3b9   : > { %v4439_v32 = vmul.f32 %v12496_v56, %v10247_v24  ;;  %v4518_v30 = vsub.f32 0.0, %v4375_v36  ;;  %v4649_v12 = vadd.s32 64, %v14322_v14  ;;  %vm4582_vm1 = vcmp.ge.f32.partialorder %v14454_v10, 0.0 }
 0x3ba   : > { %v4636_v15 = vmul.f32 %v4625_v7, %v4614_v48  ;;  %v4397_v21 = vadd.f32 1.0, %v4386_v9  ;;  %v4882_v44 = vrot.slane %v10929_v37, 7  ;;  %v4528_v41 = vmul.f32 %v4517_v46, %v4374_v52 }
 0x3bb   : > { %v4450_v35 = vadd.f32 1.4214138, %v4439_v32  ;;  %v4529_v57 = vmul.f32 %v4518_v30, %v4375_v36  ;;  %v4712_v51 = vand.u32 7, %v4649_v12  ;;  %v4615_v39 = vmul.f32 0.5, %v14441_v11 }
 0x3bc   : > { %v4824_v2 = vsel %vm4791_vm0, %v4636_v15, 0.0  ;;  %12501 = vrcp.f32 %v4397_v21  ;;  %v4883_v26 = vsel %vm14496_vm8, %v4881_v54, %v4882_v44  ;;  %v4884_v8 = vrot.slane %v4882_v44, 4 }
 0x3bd   : > { %v10930_v34 = vpack.c.bf16 %v4824_v2, %v4824_v2  ;;  %v4461_v28 = vmul.f32 %v12496_v56, %v4450_v35  ;;  %4913 = vst [vmem:[#allocation3 + $0x20] sm:$0xf] %v4883_v26  ;;  %v4548_v38 = vmul.f32 1.442695, %v4528_v41  ;;  %v4550_v27 = vmul.f32 1.442695, %v4529_v57 }
 0x3be   : > { %vm4792_vm2 = vcmp.lt.s32.totalorder %v4712_v51, 3  ;;  %v4650_v9 = vadd.s32 72, %v14322_v14  ;;  %vm4583_vm3 = vcmp.ge.f32.partialorder %v14556_v3, 0.0  ;;  %vm4584_vm5 = vcmp.ge.f32.partialorder %v14575_v22, 0.0  ;;  %v4920_v22 = vld [vmem:[#allocation3 + $0x30] sm:$0x7] }
 0x3bf   : > { %v4885_v55 = vrot.slane %v10930_v34, 7  ;;  %v10258_v62 = vadd.f32 -0.28449672, %v4461_v28  ;;  %12503 = vpow2.f32 %v4548_v38  ;;  %v4616_v34 = vmul.f32 0.5, %v14522_v45 }
 0x3c0   : > { %v12498_v0 = vpop.eup %12497  ;;  %12505 = vpow2.f32 %v4550_v27  ;;  %v4719_v44 = vand.u32 7, %v4650_v9  ;;  %v4617_v3 = vmul.f32 0.5, %v14571_v5  ;;  %vm4917_vm7 = vcmask 1042432  }
 0x3c1   : > { %v4886_v58 = vsel %vm14496_vm8, %v4884_v8, %v4885_v55  ;;  %v4483_v29 = vmul.f32 %v12496_v56, %v10258_v62  ;;  %v4418_v20 = vmul.f32 1.0614054, %v12498_v0  ;;  %v12500_v40 = vpop.eup %12499  ;;  %v4887_v37 = vrot.slane %v4885_v55, 4 }
 0x3c2   : > { %4914 = vst [vmem:[#allocation3 + $0x24] sm:$0xf] %v4886_v58  ;;  %v4651_v8 = vadd.s32 80, %v14322_v14  ;;  %vm4793_vm4 = vcmp.lt.s32.totalorder %v4719_v44, 3  ;;  %vm4918_vm9 = vsmask.f32 2304 }
 0x3c3   : > { %v4494_v47 = vadd.f32 0.2548296, %v4483_v29  ;;  %v10248_v17 = vadd.f32 -1.4531521, %v4418_v20  ;;  %vm4919_vm10 = vmand %vm4917_vm7, %vm4918_vm9  ;;  %vm4936_vm11 = vcmask (!%p10015_p12), 256000   ;;  %v12830_v57 = vmov (!%p10015_p12), 0.0  }
 0x3c4   : > { %v4726_v41 = vand.u32 7, %v4651_v8  ;;  %4926 = vst.msk [vmem:[#allocation4] sm:$0xff] (!%p10015_p12), %vm3299_vm12, %v12830_v57  ;;  %4927 = vst.msk [vmem:[#allocation4 + $0x8] sm:$0xff] (!%p10015_p12), %vm3299_vm12, %v12830_v57 }
 0x3c5   : > { %v4505_v31 = vmul.f32 %v12496_v56, %v4494_v47  ;;  %v4440_v49 = vmul.f32 %v12498_v0, %v10248_v17  ;;  %4928 = vst.msk [vmem:[#allocation4 + $0x10] sm:$0xff] (!%p10015_p12), %vm3299_vm12, %v12830_v57  ;;  %4929 = vst.msk [vmem:[#allocation4 + $0x18] sm:$0xff] (!%p10015_p12), %vm3299_vm12, %v12830_v57 }
 0x3c6   : > { %v12502_v23 = vpop.eup %12501  ;;  %vm4794_vm6 = vcmp.lt.s32.totalorder %v4726_v41, 3  ;;  %4930 = vst.msk [vmem:[#allocation4 + $0x20] sm:$0xff] (!%p10015_p12), %vm3299_vm12, %v12830_v57  ;;  %4931 = vst.msk [vmem:[#allocation4 + $0x28] sm:$0xff] (!%p10015_p12), %vm3299_vm12, %v12830_v57 }
 0x3c7   : > { %v4560_v1 = vmul.f32 %v12500_v40, %v4505_v31  ;;  %v4451_v43 = vadd.f32 1.4214138, %v4440_v49  ;;  %v4419_v52 = vmul.f32 1.0614054, %v12502_v23  ;;  %4932 = vst.msk [vmem:[#allocation4 + $0x30] sm:$0xff] (!%p10015_p12), %vm3299_vm12, %v12830_v57  ;;  %4933 = vst.msk [vmem:[#allocation4 + $0x38] sm:$0xff] (!%p10015_p12), %vm3299_vm12, %v12830_v57 }
 0x3c8   : > { %4934 = vst.msk [vmem:[#allocation4 + $0x40] sm:$0xff] (!%p10015_p12), %vm3299_vm12, %v12830_v57  ;;  %4935 = vst.msk [vmem:[#allocation4 + $0x48] sm:$0xff] (!%p10015_p12), %vm3299_vm12, %v12830_v57 }
 0x3c9   : > { %v4571_v33 = vsub.f32 1.0, %v4560_v1  ;;  %v4462_v13 = vmul.f32 %v12498_v0, %v4451_v43  ;;  %v10249_v61 = vadd.f32 -1.4531521, %v4419_v52  ;;  %v12504_v63 = vpop.eup %12503  ;;  %4937 = vst.msk [vmem:[#allocation4 + $0x50] sm:$0x7] (!%p10015_p12), %vm4936_vm11, %v12830_v57 }
 0x3ca   : > { %v12506_v2 = vpop.eup %12505 }
 0x3cb   : > { %v4593_v53 = vsub.f32 0.0, %v4571_v33  ;;  %v10259_v4 = vadd.f32 -0.28449672, %v4462_v13  ;;  %v4441_v18 = vmul.f32 %v12502_v23, %v10249_v61 }
 0x3cd   : > { %v4604_v56 = vsel %vm4582_vm1, %v4571_v33, %v4593_v53  ;;  %v4484_v6 = vmul.f32 %v12498_v0, %v10259_v4  ;;  %v4452_v19 = vadd.f32 1.4214138, %v4441_v18 }
 0x3ce   : > { %v4626_v50 = vadd.f32 1.0, %v4604_v56 }
 0x3cf   : > { %v4495_v16 = vadd.f32 0.2548296, %v4484_v6  ;;  %v4463_v42 = vmul.f32 %v12502_v23, %v4452_v19 }
 0x3d0   : > { %v4637_v36 = vmul.f32 %v4626_v50, %v4615_v39 }
 0x3d1   : > { %v4506_v60 = vmul.f32 %v12498_v0, %v4495_v16  ;;  %v10260_v24 = vadd.f32 -0.28449672, %v4463_v42 }
 0x3d2   : > { %v4825_v25 = vsel %vm4792_vm2, %v4637_v36, 0.0 }
 0x3d3   : > { %v10931_v48 = vpack.c.bf16 %v4825_v25, %v4825_v25  ;;  %v4561_v7 = vmul.f32 %v12504_v63, %v4506_v60  ;;  %v4485_v10 = vmul.f32 %v12502_v23, %v10260_v24 }
 0x3d5   : > { %v4888_v32 = vrot.slane %v10931_v48, 7  ;;  %v4572_v15 = vsub.f32 1.0, %v4561_v7  ;;  %v4496_v21 = vadd.f32 0.2548296, %v4485_v10 }
 0x3d7   : > { %v4889_v11 = vsel %vm14496_vm8, %v4887_v37, %v4888_v32  ;;  %v4594_v54 = vsub.f32 0.0, %v4572_v15  ;;  %v4507_v35 = vmul.f32 %v12502_v23, %v4496_v21  ;;  %v4890_v29 = vrot.slane %v4888_v32, 4 }
 0x3d8   : > { %4915 = vst [vmem:[#allocation3 + $0x28] sm:$0xf] %v4889_v11 }
 0x3d9   : > { %v4605_v46 = vsel %vm4583_vm3, %v4572_v15, %v4594_v54  ;;  %v4562_v26 = vmul.f32 %v12506_v2, %v4507_v35 }
 0x3da   : > { %v4627_v28 = vadd.f32 1.0, %v4605_v46 }
 0x3db   : > { %v4573_v55 = vsub.f32 1.0, %v4562_v26 }
 0x3dc   : > { %v4638_v62 = vmul.f32 %v4627_v28, %v4616_v34 }
 0x3dd   : > { %v4595_v0 = vsub.f32 0.0, %v4573_v55 }
 0x3de   : > { %v4826_v58 = vsel %vm4793_vm4, %v4638_v62, 0.0 }
 0x3df   : > { %v10932_v20 = vpack.c.bf16 %v4826_v58, %v4826_v58  ;;  %v4606_v30 = vsel %vm4584_vm5, %v4573_v55, %v4595_v0 }
 0x3e0   : > { %v4628_v47 = vadd.f32 1.0, %v4606_v30 }
 0x3e1   : > { %v4891_v17 = vrot.slane %v10932_v20, 7 }
 0x3e2   : > { %v4639_v14 = vmul.f32 %v4628_v47, %v4617_v3 }
 0x3e3   : > { %v4892_v45 = vsel %vm14496_vm8, %v4890_v29, %v4891_v17  ;;  %v4893_v31 = vrot.slane %v4891_v17, 4 }
 0x3e4   : > { %4916 = vst [vmem:[#allocation3 + $0x2c] sm:$0xf] %v4892_v45  ;;  %v4827_v38 = vsel %vm4794_vm6, %v4639_v14, 0.0 }
 0x3e5   : > { %v10933_v40 = vpack.c.bf16 %v4827_v38, %v4827_v38  ;;  %4925 = sbr.rel (%p10015_p12) target bundleno = 1004 (0x3ec), region = 130 }
 0x3e7   : > { %v4894_v49 = vrot.slane %v10933_v40, 7 }
 0x3e9   : > { %v4895_v23 = vsel %vm14496_vm8, %v4893_v31, %v4894_v49 }
 0x3ea   : > { %v4921_v5 = vsel %vm4919_vm10, %v4895_v23, %v4920_v22 }
 0x3eb   : > { %4922 = vst [vmem:[#allocation3 + $0x30] sm:$0x7] %v4921_v5 }
 0x3ec PF: > { %v12507_v59 = vld [vmem:[%s13564_s29 + $0x200] sm:$0xff]   ;;  %v12508_v1 = vld [vmem:[%s13564_s29 + $0x208] sm:$0xff]   ;;  %v12509_v12 = vld [vmem:[%s13564_s29 + $0x210] sm:$0xff]   ;;  %vm5558_vm8 = vsmask.f32 6400  ;;  %vm5762_vm13 = vcmask 1045504  }
 0x3ed   : > { %11519 = vmatprep.subr.bf16.mxu1 %v12507_v59  ;;  %v12513_v43 = vld [vmem:[%s13564_s29] sm:$0xff]   ;;  %v12510_v52 = vld [vmem:[%s13564_s29 + $0x218] sm:$0xff]   ;;  %v12515_v33 = vld [vmem:[%s13564_s29 + $0x8] sm:$0xff]   ;;  %vm5166_vm14 = vsmask.f32 7424  ;;  %vm5384_vm15 = vcmask 1046528  }
 0x3ee   : > { %11520 = vmatpush3.bf16.msra.mxu1 %v12507_v59  ;;  %11295 = vmatprep.subr.bf16.mxu0 %v12513_v43  ;;  %v12517_v13 = vld [vmem:[%s13564_s29 + $0x10] sm:$0xff]   ;;  %v12511_v61 = vld [vmem:[%s13564_s29 + $0x220] sm:$0xff]   ;;  %v14623_v53 = vld [vmem:[#allocation3 + $0xc] sm:$0xff]   ;;  %vm9797_vm0 = vcmask 256000   ;;  %p10907_p13 = scmp.ne.s32.totalorder %s12807_s20, 1 }
 0x3ef   : > { %11521 = vmatprep.subr.bf16.mxu1 %v12508_v1  ;;  %11296 = vmatpush3.bf16.msra.mxu0 %v12513_v43  ;;  %v14621_v27 = vld [vmem:[#allocation3 + $0x8] sm:$0xf]  ;;  %v6329_v51 = vld [vmem:[#allocation3 + $0x4] sm:$0xe]  ;;  %v12512_v18 = vld [vmem:[%s13564_s29 + $0x228] sm:$0xff]   ;;  %v6145_v56 = vshll.u32 %v14623_v53, 16 }
 0x3f0   : > { %11297 = vmatprep.subr.bf16.mxu0 %v12515_v33  ;;  %v14626_v4 = vcombine.low %v6329_v51, %v14621_v27  ;;  %v6149_v6 = vshrl.u32 %v14623_v53, 16  ;;  %v14633_v50 = vld [vmem:[#allocation3 + $0x14] sm:$0xff]   ;;  %v12522_v16 = vld [vmem:[%s13564_s29 + $0x18] sm:$0xff]   ;;  %v12514_v25 = vld [vmem:[%s13564_s29 + $0x230] sm:$0xff]   ;;  %vm9877_vm1 = vcmask (!%p10907_p13), 257024   ;;  %vm9888_vm2 = vcmask (!%p10907_p13), 254976  }
 0x3f1   : > { %v6536_v36 = vrot.slane %v6145_v56, 2  ;;  %v6153_v7 = vshll.u32 %v14633_v50, 16  ;;  %v6157_v9 = vshrl.u32 %v14633_v50, 16  ;;  %v12524_v10 = vld [vmem:[%s13564_s29 + $0x20] sm:$0xff]   ;;  %v12516_v32 = vld [vmem:[%s13564_s29 + $0x238] sm:$0xff]   ;;  %v12526_v15 = vld [vmem:[%s13564_s29 + $0x28] sm:$0xff]  }
 0x3f2   : > { %11522 = vmatpush3.bf16.msra.mxu1 %v12508_v1  ;;  %v6528_v19 = vshrl.u32 %v14626_v4, 16  ;;  %v6531_v39 = vshll.u32 %v14626_v4, 16  ;;  %v6535_v42 = vrot.slane %v6149_v6, 1  ;;  %v14651_v54 = vld [vmem:[#allocation3 + $0x1c] sm:$0xff]   ;;  %v12528_v44 = vld [vmem:[%s13564_s29 + $0x30] sm:$0xff]   ;;  %v12520_v8 = vld [vmem:[%s13564_s29 + $0x240] sm:$0xff]  }
 0x3f3   : > { %11523 = vmatprep.subr.bf16.mxu1 %v12509_v12  ;;  %11298 = vmatpush3.bf16.msra.mxu0 %v12515_v33  ;;  %v6539_v21 = vrot.slane %v6157_v9, 1  ;;  %v6540_v11 = vrot.slane %v6153_v7, 2  ;;  %v6161_v35 = vshll.u32 %v14651_v54, 16  ;;  %v6165_v2 = vshrl.u32 %v14651_v54, 16  ;;  %v14656_v46 = vld [vmem:[#allocation3 + $0x24] sm:$0xff]   ;;  %v12532_v29 = vld [vmem:[%s13564_s29 + $0x38] sm:$0xff]  }
 0x3f4   : > { %11299 = vmatprep.subr.bf16.mxu0 %v12517_v13  ;;  %v6530_v60 = vrot.slane %v6528_v19, 1  ;;  %v6533_v24 = vrot.slane %v6531_v39, 2  ;;  %v6537_v63 = vor.u32 %v6536_v36, %v6535_v42  ;;  %v6169_v55 = vshll.u32 %v14656_v46, 16  ;;  %v4949_v0 = vld [vmem:[#allocation3] sm:$0xf]  ;;  %v12536_v38 = vld [vmem:[%s13564_s29 + $0x40] sm:$0xff]  }
 0x3f5   : > { %v6541_v26 = vor.u32 %v6540_v11, %v6539_v21  ;;  %v6543_v34 = vrot.slane %v6165_v2, 1  ;;  %v6544_v28 = vrot.slane %v6161_v35, 2  ;;  %v6173_v62 = vshrl.u32 %v14656_v46, 16  ;;  %v14665_v41 = vld [vmem:[#allocation3 + $0x4] sm:$0xf]  ;;  %v12523_v17 = vld [vmem:[%s13564_s29 + $0x248] sm:$0xff]  }
 0x3f6   : > { %11524 = vmatpush3.bf16.msra.mxu1 %v12509_v12  ;;  %v6534_v48 = vor.u32 %v6533_v24, %v6530_v60  ;;  %v14669_v20 = vcombine.low %v4949_v0, %v14665_v41  ;;  %v6548_v47 = vrot.slane %v6169_v55, 2  ;;  %v12538_v45 = vld [vmem:[#allocation3 + $0x2c] ss:$0 sps:$4 sm:$0x77]   ;;  %v12525_v22 = vld [vmem:[%s13564_s29 + $0x250] sm:$0xff]   ;;  %v12540_v12 = vld [vmem:[%s13564_s29 + $0x48] sm:$0xff]  }
 0x3f7   : > { %11525 = vmatprep.subr.bf16.mxu1 %v12510_v52  ;;  %11300 = vmatpush3.bf16.msra.mxu0 %v12517_v13  ;;  %v6545_v58 = vor.u32 %v6544_v28, %v6543_v34  ;;  %v6542_v30 = vsel %vm5558_vm8, %v6537_v63, %v6541_v26  ;;  %v6547_v3 = vrot.slane %v6173_v62, 1  ;;  %v6552_v40 = vshrl.u32 %v12538_v45, 16  ;;  %v14681_v23 = vld [vmem:[#allocation3 + $0x8] sm:$0xff]   ;;  %v6705_v59 = vld [vmem:[#allocation3 + $0x4] sm:$0xc]  ;;  %v12530_v19 = vld [vmem:[%s13564_s29 + $0x260] sm:$0xff]  }
 0x3f8   : > { %11301 = vmatprep.subr.bf16.mxu0 %v12522_v16  ;;  %v6538_v37 = vsel %vm5558_vm8, %v6534_v48, %v6537_v63  ;;  %11311 = vmatprep.mubr.bf16.mxu0 %v14669_v20  ;;  %v6555_v31 = vshll.u32 %v12538_v45, 16  ;;  %v10507_v13 = vcombine.low %v6705_v59, %v14621_v27  ;;  %v5170_v51 = vshll.u32 %v14669_v20, 16  ;;  %v14696_v27 = vld [vmem:[#allocation3 + $0x18] sm:$0xff]   ;;  %v12545_v60 = vld [vmem:[%s13564_s29 + $0x58] sm:$0xff]   ;;  %v14701_v63 = vld [vmem:[#allocation3 + $0x20] sm:$0xff]  }
 0x3f9   : > { %11535 = vmatprep.mubr.bf16.mxu1 %v6538_v37  ;;  %v6546_v14 = vsel %vm5558_vm8, %v6541_v26, %v6545_v58  ;;  %v6549_v49 = vor.u32 %v6548_v47, %v6547_v3  ;;  %v6554_v5 = vrot.slane %v6552_v40, 1  ;;  %v6731_v39 = vrot.slane %v14623_v53, 2  ;;  %v12539_v21 = vld [vmem:[%s13564_s29 + $0x270] sm:$0xff]   ;;  %v12551_v11 = vld [vmem:[%s13564_s29 + $0x68] sm:$0xff]   ;;  %v12541_v26 = vld [vmem:[%s13564_s29 + $0x278] sm:$0xff]  }
 0x3fa   : > { %11526 = vmatpush3.bf16.msra.mxu1 %v12510_v52  ;;  %v6557_v57 = vrot.slane %v6555_v31, 2  ;;  %v12527_v52 = vld [vmem:[%s13564_s29 + $0x258] sm:$0xff]   ;;  %v5168_v42 = vshrl.u32 %v14669_v20, 16  ;;  %v5175_v36 = vshll.u32 %v14681_v23, 16  ;;  %v5172_v24 = vrot.slane %v5170_v51, 1  ;;  %v12544_v0 = vld [vmem:[%s13564_s29 + $0x280] sm:$0xff]  }
 0x3fb   : > { %11527 = vmatprep.subr.bf16.mxu1 %v12511_v61  ;;  %11302 = vmatpush3.bf16.msra.mxu0 %v12522_v16  ;;  %v6550_v43 = vsel %vm5558_vm8, %v6545_v58, %v6549_v49  ;;  %v6730_v16 = vrot.slane %v10507_v13, 2  ;;  %v6733_v34 = vrot.slane %v14633_v50, 2  ;;  %v6735_v58 = vrot.slane %v14651_v54, 2  ;;  %v12559_v31 = vld [vmem:[%s13564_s29 + $0x80] sm:$0xff]  }
 0x3fc   : > { %11303 = vmatprep.subr.bf16.mxu0 %v12524_v10  ;;  %v6558_v1 = vor.u32 %v6557_v57, %v6554_v5  ;;  %v5177_v37 = vrot.slane %v5175_v36, 1  ;;  %v5191_v3 = vshll.u32 %v14696_v27, 16  ;;  %v12550_v5 = vld [vmem:[%s13564_s29 + $0x290] sm:$0xff]   ;;  %v6737_v57 = vrot.slane %v14656_v46, 2 }
 0x3fd   : > { %v6732_v48 = vsel %vm5762_vm13, %v6730_v16, %v6731_v39  ;;  %v6734_v47 = vsel %vm5762_vm13, %v6731_v39, %v6733_v34  ;;  %v6736_v45 = vsel %vm5762_vm13, %v6733_v34, %v6735_v58  ;;  %v5203_v13 = vshrl.u32 %v14701_v63, 16  ;;  %v12558_v34 = vld [vmem:[%s13564_s29 + $0x2a8] sm:$0xff]  }
 0x3fe   : > { %11528 = vmatpush3.bf16.msra.mxu1 %v12511_v61  ;;  %v6559_v33 = vsel %vm5558_vm8, %v6549_v49, %v6558_v1  ;;  %v14689_v61 = vld [vmem:[#allocation3 + $0x10] sm:$0xff]  }
 0x3ff   : > { %11529 = vmatprep.subr.bf16.mxu1 %v12512_v18  ;;  %11304 = vmatpush3.bf16.msra.mxu0 %v12524_v10  ;;  %v12548_v10 = vld [vmem:[%s13564_s29 + $0x60] sm:$0xff]   ;;  %v5183_v28 = vshll.u32 %v14689_v61, 16  ;;  %v5187_v20 = vshrl.u32 %v14689_v61, 16 }
 0x400   : > { %11305 = vmatprep.subr.bf16.mxu0 %v12526_v15 }
 0x402   : > { %11530 = vmatpush3.bf16.msra.mxu1 %v12512_v18  ;;  %v12542_v18 = vld [vmem:[%s13564_s29 + $0x50] sm:$0xff]  }
 0x403   : > { %11531 = vmatprep.subr.bf16.mxu1 %v12514_v25  ;;  %11306 = vmatpush3.bf16.msra.mxu0 %v12526_v15  ;;  %v5173_v15 = vor.u32 %v5172_v24, %v5168_v42  ;;  %v5359_v42 = vld [vmem:[#allocation3] sm:$0xe]  ;;  %v12564_v24 = vld [vmem:[%s13564_s29 + $0x90] sm:$0xff]  }
 0x404   : > { %11307 = vmatprep.subr.bf16.mxu0 %v12528_v44 }
 0x406   : > { %11532 = vmatpush3.bf16.msra.mxu1 %v12514_v25  ;;  %v12533_v25 = vld [vmem:[%s13564_s29 + $0x268] sm:$0xff]  }
 0x407   : > { %11533 = vmatprep.subr.bf16.mxu1 %v12516_v32  ;;  %11308 = vmatpush3.bf16.msra.mxu0 %v12528_v44  ;;  %v5178_v44 = vsel %vm5166_vm14, %v5173_v15, %v5177_v37  ;;  %v14758_v15 = vld [vmem:[#allocation3 + $0xc] sm:$0xf] }
 0x408   : > { %11309 = vmatprep.subr.bf16.mxu0 %v12532_v29 }
 0x40a   : > { %11534 = vmatpush3.bf16.msra.mxu1 %v12516_v32  ;;  %v14710_v32 = vld [vmem:[#allocation3 + $0x28] ss:$0 sps:$4 sm:$0x33]  }
 0x40b   : > { %11547 = vmatprep.subr.bf16.mxu1 %v12520_v8  ;;  %11310 = vmatpush3.bf16.msra.mxu0 %v12532_v29  ;;  %v5179_v29 = vshrl.u32 %v14681_v23, 16  ;;  %v5207_v51 = vshll.u32 %v14710_v32, 16 }
 0x40c   : > { %11323 = vmatprep.subr.bf16.mxu0 %v12536_v38 }
 0x40d   : > { %11536 = vmatmul.mubr.bf16.vlgmr.msra.gmra.mrb[0].mxu1 %v6542_v30  ;;  %v12557_v30 = vld [vmem:[%s13564_s29 + $0x78] sm:$0xff]   ;;  %v5181_v40 = vor.u32 %v5179_v29, %v5177_v37  ;;  %v6886_v37 = vld [vmem:[#allocation3 + $0x8] sm:$0xf] }
 0x40e   : > { %11548 = vmatpush3.bf16.msra.mxu1 %v12520_v8  ;;  %11539 = vmatprep.mubr.bf16.mxu1 %v6546_v14  ;;  %v12554_v8 = vld [vmem:[%s13564_s29 + $0x70] sm:$0xff]   ;;  %v5185_v14 = vrot.slane %v5183_v28, 1 }
 0x40f   : > { %11549 = vmatprep.subr.bf16.mxu1 %v12523_v17  ;;  %11312 = vmatmul.mubr.bf16.vlgmr.msra.gmra.mrb[120].mxu0 %v14681_v23 }
 0x410   : > { %11324 = vmatpush3.bf16.msra.mxu0 %v12536_v38  ;;  %11315 = vmatprep.mubr.bf16.mxu0 %v14689_v61  ;;  %v12560_v38 = vld [vmem:[#allocation3 + $0x2c] ss:$0 sps:$4 sm:$0xff]   ;;  %v5189_v49 = vor.u32 %v5187_v20, %v5185_v14 }
 0x411   : > { %11325 = vmatprep.subr.bf16.mxu0 %v12540_v12  ;;  %v6739_v59 = vrot.slane %v12560_v38, 2  ;;  %v12575_v38 = vld [vmem:[%s13564_s29 + $0xb0] sm:$0xff]  }
 0x412   : > { %11550 = vmatpush3.bf16.msra.mxu1 %v12523_v17  ;;  %v12546_v17 = vld [vmem:[%s13564_s29 + $0x288] sm:$0xff]  }
 0x413   : > { %11551 = vmatprep.subr.bf16.mxu1 %v12525_v22  ;;  %v6740_v39 = vsel %vm5762_vm13, %v6737_v57, %v6739_v59 }
 0x414   : > { %11326 = vmatpush3.bf16.msra.mxu0 %v12540_v12  ;;  %v5186_v12 = vsel %vm5166_vm14, %v5181_v40, %v5185_v14  ;;  %v12567_v40 = vld [vmem:[%s13564_s29 + $0x2c0] sm:$0xff]  }
 0x415   : > { %11540 = vmatmul.mubr.bf16.gmra.mrb[4].mxu1 %v6550_v43  ;;  %11327 = vmatprep.subr.bf16.mxu0 %v12542_v18  ;;  %v12562_v43 = vld [vmem:[%s13564_s29 + $0x88] sm:$0xff]  }
 0x416   : > { %11552 = vmatpush3.bf16.msra.mxu1 %v12525_v22  ;;  %11543 = vmatprep.mubr.bf16.mxu1 %v6559_v33  ;;  %v5193_v22 = vrot.slane %v5191_v3, 1 }
 0x417   : > { %11553 = vmatprep.subr.bf16.mxu1 %v12527_v52  ;;  %11316 = vmatmul.mubr.bf16.gmra.mrb[124].mxu0 %v14696_v27 }
 0x418   : > { %11328 = vmatpush3.bf16.msra.mxu0 %v12542_v18  ;;  %11319 = vmatprep.mubr.bf16.mxu0 %v14701_v63  ;;  %v5194_v33 = vsel %vm5166_vm14, %v5189_v49, %v5193_v22  ;;  %v6738_v18 = vsel %vm5762_vm13, %v6735_v58, %v6737_v57  ;;  %v12571_v58 = vld [vmem:[%s13564_s29 + $0xa0] sm:$0xff]  }
 0x419   : > { %11329 = vmatprep.subr.bf16.mxu0 %v12545_v60  ;;  %v14783_v49 = vld [vmem:[#allocation3 + $0x18] sm:$0xff]  }
 0x41a   : > { %11554 = vmatpush3.bf16.msra.mxu1 %v12527_v52  ;;  %v5195_v52 = vshrl.u32 %v14696_v27, 16  ;;  %v12581_v57 = vld [vmem:[%s13564_s29 + $0xc0] sm:$0xff]  }
 0x41b   : > { %11555 = vmatprep.subr.bf16.mxu1 %v12530_v19 }
 0x41c   : > { %11330 = vmatpush3.bf16.msra.mxu0 %v12545_v60  ;;  %v5197_v60 = vor.u32 %v5195_v52, %v5193_v22  ;;  %v12579_v22 = vld [vmem:[%s13564_s29 + $0xb8] sm:$0xff]  }
 0x41d   : > { %11544 = vmatmul.mubr.bf16.gmra.mrb[8].mxu1 %v6558_v1  ;;  %11331 = vmatprep.subr.bf16.mxu0 %v12548_v10  ;;  %v5199_v1 = vshll.u32 %v14701_v63, 16 }
 0x41e   : > { %11556 = vmatpush3.bf16.msra.mxu1 %v12530_v19  ;;  %11563 = vmatprep.mubr.bf16.mxu1 %v6732_v48  ;;  %v12552_v19 = vld [vmem:[%s13564_s29 + $0x298] sm:$0xff]   ;;  %v5209_v48 = vrot.slane %v5207_v51, 1  ;;  %v14794_v51 = vld [vmem:[#allocation3 + $0x28] ss:$0 sps:$4 sm:$0x77]  }
 0x41f   : > { %11557 = vmatprep.subr.bf16.mxu1 %v12533_v25  ;;  %11320 = vmatmul.mubr.bf16.gmra.mrb[128].mxu0 %v14710_v32  ;;  %v5201_v16 = vrot.slane %v5199_v1, 1 }
 0x420   : > { %11332 = vmatpush3.bf16.msra.mxu0 %v12548_v10  ;;  %11339 = vmatprep.mubr.bf16.mxu0 %v5178_v44  ;;  %v12556_v10 = vld [vmem:[%s13564_s29 + $0x2a0] sm:$0xff]   ;;  %v12569_v44 = vld [vmem:[%s13564_s29 + $0x98] sm:$0xff]  }
 0x421   : > { %11333 = vmatprep.subr.bf16.mxu0 %v12551_v11 }
 0x422   : > { %11558 = vmatpush3.bf16.msra.mxu1 %v12533_v25  ;;  %v5205_v25 = vor.u32 %v5203_v13, %v5201_v16 }
 0x423   : > { %11559 = vmatprep.subr.bf16.mxu1 %v12539_v21 }
 0x424   : > { %11334 = vmatpush3.bf16.msra.mxu0 %v12551_v11  ;;  %v14762_v11 = vcombine.low %v5359_v42, %v14665_v41 }
 0x425   : > { %11335 = vmatprep.subr.bf16.mxu0 %v12554_v8 }
 0x426   : > { %11560 = vmatpush3.bf16.msra.mxu1 %v12539_v21  ;;  %v5202_v21 = vsel %vm5166_vm14, %v5197_v60, %v5201_v16  ;;  %v5385_v41 = vrot.slane %v14762_v11, 1  ;;  %v12585_v16 = vld [vmem:[%s13564_s29 + $0xc8] sm:$0xff]  }
 0x427   : > { %11561 = vmatprep.subr.bf16.mxu1 %v12541_v26 }
 0x428   : > { %11336 = vmatpush3.bf16.msra.mxu0 %v12554_v8  ;;  %v14767_v8 = vcombine.low %v6886_v37, %v14758_v15  ;;  %v12587_v37 = vld [vmem:[%s13564_s29 + $0xd0] sm:$0xff]  }
 0x429   : > { %11337 = vmatprep.subr.bf16.mxu0 %v12557_v30 }
 0x42a   : > { %11562 = vmatpush3.bf16.msra.mxu1 %v12541_v26  ;;  %v5210_v26 = vsel %vm5166_vm14, %v5205_v25, %v5209_v48  ;;  %v7105_v42 = vshrl.u32 %v14767_v8, 16 }
 0x42b   : > { %11575 = vmatprep.subr.bf16.mxu1 %v12544_v0 }
 0x42c   : > { %11338 = vmatpush3.bf16.msra.mxu0 %v12557_v30  ;;  %v5386_v30 = vrot.slane %v14681_v23, 1  ;;  %v12583_v23 = vld [vmem:[%s13564_s29 + $0x2f0] sm:$0xff]  }
 0x42d   : > { %11564 = vmatmul.mubr.bf16.vlgmr.msra.gmra.mrb[0].mxu1 %v6734_v47  ;;  %11351 = vmatprep.subr.bf16.mxu0 %v12559_v31  ;;  %v12561_v47 = vld [vmem:[%s13564_s29 + $0x2b0] sm:$0xff]  }
 0x42e   : > { %11576 = vmatpush3.bf16.msra.mxu1 %v12544_v0  ;;  %11567 = vmatprep.mubr.bf16.mxu1 %v6736_v45  ;;  %v5211_v0 = vshrl.u32 %v14710_v32, 16  ;;  %v5387_v14 = vsel %vm5384_vm15, %v5385_v41, %v5386_v30  ;;  %v12563_v45 = vld [vmem:[%s13564_s29 + $0x2b8] sm:$0xff]  }
 0x42f   : > { %11577 = vmatprep.subr.bf16.mxu1 %v12546_v17  ;;  %11340 = vmatmul.mubr.bf16.vlgmr.msra.gmra.mrb[120].mxu0 %v5186_v12  ;;  %v5390_v12 = vrot.slane %v14696_v27, 1  ;;  %v5584_v27 = vshrl.u32 %v14794_v51, 16 }
 0x430   : > { %11352 = vmatpush3.bf16.msra.mxu0 %v12559_v31  ;;  %11343 = vmatprep.mubr.bf16.mxu0 %v5194_v33  ;;  %v5213_v32 = vor.u32 %v5211_v0, %v5209_v48  ;;  %v14781_v31 = vld [vmem:[#allocation3 + $0x10] sm:$0xff]   ;;  %v12572_v33 = vld [vmem:[%s13564_s29 + $0x2d0] sm:$0xff]  }
 0x431   : > { %11353 = vmatprep.subr.bf16.mxu0 %v12562_v43  ;;  %v7112_v48 = vshll.u32 %v14781_v31, 16 }
 0x432   : > { %11578 = vmatpush3.bf16.msra.mxu1 %v12546_v17  ;;  %v12573_v17 = vld [vmem:[%s13564_s29 + $0xa8] sm:$0xff]  }
 0x433   : > { %11579 = vmatprep.subr.bf16.mxu1 %v12550_v5 }
 0x434   : > { %11354 = vmatpush3.bf16.msra.mxu0 %v12562_v43  ;;  %v7107_v43 = vshll.u32 %v14767_v8, 16 }
 0x435   : > { %11568 = vmatmul.mubr.bf16.gmra.mrb[4].mxu1 %v6738_v18  ;;  %11355 = vmatprep.subr.bf16.mxu0 %v12564_v24  ;;  %v14796_v18 = vld [vmem:[#allocation3 + $0x20] sm:$0xff]  }
 0x436   : > { %11580 = vmatpush3.bf16.msra.mxu1 %v12550_v5  ;;  %11571 = vmatprep.mubr.bf16.mxu1 %v6740_v39  ;;  %v12570_v5 = vld [vmem:[%s13564_s29 + $0x2c8] sm:$0xff]   ;;  %v12574_v39 = vld [vmem:[%s13564_s29 + $0x2d8] sm:$0xff]   ;;  %v7109_v25 = vrot.slane %v7107_v43, 1 }
 0x437   : > { %11581 = vmatprep.subr.bf16.mxu1 %v12552_v19  ;;  %11344 = vmatmul.mubr.bf16.gmra.mrb[124].mxu0 %v5202_v21  ;;  %v5560_v21 = vshrl.u32 %v14762_v11, 16  ;;  %v12586_v43 = vld [vmem:[%s13564_s29 + $0x2f8] sm:$0xff]  }
 0x438   : > { %11356 = vmatpush3.bf16.msra.mxu0 %v12564_v24  ;;  %11347 = vmatprep.mubr.bf16.mxu0 %v5210_v26  ;;  %v14803_v24 = vld [vmem:[#allocation3 + $0x28] sm:$0xff]   ;;  %v5563_v26 = vshll.u32 %v14762_v11, 16  ;;  %v7110_v0 = vor.u32 %v7109_v25, %v7105_v42  ;;  %v12588_v42 = vld [vmem:[%s13564_s29 + $0x300] sm:$0xff]  }
 0x439   : > { %11357 = vmatprep.subr.bf16.mxu0 %v12569_v44 }
 0x43a   : > { %11582 = vmatpush3.bf16.msra.mxu1 %v12552_v19 }
 0x43b   : > { %11583 = vmatprep.subr.bf16.mxu1 %v12556_v10 }
 0x43c   : > { %11358 = vmatpush3.bf16.msra.mxu0 %v12569_v44  ;;  %v5394_v44 = vrot.slane %v14794_v51, 1 }
 0x43d   : > { %11572 = vmatmul.mubr.bf16.gmra.mrb[8].mxu1 %v6739_v59  ;;  %11359 = vmatprep.subr.bf16.mxu0 %v12571_v58  ;;  %v5388_v59 = vrot.slane %v14689_v61, 1 }
 0x43e   : > { %11584 = vmatpush3.bf16.msra.mxu1 %v12556_v10  ;;  %11591 = vmatprep.mubr.bf16.mxu1 %v14767_v8  ;;  %v5392_v10 = vrot.slane %v14701_v63, 1  ;;  %v12577_v8 = vld [vmem:[%s13564_s29 + $0x2e0] sm:$0xff]  }
 0x43f   : > { %11585 = vmatprep.subr.bf16.mxu1 %v12558_v34  ;;  %11348 = vmatmul.mubr.bf16.gmra.mrb[128].mxu0 %v5213_v32  ;;  %v5389_v19 = vsel %vm5384_vm15, %v5386_v30, %v5388_v59  ;;  %v5391_v60 = vsel %vm5384_vm15, %v5388_v59, %v5390_v12  ;;  %v5562_v30 = vrot.slane %v5560_v21, 1  ;;  %v5565_v32 = vrot.slane %v5563_v26, 2  ;;  %v12598_v26 = vld [vmem:[%s13564_s29 + $0xf8] sm:$0xff]  }
 0x440   : > { %11360 = vmatpush3.bf16.msra.mxu0 %v12571_v58  ;;  %11367 = vmatprep.mubr.bf16.mxu0 %v5387_v14  ;;  %v7114_v58 = vrot.slane %v7112_v48, 1  ;;  %v5393_v41 = vsel %vm5384_vm15, %v5390_v12, %v5392_v10  ;;  %v5395_v11 = vsel %vm5384_vm15, %v5392_v10, %v5394_v44  ;;  %v5568_v14 = vrot.slane %v5175_v36, 2 }
 0x441   : > { %11361 = vmatprep.subr.bf16.mxu0 %v12573_v17  ;;  %v7120_v36 = vshll.u32 %v14783_v49, 16  ;;  %v7116_v59 = vshrl.u32 %v14781_v31, 16  ;;  %v7124_v12 = vshrl.u32 %v14783_v49, 16  ;;  %v7136_v10 = vshll.u32 %v14803_v24, 16 }
 0x442   : > { %11586 = vmatpush3.bf16.msra.mxu1 %v12558_v34  ;;  %v14814_v34 = vld [vmem:[#allocation3 + $0x30] ss:$0 sps:$4 sm:$0x33]   ;;  %v5572_v21 = vrot.slane %v5183_v28, 2 }
 0x443   : > { %11587 = vmatprep.subr.bf16.mxu1 %v12561_v47  ;;  %v7138_v28 = vrot.slane %v7136_v10, 1 }
 0x444   : > { %11362 = vmatpush3.bf16.msra.mxu0 %v12573_v17  ;;  %v5567_v17 = vrot.slane %v5179_v29, 1 }
 0x445   : > { %11363 = vmatprep.subr.bf16.mxu0 %v12575_v38 }
 0x446   : > { %11588 = vmatpush3.bf16.msra.mxu1 %v12561_v47  ;;  %v12589_v47 = vld [vmem:[%s13564_s29 + $0xd8] sm:$0xff]   ;;  %v14829_v29 = vor.u32 %v5568_v14, %v5567_v17  ;;  %v7296_v17 = vld [vmem:[#allocation3 + $0x8] sm:$0xe] }
 0x447   : > { %11589 = vmatprep.subr.bf16.mxu1 %v12563_v45  ;;  %v12592_v14 = vld [vmem:[%s13564_s29 + $0x310] sm:$0xff]  }
 0x448   : > { %11364 = vmatpush3.bf16.msra.mxu0 %v12575_v38  ;;  %v7115_v38 = vsel %vm5166_vm14, %v7110_v0, %v7114_v58  ;;  %v5576_v0 = vrot.slane %v5191_v3, 2 }
 0x449   : > { %11365 = vmatprep.subr.bf16.mxu0 %v12579_v22 }
 0x44a   : > { %11590 = vmatpush3.bf16.msra.mxu1 %v12563_v45  ;;  %v12580_v45 = vld [vmem:[%s13564_s29 + $0x2e8] sm:$0xff]  }
 0x44b   : > { %11603 = vmatprep.subr.bf16.mxu1 %v12567_v40 }
 0x44c   : > { %11366 = vmatpush3.bf16.msra.mxu0 %v12579_v22  ;;  %v5566_v22 = vor.u32 %v5565_v32, %v5562_v30  ;;  %v7140_v30 = vshrl.u32 %v14803_v24, 16  ;;  %v7698_v32 = vrot.slane %v14781_v31, 2 }
 0x44d   : > { %11592 = vmatmul.mubr.bf16.vlgmr.msra.gmra.mrb[0].mxu1 %v14781_v31  ;;  %11379 = vmatprep.subr.bf16.mxu0 %v12581_v57 }
 0x44e   : > { %11604 = vmatpush3.bf16.msra.mxu1 %v12567_v40  ;;  %11595 = vmatprep.mubr.bf16.mxu1 %v14783_v49  ;;  %v12591_v40 = vld [vmem:[%s13564_s29 + $0xe0] sm:$0xff]  }
 0x44f   : > { %11605 = vmatprep.subr.bf16.mxu1 %v12570_v5  ;;  %11368 = vmatmul.mubr.bf16.vlgmr.msra.gmra.mrb[120].mxu0 %v5389_v19  ;;  %v7122_v19 = vrot.slane %v7120_v36, 1 }
 0x450   : > { %11380 = vmatpush3.bf16.msra.mxu0 %v12581_v57  ;;  %11371 = vmatprep.mubr.bf16.mxu0 %v5391_v60  ;;  %v5570_v57 = vsel %vm5558_vm8, %v5566_v22, %v14829_v29  ;;  %v7142_v22 = vor.u32 %v7140_v30, %v7138_v28 }
 0x451   : > { %11381 = vmatprep.subr.bf16.mxu0 %v12585_v16  ;;  %v7126_v60 = vor.u32 %v7124_v12, %v7122_v19 }
 0x452   : > { %11606 = vmatpush3.bf16.msra.mxu1 %v12570_v5  ;;  %v12593_v5 = vld [vmem:[%s13564_s29 + $0xe8] sm:$0xff]  }
 0x453   : > { %11607 = vmatprep.subr.bf16.mxu1 %v12572_v33 }
 0x454   : > { %11382 = vmatpush3.bf16.msra.mxu0 %v12585_v16  ;;  %v7118_v16 = vor.u32 %v7116_v59, %v7114_v58 }
 0x455   : > { %11596 = vmatmul.mubr.bf16.gmra.mrb[4].mxu1 %v14796_v18  ;;  %11383 = vmatprep.subr.bf16.mxu0 %v12587_v37 }
 0x456   : > { %11608 = vmatpush3.bf16.msra.mxu1 %v12572_v33  ;;  %11599 = vmatprep.mubr.bf16.mxu1 %v14803_v24  ;;  %v7128_v33 = vshll.u32 %v14796_v18, 16  ;;  %v7123_v58 = vsel %vm5166_vm14, %v7118_v16, %v7122_v19  ;;  %v5586_v16 = vrot.slane %v5584_v27, 1 }
 0x457   : > { %11609 = vmatprep.subr.bf16.mxu1 %v12574_v39  ;;  %11372 = vmatmul.mubr.bf16.gmra.mrb[124].mxu0 %v5393_v41  ;;  %v12590_v41 = vld [vmem:[%s13564_s29 + $0x308] sm:$0xff]  }
 0x458   : > { %11384 = vmatpush3.bf16.msra.mxu0 %v12587_v37  ;;  %11375 = vmatprep.mubr.bf16.mxu0 %v5395_v11  ;;  %v7130_v25 = vrot.slane %v7128_v33, 1  ;;  %v5571_v37 = vrot.slane %v5187_v20, 1  ;;  %v7144_v20 = vshll.u32 %v14814_v34, 16  ;;  %v5587_v11 = vshll.u32 %v14794_v51, 16 }
 0x459   : > { %11385 = vmatprep.subr.bf16.mxu0 %v12589_v47  ;;  %v5579_v51 = vrot.slane %v5203_v13, 1 }
 0x45a   : > { %11610 = vmatpush3.bf16.msra.mxu1 %v12574_v39  ;;  %v12596_v39 = vld [vmem:[%s13564_s29 + $0xf0] sm:$0xff]   ;;  %v7131_v61 = vsel %vm5166_vm14, %v7126_v60, %v7130_v25 }
 0x45b   : > { %11611 = vmatprep.subr.bf16.mxu1 %v12577_v8 }
 0x45c   : > { %11386 = vmatpush3.bf16.msra.mxu0 %v12589_v47  ;;  %v5573_v47 = vor.u32 %v5572_v21, %v5571_v37 }
 0x45d   : > { %11600 = vmatmul.mubr.bf16.gmra.mrb[8].mxu1 %v14814_v34  ;;  %11387 = vmatprep.subr.bf16.mxu0 %v12591_v40 }
 0x45e   : > { %11612 = vmatpush3.bf16.msra.mxu1 %v12577_v8  ;;  %11619 = vmatprep.mubr.bf16.mxu1 %v7115_v38  ;;  %v5575_v8 = vrot.slane %v5195_v52, 1  ;;  %v12600_v52 = vld [vmem:[%s13564_s29 + $0x100] sm:$0xff]   ;;  %v7146_v38 = vrot.slane %v7144_v20, 1  ;;  %v7322_v20 = vrot.slane %v14781_v31, 1 }
 0x45f   : > { %11613 = vmatprep.subr.bf16.mxu1 %v12580_v45  ;;  %11376 = vmatmul.mubr.bf16.gmra.mrb[128].mxu0 %v5394_v44  ;;  %v7132_v44 = vshrl.u32 %v14796_v18, 16  ;;  %v15012_v31 = vld [vmem:[#allocation3 + $0x2c] ss:$0 sps:$4 sm:$0x33]  }
 0x460   : > { %11388 = vmatpush3.bf16.msra.mxu0 %v12591_v40  ;;  %11395 = vmatprep.mubr.bf16.mxu0 %v5570_v57  ;;  %v5577_v3 = vor.u32 %v5576_v0, %v5575_v8  ;;  %v7700_v40 = vrot.slane %v14783_v49, 2  ;;  %v5574_v57 = vsel %vm5558_vm8, %v14829_v29, %v5573_v47  ;;  %v14903_v29 = vcombine.low %v7296_v17, %v14758_v15  ;;  %v12604_v8 = vld [vmem:[%s13564_s29 + $0x110] sm:$0xff]   ;;  %v5737_v15 = vld [vmem:[#allocation3] sm:$0xc] }
 0x461   : > { %11389 = vmatprep.subr.bf16.mxu0 %v12593_v5  ;;  %v7147_v37 = vsel %vm5166_vm14, %v7142_v22, %v7146_v38  ;;  %v12610_v22 = vld [vmem:[%s13564_s29 + $0x128] sm:$0xff]   ;;  %v6177_v50 = vshll.u32 %v15012_v31, 16 }
 0x462   : > { %11614 = vmatpush3.bf16.msra.mxu1 %v12580_v45  ;;  %v7134_v45 = vor.u32 %v7132_v44, %v7130_v25  ;;  %v14889_v19 = vsel %vm5762_vm13, %v7698_v32, %v7700_v40  ;;  %v5578_v13 = vsel %vm5558_vm8, %v5573_v47, %v5577_v3  ;;  %v12594_v25 = vld [vmem:[%s13564_s29 + $0x318] sm:$0xff]   ;;  %v12757_v47 = vld [vmem:[#allocation3 + $0x4] sm:$0xf] }
 0x463   : > { %11615 = vmatprep.subr.bf16.mxu1 %v12583_v23  ;;  %v10377_v27 = vcombine.low %v5737_v15, %v12757_v47  ;;  %v12760_v15 = vld [vmem:[#allocation3 + $0x18] sm:$0xff]  }
 0x464   : > { %11390 = vmatpush3.bf16.msra.mxu0 %v12593_v5  ;;  %v7702_v5 = vrot.slane %v14796_v18, 2  ;;  %v7139_v63 = vsel %vm5166_vm14, %v7134_v45, %v7138_v28  ;;  %v12758_v45 = vld [vmem:[#allocation3 + $0x8] sm:$0xff]   ;;  %v12620_v47 = vld [vmem:[%s13564_s29 + $0x148] sm:$0xff]  }
 0x465   : > { %11391 = vmatprep.subr.bf16.mxu0 %v12596_v39 }
 0x466   : > { %11616 = vmatpush3.bf16.msra.mxu1 %v12583_v23  ;;  %v12602_v23 = vld [vmem:[%s13564_s29 + $0x108] sm:$0xff]   ;;  %v14894_v60 = vsel %vm5762_vm13, %v7700_v40, %v7702_v5  ;;  %v12601_v40 = vld [vmem:[%s13564_s29 + $0x330] sm:$0xff]  }
 0x467   : > { %11617 = vmatprep.subr.bf16.mxu1 %v12586_v43 }
 0x468   : > { %11392 = vmatpush3.bf16.msra.mxu0 %v12596_v39  ;;  %v7704_v39 = vrot.slane %v14803_v24, 2 }
 0x469   : > { %11393 = vmatprep.subr.bf16.mxu0 %v12598_v26 }
 0x46a   : > { %11618 = vmatpush3.bf16.msra.mxu1 %v12586_v43  ;;  %v5580_v43 = vrot.slane %v5199_v1, 2  ;;  %v14900_v1 = vsel %vm5762_vm13, %v7702_v5, %v7704_v39  ;;  %v12612_v5 = vld [vmem:[%s13564_s29 + $0x130] sm:$0xff]  }
 0x46b   : > { %11631 = vmatprep.subr.bf16.mxu1 %v12588_v42 }
 0x46c   : > { %11394 = vmatpush3.bf16.msra.mxu0 %v12598_v26  ;;  %v5581_v21 = vor.u32 %v5580_v43, %v5579_v51  ;;  %v7148_v26 = vshrl.u32 %v14814_v34, 16  ;;  %v12606_v34 = vld [vmem:[%s13564_s29 + $0x118] sm:$0xff]   ;;  %v12605_v43 = vld [vmem:[%s13564_s29 + $0x340] sm:$0xff]  }
 0x46d   : > { %11620 = vmatmul.mubr.bf16.vlgmr.msra.gmra.mrb[0].mxu1 %v7123_v58  ;;  %11407 = vmatprep.subr.bf16.mxu0 %v12600_v52  ;;  %v12597_v58 = vld [vmem:[%s13564_s29 + $0x320] sm:$0xff]   ;;  %v12603_v51 = vld [vmem:[%s13564_s29 + $0x338] sm:$0xff]  }
 0x46e   : > { %11632 = vmatpush3.bf16.msra.mxu1 %v12588_v42  ;;  %11623 = vmatprep.mubr.bf16.mxu1 %v7131_v61  ;;  %v5589_v42 = vrot.slane %v5587_v11, 2  ;;  %v5582_v61 = vsel %vm5558_vm8, %v5577_v3, %v5581_v21  ;;  %v7150_v28 = vor.u32 %v7148_v26, %v7146_v38  ;;  %v12599_v11 = vld [vmem:[%s13564_s29 + $0x328] sm:$0xff]   ;;  %v5763_v3 = vrot.slane %v10377_v27, 2 }
 0x46f   : > { %11633 = vmatprep.subr.bf16.mxu1 %v12590_v41  ;;  %11396 = vmatmul.mubr.bf16.vlgmr.msra.gmra.mrb[120].mxu0 %v5574_v57  ;;  %v5764_v38 = vrot.slane %v12758_v45, 2  ;;  %v7324_v57 = vrot.slane %v14783_v49, 1  ;;  %v12631_v49 = vld [vmem:[%s13564_s29 + $0x170] sm:$0xff]  }
 0x470   : > { %11408 = vmatpush3.bf16.msra.mxu0 %v12600_v52  ;;  %11399 = vmatprep.mubr.bf16.mxu0 %v5578_v13  ;;  %v5590_v0 = vor.u32 %v5589_v42, %v5586_v16  ;;  %v7326_v13 = vrot.slane %v14796_v18, 1  ;;  %v14926_v16 = vld [vmem:[#allocation3 + $0x30] ss:$0 sps:$4 sm:$0x77]  }
 0x471   : > { %11409 = vmatprep.subr.bf16.mxu0 %v12602_v23  ;;  %v12614_v42 = vld [vmem:[%s13564_s29 + $0x138] sm:$0xff]  }
 0x472   : > { %11634 = vmatpush3.bf16.msra.mxu1 %v12590_v41  ;;  %v7321_v41 = vrot.slane %v14903_v29, 1  ;;  %v5591_v52 = vsel %vm5558_vm8, %v5581_v21, %v5590_v0  ;;  %v12759_v21 = vld [vmem:[#allocation3 + $0x10] sm:$0xff]  }
 0x473   : > { %11635 = vmatprep.subr.bf16.mxu1 %v12592_v14  ;;  %v5766_v26 = vrot.slane %v12759_v21, 2  ;;  %v7506_v21 = vrot.slane %v7124_v12, 1  ;;  %v7510_v12 = vrot.slane %v7132_v44, 1  ;;  %v12633_v18 = vld [vmem:[%s13564_s29 + $0x178] sm:$0xff]  }
 0x474   : > { %11410 = vmatpush3.bf16.msra.mxu0 %v12602_v23  ;;  %v7323_v17 = vsel %vm5384_vm15, %v7321_v41, %v7322_v20  ;;  %v5765_v23 = vsel %vm5762_vm13, %v5763_v3, %v5764_v38  ;;  %v7328_v41 = vrot.slane %v14803_v24, 1  ;;  %v7503_v3 = vrot.slane %v7112_v48, 2  ;;  %v12613_v48 = vld [vmem:[%s13564_s29 + $0x360] sm:$0xff]  }
 0x475   : > { %11624 = vmatmul.mubr.bf16.gmra.mrb[4].mxu1 %v7139_v63  ;;  %11411 = vmatprep.subr.bf16.mxu0 %v12604_v8  ;;  %v7325_v63 = vsel %vm5384_vm15, %v7322_v20, %v7324_v57  ;;  %v7330_v20 = vrot.slane %v14926_v16, 1  ;;  %v6179_v24 = vrot.slane %v6177_v50, 1 }
 0x476   : > { %11636 = vmatpush3.bf16.msra.mxu1 %v12592_v14  ;;  %11627 = vmatprep.mubr.bf16.mxu1 %v7147_v37  ;;  %v12608_v14 = vld [vmem:[%s13564_s29 + $0x120] sm:$0xff]   ;;  %v7327_v37 = vsel %vm5384_vm15, %v7324_v57, %v7326_v13 }
 0x477   : > { %11637 = vmatprep.subr.bf16.mxu1 %v12594_v25  ;;  %11400 = vmatmul.mubr.bf16.gmra.mrb[124].mxu0 %v5582_v61  ;;  %v7495_v61 = vshrl.u32 %v14903_v29, 16 }
 0x478   : > { %11412 = vmatpush3.bf16.msra.mxu0 %v12604_v8  ;;  %11403 = vmatprep.mubr.bf16.mxu0 %v5591_v52  ;;  %v12609_v8 = vld [vmem:[%s13564_s29 + $0x350] sm:$0xff]   ;;  %v12611_v52 = vld [vmem:[%s13564_s29 + $0x358] sm:$0xff]  }
 0x479   : > { %11413 = vmatprep.subr.bf16.mxu0 %v12606_v34  ;;  %v7497_v45 = vrot.slane %v7495_v61, 1 }
 0x47a   : > { %11638 = vmatpush3.bf16.msra.mxu1 %v12594_v25  ;;  %v12607_v25 = vld [vmem:[%s13564_s29 + $0x348] sm:$0xff]  }
 0x47b   : > { %11639 = vmatprep.subr.bf16.mxu1 %v12597_v58 }
 0x47c   : > { %11414 = vmatpush3.bf16.msra.mxu0 %v12606_v34  ;;  %v5767_v34 = vsel %vm5762_vm13, %v5764_v38, %v5766_v26 }
 0x47d   : > { %11628 = vmatmul.mubr.bf16.gmra.mrb[8].mxu1 %v7150_v28  ;;  %11415 = vmatprep.subr.bf16.mxu0 %v12608_v14  ;;  %v7498_v28 = vshll.u32 %v14903_v29, 16  ;;  %v7331_v29 = vsel %vm5384_vm15, %v7328_v41, %v7330_v20 }
 0x47e   : > { %11640 = vmatpush3.bf16.msra.mxu1 %v12597_v58  ;;  %11647 = vmatprep.mubr.bf16.mxu1 %v7323_v17  ;;  %v5768_v58 = vrot.slane %v12760_v15, 2  ;;  %v7329_v17 = vsel %vm5384_vm15, %v7326_v13, %v7328_v41  ;;  %v12762_v15 = vld [vmem:[#allocation3 + $0x8] sm:$0xf]  ;;  %v12621_v41 = vld [vmem:[%s13564_s29 + $0x378] sm:$0xff]  }
 0x47f   : > { %11641 = vmatprep.subr.bf16.mxu1 %v12599_v11  ;;  %11404 = vmatmul.mubr.bf16.gmra.mrb[128].mxu0 %v5590_v0  ;;  %v12617_v0 = vld [vmem:[%s13564_s29 + $0x140] sm:$0xff]   ;;  %v7500_v38 = vrot.slane %v7498_v28, 2  ;;  %v7519_v28 = vshrl.u32 %v14926_v16, 16 }
 0x480   : > { %11416 = vmatpush3.bf16.msra.mxu0 %v12608_v14  ;;  %11423 = vmatprep.mubr.bf16.mxu0 %v5765_v23  ;;  %v5769_v27 = vsel %vm5762_vm13, %v5766_v26, %v5768_v58  ;;  %v7502_v14 = vrot.slane %v7116_v59, 1  ;;  %v12622_v23 = vld [vmem:[%s13564_s29 + $0x150] sm:$0xff]  }
 0x481   : > { %11417 = vmatprep.subr.bf16.mxu0 %v12610_v22  ;;  %v12619_v26 = vld [vmem:[%s13564_s29 + $0x370] sm:$0xff]  }
 0x482   : > { %11642 = vmatpush3.bf16.msra.mxu1 %v12599_v11  ;;  %v12630_v11 = vld [vmem:[#allocation3 + $0x28] ss:$0 sps:$4 sm:$0xff]  }
 0x483   : > { %11643 = vmatprep.subr.bf16.mxu1 %v12601_v40  ;;  %v5772_v59 = vrot.slane %v12630_v11, 2  ;;  %v7521_v11 = vrot.slane %v7519_v28, 1  ;;  %v6155_v28 = vrot.slane %v6153_v7, 1  ;;  %v12646_v7 = vld [vmem:[%s13564_s29 + $0x3d0] sm:$0xff]  }
 0x484   : > { %11418 = vmatpush3.bf16.msra.mxu0 %v12610_v22 }
 0x485   : > { %11419 = vmatprep.subr.bf16.mxu0 %v12612_v5 }
 0x486   : > { %11644 = vmatpush3.bf16.msra.mxu1 %v12601_v40  ;;  %v12761_v40 = vld [vmem:[#allocation3 + $0x20] sm:$0xff]  }
 0x487   : > { %11645 = vmatprep.subr.bf16.mxu1 %v12603_v51  ;;  %v5770_v22 = vrot.slane %v12761_v40, 2  ;;  %v12638_v40 = vld [vmem:[%s13564_s29 + $0x188] sm:$0xff]  }
 0x488   : > { %11420 = vmatpush3.bf16.msra.mxu0 %v12612_v5  ;;  %v7504_v5 = vor.u32 %v7503_v3, %v7502_v14  ;;  %v12636_v14 = vld [vmem:[%s13564_s29 + $0x180] sm:$0xff]   ;;  %v7672_v3 = vld [vmem:[#allocation3 + $0x8] sm:$0xc] }
 0x489   : > { %11421 = vmatprep.subr.bf16.mxu0 %v12614_v42  ;;  %v5771_v57 = vsel %vm5762_vm13, %v5768_v58, %v5770_v22  ;;  %v5773_v13 = vsel %vm5762_vm13, %v5770_v22, %v5772_v59  ;;  %v12629_v22 = vld [vmem:[%s13564_s29 + $0x398] sm:$0xff]  }
 0x48a   : > { %11646 = vmatpush3.bf16.msra.mxu1 %v12603_v51  ;;  %v7501_v51 = vor.u32 %v7500_v38, %v7497_v45 }
 0x48b   : > { %11659 = vmatprep.subr.bf16.mxu1 %v12605_v43 }
 0x48c   : > { %11422 = vmatpush3.bf16.msra.mxu0 %v12614_v42  ;;  %v12615_v42 = vld [vmem:[%s13564_s29 + $0x368] sm:$0xff]  }
 0x48d   : > { %11648 = vmatmul.mubr.bf16.vlgmr.msra.gmra.mrb[0].mxu1 %v7325_v63  ;;  %11435 = vmatprep.subr.bf16.mxu0 %v12617_v0  ;;  %v7505_v63 = vsel %vm5558_vm8, %v7501_v51, %v7504_v5  ;;  %v14988_v51 = vld [vmem:[#allocation3 + $0xc] sm:$0xff]  }
 0x48e   : > { %11660 = vmatpush3.bf16.msra.mxu1 %v12605_v43  ;;  %11651 = vmatprep.mubr.bf16.mxu1 %v7327_v37  ;;  %v12624_v43 = vld [vmem:[%s13564_s29 + $0x158] sm:$0xff]   ;;  %v5919_v37 = vld [vmem:[#allocation3 + $0x4] sm:$0xf] }
 0x48f   : > { %11661 = vmatprep.subr.bf16.mxu1 %v12607_v25  ;;  %11424 = vmatmul.mubr.bf16.vlgmr.msra.gmra.mrb[120].mxu0 %v5767_v34  ;;  %v14962_v58 = vcombine.low %v5919_v37, %v12762_v15  ;;  %v7522_v34 = vshll.u32 %v14926_v16, 16  ;;  %v12634_v37 = vld [vmem:[%s13564_s29 + $0x3a8] sm:$0xff]   ;;  %v15009_v15 = vld [vmem:[#allocation3 + $0x24] sm:$0xff]  }
 0x490   : > { %11436 = vmatpush3.bf16.msra.mxu0 %v12617_v0  ;;  %11427 = vmatprep.mubr.bf16.mxu0 %v5769_v27  ;;  %v12628_v0 = vld [vmem:[%s13564_s29 + $0x168] sm:$0xff]   ;;  %v7515_v27 = vrot.slane %v7136_v10, 2 }
 0x491   : > { %11437 = vmatprep.subr.bf16.mxu0 %v12620_v47 }
 0x492   : > { %11662 = vmatpush3.bf16.msra.mxu1 %v12607_v25  ;;  %v12626_v25 = vld [vmem:[%s13564_s29 + $0x160] sm:$0xff]  }
 0x493   : > { %11663 = vmatprep.subr.bf16.mxu1 %v12609_v8 }
 0x494   : > { %11438 = vmatpush3.bf16.msra.mxu0 %v12620_v47  ;;  %v7514_v47 = vrot.slane %v7140_v30, 1  ;;  %v12763_v30 = vld [vmem:[#allocation3 + $0xc] sm:$0xf] }
 0x495   : > { %11652 = vmatmul.mubr.bf16.gmra.mrb[4].mxu1 %v7329_v17  ;;  %11439 = vmatprep.subr.bf16.mxu0 %v12622_v23  ;;  %v7524_v17 = vrot.slane %v7522_v34, 2  ;;  %v10637_v38 = vcombine.low %v7672_v3, %v12763_v30  ;;  %v12655_v34 = vld [vmem:[#allocation3 + $0x30] ss:$0 sps:$4 sm:$0xff]   ;;  %v12666_v3 = vld [vmem:[%s13564_s29 + $0x1e0] sm:$0xff]   ;;  %v12656_v30 = vld [vmem:[%s13564_s29 + $0x3f0] sm:$0xff]  }
 0x496   : > { %11664 = vmatpush3.bf16.msra.mxu1 %v12609_v8  ;;  %11655 = vmatprep.mubr.bf16.mxu1 %v7331_v29  ;;  %v7507_v8 = vrot.slane %v7120_v36, 2  ;;  %v12623_v36 = vld [vmem:[%s13564_s29 + $0x380] sm:$0xff]   ;;  %v12627_v29 = vld [vmem:[%s13564_s29 + $0x390] sm:$0xff]   ;;  %v7516_v45 = vor.u32 %v7515_v27, %v7514_v47  ;;  %v7706_v47 = vrot.slane %v12655_v34, 2 }
 0x497   : > { %11665 = vmatprep.subr.bf16.mxu1 %v12611_v52  ;;  %11428 = vmatmul.mubr.bf16.gmra.mrb[124].mxu0 %v5771_v57  ;;  %v7525_v10 = vor.u32 %v7524_v17, %v7521_v11  ;;  %v12640_v57 = vld [vmem:[%s13564_s29 + $0x190] sm:$0xff]  }
 0x498   : > { %11440 = vmatpush3.bf16.msra.mxu0 %v12622_v23  ;;  %11431 = vmatprep.mubr.bf16.mxu0 %v5773_v13  ;;  %v7508_v61 = vor.u32 %v7507_v8, %v7506_v21  ;;  %v12632_v13 = vld [vmem:[%s13564_s29 + $0x3a0] sm:$0xff]   ;;  %v15004_v8 = vld [vmem:[#allocation3 + $0x1c] sm:$0xff]   ;;  %v12659_v11 = vld [vmem:[%s13564_s29 + $0x1d0] sm:$0xff]  }
 0x499   : > { %11441 = vmatprep.subr.bf16.mxu0 %v12624_v43  ;;  %v12677_v34 = vld [vmem:[%s13564_s29 + $0x430] sm:$0xff]  }
 0x49a   : > { %11666 = vmatpush3.bf16.msra.mxu1 %v12611_v52  ;;  %v12625_v52 = vld [vmem:[%s13564_s29 + $0x388] sm:$0xff]  }
 0x49b   : > { %11667 = vmatprep.subr.bf16.mxu1 %v12613_v48 }
 0x49c   : > { %11442 = vmatpush3.bf16.msra.mxu0 %v12624_v43  ;;  %v14993_v43 = vld [vmem:[#allocation3 + $0x14] sm:$0xff]  }
 0x49d   : > { %11656 = vmatmul.mubr.bf16.gmra.mrb[8].mxu1 %v7330_v20  ;;  %11443 = vmatprep.subr.bf16.mxu0 %v12626_v25  ;;  %v7511_v20 = vrot.slane %v7128_v33, 2  ;;  %v7509_v33 = vsel %vm5558_vm8, %v7504_v5, %v7508_v61  ;;  %v7526_v5 = vsel %vm5558_vm8, %v7516_v45, %v7525_v10 }
 0x49e   : > { %11668 = vmatpush3.bf16.msra.mxu1 %v12613_v48  ;;  %11675 = vmatprep.mubr.bf16.mxu1 %v7505_v63  ;;  %v7697_v48 = vrot.slane %v10637_v38, 2 }
 0x49f   : > { %11669 = vmatprep.subr.bf16.mxu1 %v12615_v42  ;;  %11432 = vmatmul.mubr.bf16.gmra.mrb[128].mxu0 %v5772_v59  ;;  %v7512_v44 = vor.u32 %v7511_v20, %v7510_v12  ;;  %v6140_v59 = vshll.u32 %v14962_v58, 16  ;;  %v12639_v12 = vld [vmem:[%s13564_s29 + $0x3b8] sm:$0xff]   ;;  %v12649_v20 = vld [vmem:[%s13564_s29 + $0x1b0] sm:$0xff]  }
 0x4a0   : > { %11444 = vmatpush3.bf16.msra.mxu0 %v12626_v25  ;;  %11451 = vmatprep.mubr.bf16.mxu0 %v14962_v58  ;;  %v12643_v25 = vld [vmem:[%s13564_s29 + $0x198] sm:$0xff]   ;;  %v7699_v21 = vsel %vm5762_vm13, %v7697_v48, %v7698_v32 }
 0x4a1   : > { %11445 = vmatprep.subr.bf16.mxu0 %v12628_v0  ;;  %v7513_v16 = vsel %vm5558_vm8, %v7508_v61, %v7512_v44  ;;  %v7517_v23 = vsel %vm5558_vm8, %v7512_v44, %v7516_v45  ;;  %v6142_v63 = vrot.slane %v6140_v59, 1  ;;  %v12652_v61 = vld [vmem:[%s13564_s29 + $0x1b8] sm:$0xff]   ;;  %v6355_v45 = vrot.slane %v14988_v51, 1  ;;  %v15072_v59 = vld [vmem:[#allocation3 + $0x14] sm:$0xff]  }
 0x4a2   : > { %11670 = vmatpush3.bf16.msra.mxu1 %v12615_v42  ;;  %v6138_v42 = vshrl.u32 %v14962_v58, 16  ;;  %v12637_v58 = vld [vmem:[%s13564_s29 + $0x3b0] sm:$0xff]   ;;  %v12674_v48 = vld [vmem:[%s13564_s29 + $0x1f8] sm:$0xff]  }
 0x4a3   : > { %11671 = vmatprep.subr.bf16.mxu1 %v12619_v26 }
 0x4a4   : > { %11446 = vmatpush3.bf16.msra.mxu0 %v12628_v0  ;;  %v6147_v0 = vrot.slane %v6145_v56, 1  ;;  %v6143_v32 = vor.u32 %v6142_v63, %v6138_v42  ;;  %v12647_v56 = vld [vmem:[%s13564_s29 + $0x1a8] sm:$0xff]   ;;  %v12667_v63 = vld [vmem:[%s13564_s29 + $0x410] sm:$0xff]  }
 0x4a5   : > { %11447 = vmatprep.subr.bf16.mxu0 %v12631_v49 }
 0x4a6   : > { %11672 = vmatpush3.bf16.msra.mxu1 %v12619_v26  ;;  %v12645_v26 = vld [vmem:[%s13564_s29 + $0x1a0] sm:$0xff]   ;;  %v6151_v44 = vor.u32 %v6149_v6, %v6147_v0  ;;  %v12657_v6 = vld [vmem:[%s13564_s29 + $0x1c8] sm:$0xff]  }
 0x4a7   : > { %11673 = vmatprep.subr.bf16.mxu1 %v12621_v41 }
 0x4a8   : > { %11448 = vmatpush3.bf16.msra.mxu0 %v12631_v49  ;;  %v12642_v49 = vld [vmem:[%s13564_s29 + $0x3c0] sm:$0xff]   ;;  %v6156_v53 = vsel %vm5166_vm14, %v6151_v44, %v6155_v28 }
 0x4a9   : > { %11449 = vmatprep.subr.bf16.mxu0 %v12633_v18 }
 0x4aa   : > { %11674 = vmatpush3.bf16.msra.mxu1 %v12621_v41  ;;  %v6148_v41 = vsel %vm5166_vm14, %v6143_v32, %v6147_v0  ;;  %v6361_v32 = vrot.slane %v15009_v15, 1 }
 0x4ab   : > { %11687 = vmatprep.subr.bf16.mxu1 %v12623_v36 }
 0x4ac   : > { %11450 = vmatpush3.bf16.msra.mxu0 %v12633_v18  ;;  %v12654_v18 = vld [vmem:[%s13564_s29 + $0x1c0] sm:$0xff]  }
 0x4ad   : > { %11676 = vmatmul.mubr.bf16.vlgmr.msra.gmra.mrb[0].mxu1 %v7509_v33  ;;  %11463 = vmatprep.subr.bf16.mxu0 %v12636_v14  ;;  %v6159_v33 = vor.u32 %v6157_v9, %v6155_v28  ;;  %v12648_v9 = vld [vmem:[%s13564_s29 + $0x3d8] sm:$0xff]  }
 0x4ae   : > { %11688 = vmatpush3.bf16.msra.mxu1 %v12623_v36  ;;  %11679 = vmatprep.mubr.bf16.mxu1 %v7513_v16  ;;  %v12644_v36 = vld [vmem:[%s13564_s29 + $0x3c8] sm:$0xff]   ;;  %v15052_v16 = vld [vmem:[#allocation3 + $0x10] sm:$0xf] }
 0x4af   : > { %11689 = vmatprep.subr.bf16.mxu1 %v12625_v52  ;;  %11452 = vmatmul.mubr.bf16.vlgmr.msra.gmra.mrb[120].mxu0 %v14988_v51  ;;  %v15075_v51 = vld [vmem:[#allocation3 + $0x1c] sm:$0xff]  }
 0x4b0   : > { %11464 = vmatpush3.bf16.msra.mxu0 %v12636_v14  ;;  %11455 = vmatprep.mubr.bf16.mxu0 %v14993_v43  ;;  %v6181_v14 = vshrl.u32 %v15012_v31, 16  ;;  %v8087_v44 = vshll.u32 %v15075_v51, 16 }
 0x4b1   : > { %11465 = vmatprep.subr.bf16.mxu0 %v12638_v40 }
 0x4b2   : > { %11690 = vmatpush3.bf16.msra.mxu1 %v12625_v52  ;;  %v6163_v52 = vrot.slane %v6161_v35, 1  ;;  %v7707_v35 = vsel %vm5762_vm13, %v7704_v39, %v7706_v47  ;;  %v12651_v39 = vld [vmem:[%s13564_s29 + $0x3e0] sm:$0xff]   ;;  %v6183_v38 = vor.u32 %v6181_v14, %v6179_v24 }
 0x4b3   : > { %11691 = vmatprep.subr.bf16.mxu1 %v12627_v29 }
 0x4b4   : > { %11466 = vmatpush3.bf16.msra.mxu0 %v12638_v40  ;;  %v6167_v27 = vor.u32 %v6165_v2, %v6163_v52  ;;  %v12664_v2 = vld [vmem:[%s13564_s29 + $0x1d8] sm:$0xff]  }
 0x4b5   : > { %11680 = vmatmul.mubr.bf16.gmra.mrb[4].mxu1 %v7517_v23  ;;  %11467 = vmatprep.subr.bf16.mxu0 %v12640_v57  ;;  %v12662_v23 = vld [vmem:[%s13564_s29 + $0x400] sm:$0xff]  }
 0x4b6   : > { %11692 = vmatpush3.bf16.msra.mxu1 %v12627_v29  ;;  %11683 = vmatprep.mubr.bf16.mxu1 %v7526_v5  ;;  %v6354_v29 = vrot.slane %v14626_v4, 1  ;;  %v12670_v4 = vld [vmem:[%s13564_s29 + $0x1f0] sm:$0xff]   ;;  %v12665_v5 = vld [vmem:[%s13564_s29 + $0x408] sm:$0xff]  }
 0x4b7   : > { %11693 = vmatprep.subr.bf16.mxu1 %v12629_v22  ;;  %11456 = vmatmul.mubr.bf16.gmra.mrb[124].mxu0 %v15004_v8 }
 0x4b8   : > { %11468 = vmatpush3.bf16.msra.mxu0 %v12640_v57  ;;  %11459 = vmatprep.mubr.bf16.mxu0 %v15009_v15  ;;  %v6356_v40 = vsel %vm5384_vm15, %v6354_v29, %v6355_v45  ;;  %v6357_v57 = vrot.slane %v14993_v43, 1  ;;  %v12675_v15 = vld [vmem:[%s13564_s29 + $0x428] sm:$0xff]  }
 0x4b9   : > { %11469 = vmatprep.subr.bf16.mxu0 %v12643_v25 }
 0x4ba   : > { %11694 = vmatpush3.bf16.msra.mxu1 %v12629_v22  ;;  %v12658_v22 = vld [vmem:[%s13564_s29 + $0x3f8] sm:$0xff]  }
 0x4bb   : > { %11695 = vmatprep.subr.bf16.mxu1 %v12632_v13 }
 0x4bc   : > { %11470 = vmatpush3.bf16.msra.mxu0 %v12643_v25  ;;  %v6358_v25 = vsel %vm5384_vm15, %v6355_v45, %v6357_v57 }
 0x4bd   : > { %11684 = vmatmul.mubr.bf16.gmra.mrb[8].mxu1 %v7525_v10  ;;  %11471 = vmatprep.subr.bf16.mxu0 %v12645_v26  ;;  %v12668_v10 = vld [vmem:[%s13564_s29 + $0x1e8] sm:$0xff]  }
 0x4be   : > { %11696 = vmatpush3.bf16.msra.mxu1 %v12632_v13  ;;  %11703 = vmatprep.mubr.bf16.mxu1 %v7699_v21  ;;  %v6359_v13 = vrot.slane %v15004_v8, 1  ;;  %v15088_v21 = vld [vmem:[#allocation3 + $0x2c] sm:$0xff]  }
 0x4bf   : > { %11697 = vmatprep.subr.bf16.mxu1 %v12634_v37  ;;  %11460 = vmatmul.mubr.bf16.gmra.mrb[128].mxu0 %v15012_v31  ;;  %v8079_v31 = vshll.u32 %v15072_v59, 16 }
 0x4c0   : > { %11472 = vmatpush3.bf16.msra.mxu0 %v12645_v26  ;;  %11479 = vmatprep.mubr.bf16.mxu0 %v6148_v41  ;;  %v6360_v43 = vsel %vm5384_vm15, %v6357_v57, %v6359_v13  ;;  %v12669_v26 = vld [vmem:[%s13564_s29 + $0x418] sm:$0xff]   ;;  %v12672_v41 = vld [vmem:[%s13564_s29 + $0x420] sm:$0xff]  }
 0x4c1   : > { %11473 = vmatprep.subr.bf16.mxu0 %v12647_v56  ;;  %v12688_v57 = vld [vmem:[%s13564_s29 + $0x480] sm:$0xff]  }
 0x4c2   : > { %11698 = vmatpush3.bf16.msra.mxu1 %v12634_v37  ;;  %v15085_v37 = vld [vmem:[#allocation3 + $0x24] sm:$0xff]  }
 0x4c3   : > { %11699 = vmatprep.subr.bf16.mxu1 %v12637_v58 }
 0x4c4   : > { %11474 = vmatpush3.bf16.msra.mxu0 %v12647_v56 }
 0x4c5   : > { %11475 = vmatprep.subr.bf16.mxu0 %v12649_v20 }
 0x4c6   : > { %11700 = vmatpush3.bf16.msra.mxu1 %v12637_v58  ;;  %v12768_v58 = vld [vmem:[#allocation3 + $0x2c] ss:$0 sps:$4 sm:$0x77]  }
 0x4c7   : > { %11701 = vmatprep.subr.bf16.mxu1 %v12639_v12  ;;  %v6363_v56 = vrot.slane %v12768_v58, 1 }
 0x4c8   : > { %11476 = vmatpush3.bf16.msra.mxu0 %v12649_v20  ;;  %v8081_v20 = vrot.slane %v8079_v31, 1 }
 0x4c9   : > { %11477 = vmatprep.subr.bf16.mxu0 %v12652_v61 }
 0x4ca   : > { %11702 = vmatpush3.bf16.msra.mxu1 %v12639_v12 }
 0x4cb   : > { %11715 = vmatprep.subr.bf16.mxu1 %v12642_v49 }
 0x4cc   : > { %11478 = vmatpush3.bf16.msra.mxu0 %v12652_v61  ;;  %v6364_v61 = vsel %vm5384_vm15, %v6361_v32, %v6363_v56 }
 0x4cd   : > { %11704 = vmatmul.mubr.bf16.vlgmr.msra.gmra.mrb[0].mxu1 %v14889_v19  ;;  %11491 = vmatprep.subr.bf16.mxu0 %v12654_v18  ;;  %v6164_v19 = vsel %vm5166_vm14, %v6159_v33, %v6163_v52  ;;  %v12679_v33 = vld [vmem:[%s13564_s29 + $0x438] sm:$0xff]   ;;  %v8091_v52 = vshrl.u32 %v15075_v51, 16 }
 0x4ce   : > { %11716 = vmatpush3.bf16.msra.mxu1 %v12642_v49  ;;  %11707 = vmatprep.mubr.bf16.mxu1 %v14894_v60  ;;  %v6171_v60 = vrot.slane %v6169_v55, 1  ;;  %v7853_v55 = vld [vmem:[#allocation3 + $0xc] sm:$0xf]  ;;  %v6362_v49 = vsel %vm5384_vm15, %v6359_v13, %v6361_v32  ;;  %v8293_v13 = vrot.slane %v15085_v37, 1 }
 0x4cf   : > { %11717 = vmatprep.subr.bf16.mxu1 %v12644_v36  ;;  %11480 = vmatmul.mubr.bf16.vlgmr.msra.gmra.mrb[120].mxu0 %v6156_v53  ;;  %v15058_v46 = vcombine.low %v7853_v55, %v15052_v16 }
 0x4d0   : > { %11492 = vmatpush3.bf16.msra.mxu0 %v12654_v18  ;;  %11483 = vmatprep.mubr.bf16.mxu0 %v6164_v19  ;;  %v6175_v17 = vor.u32 %v6173_v62, %v6171_v60  ;;  %v6172_v54 = vsel %vm5166_vm14, %v6167_v27, %v6171_v60  ;;  %v12653_v62 = vld [vmem:[%s13564_s29 + $0x3e8] sm:$0xff]   ;;  %v8083_v18 = vshrl.u32 %v15072_v59, 16  ;;  %v8099_v60 = vshrl.u32 %v15085_v37, 16 }
 0x4d1   : > { %11493 = vmatprep.subr.bf16.mxu0 %v12657_v6  ;;  %v8074_v42 = vshll.u32 %v15058_v46, 16  ;;  %v8072_v8 = vshrl.u32 %v15058_v46, 16  ;;  %v12681_v27 = vld [vmem:[%s13564_s29 + $0x448] sm:$0xff]  }
 0x4d2   : > { %11718 = vmatpush3.bf16.msra.mxu1 %v12644_v36  ;;  %v12678_v36 = vld [vmem:[#allocation3 + $0x34] ss:$0 sps:$4 sm:$0x33]   ;;  %v8085_v53 = vor.u32 %v8083_v18, %v8081_v20 }
 0x4d3   : > { %11719 = vmatprep.subr.bf16.mxu1 %v12646_v7  ;;  %v8076_v0 = vrot.slane %v8074_v42, 1  ;;  %v8115_v45 = vshrl.u32 %v12678_v36, 16 }
 0x4d4   : > { %11494 = vmatpush3.bf16.msra.mxu0 %v12657_v6  ;;  %v12680_v6 = vld [vmem:[%s13564_s29 + $0x440] sm:$0xff]  }
 0x4d5   : > { %11708 = vmatmul.mubr.bf16.gmra.mrb[4].mxu1 %v14900_v1  ;;  %11495 = vmatprep.subr.bf16.mxu0 %v12659_v11  ;;  %v6180_v1 = vsel %vm5166_vm14, %v6175_v17, %v6179_v24  ;;  %v8077_v12 = vor.u32 %v8076_v0, %v8072_v8  ;;  %v8107_v17 = vshrl.u32 %v15088_v21, 16  ;;  %v8111_v24 = vshll.u32 %v12678_v36, 16  ;;  %v12690_v0 = vld [vmem:[%s13564_s29 + $0x490] sm:$0xff]  }
 0x4d6   : > { %11720 = vmatpush3.bf16.msra.mxu1 %v12646_v7  ;;  %11711 = vmatprep.mubr.bf16.mxu1 %v7707_v35  ;;  %v8095_v7 = vshll.u32 %v15085_v37, 16 }
 0x4d7   : > { %11721 = vmatprep.subr.bf16.mxu1 %v12648_v9  ;;  %11484 = vmatmul.mubr.bf16.gmra.mrb[124].mxu0 %v6172_v54  ;;  %v8082_v28 = vsel %vm5166_vm14, %v8077_v12, %v8081_v20  ;;  %v12682_v54 = vld [vmem:[%s13564_s29 + $0x450] sm:$0xff]   ;;  %v12691_v12 = vld [vmem:[%s13564_s29 + $0x498] sm:$0xff]  }
 0x4d8   : > { %11496 = vmatpush3.bf16.msra.mxu0 %v12659_v11  ;;  %11487 = vmatprep.mubr.bf16.mxu0 %v6180_v1  ;;  %v8097_v50 = vrot.slane %v8095_v7, 1  ;;  %v8113_v1 = vrot.slane %v8111_v24, 1 }
 0x4d9   : > { %11497 = vmatprep.subr.bf16.mxu0 %v12664_v2 }
 0x4da   : > { %11722 = vmatpush3.bf16.msra.mxu1 %v12648_v9  ;;  %v8103_v9 = vshll.u32 %v15088_v21, 16  ;;  %v8101_v55 = vor.u32 %v8099_v60, %v8097_v50 }
 0x4db   : > { %11723 = vmatprep.subr.bf16.mxu1 %v12651_v39 }
 0x4dc   : > { %11498 = vmatpush3.bf16.msra.mxu0 %v12664_v2 }
 0x4dd   : > { %11712 = vmatmul.mubr.bf16.gmra.mrb[8].mxu1 %v7706_v47  ;;  %11499 = vmatprep.subr.bf16.mxu0 %v12666_v3  ;;  %v8089_v47 = vrot.slane %v8087_v44, 1 }
 0x4de   : > { %11724 = vmatpush3.bf16.msra.mxu1 %v12651_v39  ;;  %11731 = vmatprep.mubr.bf16.mxu1 %v15058_v46  ;;  %v8105_v39 = vrot.slane %v8103_v9, 1  ;;  %v8263_v46 = vld [vmem:[#allocation3 + $0xc] sm:$0xe] }
 0x4df   : > { %11725 = vmatprep.subr.bf16.mxu1 %v12653_v62  ;;  %11488 = vmatmul.mubr.bf16.gmra.mrb[128].mxu0 %v6183_v38  ;;  %v8093_v19 = vor.u32 %v8091_v52, %v8089_v47  ;;  %v8090_v35 = vsel %vm5166_vm14, %v8085_v53, %v8089_v47  ;;  %v10717_v14 = vcombine.low %v8263_v46, %v15052_v16  ;;  %v8474_v53 = vrot.slane %v8087_v44, 2 }
 0x4e0   : > { %11500 = vmatpush3.bf16.msra.mxu0 %v12666_v3  ;;  %11507 = vmatprep.mubr.bf16.mxu0 %v6356_v40  ;;  %v8109_v2 = vor.u32 %v8107_v17, %v8105_v39  ;;  %v12683_v3 = vld [vmem:[%s13564_s29 + $0x458] sm:$0xff]   ;;  %v8117_v40 = vor.u32 %v8115_v45, %v8113_v1 }
 0x4e1   : > { %11501 = vmatprep.subr.bf16.mxu0 %v12668_v10  ;;  %v8098_v11 = vsel %vm5166_vm14, %v8093_v19, %v8097_v50  ;;  %v8288_v38 = vrot.slane %v10717_v14, 1  ;;  %v8462_v32 = vshrl.u32 %v10717_v14, 16  ;;  %v8465_v58 = vshll.u32 %v10717_v14, 16  ;;  %v15184_v14 = vld [vmem:[%s13564_s29 + $0x608] sm:$0xff]  }
 0x4e2   : > { %11726 = vmatpush3.bf16.msra.mxu1 %v12653_v62  ;;  %v8106_v62 = vsel %vm5166_vm14, %v8101_v55, %v8105_v39  ;;  %v8114_v29 = vsel %vm5166_vm14, %v8109_v2, %v8113_v1  ;;  %v8477_v19 = vrot.slane %v8099_v60, 1  ;;  %v8478_v50 = vrot.slane %v8095_v7, 2  ;;  %v12698_v7 = vld [vmem:[%s13564_s29 + $0x4c8] sm:$0xff]   ;;  %v15178_v1 = vld [vmem:[%s13564_s29 + $0x600] sm:$0xff]  }
 0x4e3   : > { %11727 = vmatprep.subr.bf16.mxu1 %v12656_v30  ;;  %v8464_v20 = vrot.slane %v8462_v32, 1  ;;  %v8481_v39 = vrot.slane %v8107_v17, 1  ;;  %v8482_v60 = vrot.slane %v8103_v9, 2  ;;  %v12699_v17 = vld [vmem:[%s13564_s29 + $0x4d0] sm:$0xff]   ;;  %v8639_v9 = vld [vmem:[#allocation3 + $0xc] sm:$0xc] }
 0x4e4   : > { %11502 = vmatpush3.bf16.msra.mxu0 %v12668_v10  ;;  %v8289_v10 = vrot.slane %v15072_v59, 1 }
 0x4e5   : > { %11503 = vmatprep.subr.bf16.mxu0 %v12670_v4  ;;  %v8483_v46 = vor.u32 %v8482_v60, %v8481_v39  ;;  %v12717_v39 = vld [vmem:[%s13564_s29 + $0x540] sm:$0xff]   ;;  %v12719_v60 = vld [vmem:[%s13564_s29 + $0x548] sm:$0xff]  }
 0x4e6   : > { %11728 = vmatpush3.bf16.msra.mxu1 %v12656_v30  ;;  %v12684_v30 = vld [vmem:[%s13564_s29 + $0x460] sm:$0xff]  }
 0x4e7   : > { %11729 = vmatprep.subr.bf16.mxu1 %v12658_v22 }
 0x4e8   : > { %11504 = vmatpush3.bf16.msra.mxu0 %v12670_v4  ;;  %v8290_v4 = vsel %vm5384_vm15, %v8288_v38, %v8289_v10  ;;  %v15193_v38 = vld [vmem:[%s13564_s29 + $0x610] sm:$0xff]  }
 0x4e9   : > { %11505 = vmatprep.subr.bf16.mxu0 %v12674_v48 }
 0x4ea   : > { %11730 = vmatpush3.bf16.msra.mxu1 %v12658_v22  ;;  %v12685_v22 = vld [vmem:[%s13564_s29 + $0x468] sm:$0xff]  }
 0x4eb   : > { %11743 = vmatprep.subr.bf16.mxu1 %v12662_v23 }
 0x4ec   : > { %11506 = vmatpush3.bf16.msra.mxu0 %v12674_v48  ;;  %v12687_v48 = vld [vmem:[%s13564_s29 + $0x478] sm:$0xff]  }
 0x4ed   : > { %11732 = vmatmul.mubr.bf16.vlgmr.msra.gmra.mrb[0].mxu1 %v15072_v59  ;;  %11967 = vmatprep.subr.bf16.mxu0 %v15178_v1 }
 0x4ee   : > { %11744 = vmatpush3.bf16.msra.mxu1 %v12662_v23  ;;  %11735 = vmatprep.mubr.bf16.mxu1 %v15075_v51  ;;  %v12686_v23 = vld [vmem:[%s13564_s29 + $0x470] sm:$0xff]  }
 0x4ef   : > { %11745 = vmatprep.subr.bf16.mxu1 %v12665_v5  ;;  %11508 = vmatmul.mubr.bf16.vlgmr.msra.gmra.mrb[120].mxu0 %v6358_v25  ;;  %v12689_v25 = vld [vmem:[%s13564_s29 + $0x488] sm:$0xff]  }
 0x4f0   : > { %11511 = vmatprep.mubr.bf16.mxu0 %v6360_v43  ;;  %11968 = vmatpush3.bf16.msra.mxu0 %v15178_v1 }
 0x4f1   : > { %11969 = vmatprep.subr.bf16.mxu0 %v15184_v14 }
 0x4f2   : > { %11746 = vmatpush3.bf16.msra.mxu1 %v12665_v5  ;;  %v8291_v5 = vrot.slane %v15075_v51, 1 }
 0x4f3   : > { %11747 = vmatprep.subr.bf16.mxu1 %v12667_v63 }
 0x4f4   : > { %v8292_v42 = vsel %vm5384_vm15, %v8289_v10, %v8291_v5  ;;  %v8294_v43 = vsel %vm5384_vm15, %v8291_v5, %v8293_v13  ;;  %11970 = vmatpush3.bf16.msra.mxu0 %v15184_v14  ;;  %v12701_v10 = vld [vmem:[%s13564_s29 + $0x4e0] sm:$0xff]   ;;  %v15213_v5 = vld [vmem:[%s13564_s29 + $0x628] sm:$0xff]  }
 0x4f5   : > { %11736 = vmatmul.mubr.bf16.gmra.mrb[4].mxu1 %v15085_v37  ;;  %11971 = vmatprep.subr.bf16.mxu0 %v15193_v38 }
 0x4f6   : > { %11748 = vmatpush3.bf16.msra.mxu1 %v12667_v63  ;;  %11739 = vmatprep.mubr.bf16.mxu1 %v15088_v21  ;;  %v12694_v63 = vld [vmem:[#allocation3 + $0x34] ss:$0 sps:$4 sm:$0x77]  }
 0x4f7   : > { %11749 = vmatprep.subr.bf16.mxu1 %v12669_v26  ;;  %11512 = vmatmul.mubr.bf16.gmra.mrb[124].mxu0 %v6362_v49  ;;  %v8297_v8 = vrot.slane %v12694_v63, 1  ;;  %v8467_v49 = vrot.slane %v8465_v58, 2  ;;  %v8489_v24 = vshll.u32 %v12694_v63, 16  ;;  %v15235_v58 = vld [vmem:[#allocation3 + $0x20] sm:$0xff]  }
 0x4f8   : > { %11515 = vmatprep.mubr.bf16.mxu0 %v6364_v61  ;;  %v8470_v61 = vrot.slane %v8079_v31, 2  ;;  %v12695_v31 = vld [vmem:[%s13564_s29 + $0x4b0] sm:$0xff]   ;;  %11972 = vmatpush3.bf16.msra.mxu0 %v15193_v38 }
 0x4f9   : > { %v8491_v2 = vrot.slane %v8489_v24, 2  ;;  %v12713_v24 = vld [vmem:[%s13564_s29 + $0x530] sm:$0xff]  }
 0x4fa   : > { %11750 = vmatpush3.bf16.msra.mxu1 %v12669_v26  ;;  %v8295_v26 = vrot.slane %v15088_v21, 1 }
 0x4fb   : > { %11751 = vmatprep.subr.bf16.mxu1 %v12672_v41 }
 0x4fd   : > { %11740 = vmatmul.mubr.bf16.gmra.mrb[8].mxu1 %v12678_v36  ;;  %v8469_v36 = vrot.slane %v8083_v18, 1  ;;  %v8473_v18 = vrot.slane %v8091_v52, 1  ;;  %v8486_v52 = vshrl.u32 %v12694_v63, 16  ;;  %v12706_v63 = vld [vmem:[%s13564_s29 + $0x500] sm:$0xff]  }
 0x4fe   : > { %11752 = vmatpush3.bf16.msra.mxu1 %v12672_v41  ;;  %11759 = vmatprep.mubr.bf16.mxu1 %v8082_v28  ;;  %v8298_v41 = vsel %vm5384_vm15, %v8295_v26, %v8297_v8  ;;  %v8468_v28 = vor.u32 %v8467_v49, %v8464_v20  ;;  %v9634_v49 = vrot.slane %v15235_v58, 2 }
 0x4ff   : > { %11753 = vmatprep.subr.bf16.mxu1 %v12675_v15  ;;  %11516 = vmatmul.mubr.bf16.gmra.mrb[128].mxu0 %v6363_v56  ;;  %v8296_v56 = vsel %vm5384_vm15, %v8293_v13, %v8295_v26  ;;  %v15219_v13 = vld [vmem:[%s13564_s29 + $0x630] sm:$0xff]   ;;  %v9606_v26 = vld [vmem:[#allocation3 + $0x10] sm:$0xc] }
 0x502   : > { %11754 = vmatpush3.bf16.msra.mxu1 %v12675_v15  ;;  %v12692_v15 = vld [vmem:[%s13564_s29 + $0x4a0] sm:$0xff]  }
 0x503   : > { %11755 = vmatprep.subr.bf16.mxu1 %v12677_v34 }
 0x506   : > { %11756 = vmatpush3.bf16.msra.mxu1 %v12677_v34  ;;  %v8471_v34 = vor.u32 %v8470_v61, %v8469_v36  ;;  %v8671_v61 = vrot.slane %v15088_v21, 2 }
 0x507   : > { %11757 = vmatprep.subr.bf16.mxu1 %v12679_v33 }
 0x508   : > { %v8472_v47 = vsel %vm5558_vm8, %v8468_v28, %v8471_v34  ;;  %v12708_v28 = vld [vmem:[%s13564_s29 + $0x510] sm:$0xff]  }
 0x50a   : > { %11758 = vmatpush3.bf16.msra.mxu1 %v12679_v33  ;;  %v12693_v33 = vld [vmem:[%s13564_s29 + $0x4a8] sm:$0xff]  }
 0x50b   : > { %11771 = vmatprep.subr.bf16.mxu1 %v12680_v6 }
 0x50d   : > { %11760 = vmatmul.mubr.bf16.vlgmr.msra.gmra.mrb[0].mxu1 %v8090_v35  ;;  %v8475_v35 = vor.u32 %v8474_v53, %v8473_v18  ;;  %v12709_v18 = vld [vmem:[%s13564_s29 + $0x518] sm:$0xff]  }
 0x50e   : > { %11772 = vmatpush3.bf16.msra.mxu1 %v12680_v6  ;;  %11763 = vmatprep.mubr.bf16.mxu1 %v8098_v11  ;;  %v12696_v6 = vld [vmem:[%s13564_s29 + $0x4b8] sm:$0xff]   ;;  %v8479_v11 = vor.u32 %v8478_v50, %v8477_v19 }
 0x50f   : > { %11773 = vmatprep.subr.bf16.mxu1 %v12681_v27  ;;  %v8476_v44 = vsel %vm5558_vm8, %v8471_v34, %v8475_v35 }
 0x510   : > { %v8480_v55 = vsel %vm5558_vm8, %v8475_v35, %v8479_v11  ;;  %v12710_v35 = vld [vmem:[%s13564_s29 + $0x520] sm:$0xff]  }
 0x512   : > { %11774 = vmatpush3.bf16.msra.mxu1 %v12681_v27  ;;  %v12697_v27 = vld [vmem:[%s13564_s29 + $0x4c0] sm:$0xff]  }
 0x513   : > { %11775 = vmatprep.subr.bf16.mxu1 %v12682_v54 }
 0x515   : > { %11764 = vmatmul.mubr.bf16.gmra.mrb[4].mxu1 %v8106_v62 }
 0x516   : > { %11776 = vmatpush3.bf16.msra.mxu1 %v12682_v54  ;;  %11767 = vmatprep.mubr.bf16.mxu1 %v8114_v29  ;;  %v8488_v54 = vrot.slane %v8486_v52, 1  ;;  %v12700_v29 = vld [vmem:[%s13564_s29 + $0x4d8] sm:$0xff]   ;;  %v12711_v52 = vld [vmem:[%s13564_s29 + $0x528] sm:$0xff]  }
 0x517   : > { %11777 = vmatprep.subr.bf16.mxu1 %v12683_v3 }
 0x518   : > { %v8492_v62 = vor.u32 %v8491_v2, %v8488_v54  ;;  %v12721_v54 = vld [vmem:[%s13564_s29 + $0x558] sm:$0xff]  }
 0x51a   : > { %11778 = vmatpush3.bf16.msra.mxu1 %v12683_v3  ;;  %v8484_v3 = vsel %vm5558_vm8, %v8479_v11, %v8483_v46  ;;  %v8493_v45 = vsel %vm5558_vm8, %v8483_v46, %v8492_v62 }
 0x51b   : > { %11779 = vmatprep.subr.bf16.mxu1 %v12684_v30 }
 0x51d   : > { %11768 = vmatmul.mubr.bf16.gmra.mrb[8].mxu1 %v8117_v40 }
 0x51e   : > { %11780 = vmatpush3.bf16.msra.mxu1 %v12684_v30  ;;  %11787 = vmatprep.mubr.bf16.mxu1 %v8290_v4  ;;  %v10767_v30 = vcombine.low %v8639_v9, %v15052_v16  ;;  %v15200_v16 = vld [vmem:[%s13564_s29 + $0x618] sm:$0xff]   ;;  %v12702_v4 = vld [vmem:[%s13564_s29 + $0x4e8] sm:$0xff]  }
 0x51f   : > { %11781 = vmatprep.subr.bf16.mxu1 %v12685_v22  ;;  %11973 = vmatprep.subr.bf16.mxu0 %v15200_v16 }
 0x520   : > { %v8664_v40 = vrot.slane %v10767_v30, 2  ;;  %11974 = vmatpush3.bf16.msra.mxu0 %v15200_v16 }
 0x522   : > { %11782 = vmatpush3.bf16.msra.mxu1 %v12685_v22  ;;  %v8665_v22 = vrot.slane %v15072_v59, 2  ;;  %v15207_v59 = vld [vmem:[%s13564_s29 + $0x620] sm:$0xff]  }
 0x523   : > { %11783 = vmatprep.subr.bf16.mxu1 %v12686_v23  ;;  %11975 = vmatprep.subr.bf16.mxu0 %v15207_v59 }
 0x524   : > { %11976 = vmatpush3.bf16.msra.mxu0 %v15207_v59 }
 0x525   : > { %11977 = vmatprep.subr.bf16.mxu0 %v15213_v5 }
 0x526   : > { %11784 = vmatpush3.bf16.msra.mxu1 %v12686_v23  ;;  %v8666_v23 = vsel %vm5762_vm13, %v8664_v40, %v8665_v22  ;;  %v9054_v40 = vshll.u32 %v15235_v58, 16 }
 0x527   : > { %11785 = vmatprep.subr.bf16.mxu1 %v12687_v48 }
 0x528   : > { %11978 = vmatpush3.bf16.msra.mxu0 %v15213_v5 }
 0x529   : > { %11979 = vmatprep.subr.bf16.mxu0 %v15219_v13 }
 0x52a   : > { %11786 = vmatpush3.bf16.msra.mxu1 %v12687_v48  ;;  %v12703_v48 = vld [vmem:[%s13564_s29 + $0x4f0] sm:$0xff]  }
 0x52b   : > { %11799 = vmatprep.subr.bf16.mxu1 %v12688_v57 }
 0x52c   : > { %11980 = vmatpush3.bf16.msra.mxu0 %v15219_v13 }
 0x52d   : > { %11788 = vmatmul.mubr.bf16.vlgmr.msra.gmra.mrb[0].mxu1 %v8292_v42  ;;  %v8667_v42 = vrot.slane %v15075_v51, 2 }
 0x52e   : > { %11800 = vmatpush3.bf16.msra.mxu1 %v12688_v57  ;;  %11791 = vmatprep.mubr.bf16.mxu1 %v8294_v43  ;;  %v12704_v57 = vld [vmem:[%s13564_s29 + $0x4f8] sm:$0xff]   ;;  %v15225_v43 = vld [vmem:[#allocation3 + $0x14] sm:$0xf] }
 0x52f   : > { %11801 = vmatprep.subr.bf16.mxu1 %v12689_v25  ;;  %v10897_v32 = vcombine.low %v9606_v26, %v15225_v43  ;;  %v8668_v51 = vsel %vm5762_vm13, %v8665_v22, %v8667_v42 }
 0x532   : > { %11802 = vmatpush3.bf16.msra.mxu1 %v12689_v25  ;;  %v8669_v25 = vrot.slane %v15085_v37, 2  ;;  %v12707_v37 = vld [vmem:[%s13564_s29 + $0x508] sm:$0xff]  }
 0x533   : > { %11803 = vmatprep.subr.bf16.mxu1 %v12690_v0 }
 0x535   : > { %11792 = vmatmul.mubr.bf16.gmra.mrb[4].mxu1 %v8296_v56  ;;  %v8670_v56 = vsel %vm5762_vm13, %v8667_v42, %v8669_v25 }
 0x536   : > { %11804 = vmatpush3.bf16.msra.mxu1 %v12690_v0  ;;  %11795 = vmatprep.mubr.bf16.mxu1 %v8298_v41  ;;  %v15231_v0 = vld [vmem:[%s13564_s29 + $0x638] sm:$0xff]   ;;  %v12712_v41 = vld [vmem:[#allocation3 + $0x34] ss:$0 sps:$4 sm:$0xff]  }
 0x537   : > { %11805 = vmatprep.subr.bf16.mxu1 %v12691_v12  ;;  %11981 = vmatprep.subr.bf16.mxu0 %v15231_v0  ;;  %v8673_v34 = vrot.slane %v12712_v41, 2 }
 0x538   : > { %11982 = vmatpush3.bf16.msra.mxu0 %v15231_v0 }
 0x539   : > { %v8674_v53 = vsel %vm5762_vm13, %v8671_v61, %v8673_v34 }
 0x53a   : > { %11806 = vmatpush3.bf16.msra.mxu1 %v12691_v12  ;;  %v9631_v12 = vrot.slane %v10897_v32, 2 }
 0x53b   : > { %11807 = vmatprep.subr.bf16.mxu1 %v12692_v15 }
 0x53d   : > { %11796 = vmatmul.mubr.bf16.gmra.mrb[8].mxu1 %v8297_v8  ;;  %v15228_v8 = vld [vmem:[#allocation3 + $0x18] sm:$0xff]  }
 0x53e   : > { %11808 = vmatpush3.bf16.msra.mxu1 %v12692_v15  ;;  %11815 = vmatprep.mubr.bf16.mxu1 %v8472_v47  ;;  %v9632_v20 = vrot.slane %v15228_v8, 2  ;;  %v8672_v47 = vsel %vm5762_vm13, %v8669_v25, %v8671_v61  ;;  %v9050_v22 = vshrl.u32 %v15228_v8, 16  ;;  %v12732_v61 = vld [vmem:[%s13564_s29 + $0x590] sm:$0xff]  }
 0x53f   : > { %11809 = vmatprep.subr.bf16.mxu1 %v12693_v33 }
 0x540   : > { %v9633_v36 = vsel %vm5762_vm13, %v9631_v12, %v9632_v20  ;;  %v9635_v15 = vsel %vm5762_vm13, %v9632_v20, %v9634_v49 }
 0x541   : > { %11983 = vmatprep.mubr.bf16.mxu0 %v9633_v36 }
 0x542   : > { %11810 = vmatpush3.bf16.msra.mxu1 %v12693_v33  ;;  %11984 = vmatmul.mubr.bf16.vlgmr.msra.gmra.mrb[132].mxu0 %v9635_v15  ;;  %v15247_v33 = vld [vmem:[#allocation3 + $0x28] sm:$0xff]  }
 0x543   : > { %11811 = vmatprep.subr.bf16.mxu1 %v12695_v31  ;;  %v9636_v21 = vrot.slane %v15247_v33, 2 }
 0x545   : > { %v9637_v19 = vsel %vm5762_vm13, %v9634_v49, %v9636_v21 }
 0x546   : > { %11812 = vmatpush3.bf16.msra.mxu1 %v12695_v31  ;;  %v15250_v31 = vld [vmem:[#allocation3 + $0x30] sm:$0xff]   ;;  %11987 = vmatprep.mubr.bf16.mxu0 %v9637_v19 }
 0x547   : > { %11813 = vmatprep.subr.bf16.mxu1 %v12696_v6  ;;  %v9070_v32 = vshll.u32 %v15250_v31, 16  ;;  %v9074_v12 = vshrl.u32 %v15250_v31, 16 }
 0x549   : > { %v9072_v49 = vrot.slane %v9070_v32, 1 }
 0x54a   : > { %11814 = vmatpush3.bf16.msra.mxu1 %v12696_v6  ;;  %v9638_v6 = vrot.slane %v15250_v31, 2 }
 0x54b   : > { %11827 = vmatprep.subr.bf16.mxu1 %v12697_v27  ;;  %v9076_v15 = vor.u32 %v9074_v12, %v9072_v49 }
 0x54c   : > { %v9639_v50 = vsel %vm5762_vm13, %v9636_v21, %v9638_v6 }
 0x54d   : > { %11816 = vmatmul.mubr.bf16.vlgmr.msra.gmra.mrb[0].mxu1 %v8476_v44  ;;  %11988 = vmatmul.mubr.bf16.gmra.mrb[136].mxu0 %v9639_v50  ;;  %v12714_v44 = vld [vmem:[%s13564_s29 + $0x538] sm:$0xff]   ;;  %v12734_v50 = vld [vmem:[%s13564_s29 + $0x5a0] sm:$0xff]  }
 0x54e   : > { %11828 = vmatpush3.bf16.msra.mxu1 %v12697_v27  ;;  %11819 = vmatprep.mubr.bf16.mxu1 %v8480_v55  ;;  %v8820_v27 = vld [vmem:[#allocation3 + $0x10] sm:$0xf]  ;;  %v12720_v55 = vld [vmem:[%s13564_s29 + $0x550] sm:$0xff]  }
 0x54f   : > { %11829 = vmatprep.subr.bf16.mxu1 %v12698_v7  ;;  %v10793_v11 = vcombine.low %v8820_v27, %v15225_v43  ;;  %v9256_v27 = vrot.slane %v15228_v8, 1 }
 0x551   : > { %v9039_v2 = vshrl.u32 %v10793_v11, 16 }
 0x552   : > { %11830 = vmatpush3.bf16.msra.mxu1 %v12698_v7  ;;  %v9041_v7 = vshll.u32 %v10793_v11, 16 }
 0x553   : > { %11831 = vmatprep.subr.bf16.mxu1 %v12699_v17 }
 0x554   : > { %v9043_v46 = vrot.slane %v9041_v7, 1  ;;  %v12738_v7 = vld [vmem:[%s13564_s29 + $0x5c0] sm:$0xff]  }
 0x555   : > { %11820 = vmatmul.mubr.bf16.gmra.mrb[4].mxu1 %v8484_v3 }
 0x556   : > { %11832 = vmatpush3.bf16.msra.mxu1 %v12699_v17  ;;  %11823 = vmatprep.mubr.bf16.mxu1 %v8493_v45  ;;  %v9046_v17 = vshll.u32 %v15228_v8, 16  ;;  %v9044_v9 = vor.u32 %v9043_v46, %v9039_v2  ;;  %v12725_v45 = vld [vmem:[%s13564_s29 + $0x568] sm:$0xff]  }
 0x557   : > { %11833 = vmatprep.subr.bf16.mxu1 %v12700_v29 }
 0x558   : > { %v9048_v3 = vrot.slane %v9046_v17, 1 }
 0x55a   : > { %11834 = vmatpush3.bf16.msra.mxu1 %v12700_v29  ;;  %v12728_v29 = vld [vmem:[#allocation3 + $0x38] ss:$0 sps:$4 sm:$0x33]   ;;  %v9049_v30 = vsel %vm5166_vm14, %v9044_v9, %v9048_v3  ;;  %v9052_v42 = vor.u32 %v9050_v22, %v9048_v3  ;;  %v12740_v3 = vld [vmem:[%s13564_s29 + $0x5c8] sm:$0xff]  }
 0x55b   : > { %11835 = vmatprep.subr.bf16.mxu1 %v12701_v10  ;;  %v9078_v20 = vshll.u32 %v12728_v29, 16  ;;  %v9082_v19 = vshrl.u32 %v12728_v29, 16  ;;  %v15329_v9 = vld [vmem:[#allocation3 + $0x38] ss:$0 sps:$4 sm:$0x77]  }
 0x55d   : > { %11824 = vmatmul.mubr.bf16.gmra.mrb[8].mxu1 %v8492_v62  ;;  %v12723_v62 = vld [vmem:[%s13564_s29 + $0x560] sm:$0xff]  }
 0x55e   : > { %11836 = vmatpush3.bf16.msra.mxu1 %v12701_v10  ;;  %11843 = vmatprep.mubr.bf16.mxu1 %v8666_v23  ;;  %v12727_v10 = vld [vmem:[%s13564_s29 + $0x570] sm:$0xff]   ;;  %v9058_v23 = vshrl.u32 %v15235_v58, 16 }
 0x55f   : > { %11837 = vmatprep.subr.bf16.mxu1 %v12702_v4 }
 0x562   : > { %11838 = vmatpush3.bf16.msra.mxu1 %v12702_v4  ;;  %v12729_v4 = vld [vmem:[%s13564_s29 + $0x578] sm:$0xff]  }
 0x563   : > { %11839 = vmatprep.subr.bf16.mxu1 %v12703_v48 }
 0x566   : > { %11840 = vmatpush3.bf16.msra.mxu1 %v12703_v48  ;;  %v9062_v48 = vshll.u32 %v15247_v33, 16 }
 0x567   : > { %11841 = vmatprep.subr.bf16.mxu1 %v12704_v57 }
 0x568   : > { %v9064_v26 = vrot.slane %v9062_v48, 1 }
 0x56a   : > { %11842 = vmatpush3.bf16.msra.mxu1 %v12704_v57  ;;  %v9056_v57 = vrot.slane %v9054_v40, 1 }
 0x56b   : > { %11855 = vmatprep.subr.bf16.mxu1 %v12706_v63 }
 0x56c   : > { %v9060_v25 = vor.u32 %v9058_v23, %v9056_v57 }
 0x56d   : > { %11844 = vmatmul.mubr.bf16.vlgmr.msra.gmra.mrb[0].mxu1 %v8668_v51  ;;  %v9057_v51 = vsel %vm5166_vm14, %v9052_v42, %v9056_v57 }
 0x56e   : > { %11856 = vmatpush3.bf16.msra.mxu1 %v12706_v63  ;;  %11847 = vmatprep.mubr.bf16.mxu1 %v8670_v56  ;;  %v12730_v63 = vld [vmem:[%s13564_s29 + $0x580] sm:$0xff]   ;;  %v12731_v56 = vld [vmem:[%s13564_s29 + $0x588] sm:$0xff]   ;;  %v9065_v41 = vsel %vm5166_vm14, %v9060_v25, %v9064_v26 }
 0x56f   : > { %11857 = vmatprep.subr.bf16.mxu1 %v12707_v37 }
 0x572   : > { %11858 = vmatpush3.bf16.msra.mxu1 %v12707_v37  ;;  %v9066_v37 = vshrl.u32 %v15247_v33, 16 }
 0x573   : > { %11859 = vmatprep.subr.bf16.mxu1 %v12708_v28 }
 0x574   : > { %v9068_v36 = vor.u32 %v9066_v37, %v9064_v26 }
 0x575   : > { %11848 = vmatmul.mubr.bf16.gmra.mrb[4].mxu1 %v8672_v47 }
 0x576   : > { %11860 = vmatpush3.bf16.msra.mxu1 %v12708_v28  ;;  %11851 = vmatprep.mubr.bf16.mxu1 %v8674_v53  ;;  %v9080_v28 = vrot.slane %v9078_v20, 1  ;;  %v9073_v47 = vsel %vm5166_vm14, %v9068_v36, %v9072_v49  ;;  %v12733_v53 = vld [vmem:[%s13564_s29 + $0x598] sm:$0xff]   ;;  %v9436_v36 = vrot.slane %v9050_v22, 1  ;;  %v12751_v22 = vld [vmem:[%s13564_s29 + $0x5f0] sm:$0xff]  }
 0x577   : > { %11861 = vmatprep.subr.bf16.mxu1 %v12709_v18 }
 0x578   : > { %v9081_v21 = vsel %vm5166_vm14, %v9076_v15, %v9080_v28 }
 0x57a   : > { %11862 = vmatpush3.bf16.msra.mxu1 %v12709_v18 }
 0x57b   : > { %11863 = vmatprep.subr.bf16.mxu1 %v12710_v35 }
 0x57d   : > { %11852 = vmatmul.mubr.bf16.gmra.mrb[8].mxu1 %v8673_v34  ;;  %v9230_v34 = vld [vmem:[#allocation3 + $0x10] sm:$0xe] }
 0x57e   : > { %11864 = vmatpush3.bf16.msra.mxu1 %v12710_v35  ;;  %11871 = vmatprep.mubr.bf16.mxu1 %v10793_v11  ;;  %v10847_v18 = vcombine.low %v9230_v34, %v15225_v43  ;;  %v9084_v11 = vor.u32 %v9082_v19, %v9080_v28  ;;  %v12735_v43 = vld [vmem:[%s13564_s29 + $0x5a8] sm:$0xff]   ;;  %v12746_v28 = vld [vmem:[%s13564_s29 + $0x5e0] sm:$0xff]   ;;  %v9440_v19 = vrot.slane %v9058_v23, 1  ;;  %v9456_v23 = vshll.u32 %v15329_v9, 16 }
 0x57f   : > { %11865 = vmatprep.subr.bf16.mxu1 %v12711_v52 }
 0x580   : > { %v9255_v35 = vrot.slane %v10847_v18, 1  ;;  %v9429_v42 = vshrl.u32 %v10847_v18, 16 }
 0x582   : > { %11866 = vmatpush3.bf16.msra.mxu1 %v12711_v52  ;;  %v9257_v52 = vsel %vm5384_vm15, %v9255_v35, %v9256_v27  ;;  %v9431_v20 = vrot.slane %v9429_v42, 1  ;;  %v12753_v35 = vld [vmem:[%s13564_s29 + $0x5f8] sm:$0xff]  }
 0x583   : > { %11867 = vmatprep.subr.bf16.mxu1 %v12713_v24 }
 0x586   : > { %11868 = vmatpush3.bf16.msra.mxu1 %v12713_v24  ;;  %v12736_v24 = vld [vmem:[%s13564_s29 + $0x5b0] sm:$0xff]  }
 0x587   : > { %11869 = vmatprep.subr.bf16.mxu1 %v12714_v44 }
 0x58a   : > { %11870 = vmatpush3.bf16.msra.mxu1 %v12714_v44  ;;  %v12737_v44 = vld [vmem:[%s13564_s29 + $0x5b8] sm:$0xff]  }
 0x58b   : > { %11883 = vmatprep.subr.bf16.mxu1 %v12717_v39 }
 0x58d   : > { %11872 = vmatmul.mubr.bf16.vlgmr.msra.gmra.mrb[0].mxu1 %v15228_v8  ;;  %v12748_v8 = vld [vmem:[%s13564_s29 + $0x5e8] sm:$0xff]  }
 0x58e   : > { %11884 = vmatpush3.bf16.msra.mxu1 %v12717_v39  ;;  %11875 = vmatprep.mubr.bf16.mxu1 %v15235_v58  ;;  %v9258_v39 = vrot.slane %v15235_v58, 1 }
 0x58f   : > { %11885 = vmatprep.subr.bf16.mxu1 %v12719_v60 }
 0x592   : > { %11886 = vmatpush3.bf16.msra.mxu1 %v12719_v60 }
 0x593   : > { %11887 = vmatprep.subr.bf16.mxu1 %v12720_v55 }
 0x595   : > { %11876 = vmatmul.mubr.bf16.gmra.mrb[4].mxu1 %v15247_v33 }
 0x596   : > { %11888 = vmatpush3.bf16.msra.mxu1 %v12720_v55  ;;  %11879 = vmatprep.mubr.bf16.mxu1 %v15250_v31 }
 0x597   : > { %11889 = vmatprep.subr.bf16.mxu1 %v12721_v54 }
 0x59a   : > { %11890 = vmatpush3.bf16.msra.mxu1 %v12721_v54  ;;  %v9260_v54 = vrot.slane %v15247_v33, 1 }
 0x59b   : > { %11891 = vmatprep.subr.bf16.mxu1 %v12723_v62 }
 0x59d   : > { %11880 = vmatmul.mubr.bf16.gmra.mrb[8].mxu1 %v12728_v29  ;;  %v9261_v29 = vsel %vm5384_vm15, %v9258_v39, %v9260_v54 }
 0x59e   : > { %11892 = vmatpush3.bf16.msra.mxu1 %v12723_v62  ;;  %11899 = vmatprep.mubr.bf16.mxu1 %v9049_v30  ;;  %v9259_v62 = vsel %vm5384_vm15, %v9256_v27, %v9258_v39  ;;  %v9264_v30 = vrot.slane %v15329_v9, 1  ;;  %v9444_v27 = vrot.slane %v9066_v37, 1  ;;  %v9449_v37 = vrot.slane %v9070_v32, 2 }
 0x59f   : > { %11893 = vmatprep.subr.bf16.mxu1 %v12725_v45 }
 0x5a2   : > { %11894 = vmatpush3.bf16.msra.mxu1 %v12725_v45  ;;  %v9262_v45 = vrot.slane %v15250_v31, 1 }
 0x5a3   : > { %11895 = vmatprep.subr.bf16.mxu1 %v12727_v10 }
 0x5a6   : > { %11896 = vmatpush3.bf16.msra.mxu1 %v12727_v10 }
 0x5a7   : > { %11897 = vmatprep.subr.bf16.mxu1 %v12729_v4 }
 0x5aa   : > { %11898 = vmatpush3.bf16.msra.mxu1 %v12729_v4  ;;  %v12742_v4 = vld [vmem:[%s13564_s29 + $0x5d0] sm:$0xff]  }
 0x5ab   : > { %11911 = vmatprep.subr.bf16.mxu1 %v12730_v63 }
 0x5ad   : > { %11900 = vmatmul.mubr.bf16.vlgmr.msra.gmra.mrb[0].mxu1 %v9057_v51  ;;  %v9263_v51 = vsel %vm5384_vm15, %v9260_v54, %v9262_v45  ;;  %v12756_v54 = vld [vmem:[#allocation3 + $0x38] ss:$0 sps:$4 sm:$0xff]  }
 0x5ae   : > { %11912 = vmatpush3.bf16.msra.mxu1 %v12730_v63  ;;  %11903 = vmatprep.mubr.bf16.mxu1 %v9065_v41  ;;  %v9432_v63 = vshll.u32 %v10847_v18, 16  ;;  %v12744_v41 = vld [vmem:[%s13564_s29 + $0x5d8] sm:$0xff]  }
 0x5af   : > { %11913 = vmatprep.subr.bf16.mxu1 %v12731_v56 }
 0x5b0   : > { %v9434_v49 = vrot.slane %v9432_v63, 2 }
 0x5b2   : > { %11914 = vmatpush3.bf16.msra.mxu1 %v12731_v56  ;;  %v9265_v56 = vsel %vm5384_vm15, %v9262_v45, %v9264_v30  ;;  %v9435_v34 = vor.u32 %v9434_v49, %v9431_v20  ;;  %v4938_v45 = vld [vmem:[#allocation4] sm:$0xff] }
 0x5b3   : > { %11915 = vmatprep.subr.bf16.mxu1 %v12732_v61 }
 0x5b5   : > { %11904 = vmatmul.mubr.bf16.gmra.mrb[4].mxu1 %v9073_v47 }
 0x5b6   : > { %11916 = vmatpush3.bf16.msra.mxu1 %v12732_v61  ;;  %11907 = vmatprep.mubr.bf16.mxu1 %v9081_v21  ;;  %v9437_v61 = vrot.slane %v9046_v17, 2 }
 0x5b7   : > { %11917 = vmatprep.subr.bf16.mxu1 %v12733_v53 }
 0x5b8   : > { %v9438_v47 = vor.u32 %v9437_v61, %v9436_v36 }
 0x5ba   : > { %11918 = vmatpush3.bf16.msra.mxu1 %v12733_v53  ;;  %v9439_v17 = vsel %vm5558_vm8, %v9435_v34, %v9438_v47 }
 0x5bb   : > { %11919 = vmatprep.subr.bf16.mxu1 %v12734_v50 }
 0x5bd   : > { %11908 = vmatmul.mubr.bf16.gmra.mrb[8].mxu1 %v9084_v11  ;;  %v9445_v11 = vrot.slane %v9062_v48, 2 }
 0x5be   : > { %11920 = vmatpush3.bf16.msra.mxu1 %v12734_v50  ;;  %11927 = vmatprep.mubr.bf16.mxu1 %v9257_v52  ;;  %v9441_v50 = vrot.slane %v9054_v40, 2  ;;  %v9448_v40 = vrot.slane %v9074_v12, 1 }
 0x5bf   : > { %11921 = vmatprep.subr.bf16.mxu1 %v12735_v43  ;;  %v9446_v52 = vor.u32 %v9445_v11, %v9444_v27 }
 0x5c0   : > { %v9450_v39 = vor.u32 %v9449_v37, %v9448_v40  ;;  %v4946_v37 = vld [vmem:[#allocation4 + $0x40] sm:$0xff] }
 0x5c2   : > { %11922 = vmatpush3.bf16.msra.mxu1 %v12735_v43  ;;  %v15318_v60 = vpop.f32.mrb[120].mxu0  ;;  %v9442_v43 = vor.u32 %v9441_v50, %v9440_v19  ;;  %v9451_v12 = vsel %vm5558_vm8, %v9446_v52, %v9450_v39 }
 0x5c3   : > { %11923 = vmatprep.subr.bf16.mxu1 %v12736_v24  ;;  %v15321_v55 = vpop.f32.mrb[121].mxu0 }
 0x5c4   : > { %v15324_v2 = vpop.f32.mrb[122].mxu0  ;;  %v9443_v58 = vsel %vm5558_vm8, %v9438_v47, %v9442_v43  ;;  %v9447_v33 = vsel %vm5558_vm8, %v9442_v43, %v9446_v52 }
 0x5c5   : > { %v15326_v46 = vpop.f32.mrb[123].mxu0 }
 0x5c6   : > { %11924 = vmatpush3.bf16.msra.mxu1 %v12736_v24  ;;  %v9453_v24 = vshrl.u32 %v15329_v9, 16 }
 0x5c7   : > { %11925 = vmatprep.subr.bf16.mxu1 %v12737_v44 }
 0x5c8   : > { %v9455_v48 = vrot.slane %v9453_v24, 1 }
 0x5ca   : > { %11926 = vmatpush3.bf16.msra.mxu1 %v12737_v44  ;;  %v15335_v10 = vpop.f32.mrb[124].mxu0  ;;  %v9458_v44 = vrot.slane %v9456_v23, 2 }
 0x5cb   : > { %11939 = vmatprep.subr.bf16.mxu1 %v12738_v7  ;;  %v15338_v57 = vpop.f32.mrb[125].mxu0 }
 0x5cc   : > { %v15340_v25 = vpop.f32.mrb[126].mxu0 }
 0x5cd   : > { %11928 = vmatmul.mubr.bf16.vlgmr.msra.gmra.mrb[0].mxu1 %v9259_v62  ;;  %v15342_v26 = vpop.f32.mrb[127].mxu0 }
 0x5ce   : > { %11940 = vmatpush3.bf16.msra.mxu1 %v12738_v7  ;;  %11931 = vmatprep.mubr.bf16.mxu1 %v9261_v29  ;;  %v9459_v7 = vor.u32 %v9458_v44, %v9455_v48  ;;  %v4940_v29 = vld [vmem:[#allocation4 + $0x10] sm:$0xff] }
 0x5cf   : > { %11941 = vmatprep.subr.bf16.mxu1 %v12740_v3 }
 0x5d0   : > { %v9460_v32 = vsel %vm5558_vm8, %v9450_v39, %v9459_v7 }
 0x5d2   : > { %11942 = vmatpush3.bf16.msra.mxu1 %v12740_v3  ;;  %v15351_v15 = vpop.f32.mrb[128].mxu0 }
 0x5d3   : > { %11943 = vmatprep.subr.bf16.mxu1 %v12742_v4  ;;  %v15354_v18 = vpop.f32.mrb[129].mxu0 }
 0x5d4   : > { %v11518_v53 = vpop.f32.mrb[130].mxu0  ;;  %v12037_v48 = vadd.f32 %v15354_v18, %v4946_v37  ;;  %v10908_v18 = vld [vmem:[%s15473_s4] ss:$0 sm:$0xff] (!%p10907_p13) }
 0x5d5   : > { %11932 = vmatmul.mubr.bf16.gmra.mrb[4].mxu1 %v9263_v51  ;;  %v15356_v21 = vpop.f32.mrb[131].mxu0  ;;  %v4942_v53 = vld [vmem:[#allocation4 + $0x20] sm:$0xff] }
 0x5d6   : > { %11944 = vmatpush3.bf16.msra.mxu1 %v12742_v4  ;;  %11935 = vmatprep.mubr.bf16.mxu1 %v9265_v56  ;;  %v4939_v4 = vld [vmem:[#allocation4 + $0x8] sm:$0xff] }
 0x5d7   : > { %11945 = vmatprep.subr.bf16.mxu1 %v12744_v41  ;;  %v12020_v56 = vadd.f32 %v15326_v46, %v4939_v4  ;;  %v12026_v46 = vadd.f32 %v15338_v57, %v4942_v53 }
 0x5da   : > { %11946 = vmatpush3.bf16.msra.mxu1 %v12744_v41 }
 0x5db   : > { %11947 = vmatprep.subr.bf16.mxu1 %v12746_v28 }
 0x5dd   : > { %11936 = vmatmul.mubr.bf16.gmra.mrb[8].mxu1 %v9264_v30  ;;  %v12011_v30 = vadd.f32 %v15318_v60, %v4940_v29 }
 0x5de   : > { %11948 = vmatpush3.bf16.msra.mxu1 %v12746_v28  ;;  %11955 = vmatprep.mubr.bf16.mxu1 %v9439_v17  ;;  %v4944_v28 = vld [vmem:[#allocation4 + $0x30] sm:$0xff]  ;;  %v4943_v17 = vld [vmem:[#allocation4 + $0x28] sm:$0xff] }
 0x5df   : > { %11949 = vmatprep.subr.bf16.mxu1 %v12748_v8  ;;  %v12032_v27 = vadd.f32 %v15342_v26, %v4943_v17 }
 0x5e2   : > { %11950 = vmatpush3.bf16.msra.mxu1 %v12748_v8  ;;  %v12023_v8 = vadd.f32 %v15335_v10, %v4944_v28 }
 0x5e3   : > { %11951 = vmatprep.subr.bf16.mxu1 %v12751_v22 }
 0x5e6   : > { %11952 = vmatpush3.bf16.msra.mxu1 %v12751_v22 }
 0x5e7   : > { %11953 = vmatprep.subr.bf16.mxu1 %v12753_v35 }
 0x5ea   : > { %11954 = vmatpush3.bf16.msra.mxu1 %v12753_v35 }
 0x5eb   : > { %11995 = vmatprep.subr.bf16.mxu1 %v15178_v1 }
 0x5ed   : > { %11956 = vmatmul.mubr.bf16.vlgmr.msra.gmra.mrb[0].mxu1 %v9443_v58 }
 0x5ee   : > { %12003 = vmatpush3.bf16.msra.mxu1 %v15178_v1  ;;  %11959 = vmatprep.mubr.bf16.mxu1 %v9447_v33  ;;  %v9640_v1 = vrot.slane %v12756_v54, 2  ;;  %v4947_v33 = vld [vmem:[#allocation4 + $0x48] sm:$0xff] }
 0x5ef   : > { %11996 = vmatprep.subr.bf16.mxu1 %v15184_v14 }
 0x5f2   : > { %12004 = vmatpush3.bf16.msra.mxu1 %v15184_v14  ;;  %v9641_v14 = vsel %vm5762_vm13, %v9638_v6, %v9640_v1 }
 0x5f3   : > { %11997 = vmatprep.subr.bf16.mxu1 %v15193_v38 }
 0x5f5   : > { %11960 = vmatmul.mubr.bf16.gmra.mrb[4].mxu1 %v9451_v12  ;;  %v12039_v12 = vadd.f32 %v15356_v21, %v4947_v33 }
 0x5f6   : > { %12005 = vmatpush3.bf16.msra.mxu1 %v15193_v38  ;;  %11963 = vmatprep.mubr.bf16.mxu1 %v9460_v32 }
 0x5f7   : > { %11998 = vmatprep.subr.bf16.mxu1 %v15200_v16 }
 0x5fa   : > { %12006 = vmatpush3.bf16.msra.mxu1 %v15200_v16 }
 0x5fb   : > { %11999 = vmatprep.subr.bf16.mxu1 %v15207_v59 }
 0x5fd   : > { %11964 = vmatmul.mubr.bf16.gmra.mrb[8].mxu1 %v9459_v7 }
 0x5fe   : > { %12007 = vmatpush3.bf16.msra.mxu1 %v15207_v59  ;;  %11991 = vmatprep.mubr.bf16.mxu1 %v9641_v14 }
 0x5ff   : > { %12000 = vmatprep.subr.bf16.mxu1 %v15213_v5 }
 0x602   : > { %12008 = vmatpush3.bf16.msra.mxu1 %v15213_v5  ;;  %v4941_v5 = vld [vmem:[#allocation4 + $0x18] sm:$0xff] }
 0x603   : > { %12001 = vmatprep.subr.bf16.mxu1 %v15219_v13 }
 0x606   : > { %12009 = vmatpush3.bf16.msra.mxu1 %v15219_v13  ;;  %v12014_v13 = vadd.f32 %v15321_v55, %v4938_v45  ;;  %v4945_v55 = vld [vmem:[#allocation4 + $0x38] sm:$0xff] }
 0x607   : > { %12002 = vmatprep.subr.bf16.mxu1 %v15231_v0  ;;  %v12029_v19 = vadd.f32 %v15340_v25, %v4945_v55  ;;  %v4948_v25 = vld [vmem:[#allocation4 + $0x50] sm:$0x7] }
 0x608   : > { %v12035_v26 = vadd.f32 %v15351_v15, %v4948_v25 }
 0x60a   : > { %12010 = vmatpush3.bf16.msra.mxu1 %v15231_v0  ;;  %v12017_v0 = vadd.f32 %v15324_v2, %v4941_v5 }
 0x60d   : > { %11992 = vmatmul.mubr.bf16.vlgmr.msra.gmra.mrb[8].mxu1 %v9640_v1 }
 0x615   : > { %v11985_v38 = vpop.f32.mrb[132].mxu0 }
 0x616   : > { %v9730_v16 = vpop.f32.mrb[133].mxu0 }
 0x617   : > { %v11986_v31 = vpop.f32.mrb[134].mxu0 }
 0x618   : > { %v9733_v6 = vpop.f32.mrb[135].mxu0 }
 0x620   : > { %v11989_v62 = vpop.f32.mrb[136].mxu0 }
 0x621   : > { %v9746_v59 = vpop.f32.mrb[137].mxu0 }
 0x622   : > { %v11990_v9 = vpop.f32.mrb[138].mxu0 }
 0x623   : > { %v9749_v3 = vpop.f32.mrb[139].mxu0 }
 0x6c0   : > { %v11957_v42 = vpop.f32.mrb[0].mxu1 }
 0x6c1   : > { %v12012_v63 = vadd.f32 %v12011_v30, %v11957_v42  ;;  %v9549_v51 = vpop.f32.mrb[1].mxu1 }
 0x6c2   : > { %v12015_v41 = vadd.f32 %v12014_v13, %v9549_v51  ;;  %v11958_v20 = vpop.f32.mrb[2].mxu1 }
 0x6c3   : > { %v12018_v49 = vadd.f32 %v12017_v0, %v11958_v20  ;;  %v12013_v36 = vadd.f32 %v12012_v63, %v11985_v38  ;;  %v9552_v61 = vpop.f32.mrb[3].mxu1 }
 0x6c4   : > { %v12021_v34 = vadd.f32 %v12020_v56, %v9552_v61  ;;  %v12016_v47 = vadd.f32 %v12015_v41, %v9730_v16 }
 0x6c5   : > { %9789 = vst.msk [vmem:[#allocation4 + $0x10] sm:$0xff] %vm3299_vm12, %v12013_v36  ;;  %v12019_v60 = vadd.f32 %v12018_v49, %v11986_v31 }
 0x6c6   : > { %9787 = vst.msk [vmem:[#allocation4] sm:$0xff] %vm3299_vm12, %v12016_v47  ;;  %v12022_v2 = vadd.f32 %v12021_v34, %v9733_v6 }
 0x6c7   : > { %9790 = vst.msk [vmem:[#allocation4 + $0x18] sm:$0xff] %vm3299_vm12, %v12019_v60 }
 0x6c8   : > { %9788 = vst.msk [vmem:[#allocation4 + $0x8] sm:$0xff] %vm3299_vm12, %v12022_v2  ;;  %v11961_v22 = vpop.f32.mrb[4].mxu1  ;;  %v9891_v2 = vld [vmem:[%s13560_s27 + $0x28] sm:$0x3] (!%p10907_p13) }
 0x6c9   : > { %v12024_v50 = vadd.f32 %v12023_v8, %v11961_v22  ;;  %v9565_v35 = vpop.f32.mrb[5].mxu1 }
 0x6ca   : > { %v12027_v11 = vadd.f32 %v12026_v46, %v9565_v35  ;;  %v11962_v43 = vpop.f32.mrb[6].mxu1 }
 0x6cb   : > { %v12030_v52 = vadd.f32 %v12029_v19, %v11962_v43  ;;  %v12025_v24 = vadd.f32 %v12024_v50, %v11989_v62  ;;  %v9568_v23 = vpop.f32.mrb[7].mxu1 }
 0x6cc   : > { %v12033_v10 = vadd.f32 %v12032_v27, %v9568_v23  ;;  %v12028_v58 = vadd.f32 %v12027_v11, %v9746_v59  ;;  %v9805_v31 = vld [vmem:[#allocation4 + $0x10] sm:$0xff] (!%p10907_p13) }
 0x6cd   : > { %9793 = vst.msk [vmem:[#allocation4 + $0x30] sm:$0xff] %vm3299_vm12, %v12025_v24  ;;  %v12031_v40 = vadd.f32 %v12030_v52, %v11990_v9  ;;  %v9803_v15 = vld [vmem:[#allocation4] sm:$0xff] (!%p10907_p13)  ;;  %v9823_v59 = vadd.f32 (!%p10907_p13), %v10908_v18, %v9805_v31 }
 0x6ce   : > { %9791 = vst.msk [vmem:[#allocation4 + $0x20] sm:$0xff] %vm3299_vm12, %v12028_v58  ;;  %v12034_v57 = vadd.f32 %v12033_v10, %v9749_v3  ;;  %v9821_v16 = vadd.f32 (!%p10907_p13), %v10908_v18, %v9803_v15  ;;  %v9806_v6 = vld [vmem:[#allocation4 + $0x18] sm:$0xff] (!%p10907_p13) }
 0x6cf   : > { %9794 = vst.msk [vmem:[#allocation4 + $0x38] sm:$0xff] %vm3299_vm12, %v12031_v40  ;;  %v9804_v38 = vld [vmem:[#allocation4 + $0x8] sm:$0xff] (!%p10907_p13)  ;;  %v9824_v9 = vadd.f32 (!%p10907_p13), %v10908_v18, %v9806_v6  ;;  %v10936_v56 = vpack.c.bf16 (!%p10907_p13), %v9823_v59, %v9823_v59 }
 0x6d0   : > { %9792 = vst.msk [vmem:[#allocation4 + $0x28] sm:$0xff] %vm3299_vm12, %v12034_v57  ;;  %v9822_v21 = vadd.f32 (!%p10907_p13), %v10908_v18, %v9804_v38  ;;  %v10934_v30 = vpack.c.bf16 (!%p10907_p13), %v9821_v16, %v9821_v16 }
 0x6d1   : > { %v10937_v41 = vpack.c.bf16 (!%p10907_p13), %v9824_v9, %v9824_v9  ;;  %9880 = vst.msk [vmem:[%s13560_s27 + $0x8] sm:$0xf] (!%p10907_p13), %vm9877_vm1, %v10936_v56 }
 0x6d2   : > { %v10935_v4 = vpack.c.bf16 (!%p10907_p13), %v9822_v21, %v9822_v21  ;;  %9878 = vst.msk [vmem:[%s13560_s27] sm:$0xf] (!%p10907_p13), %vm9877_vm1, %v10934_v30 }
 0x6d3   : > { %9881 = vst.msk [vmem:[%s13560_s27 + $0xc] sm:$0xf] (!%p10907_p13), %vm9877_vm1, %v10937_v41 }
 0x6d4   : > { %v9809_v45 = vld [vmem:[#allocation4 + $0x30] sm:$0xff] (!%p10907_p13)  ;;  %9879 = vst.msk [vmem:[%s13560_s27 + $0x4] sm:$0xf] (!%p10907_p13), %vm9877_vm1, %v10935_v4 }
 0x6d5   : > { %v9807_v62 = vld [vmem:[#allocation4 + $0x20] sm:$0xff] (!%p10907_p13)  ;;  %v9827_v42 = vadd.f32 (!%p10907_p13), %v10908_v18, %v9809_v45 }
 0x6d6   : > { %v9825_v3 = vadd.f32 (!%p10907_p13), %v10908_v18, %v9807_v62  ;;  %v9810_v5 = vld [vmem:[#allocation4 + $0x38] sm:$0xff] (!%p10907_p13) }
 0x6d7   : > { %v9808_v29 = vld [vmem:[#allocation4 + $0x28] sm:$0xff] (!%p10907_p13)  ;;  %v9828_v49 = vadd.f32 (!%p10907_p13), %v10908_v18, %v9810_v5  ;;  %v10940_v61 = vpack.c.bf16 (!%p10907_p13), %v9827_v42, %v9827_v42 }
 0x6d8   : > { %v9826_v13 = vadd.f32 (!%p10907_p13), %v10908_v18, %v9808_v29  ;;  %v10938_v20 = vpack.c.bf16 (!%p10907_p13), %v9825_v3, %v9825_v3 }
 0x6d9   : > { %v10941_v47 = vpack.c.bf16 (!%p10907_p13), %v9828_v49, %v9828_v49  ;;  %9884 = vst.msk [vmem:[%s13560_s27 + $0x18] sm:$0xf] (!%p10907_p13), %vm9877_vm1, %v10940_v61 }
 0x6da   : > { %v10939_v36 = vpack.c.bf16 (!%p10907_p13), %v9826_v13, %v9826_v13  ;;  %9882 = vst.msk [vmem:[%s13560_s27 + $0x10] sm:$0xf] (!%p10907_p13), %vm9877_vm1, %v10938_v20 }
 0x6db   : > { %9885 = vst.msk [vmem:[%s13560_s27 + $0x1c] sm:$0xf] (!%p10907_p13), %vm9877_vm1, %v10941_v47 }
 0x6dc   : > { %9883 = vst.msk [vmem:[%s13560_s27 + $0x14] sm:$0xf] (!%p10907_p13), %vm9877_vm1, %v10939_v36 }
 0x6e0   : > { %v11993_v44 = vpop.f32.mrb[8].mxu1  ;;  %9802 = sbr.rel (%p10907_p13) target bundleno = 1779 (0x6f3), region = 134 }
 0x6e1   : > { %v12036_v39 = vadd.f32 %v12035_v26, %v11993_v44  ;;  %v9762_v7 = vpop.f32.mrb[9].mxu1 }
 0x6e2   : > { %v12038_v32 = vadd.f32 %v12037_v48, %v9762_v7  ;;  %v11994_v54 = vpop.f32.mrb[10].mxu1 }
 0x6e3   : > { %9798 = vst.msk [vmem:[#allocation4 + $0x50] sm:$0x7] %vm9797_vm0, %v12036_v39  ;;  %v9765_v1 = vpop.f32.mrb[11].mxu1 }
 0x6e4   : > { %9795 = vst.msk [vmem:[#allocation4 + $0x40] sm:$0xff] %vm3299_vm12, %v12038_v32  ;;  %v12040_v14 = vadd.f32 %v12039_v12, %v9765_v1 }
 0x6e6   : > { %9796 = vst.msk [vmem:[#allocation4 + $0x48] sm:$0xff] %vm3299_vm12, %v12040_v14  ;;  %vm9889_vm12 = vsmask.f32 (!%p10907_p13), 1280 }
 0x6e7   : > { %vm9890_vm3 = vmand %vm9888_vm2, %vm9889_vm12 }
 0x6ea   : > { %v9813_v51 = vld [vmem:[#allocation4 + $0x50] sm:$0x7] }
 0x6eb   : > { %v9811_v0 = vld [vmem:[#allocation4 + $0x40] sm:$0xff]  ;;  %v9831_v53 = vadd.f32 %v10908_v18, %v9813_v51 }
 0x6ec   : > { %v9829_v28 = vadd.f32 %v10908_v18, %v9811_v0 }
 0x6ed   : > { %v9812_v63 = vld [vmem:[#allocation4 + $0x48] sm:$0xff]  ;;  %v10944_v8 = vpack.c.bf16 %v9831_v53, %v9831_v53 }
 0x6ee   : > { %v9830_v34 = vadd.f32 %v10908_v18, %v9812_v63  ;;  %v10942_v60 = vpack.c.bf16 %v9829_v28, %v9829_v28 }
 0x6ef   : > { %v9892_v17 = vsel %vm9890_vm3, %v10944_v8, %v9891_v2 }
 0x6f0   : > { %v10943_v55 = vpack.c.bf16 %v9830_v34, %v9830_v34  ;;  %9886 = vst.msk [vmem:[%s13560_s27 + $0x20] sm:$0xf] %vm9877_vm1, %v10942_v60  ;;  %9893 = vst [vmem:[%s13560_s27 + $0x28] sm:$0x3] %v9892_v17 }
 0x6f2   : > { %9887 = vst.msk [vmem:[%s13560_s27 + $0x24] sm:$0xf] %vm9877_vm1, %v10943_v55 }
 0x6f3 PF: > { %s15_s24 = sadd.s32 1, %s12823_s24   ;;  %s15499_s18 = smov %s12803_s19 }
 0x6f4   : > { %p12_p0 = scmp.ge.s32.totalorder %s15_s24, 6   ;;  %s15500_s19 = smov %s12914_s30 }
 0x6f5   : > { %s15501_s20 = smov %s12815_s22  ;;  %s15502_s21 = smov %s12819_s23 }
 0x6f6   : > { %s15503_s22 = smov %s15506_s25  ;;  %s15504_s23 = smov %s15510_s26 }
 0x6f7   :  { %14 = sbr.rel (!%p12_p0) target bundleno = 4 (0x4), region = 211 }

</bundles_post_ra>
